<compile_context>
chip_gen: v7x
topology: tpu7x:2x2x1
jax: 0.10.0
libtpu: 0.0.40
codegen_flags: <defaults>
</compile_context>

<pallas_src>
import functools

import jax
import jax.numpy as jnp
from jax.experimental import pallas as pl
from jax.experimental.pallas import tpu as pltpu

IMAGE_HEIGHT = 16
IMAGE_WIDTH = 16
NUM_CLASSES = 3  # len(['Bungalow', 'High-rise', 'Storey-Building'])

_FC_TK_CAP = 4096  # K tile for the fc matmuls (review: 2048-4096)


def _round_up(v, m):
    return (v + m - 1) // m * m


def _pick_row_tile(ho, target=16):
    t = min(ho, target)
    while ho % t:
        t -= 1
    return t


# ---------------------------------------------------------------------------
# Fused matmul + bias (+ReLU): K-tiled accumulation on the MXU (fc1 / fc2)
# ---------------------------------------------------------------------------

def _matmul_bias_act_kernel(x_ref, w_ref, b_ref, o_ref, acc_ref, *, apply_relu):
    k = pl.program_id(2)

    @pl.when(k == 0)
    def _init():
        acc_ref[...] = jnp.zeros_like(acc_ref)

    acc_ref[...] += jnp.dot(x_ref[...], w_ref[...],
                            preferred_element_type=jnp.float32)

    @pl.when(k == pl.num_programs(2) - 1)
    def _epilogue():
        y = acc_ref[...] + b_ref[...]          # bias once, in f32
        if apply_relu:
            y = jnp.maximum(y, 0.0)
        o_ref[...] = y.astype(o_ref.dtype)


def prep_linear(w, b, *, tk_cap=_FC_TK_CAP):
    """One-time weight prep: pad (K,N) -> (Kp,Np) tile multiples, cast to bf16."""
    K, N = w.shape
    tk = min(_round_up(K, 128), tk_cap)
    Kp, Np = _round_up(K, tk), _round_up(N, 128)
    wp = jnp.pad(w, ((0, Kp - K), (0, Np - N))).astype(jnp.bfloat16)
    bp = jnp.pad(b.astype(jnp.float32).reshape(1, N), ((0, 0), (0, Np - N)))
    return wp, bp


def matmul_bias_act(x, wp, bp, n_out, *, apply_relu, out_dtype):
    """(M,K) @ pre-padded bf16 (Kp,Np) weights + bias (+ReLU), f32 accumulation."""
    M, K = x.shape
    Kp, Np = wp.shape
    tk = min(Kp, _FC_TK_CAP)       # divides Kp by construction in prep_linear
    tn = 128                       # N=256 -> 2 parallel N tiles (v7x 2nd core)
    tm = min(_round_up(M, 8), 256)
    Mp = _round_up(M, tm)

    xp = x.astype(jnp.bfloat16)
    if (Mp, Kp) != (M, K):
        xp = jnp.pad(xp, ((0, Mp - M), (0, Kp - K)))

    kernel = functools.partial(_matmul_bias_act_kernel, apply_relu=apply_relu)
    out = pl.pallas_call(
        kernel,
        out_shape=jax.ShapeDtypeStruct((Mp, Np), out_dtype),
        grid_spec=pltpu.PrefetchScalarGridSpec(
            num_scalar_prefetch=0,
            grid=(Mp // tm, Np // tn, Kp // tk),
            in_specs=[
                pl.BlockSpec((tm, tk), lambda i, j, k: (i, k)),
                pl.BlockSpec((tk, tn), lambda i, j, k: (k, j)),
                pl.BlockSpec((1, tn), lambda i, j, k: (0, j)),
            ],
            out_specs=pl.BlockSpec((tm, tn), lambda i, j, k: (i, j)),
            scratch_shapes=[pltpu.VMEM((tm, tn), jnp.float32)],
        ),
        compiler_params=pltpu.CompilerParams(
            dimension_semantics=("parallel", "parallel", "arbitrary")),
    )(xp, wp, bp)
    return out[:M, :n_out]


# ---------------------------------------------------------------------------
# Fused Conv2d(3x3, stride 1, pad 1) + bias + ReLU + MaxPool2d(2, 2)
# ---------------------------------------------------------------------------

def _conv3x3_relu_pool_kernel(x_ref, w_ref, b_ref, o_ref, *, Ho, Wo, TP, Cin, Cout):
    """One batch element per grid step (whole padded image auto-pipelined to VMEM).

    x_ref : (H+2, W+2, Cin) bf16 padded input (batch dim squeezed)
    w_ref : (9, Cin, Cout) bf16 per-tap weights
    b_ref : (1, Cout) f32 bias
    o_ref : (Ho, Wo*Cout) bf16 pooled output (lane-dense rows, NHWC byte order)
    """
    We = 2 * Wo                    # conv columns actually consumed by pooling
    RC = 2 * TP                    # conv rows per chunk
    bias = b_ref[...]
    num_chunks = Ho // TP

    for c in range(num_chunks):                         # static -> fully unrolled
        r0 = c * RC
        acc = jnp.zeros((RC * We, Cout), jnp.float32)
        for t in range(9):                              # one big MXU dot per tap
            ky, kx = t // 3, t % 3
            a = x_ref[r0 + ky:r0 + ky + RC, kx:kx + We, :]     # (RC, We, Cin)
            acc = acc + jnp.dot(a.reshape(RC * We, Cin), w_ref[t],
                                preferred_element_type=jnp.float32)
        y = jnp.maximum(acc + bias, 0.0)                # bias + ReLU, f32 (RC*We, Cout)
        y = y.reshape(TP, 2, We, Cout)
        y = jnp.maximum(y[:, 0], y[:, 1])               # row-pair max   (TP, We, Cout)
        y = y.reshape(TP, Wo, 2, Cout)
        y = jnp.maximum(y[:, :, 0, :], y[:, :, 1, :])   # col-pair max   (TP, Wo, Cout)
        o_ref[c * TP:(c + 1) * TP, :] = (
            y.reshape(TP, Wo * Cout).astype(o_ref.dtype))      # lane-dense store


def conv3x3_relu_pool(x, w9, b2):
    """x: (N,H,W,Cin); w9: (9,Cin,Cout) bf16; b2: (1,Cout) f32 -> (N, Ho, Wo*Cout) bf16."""
    n, h, wdt, cin = x.shape
    cout = w9.shape[-1]
    ho, wo = h // 2, wdt // 2          # PyTorch MaxPool2d(2,2) floors odd dims
    tp = _pick_row_tile(ho, target=16)

    xp = jnp.pad(x.astype(jnp.bfloat16), ((0, 0), (1, 1), (1, 1), (0, 0)))

    kernel = functools.partial(_conv3x3_relu_pool_kernel,
                               Ho=ho, Wo=wo, TP=tp, Cin=cin, Cout=cout)
    return pl.pallas_call(
        kernel,
        out_shape=jax.ShapeDtypeStruct((n, ho, wo * cout), jnp.bfloat16),
        grid_spec=pltpu.PrefetchScalarGridSpec(
            num_scalar_prefetch=0,
            grid=(n,),
            in_specs=[
                pl.BlockSpec((None, h + 2, wdt + 2, cin), lambda b: (b, 0, 0, 0)),
                pl.BlockSpec((9, cin, cout), lambda b: (0, 0, 0)),
                pl.BlockSpec((1, cout), lambda b: (0, 0)),
            ],
            out_specs=pl.BlockSpec((None, ho, wo * cout), lambda b: (b, 0, 0)),
        ),
        compiler_params=pltpu.CompilerParams(dimension_semantics=("parallel",)),
    )(xp, w9, b2)


# ---------------------------------------------------------------------------
# Params (PyTorch layout) + one-time kernel-ready preparation
# ---------------------------------------------------------------------------

def init_params(key):
    def uniform(k, shape, fan_in):
        bound = 1.0 / jnp.sqrt(jnp.float32(fan_in))
        return jax.random.uniform(k, shape, jnp.float32, -bound, bound)

    ks = jax.random.split(key, 10)
    fc1_in = 128 * (IMAGE_HEIGHT // 8) * (IMAGE_WIDTH // 8)
    return {
        'conv1_w': uniform(ks[0], (16, 3, 3, 3), 3 * 9),
        'conv1_b': uniform(ks[1], (16,), 3 * 9),
        'conv2_w': uniform(ks[2], (32, 16, 3, 3), 16 * 9),
        'conv2_b': uniform(ks[3], (32,), 16 * 9),
        'conv3_w': uniform(ks[4], (128, 32, 3, 3), 32 * 9),
        'conv3_b': uniform(ks[5], (128,), 32 * 9),
        'fc1_w': uniform(ks[6], (fc1_in, 256), fc1_in),
        'fc1_b': uniform(ks[7], (256,), fc1_in),
        'fc2_w': uniform(ks[8], (256, NUM_CLASSES), 256),
        'fc2_b': uniform(ks[9], (NUM_CLASSES,), 256),
    }


def prepare_params(params, image_height, image_width):
    """One-time weight prep: conv taps -> (9,Cin,Cout) bf16; fc1 rows permuted from
    NCHW-flatten to NHWC-flatten order; fc weights padded/cast once (no per-call work)."""
    p = {}
    for name in ('conv1', 'conv2', 'conv3'):
        w = params[name + '_w']                 # (Cout, Cin, 3, 3) torch layout
        cout, cin = w.shape[0], w.shape[1]
        p[name + '_w'] = (jnp.transpose(w, (2, 3, 1, 0))
                          .reshape(9, cin, cout).astype(jnp.bfloat16))
        p[name + '_b'] = params[name + '_b'].reshape(1, cout).astype(jnp.float32)

    ho3, wo3, c3 = image_height // 8, image_width // 8, 128
    fc1_w = params['fc1_w']                     # rows in NCHW flatten order (c, h, w)
    n_hid = fc1_w.shape[1]
    fc1_w = (fc1_w.reshape(c3, ho3, wo3, n_hid)
             .transpose(1, 2, 0, 3)             # -> (h, w, c, out): NHWC flatten order
             .reshape(c3 * ho3 * wo3, n_hid))
    p['fc1_w'], p['fc1_b'] = prep_linear(fc1_w, params['fc1_b'])
    p['fc2_w'], p['fc2_b'] = prep_linear(params['fc2_w'], params['fc2_b'])
    return p


# ---------------------------------------------------------------------------
# Model forward
# ---------------------------------------------------------------------------

def cnn_forward(x_nchw, p):
    n = x_nchw.shape[0]
    x = jnp.transpose(x_nchw, (0, 2, 3, 1))                       # NCHW -> NHWC
    x = conv3x3_relu_pool(x, p['conv1_w'], p['conv1_b'])          # (N, H/2, W/2*16)
    x = conv3x3_relu_pool(x.reshape(n, x.shape[1], -1, 16),
                          p['conv2_w'], p['conv2_b'])             # (N, H/4, W/4*32)
    x = conv3x3_relu_pool(x.reshape(n, x.shape[1], -1, 32),
                          p['conv3_w'], p['conv3_b'])             # (N, H/8, W/8*128)
    x = x.reshape(n, -1)            # NHWC flatten; fc1_w rows were permuted to match
    x = matmul_bias_act(x, p['fc1_w'], p['fc1_b'], 256,
                        apply_relu=True, out_dtype=jnp.bfloat16)
    # TODO(synk): nn.Dropout(0.4) is identity at inference; training-mode mask not implemented.
    x = matmul_bias_act(x, p['fc2_w'], p['fc2_b'], NUM_CLASSES,
                        apply_relu=False, out_dtype=jnp.float32)
    return x


if __name__ == "__main__":
    key = jax.random.PRNGKey(0)
    k_in, k_par = jax.random.split(key)
    params = init_params(k_par)
    prepped = prepare_params(params, IMAGE_HEIGHT, IMAGE_WIDTH)   # one-time weight prep

    # PyTorch-style NCHW input: (batch=2, channels=3, H=16, W=16)
    x = jax.random.normal(k_in, (2, 3, IMAGE_HEIGHT, IMAGE_WIDTH), jnp.float32)

    out = jax.jit(cnn_forward)(x, prepped)
    out = jax.block_until_ready(out)
    assert out.shape == (2, NUM_CLASSES), out.shape
    print("KERNEL_OK")
</pallas_src>

<mosaic_0001>
module attributes {stable_mosaic.version = 11 : i64} {
  func.func @_conv3x3_relu_pool_kernel(%arg0: i32, %arg1: memref<1x18x18x3xbf16, #tpu.memory_space<vmem>>, %arg2: memref<9x3x16xbf16, #tpu.memory_space<vmem>>, %arg3: memref<1x16xf32, #tpu.memory_space<vmem>>, %arg4: memref<1x8x128xbf16, #tpu.memory_space<vmem>>) attributes {dimension_semantics = [#tpu.dimension_semantics<parallel>], iteration_bounds = array<i64: 2>, scalar_prefetch = 0 : i64, scratch_operands = 0 : i64, tpu.core_type = #tpu.core_type<tc>, window_params = [{transform_indices = @transform_0, window_bounds = array<i64: 1, 18, 18, 3>}, {pipeline_mode = #tpu.pipeline_mode<synchronous>, transform_indices = @transform_1, window_bounds = array<i64: 9, 3, 16>}, {pipeline_mode = #tpu.pipeline_mode<synchronous>, transform_indices = @transform_2, window_bounds = array<i64: 1, 16>}, {transform_indices = @transform_3, window_bounds = array<i64: 1, 8, 128>}]} {
    %c0 = arith.constant 0 : index
    %c0_0 = arith.constant 0 : index
    %0 = vector.load %arg3[%c0, %c0_0] : memref<1x16xf32, #tpu.memory_space<vmem>>, vector<1x16xf32>
    %cst = arith.constant 0.000000e+00 : f32
    %1 = vector.broadcast %cst : f32 to vector<256x16xf32>
    %c0_1 = arith.constant 0 : index
    %c0_2 = arith.constant 0 : index
    %c0_3 = arith.constant 0 : index
    %c0_4 = arith.constant 0 : index
    %2 = vector.load %arg1[%c0_1, %c0_2, %c0_3, %c0_4] : memref<1x18x18x3xbf16, #tpu.memory_space<vmem>>, vector<1x16x16x3xbf16>
    %3 = vector.shape_cast %2 : vector<1x16x16x3xbf16> to vector<16x16x3xbf16>
    %4 = vector.shape_cast %3 : vector<16x16x3xbf16> to vector<256x3xbf16>
    %c0_5 = arith.constant 0 : index
    %c0_6 = arith.constant 0 : index
    %c0_7 = arith.constant 0 : index
    %5 = vector.load %arg2[%c0_5, %c0_6, %c0_7] : memref<9x3x16xbf16, #tpu.memory_space<vmem>>, vector<1x3x16xbf16>
    %6 = vector.shape_cast %5 : vector<1x3x16xbf16> to vector<3x16xbf16>
    %cst_8 = arith.constant dense<0.000000e+00> : vector<256x16xf32>
    %7 = tpu.matmul %4, %6, %cst_8 {dimension_numbers = #tpu.dot_dimension_numbers<[1], [0], [0], [1], [0, 0, 1, 1], [], []>} : vector<256x3xbf16>, vector<3x16xbf16>, vector<256x16xf32> -> vector<256x16xf32>
    %8 = arith.addf %1, %7 : vector<256x16xf32>
    %c0_9 = arith.constant 0 : index
    %c0_10 = arith.constant 0 : index
    %c1 = arith.constant 1 : index
    %c0_11 = arith.constant 0 : index
    %9 = vector.load %arg1[%c0_9, %c0_10, %c1, %c0_11] : memref<1x18x18x3xbf16, #tpu.memory_space<vmem>>, vector<1x16x16x3xbf16>
    %10 = vector.shape_cast %9 : vector<1x16x16x3xbf16> to vector<16x16x3xbf16>
    %11 = vector.shape_cast %10 : vector<16x16x3xbf16> to vector<256x3xbf16>
    %c1_12 = arith.constant 1 : index
    %c0_13 = arith.constant 0 : index
    %c0_14 = arith.constant 0 : index
    %12 = vector.load %arg2[%c1_12, %c0_13, %c0_14] : memref<9x3x16xbf16, #tpu.memory_space<vmem>>, vector<1x3x16xbf16>
    %13 = vector.shape_cast %12 : vector<1x3x16xbf16> to vector<3x16xbf16>
    %cst_15 = arith.constant dense<0.000000e+00> : vector<256x16xf32>
    %14 = tpu.matmul %11, %13, %cst_15 {dimension_numbers = #tpu.dot_dimension_numbers<[1], [0], [0], [1], [0, 0, 1, 1], [], []>} : vector<256x3xbf16>, vector<3x16xbf16>, vector<256x16xf32> -> vector<256x16xf32>
    %15 = arith.addf %8, %14 : vector<256x16xf32>
    %c0_16 = arith.constant 0 : index
    %c0_17 = arith.constant 0 : index
    %c2 = arith.constant 2 : index
    %c0_18 = arith.constant 0 : index
    %16 = vector.load %arg1[%c0_16, %c0_17, %c2, %c0_18] : memref<1x18x18x3xbf16, #tpu.memory_space<vmem>>, vector<1x16x16x3xbf16>
    %17 = vector.shape_cast %16 : vector<1x16x16x3xbf16> to vector<16x16x3xbf16>
    %18 = vector.shape_cast %17 : vector<16x16x3xbf16> to vector<256x3xbf16>
    %c2_19 = arith.constant 2 : index
    %c0_20 = arith.constant 0 : index
    %c0_21 = arith.constant 0 : index
    %19 = vector.load %arg2[%c2_19, %c0_20, %c0_21] : memref<9x3x16xbf16, #tpu.memory_space<vmem>>, vector<1x3x16xbf16>
    %20 = vector.shape_cast %19 : vector<1x3x16xbf16> to vector<3x16xbf16>
    %cst_22 = arith.constant dense<0.000000e+00> : vector<256x16xf32>
    %21 = tpu.matmul %18, %20, %cst_22 {dimension_numbers = #tpu.dot_dimension_numbers<[1], [0], [0], [1], [0, 0, 1, 1], [], []>} : vector<256x3xbf16>, vector<3x16xbf16>, vector<256x16xf32> -> vector<256x16xf32>
    %22 = arith.addf %15, %21 : vector<256x16xf32>
    %c0_23 = arith.constant 0 : index
    %c1_24 = arith.constant 1 : index
    %c0_25 = arith.constant 0 : index
    %c0_26 = arith.constant 0 : index
    %23 = vector.load %arg1[%c0_23, %c1_24, %c0_25, %c0_26] : memref<1x18x18x3xbf16, #tpu.memory_space<vmem>>, vector<1x16x16x3xbf16>
    %24 = vector.shape_cast %23 : vector<1x16x16x3xbf16> to vector<16x16x3xbf16>
    %25 = vector.shape_cast %24 : vector<16x16x3xbf16> to vector<256x3xbf16>
    %c3 = arith.constant 3 : index
    %c0_27 = arith.constant 0 : index
    %c0_28 = arith.constant 0 : index
    %26 = vector.load %arg2[%c3, %c0_27, %c0_28] : memref<9x3x16xbf16, #tpu.memory_space<vmem>>, vector<1x3x16xbf16>
    %27 = vector.shape_cast %26 : vector<1x3x16xbf16> to vector<3x16xbf16>
    %cst_29 = arith.constant dense<0.000000e+00> : vector<256x16xf32>
    %28 = tpu.matmul %25, %27, %cst_29 {dimension_numbers = #tpu.dot_dimension_numbers<[1], [0], [0], [1], [0, 0, 1, 1], [], []>} : vector<256x3xbf16>, vector<3x16xbf16>, vector<256x16xf32> -> vector<256x16xf32>
    %29 = arith.addf %22, %28 : vector<256x16xf32>
    %c0_30 = arith.constant 0 : index
    %c1_31 = arith.constant 1 : index
    %c1_32 = arith.constant 1 : index
    %c0_33 = arith.constant 0 : index
    %30 = vector.load %arg1[%c0_30, %c1_31, %c1_32, %c0_33] : memref<1x18x18x3xbf16, #tpu.memory_space<vmem>>, vector<1x16x16x3xbf16>
    %31 = vector.shape_cast %30 : vector<1x16x16x3xbf16> to vector<16x16x3xbf16>
    %32 = vector.shape_cast %31 : vector<16x16x3xbf16> to vector<256x3xbf16>
    %c4 = arith.constant 4 : index
    %c0_34 = arith.constant 0 : index
    %c0_35 = arith.constant 0 : index
    %33 = vector.load %arg2[%c4, %c0_34, %c0_35] : memref<9x3x16xbf16, #tpu.memory_space<vmem>>, vector<1x3x16xbf16>
    %34 = vector.shape_cast %33 : vector<1x3x16xbf16> to vector<3x16xbf16>
    %cst_36 = arith.constant dense<0.000000e+00> : vector<256x16xf32>
    %35 = tpu.matmul %32, %34, %cst_36 {dimension_numbers = #tpu.dot_dimension_numbers<[1], [0], [0], [1], [0, 0, 1, 1], [], []>} : vector<256x3xbf16>, vector<3x16xbf16>, vector<256x16xf32> -> vector<256x16xf32>
    %36 = arith.addf %29, %35 : vector<256x16xf32>
    %c0_37 = arith.constant 0 : index
    %c1_38 = arith.constant 1 : index
    %c2_39 = arith.constant 2 : index
    %c0_40 = arith.constant 0 : index
    %37 = vector.load %arg1[%c0_37, %c1_38, %c2_39, %c0_40] : memref<1x18x18x3xbf16, #tpu.memory_space<vmem>>, vector<1x16x16x3xbf16>
    %38 = vector.shape_cast %37 : vector<1x16x16x3xbf16> to vector<16x16x3xbf16>
    %39 = vector.shape_cast %38 : vector<16x16x3xbf16> to vector<256x3xbf16>
    %c5 = arith.constant 5 : index
    %c0_41 = arith.constant 0 : index
    %c0_42 = arith.constant 0 : index
    %40 = vector.load %arg2[%c5, %c0_41, %c0_42] : memref<9x3x16xbf16, #tpu.memory_space<vmem>>, vector<1x3x16xbf16>
    %41 = vector.shape_cast %40 : vector<1x3x16xbf16> to vector<3x16xbf16>
    %cst_43 = arith.constant dense<0.000000e+00> : vector<256x16xf32>
    %42 = tpu.matmul %39, %41, %cst_43 {dimension_numbers = #tpu.dot_dimension_numbers<[1], [0], [0], [1], [0, 0, 1, 1], [], []>} : vector<256x3xbf16>, vector<3x16xbf16>, vector<256x16xf32> -> vector<256x16xf32>
    %43 = arith.addf %36, %42 : vector<256x16xf32>
    %c0_44 = arith.constant 0 : index
    %c2_45 = arith.constant 2 : index
    %c0_46 = arith.constant 0 : index
    %c0_47 = arith.constant 0 : index
    %44 = vector.load %arg1[%c0_44, %c2_45, %c0_46, %c0_47] : memref<1x18x18x3xbf16, #tpu.memory_space<vmem>>, vector<1x16x16x3xbf16>
    %45 = vector.shape_cast %44 : vector<1x16x16x3xbf16> to vector<16x16x3xbf16>
    %46 = vector.shape_cast %45 : vector<16x16x3xbf16> to vector<256x3xbf16>
    %c6 = arith.constant 6 : index
    %c0_48 = arith.constant 0 : index
    %c0_49 = arith.constant 0 : index
    %47 = vector.load %arg2[%c6, %c0_48, %c0_49] : memref<9x3x16xbf16, #tpu.memory_space<vmem>>, vector<1x3x16xbf16>
    %48 = vector.shape_cast %47 : vector<1x3x16xbf16> to vector<3x16xbf16>
    %cst_50 = arith.constant dense<0.000000e+00> : vector<256x16xf32>
    %49 = tpu.matmul %46, %48, %cst_50 {dimension_numbers = #tpu.dot_dimension_numbers<[1], [0], [0], [1], [0, 0, 1, 1], [], []>} : vector<256x3xbf16>, vector<3x16xbf16>, vector<256x16xf32> -> vector<256x16xf32>
    %50 = arith.addf %43, %49 : vector<256x16xf32>
    %c0_51 = arith.constant 0 : index
    %c2_52 = arith.constant 2 : index
    %c1_53 = arith.constant 1 : index
    %c0_54 = arith.constant 0 : index
    %51 = vector.load %arg1[%c0_51, %c2_52, %c1_53, %c0_54] : memref<1x18x18x3xbf16, #tpu.memory_space<vmem>>, vector<1x16x16x3xbf16>
    %52 = vector.shape_cast %51 : vector<1x16x16x3xbf16> to vector<16x16x3xbf16>
    %53 = vector.shape_cast %52 : vector<16x16x3xbf16> to vector<256x3xbf16>
    %c7 = arith.constant 7 : index
    %c0_55 = arith.constant 0 : index
    %c0_56 = arith.constant 0 : index
    %54 = vector.load %arg2[%c7, %c0_55, %c0_56] : memref<9x3x16xbf16, #tpu.memory_space<vmem>>, vector<1x3x16xbf16>
    %55 = vector.shape_cast %54 : vector<1x3x16xbf16> to vector<3x16xbf16>
    %cst_57 = arith.constant dense<0.000000e+00> : vector<256x16xf32>
    %56 = tpu.matmul %53, %55, %cst_57 {dimension_numbers = #tpu.dot_dimension_numbers<[1], [0], [0], [1], [0, 0, 1, 1], [], []>} : vector<256x3xbf16>, vector<3x16xbf16>, vector<256x16xf32> -> vector<256x16xf32>
    %57 = arith.addf %50, %56 : vector<256x16xf32>
    %c0_58 = arith.constant 0 : index
    %c2_59 = arith.constant 2 : index
    %c2_60 = arith.constant 2 : index
    %c0_61 = arith.constant 0 : index
    %58 = vector.load %arg1[%c0_58, %c2_59, %c2_60, %c0_61] : memref<1x18x18x3xbf16, #tpu.memory_space<vmem>>, vector<1x16x16x3xbf16>
    %59 = vector.shape_cast %58 : vector<1x16x16x3xbf16> to vector<16x16x3xbf16>
    %60 = vector.shape_cast %59 : vector<16x16x3xbf16> to vector<256x3xbf16>
    %c8 = arith.constant 8 : index
    %c0_62 = arith.constant 0 : index
    %c0_63 = arith.constant 0 : index
    %61 = vector.load %arg2[%c8, %c0_62, %c0_63] : memref<9x3x16xbf16, #tpu.memory_space<vmem>>, vector<1x3x16xbf16>
    %62 = vector.shape_cast %61 : vector<1x3x16xbf16> to vector<3x16xbf16>
    %cst_64 = arith.constant dense<0.000000e+00> : vector<256x16xf32>
    %63 = tpu.matmul %60, %62, %cst_64 {dimension_numbers = #tpu.dot_dimension_numbers<[1], [0], [0], [1], [0, 0, 1, 1], [], []>} : vector<256x3xbf16>, vector<3x16xbf16>, vector<256x16xf32> -> vector<256x16xf32>
    %64 = arith.addf %57, %63 : vector<256x16xf32>
    %65 = vector.broadcast %0 : vector<1x16xf32> to vector<256x16xf32>
    %66 = arith.addf %64, %65 : vector<256x16xf32>
    %cst_65 = arith.constant 0.000000e+00 : f32
    %67 = vector.broadcast %cst_65 : f32 to vector<256x16xf32>
    %68 = arith.maximumf %66, %67 : vector<256x16xf32>
    %69 = vector.shape_cast %68 : vector<256x16xf32> to vector<8x2x16x16xf32>
    %70 = vector.extract_strided_slice %69 {offsets = [0, 0, 0, 0], sizes = [8, 1, 16, 16], strides = [1, 1, 1, 1]} : vector<8x2x16x16xf32> to vector<8x1x16x16xf32>
    %71 = vector.shape_cast %70 : vector<8x1x16x16xf32> to vector<8x16x16xf32>
    %72 = vector.extract_strided_slice %69 {offsets = [0, 1, 0, 0], sizes = [8, 1, 16, 16], strides = [1, 1, 1, 1]} : vector<8x2x16x16xf32> to vector<8x1x16x16xf32>
    %73 = vector.shape_cast %72 : vector<8x1x16x16xf32> to vector<8x16x16xf32>
    %74 = arith.maximumf %71, %73 : vector<8x16x16xf32>
    %75 = vector.shape_cast %74 : vector<8x16x16xf32> to vector<8x8x2x16xf32>
    %76 = vector.extract_strided_slice %75 {offsets = [0, 0, 0, 0], sizes = [8, 8, 1, 16], strides = [1, 1, 1, 1]} : vector<8x8x2x16xf32> to vector<8x8x1x16xf32>
    %77 = vector.shape_cast %76 : vector<8x8x1x16xf32> to vector<8x8x16xf32>
    %78 = vector.extract_strided_slice %75 {offsets = [0, 0, 1, 0], sizes = [8, 8, 1, 16], strides = [1, 1, 1, 1]} : vector<8x8x2x16xf32> to vector<8x8x1x16xf32>
    %79 = vector.shape_cast %78 : vector<8x8x1x16xf32> to vector<8x8x16xf32>
    %80 = arith.maximumf %77, %79 : vector<8x8x16xf32>
    %81 = vector.shape_cast %80 : vector<8x8x16xf32> to vector<8x128xf32>
    %82 = arith.truncf %81 : vector<8x128xf32> to vector<8x128xbf16>
    %c0_66 = arith.constant 0 : index
    %c0_67 = arith.constant 0 : index
    %c0_68 = arith.constant 0 : index
    %83 = vector.load %arg4[%c0_66, %c0_67, %c0_68] : memref<1x8x128xbf16, #tpu.memory_space<vmem>>, vector<1x8x128xbf16>
    %84 = vector.shape_cast %83 : vector<1x8x128xbf16> to vector<8x128xbf16>
    %85 = vector.shape_cast %82 : vector<8x128xbf16> to vector<1x8x128xbf16>
    tpu.vector_store %arg4[%c0_66, %c0_67, %c0_68], %85 {strides = array<i32>} : memref<1x8x128xbf16, #tpu.memory_space<vmem>>, vector<1x8x128xbf16>,
    return
  }
  func.func @transform_0(%arg0: i32) -> (i32, i32, i32, i32) {
    %c0_i32 = arith.constant 0 : i32
    %c0_i32_0 = arith.constant 0 : i32
    %c0_i32_1 = arith.constant 0 : i32
    %c0_i32_2 = arith.constant 0 : i32
    return %arg0, %c0_i32, %c0_i32_0, %c0_i32_1 : i32, i32, i32, i32
  }
  func.func @transform_1(%arg0: i32) -> (i32, i32, i32) {
    %c0_i32 = arith.constant 0 : i32
    %c0_i32_0 = arith.constant 0 : i32
    %c0_i32_1 = arith.constant 0 : i32
    %c0_i32_2 = arith.constant 0 : i32
    return %c0_i32, %c0_i32_0, %c0_i32_1 : i32, i32, i32
  }
  func.func @transform_2(%arg0: i32) -> (i32, i32) {
    %c0_i32 = arith.constant 0 : i32
    %c0_i32_0 = arith.constant 0 : i32
    %c0_i32_1 = arith.constant 0 : i32
    return %c0_i32, %c0_i32_0 : i32, i32
  }
  func.func @transform_3(%arg0: i32) -> (i32, i32, i32) {
    %c0_i32 = arith.constant 0 : i32
    %c0_i32_0 = arith.constant 0 : i32
    %c0_i32_1 = arith.constant 0 : i32
    return %arg0, %c0_i32, %c0_i32_0 : i32, i32, i32
  }
}

module attributes {stable_mosaic.version = 11 : i64} {
  func.func @_conv3x3_relu_pool_kernel(%arg0: i32, %arg1: memref<1x10x10x16xbf16, #tpu.memory_space<vmem>>, %arg2: memref<9x16x32xbf16, #tpu.memory_space<vmem>>, %arg3: memref<1x32xf32, #tpu.memory_space<vmem>>, %arg4: memref<1x4x128xbf16, #tpu.memory_space<vmem>>) attributes {dimension_semantics = [#tpu.dimension_semantics<parallel>], iteration_bounds = array<i64: 2>, scalar_prefetch = 0 : i64, scratch_operands = 0 : i64, tpu.core_type = #tpu.core_type<tc>, window_params = [{transform_indices = @transform_0, window_bounds = array<i64: 1, 10, 10, 16>}, {pipeline_mode = #tpu.pipeline_mode<synchronous>, transform_indices = @transform_1, window_bounds = array<i64: 9, 16, 32>}, {pipeline_mode = #tpu.pipeline_mode<synchronous>, transform_indices = @transform_2, window_bounds = array<i64: 1, 32>}, {transform_indices = @transform_3, window_bounds = array<i64: 1, 4, 128>}]} {
    %c0 = arith.constant 0 : index
    %c0_0 = arith.constant 0 : index
    %0 = vector.load %arg3[%c0, %c0_0] : memref<1x32xf32, #tpu.memory_space<vmem>>, vector<1x32xf32>
    %cst = arith.constant 0.000000e+00 : f32
    %1 = vector.broadcast %cst : f32 to vector<64x32xf32>
    %c0_1 = arith.constant 0 : index
    %c0_2 = arith.constant 0 : index
    %c0_3 = arith.constant 0 : index
    %c0_4 = arith.constant 0 : index
    %2 = vector.load %arg1[%c0_1, %c0_2, %c0_3, %c0_4] : memref<1x10x10x16xbf16, #tpu.memory_space<vmem>>, vector<1x8x8x16xbf16>
    %3 = vector.shape_cast %2 : vector<1x8x8x16xbf16> to vector<8x8x16xbf16>
    %4 = vector.shape_cast %3 : vector<8x8x16xbf16> to vector<64x16xbf16>
    %c0_5 = arith.constant 0 : index
    %c0_6 = arith.constant 0 : index
    %c0_7 = arith.constant 0 : index
    %5 = vector.load %arg2[%c0_5, %c0_6, %c0_7] : memref<9x16x32xbf16, #tpu.memory_space<vmem>>, vector<1x16x32xbf16>
    %6 = vector.shape_cast %5 : vector<1x16x32xbf16> to vector<16x32xbf16>
    %cst_8 = arith.constant dense<0.000000e+00> : vector<64x32xf32>
    %7 = tpu.matmul %4, %6, %cst_8 {dimension_numbers = #tpu.dot_dimension_numbers<[1], [0], [0], [1], [0, 0, 1, 1], [], []>} : vector<64x16xbf16>, vector<16x32xbf16>, vector<64x32xf32> -> vector<64x32xf32>
    %8 = arith.addf %1, %7 : vector<64x32xf32>
    %c0_9 = arith.constant 0 : index
    %c0_10 = arith.constant 0 : index
    %c1 = arith.constant 1 : index
    %c0_11 = arith.constant 0 : index
    %9 = vector.load %arg1[%c0_9, %c0_10, %c1, %c0_11] : memref<1x10x10x16xbf16, #tpu.memory_space<vmem>>, vector<1x8x8x16xbf16>
    %10 = vector.shape_cast %9 : vector<1x8x8x16xbf16> to vector<8x8x16xbf16>
    %11 = vector.shape_cast %10 : vector<8x8x16xbf16> to vector<64x16xbf16>
    %c1_12 = arith.constant 1 : index
    %c0_13 = arith.constant 0 : index
    %c0_14 = arith.constant 0 : index
    %12 = vector.load %arg2[%c1_12, %c0_13, %c0_14] : memref<9x16x32xbf16, #tpu.memory_space<vmem>>, vector<1x16x32xbf16>
    %13 = vector.shape_cast %12 : vector<1x16x32xbf16> to vector<16x32xbf16>
    %cst_15 = arith.constant dense<0.000000e+00> : vector<64x32xf32>
    %14 = tpu.matmul %11, %13, %cst_15 {dimension_numbers = #tpu.dot_dimension_numbers<[1], [0], [0], [1], [0, 0, 1, 1], [], []>} : vector<64x16xbf16>, vector<16x32xbf16>, vector<64x32xf32> -> vector<64x32xf32>
    %15 = arith.addf %8, %14 : vector<64x32xf32>
    %c0_16 = arith.constant 0 : index
    %c0_17 = arith.constant 0 : index
    %c2 = arith.constant 2 : index
    %c0_18 = arith.constant 0 : index
    %16 = vector.load %arg1[%c0_16, %c0_17, %c2, %c0_18] : memref<1x10x10x16xbf16, #tpu.memory_space<vmem>>, vector<1x8x8x16xbf16>
    %17 = vector.shape_cast %16 : vector<1x8x8x16xbf16> to vector<8x8x16xbf16>
    %18 = vector.shape_cast %17 : vector<8x8x16xbf16> to vector<64x16xbf16>
    %c2_19 = arith.constant 2 : index
    %c0_20 = arith.constant 0 : index
    %c0_21 = arith.constant 0 : index
    %19 = vector.load %arg2[%c2_19, %c0_20, %c0_21] : memref<9x16x32xbf16, #tpu.memory_space<vmem>>, vector<1x16x32xbf16>
    %20 = vector.shape_cast %19 : vector<1x16x32xbf16> to vector<16x32xbf16>
    %cst_22 = arith.constant dense<0.000000e+00> : vector<64x32xf32>
    %21 = tpu.matmul %18, %20, %cst_22 {dimension_numbers = #tpu.dot_dimension_numbers<[1], [0], [0], [1], [0, 0, 1, 1], [], []>} : vector<64x16xbf16>, vector<16x32xbf16>, vector<64x32xf32> -> vector<64x32xf32>
    %22 = arith.addf %15, %21 : vector<64x32xf32>
    %c0_23 = arith.constant 0 : index
    %c1_24 = arith.constant 1 : index
    %c0_25 = arith.constant 0 : index
    %c0_26 = arith.constant 0 : index
    %23 = vector.load %arg1[%c0_23, %c1_24, %c0_25, %c0_26] : memref<1x10x10x16xbf16, #tpu.memory_space<vmem>>, vector<1x8x8x16xbf16>
    %24 = vector.shape_cast %23 : vector<1x8x8x16xbf16> to vector<8x8x16xbf16>
    %25 = vector.shape_cast %24 : vector<8x8x16xbf16> to vector<64x16xbf16>
    %c3 = arith.constant 3 : index
    %c0_27 = arith.constant 0 : index
    %c0_28 = arith.constant 0 : index
    %26 = vector.load %arg2[%c3, %c0_27, %c0_28] : memref<9x16x32xbf16, #tpu.memory_space<vmem>>, vector<1x16x32xbf16>
    %27 = vector.shape_cast %26 : vector<1x16x32xbf16> to vector<16x32xbf16>
    %cst_29 = arith.constant dense<0.000000e+00> : vector<64x32xf32>
    %28 = tpu.matmul %25, %27, %cst_29 {dimension_numbers = #tpu.dot_dimension_numbers<[1], [0], [0], [1], [0, 0, 1, 1], [], []>} : vector<64x16xbf16>, vector<16x32xbf16>, vector<64x32xf32> -> vector<64x32xf32>
    %29 = arith.addf %22, %28 : vector<64x32xf32>
    %c0_30 = arith.constant 0 : index
    %c1_31 = arith.constant 1 : index
    %c1_32 = arith.constant 1 : index
    %c0_33 = arith.constant 0 : index
    %30 = vector.load %arg1[%c0_30, %c1_31, %c1_32, %c0_33] : memref<1x10x10x16xbf16, #tpu.memory_space<vmem>>, vector<1x8x8x16xbf16>
    %31 = vector.shape_cast %30 : vector<1x8x8x16xbf16> to vector<8x8x16xbf16>
    %32 = vector.shape_cast %31 : vector<8x8x16xbf16> to vector<64x16xbf16>
    %c4 = arith.constant 4 : index
    %c0_34 = arith.constant 0 : index
    %c0_35 = arith.constant 0 : index
    %33 = vector.load %arg2[%c4, %c0_34, %c0_35] : memref<9x16x32xbf16, #tpu.memory_space<vmem>>, vector<1x16x32xbf16>
    %34 = vector.shape_cast %33 : vector<1x16x32xbf16> to vector<16x32xbf16>
    %cst_36 = arith.constant dense<0.000000e+00> : vector<64x32xf32>
    %35 = tpu.matmul %32, %34, %cst_36 {dimension_numbers = #tpu.dot_dimension_numbers<[1], [0], [0], [1], [0, 0, 1, 1], [], []>} : vector<64x16xbf16>, vector<16x32xbf16>, vector<64x32xf32> -> vector<64x32xf32>
    %36 = arith.addf %29, %35 : vector<64x32xf32>
    %c0_37 = arith.constant 0 : index
    %c1_38 = arith.constant 1 : index
    %c2_39 = arith.constant 2 : index
    %c0_40 = arith.constant 0 : index
    %37 = vector.load %arg1[%c0_37, %c1_38, %c2_39, %c0_40] : memref<1x10x10x16xbf16, #tpu.memory_space<vmem>>, vector<1x8x8x16xbf16>
    %38 = vector.shape_cast %37 : vector<1x8x8x16xbf16> to vector<8x8x16xbf16>
    %39 = vector.shape_cast %38 : vector<8x8x16xbf16> to vector<64x16xbf16>
    %c5 = arith.constant 5 : index
    %c0_41 = arith.constant 0 : index
    %c0_42 = arith.constant 0 : index
    %40 = vector.load %arg2[%c5, %c0_41, %c0_42] : memref<9x16x32xbf16, #tpu.memory_space<vmem>>, vector<1x16x32xbf16>
    %41 = vector.shape_cast %40 : vector<1x16x32xbf16> to vector<16x32xbf16>
    %cst_43 = arith.constant dense<0.000000e+00> : vector<64x32xf32>
    %42 = tpu.matmul %39, %41, %cst_43 {dimension_numbers = #tpu.dot_dimension_numbers<[1], [0], [0], [1], [0, 0, 1, 1], [], []>} : vector<64x16xbf16>, vector<16x32xbf16>, vector<64x32xf32> -> vector<64x32xf32>
    %43 = arith.addf %36, %42 : vector<64x32xf32>
    %c0_44 = arith.constant 0 : index
    %c2_45 = arith.constant 2 : index
    %c0_46 = arith.constant 0 : index
    %c0_47 = arith.constant 0 : index
    %44 = vector.load %arg1[%c0_44, %c2_45, %c0_46, %c0_47] : memref<1x10x10x16xbf16, #tpu.memory_space<vmem>>, vector<1x8x8x16xbf16>
    %45 = vector.shape_cast %44 : vector<1x8x8x16xbf16> to vector<8x8x16xbf16>
    %46 = vector.shape_cast %45 : vector<8x8x16xbf16> to vector<64x16xbf16>
    %c6 = arith.constant 6 : index
    %c0_48 = arith.constant 0 : index
    %c0_49 = arith.constant 0 : index
    %47 = vector.load %arg2[%c6, %c0_48, %c0_49] : memref<9x16x32xbf16, #tpu.memory_space<vmem>>, vector<1x16x32xbf16>
    %48 = vector.shape_cast %47 : vector<1x16x32xbf16> to vector<16x32xbf16>
    %cst_50 = arith.constant dense<0.000000e+00> : vector<64x32xf32>
    %49 = tpu.matmul %46, %48, %cst_50 {dimension_numbers = #tpu.dot_dimension_numbers<[1], [0], [0], [1], [0, 0, 1, 1], [], []>} : vector<64x16xbf16>, vector<16x32xbf16>, vector<64x32xf32> -> vector<64x32xf32>
    %50 = arith.addf %43, %49 : vector<64x32xf32>
    %c0_51 = arith.constant 0 : index
    %c2_52 = arith.constant 2 : index
    %c1_53 = arith.constant 1 : index
    %c0_54 = arith.constant 0 : index
    %51 = vector.load %arg1[%c0_51, %c2_52, %c1_53, %c0_54] : memref<1x10x10x16xbf16, #tpu.memory_space<vmem>>, vector<1x8x8x16xbf16>
    %52 = vector.shape_cast %51 : vector<1x8x8x16xbf16> to vector<8x8x16xbf16>
    %53 = vector.shape_cast %52 : vector<8x8x16xbf16> to vector<64x16xbf16>
    %c7 = arith.constant 7 : index
    %c0_55 = arith.constant 0 : index
    %c0_56 = arith.constant 0 : index
    %54 = vector.load %arg2[%c7, %c0_55, %c0_56] : memref<9x16x32xbf16, #tpu.memory_space<vmem>>, vector<1x16x32xbf16>
    %55 = vector.shape_cast %54 : vector<1x16x32xbf16> to vector<16x32xbf16>
    %cst_57 = arith.constant dense<0.000000e+00> : vector<64x32xf32>
    %56 = tpu.matmul %53, %55, %cst_57 {dimension_numbers = #tpu.dot_dimension_numbers<[1], [0], [0], [1], [0, 0, 1, 1], [], []>} : vector<64x16xbf16>, vector<16x32xbf16>, vector<64x32xf32> -> vector<64x32xf32>
    %57 = arith.addf %50, %56 : vector<64x32xf32>
    %c0_58 = arith.constant 0 : index
    %c2_59 = arith.constant 2 : index
    %c2_60 = arith.constant 2 : index
    %c0_61 = arith.constant 0 : index
    %58 = vector.load %arg1[%c0_58, %c2_59, %c2_60, %c0_61] : memref<1x10x10x16xbf16, #tpu.memory_space<vmem>>, vector<1x8x8x16xbf16>
    %59 = vector.shape_cast %58 : vector<1x8x8x16xbf16> to vector<8x8x16xbf16>
    %60 = vector.shape_cast %59 : vector<8x8x16xbf16> to vector<64x16xbf16>
    %c8 = arith.constant 8 : index
    %c0_62 = arith.constant 0 : index
    %c0_63 = arith.constant 0 : index
    %61 = vector.load %arg2[%c8, %c0_62, %c0_63] : memref<9x16x32xbf16, #tpu.memory_space<vmem>>, vector<1x16x32xbf16>
    %62 = vector.shape_cast %61 : vector<1x16x32xbf16> to vector<16x32xbf16>
    %cst_64 = arith.constant dense<0.000000e+00> : vector<64x32xf32>
    %63 = tpu.matmul %60, %62, %cst_64 {dimension_numbers = #tpu.dot_dimension_numbers<[1], [0], [0], [1], [0, 0, 1, 1], [], []>} : vector<64x16xbf16>, vector<16x32xbf16>, vector<64x32xf32> -> vector<64x32xf32>
    %64 = arith.addf %57, %63 : vector<64x32xf32>
    %65 = vector.broadcast %0 : vector<1x32xf32> to vector<64x32xf32>
    %66 = arith.addf %64, %65 : vector<64x32xf32>
    %cst_65 = arith.constant 0.000000e+00 : f32
    %67 = vector.broadcast %cst_65 : f32 to vector<64x32xf32>
    %68 = arith.maximumf %66, %67 : vector<64x32xf32>
    %69 = vector.shape_cast %68 : vector<64x32xf32> to vector<4x2x8x32xf32>
    %70 = vector.extract_strided_slice %69 {offsets = [0, 0, 0, 0], sizes = [4, 1, 8, 32], strides = [1, 1, 1, 1]} : vector<4x2x8x32xf32> to vector<4x1x8x32xf32>
    %71 = vector.shape_cast %70 : vector<4x1x8x32xf32> to vector<4x8x32xf32>
    %72 = vector.extract_strided_slice %69 {offsets = [0, 1, 0, 0], sizes = [4, 1, 8, 32], strides = [1, 1, 1, 1]} : vector<4x2x8x32xf32> to vector<4x1x8x32xf32>
    %73 = vector.shape_cast %72 : vector<4x1x8x32xf32> to vector<4x8x32xf32>
    %74 = arith.maximumf %71, %73 : vector<4x8x32xf32>
    %75 = vector.shape_cast %74 : vector<4x8x32xf32> to vector<4x4x2x32xf32>
    %76 = vector.extract_strided_slice %75 {offsets = [0, 0, 0, 0], sizes = [4, 4, 1, 32], strides = [1, 1, 1, 1]} : vector<4x4x2x32xf32> to vector<4x4x1x32xf32>
    %77 = vector.shape_cast %76 : vector<4x4x1x32xf32> to vector<4x4x32xf32>
    %78 = vector.extract_strided_slice %75 {offsets = [0, 0, 1, 0], sizes = [4, 4, 1, 32], strides = [1, 1, 1, 1]} : vector<4x4x2x32xf32> to vector<4x4x1x32xf32>
    %79 = vector.shape_cast %78 : vector<4x4x1x32xf32> to vector<4x4x32xf32>
    %80 = arith.maximumf %77, %79 : vector<4x4x32xf32>
    %81 = vector.shape_cast %80 : vector<4x4x32xf32> to vector<4x128xf32>
    %82 = arith.truncf %81 : vector<4x128xf32> to vector<4x128xbf16>
    %c0_66 = arith.constant 0 : index
    %c0_67 = arith.constant 0 : index
    %c0_68 = arith.constant 0 : index
    %83 = vector.load %arg4[%c0_66, %c0_67, %c0_68] : memref<1x4x128xbf16, #tpu.memory_space<vmem>>, vector<1x4x128xbf16>
    %84 = vector.shape_cast %83 : vector<1x4x128xbf16> to vector<4x128xbf16>
    %85 = vector.shape_cast %82 : vector<4x128xbf16> to vector<1x4x128xbf16>
    tpu.vector_store %arg4[%c0_66, %c0_67, %c0_68], %85 {strides = array<i32>} : memref<1x4x128xbf16, #tpu.memory_space<vmem>>, vector<1x4x128xbf16>,
    return
  }
  func.func @transform_0(%arg0: i32) -> (i32, i32, i32, i32) {
    %c0_i32 = arith.constant 0 : i32
    %c0_i32_0 = arith.constant 0 : i32
    %c0_i32_1 = arith.constant 0 : i32
    %c0_i32_2 = arith.constant 0 : i32
    return %arg0, %c0_i32, %c0_i32_0, %c0_i32_1 : i32, i32, i32, i32
  }
  func.func @transform_1(%arg0: i32) -> (i32, i32, i32) {
    %c0_i32 = arith.constant 0 : i32
    %c0_i32_0 = arith.constant 0 : i32
    %c0_i32_1 = arith.constant 0 : i32
    %c0_i32_2 = arith.constant 0 : i32
    return %c0_i32, %c0_i32_0, %c0_i32_1 : i32, i32, i32
  }
  func.func @transform_2(%arg0: i32) -> (i32, i32) {
    %c0_i32 = arith.constant 0 : i32
    %c0_i32_0 = arith.constant 0 : i32
    %c0_i32_1 = arith.constant 0 : i32
    return %c0_i32, %c0_i32_0 : i32, i32
  }
  func.func @transform_3(%arg0: i32) -> (i32, i32, i32) {
    %c0_i32 = arith.constant 0 : i32
    %c0_i32_0 = arith.constant 0 : i32
    %c0_i32_1 = arith.constant 0 : i32
    return %arg0, %c0_i32, %c0_i32_0 : i32, i32, i32
  }
}

module attributes {stable_mosaic.version = 11 : i64} {
  func.func @_conv3x3_relu_pool_kernel(%arg0: i32, %arg1: memref<1x6x6x32xbf16, #tpu.memory_space<vmem>>, %arg2: memref<9x32x128xbf16, #tpu.memory_space<vmem>>, %arg3: memref<1x128xf32, #tpu.memory_space<vmem>>, %arg4: memref<1x2x256xbf16, #tpu.memory_space<vmem>>) attributes {dimension_semantics = [#tpu.dimension_semantics<parallel>], iteration_bounds = array<i64: 2>, scalar_prefetch = 0 : i64, scratch_operands = 0 : i64, tpu.core_type = #tpu.core_type<tc>, window_params = [{transform_indices = @transform_0, window_bounds = array<i64: 1, 6, 6, 32>}, {pipeline_mode = #tpu.pipeline_mode<synchronous>, transform_indices = @transform_1, window_bounds = array<i64: 9, 32, 128>}, {pipeline_mode = #tpu.pipeline_mode<synchronous>, transform_indices = @transform_2, window_bounds = array<i64: 1, 128>}, {transform_indices = @transform_3, window_bounds = array<i64: 1, 2, 256>}]} {
    %c0 = arith.constant 0 : index
    %c0_0 = arith.constant 0 : index
    %0 = vector.load %arg3[%c0, %c0_0] : memref<1x128xf32, #tpu.memory_space<vmem>>, vector<1x128xf32>
    %cst = arith.constant 0.000000e+00 : f32
    %1 = vector.broadcast %cst : f32 to vector<16x128xf32>
    %c0_1 = arith.constant 0 : index
    %c0_2 = arith.constant 0 : index
    %c0_3 = arith.constant 0 : index
    %c0_4 = arith.constant 0 : index
    %2 = vector.load %arg1[%c0_1, %c0_2, %c0_3, %c0_4] : memref<1x6x6x32xbf16, #tpu.memory_space<vmem>>, vector<1x4x4x32xbf16>
    %3 = vector.shape_cast %2 : vector<1x4x4x32xbf16> to vector<4x4x32xbf16>
    %4 = vector.shape_cast %3 : vector<4x4x32xbf16> to vector<16x32xbf16>
    %c0_5 = arith.constant 0 : index
    %c0_6 = arith.constant 0 : index
    %c0_7 = arith.constant 0 : index
    %5 = vector.load %arg2[%c0_5, %c0_6, %c0_7] : memref<9x32x128xbf16, #tpu.memory_space<vmem>>, vector<1x32x128xbf16>
    %6 = vector.shape_cast %5 : vector<1x32x128xbf16> to vector<32x128xbf16>
    %cst_8 = arith.constant dense<0.000000e+00> : vector<16x128xf32>
    %7 = tpu.matmul %4, %6, %cst_8 {dimension_numbers = #tpu.dot_dimension_numbers<[1], [0], [0], [1], [0, 0, 1, 1], [], []>} : vector<16x32xbf16>, vector<32x128xbf16>, vector<16x128xf32> -> vector<16x128xf32>
    %8 = arith.addf %1, %7 : vector<16x128xf32>
    %c0_9 = arith.constant 0 : index
    %c0_10 = arith.constant 0 : index
    %c1 = arith.constant 1 : index
    %c0_11 = arith.constant 0 : index
    %9 = vector.load %arg1[%c0_9, %c0_10, %c1, %c0_11] : memref<1x6x6x32xbf16, #tpu.memory_space<vmem>>, vector<1x4x4x32xbf16>
    %10 = vector.shape_cast %9 : vector<1x4x4x32xbf16> to vector<4x4x32xbf16>
    %11 = vector.shape_cast %10 : vector<4x4x32xbf16> to vector<16x32xbf16>
    %c1_12 = arith.constant 1 : index
    %c0_13 = arith.constant 0 : index
    %c0_14 = arith.constant 0 : index
    %12 = vector.load %arg2[%c1_12, %c0_13, %c0_14] : memref<9x32x128xbf16, #tpu.memory_space<vmem>>, vector<1x32x128xbf16>
    %13 = vector.shape_cast %12 : vector<1x32x128xbf16> to vector<32x128xbf16>
    %cst_15 = arith.constant dense<0.000000e+00> : vector<16x128xf32>
    %14 = tpu.matmul %11, %13, %cst_15 {dimension_numbers = #tpu.dot_dimension_numbers<[1], [0], [0], [1], [0, 0, 1, 1], [], []>} : vector<16x32xbf16>, vector<32x128xbf16>, vector<16x128xf32> -> vector<16x128xf32>
    %15 = arith.addf %8, %14 : vector<16x128xf32>
    %c0_16 = arith.constant 0 : index
    %c0_17 = arith.constant 0 : index
    %c2 = arith.constant 2 : index
    %c0_18 = arith.constant 0 : index
    %16 = vector.load %arg1[%c0_16, %c0_17, %c2, %c0_18] : memref<1x6x6x32xbf16, #tpu.memory_space<vmem>>, vector<1x4x4x32xbf16>
    %17 = vector.shape_cast %16 : vector<1x4x4x32xbf16> to vector<4x4x32xbf16>
    %18 = vector.shape_cast %17 : vector<4x4x32xbf16> to vector<16x32xbf16>
    %c2_19 = arith.constant 2 : index
    %c0_20 = arith.constant 0 : index
    %c0_21 = arith.constant 0 : index
    %19 = vector.load %arg2[%c2_19, %c0_20, %c0_21] : memref<9x32x128xbf16, #tpu.memory_space<vmem>>, vector<1x32x128xbf16>
    %20 = vector.shape_cast %19 : vector<1x32x128xbf16> to vector<32x128xbf16>
    %cst_22 = arith.constant dense<0.000000e+00> : vector<16x128xf32>
    %21 = tpu.matmul %18, %20, %cst_22 {dimension_numbers = #tpu.dot_dimension_numbers<[1], [0], [0], [1], [0, 0, 1, 1], [], []>} : vector<16x32xbf16>, vector<32x128xbf16>, vector<16x128xf32> -> vector<16x128xf32>
    %22 = arith.addf %15, %21 : vector<16x128xf32>
    %c0_23 = arith.constant 0 : index
    %c1_24 = arith.constant 1 : index
    %c0_25 = arith.constant 0 : index
    %c0_26 = arith.constant 0 : index
    %23 = vector.load %arg1[%c0_23, %c1_24, %c0_25, %c0_26] : memref<1x6x6x32xbf16, #tpu.memory_space<vmem>>, vector<1x4x4x32xbf16>
    %24 = vector.shape_cast %23 : vector<1x4x4x32xbf16> to vector<4x4x32xbf16>
    %25 = vector.shape_cast %24 : vector<4x4x32xbf16> to vector<16x32xbf16>
    %c3 = arith.constant 3 : index
    %c0_27 = arith.constant 0 : index
    %c0_28 = arith.constant 0 : index
    %26 = vector.load %arg2[%c3, %c0_27, %c0_28] : memref<9x32x128xbf16, #tpu.memory_space<vmem>>, vector<1x32x128xbf16>
    %27 = vector.shape_cast %26 : vector<1x32x128xbf16> to vector<32x128xbf16>
    %cst_29 = arith.constant dense<0.000000e+00> : vector<16x128xf32>
    %28 = tpu.matmul %25, %27, %cst_29 {dimension_numbers = #tpu.dot_dimension_numbers<[1], [0], [0], [1], [0, 0, 1, 1], [], []>} : vector<16x32xbf16>, vector<32x128xbf16>, vector<16x128xf32> -> vector<16x128xf32>
    %29 = arith.addf %22, %28 : vector<16x128xf32>
    %c0_30 = arith.constant 0 : index
    %c1_31 = arith.constant 1 : index
    %c1_32 = arith.constant 1 : index
    %c0_33 = arith.constant 0 : index
    %30 = vector.load %arg1[%c0_30, %c1_31, %c1_32, %c0_33] : memref<1x6x6x32xbf16, #tpu.memory_space<vmem>>, vector<1x4x4x32xbf16>
    %31 = vector.shape_cast %30 : vector<1x4x4x32xbf16> to vector<4x4x32xbf16>
    %32 = vector.shape_cast %31 : vector<4x4x32xbf16> to vector<16x32xbf16>
    %c4 = arith.constant 4 : index
    %c0_34 = arith.constant 0 : index
    %c0_35 = arith.constant 0 : index
    %33 = vector.load %arg2[%c4, %c0_34, %c0_35] : memref<9x32x128xbf16, #tpu.memory_space<vmem>>, vector<1x32x128xbf16>
    %34 = vector.shape_cast %33 : vector<1x32x128xbf16> to vector<32x128xbf16>
    %cst_36 = arith.constant dense<0.000000e+00> : vector<16x128xf32>
    %35 = tpu.matmul %32, %34, %cst_36 {dimension_numbers = #tpu.dot_dimension_numbers<[1], [0], [0], [1], [0, 0, 1, 1], [], []>} : vector<16x32xbf16>, vector<32x128xbf16>, vector<16x128xf32> -> vector<16x128xf32>
    %36 = arith.addf %29, %35 : vector<16x128xf32>
    %c0_37 = arith.constant 0 : index
    %c1_38 = arith.constant 1 : index
    %c2_39 = arith.constant 2 : index
    %c0_40 = arith.constant 0 : index
    %37 = vector.load %arg1[%c0_37, %c1_38, %c2_39, %c0_40] : memref<1x6x6x32xbf16, #tpu.memory_space<vmem>>, vector<1x4x4x32xbf16>
    %38 = vector.shape_cast %37 : vector<1x4x4x32xbf16> to vector<4x4x32xbf16>
    %39 = vector.shape_cast %38 : vector<4x4x32xbf16> to vector<16x32xbf16>
    %c5 = arith.constant 5 : index
    %c0_41 = arith.constant 0 : index
    %c0_42 = arith.constant 0 : index
    %40 = vector.load %arg2[%c5, %c0_41, %c0_42] : memref<9x32x128xbf16, #tpu.memory_space<vmem>>, vector<1x32x128xbf16>
    %41 = vector.shape_cast %40 : vector<1x32x128xbf16> to vector<32x128xbf16>
    %cst_43 = arith.constant dense<0.000000e+00> : vector<16x128xf32>
    %42 = tpu.matmul %39, %41, %cst_43 {dimension_numbers = #tpu.dot_dimension_numbers<[1], [0], [0], [1], [0, 0, 1, 1], [], []>} : vector<16x32xbf16>, vector<32x128xbf16>, vector<16x128xf32> -> vector<16x128xf32>
    %43 = arith.addf %36, %42 : vector<16x128xf32>
    %c0_44 = arith.constant 0 : index
    %c2_45 = arith.constant 2 : index
    %c0_46 = arith.constant 0 : index
    %c0_47 = arith.constant 0 : index
    %44 = vector.load %arg1[%c0_44, %c2_45, %c0_46, %c0_47] : memref<1x6x6x32xbf16, #tpu.memory_space<vmem>>, vector<1x4x4x32xbf16>
    %45 = vector.shape_cast %44 : vector<1x4x4x32xbf16> to vector<4x4x32xbf16>
    %46 = vector.shape_cast %45 : vector<4x4x32xbf16> to vector<16x32xbf16>
    %c6 = arith.constant 6 : index
    %c0_48 = arith.constant 0 : index
    %c0_49 = arith.constant 0 : index
    %47 = vector.load %arg2[%c6, %c0_48, %c0_49] : memref<9x32x128xbf16, #tpu.memory_space<vmem>>, vector<1x32x128xbf16>
    %48 = vector.shape_cast %47 : vector<1x32x128xbf16> to vector<32x128xbf16>
    %cst_50 = arith.constant dense<0.000000e+00> : vector<16x128xf32>
    %49 = tpu.matmul %46, %48, %cst_50 {dimension_numbers = #tpu.dot_dimension_numbers<[1], [0], [0], [1], [0, 0, 1, 1], [], []>} : vector<16x32xbf16>, vector<32x128xbf16>, vector<16x128xf32> -> vector<16x128xf32>
    %50 = arith.addf %43, %49 : vector<16x128xf32>
    %c0_51 = arith.constant 0 : index
    %c2_52 = arith.constant 2 : index
    %c1_53 = arith.constant 1 : index
    %c0_54 = arith.constant 0 : index
    %51 = vector.load %arg1[%c0_51, %c2_52, %c1_53, %c0_54] : memref<1x6x6x32xbf16, #tpu.memory_space<vmem>>, vector<1x4x4x32xbf16>
    %52 = vector.shape_cast %51 : vector<1x4x4x32xbf16> to vector<4x4x32xbf16>
    %53 = vector.shape_cast %52 : vector<4x4x32xbf16> to vector<16x32xbf16>
    %c7 = arith.constant 7 : index
    %c0_55 = arith.constant 0 : index
    %c0_56 = arith.constant 0 : index
    %54 = vector.load %arg2[%c7, %c0_55, %c0_56] : memref<9x32x128xbf16, #tpu.memory_space<vmem>>, vector<1x32x128xbf16>
    %55 = vector.shape_cast %54 : vector<1x32x128xbf16> to vector<32x128xbf16>
    %cst_57 = arith.constant dense<0.000000e+00> : vector<16x128xf32>
    %56 = tpu.matmul %53, %55, %cst_57 {dimension_numbers = #tpu.dot_dimension_numbers<[1], [0], [0], [1], [0, 0, 1, 1], [], []>} : vector<16x32xbf16>, vector<32x128xbf16>, vector<16x128xf32> -> vector<16x128xf32>
    %57 = arith.addf %50, %56 : vector<16x128xf32>
    %c0_58 = arith.constant 0 : index
    %c2_59 = arith.constant 2 : index
    %c2_60 = arith.constant 2 : index
    %c0_61 = arith.constant 0 : index
    %58 = vector.load %arg1[%c0_58, %c2_59, %c2_60, %c0_61] : memref<1x6x6x32xbf16, #tpu.memory_space<vmem>>, vector<1x4x4x32xbf16>
    %59 = vector.shape_cast %58 : vector<1x4x4x32xbf16> to vector<4x4x32xbf16>
    %60 = vector.shape_cast %59 : vector<4x4x32xbf16> to vector<16x32xbf16>
    %c8 = arith.constant 8 : index
    %c0_62 = arith.constant 0 : index
    %c0_63 = arith.constant 0 : index
    %61 = vector.load %arg2[%c8, %c0_62, %c0_63] : memref<9x32x128xbf16, #tpu.memory_space<vmem>>, vector<1x32x128xbf16>
    %62 = vector.shape_cast %61 : vector<1x32x128xbf16> to vector<32x128xbf16>
    %cst_64 = arith.constant dense<0.000000e+00> : vector<16x128xf32>
    %63 = tpu.matmul %60, %62, %cst_64 {dimension_numbers = #tpu.dot_dimension_numbers<[1], [0], [0], [1], [0, 0, 1, 1], [], []>} : vector<16x32xbf16>, vector<32x128xbf16>, vector<16x128xf32> -> vector<16x128xf32>
    %64 = arith.addf %57, %63 : vector<16x128xf32>
    %65 = vector.broadcast %0 : vector<1x128xf32> to vector<16x128xf32>
    %66 = arith.addf %64, %65 : vector<16x128xf32>
    %cst_65 = arith.constant 0.000000e+00 : f32
    %67 = vector.broadcast %cst_65 : f32 to vector<16x128xf32>
    %68 = arith.maximumf %66, %67 : vector<16x128xf32>
    %69 = vector.shape_cast %68 : vector<16x128xf32> to vector<2x2x4x128xf32>
    %70 = vector.extract_strided_slice %69 {offsets = [0, 0, 0, 0], sizes = [2, 1, 4, 128], strides = [1, 1, 1, 1]} : vector<2x2x4x128xf32> to vector<2x1x4x128xf32>
    %71 = vector.shape_cast %70 : vector<2x1x4x128xf32> to vector<2x4x128xf32>
    %72 = vector.extract_strided_slice %69 {offsets = [0, 1, 0, 0], sizes = [2, 1, 4, 128], strides = [1, 1, 1, 1]} : vector<2x2x4x128xf32> to vector<2x1x4x128xf32>
    %73 = vector.shape_cast %72 : vector<2x1x4x128xf32> to vector<2x4x128xf32>
    %74 = arith.maximumf %71, %73 : vector<2x4x128xf32>
    %75 = vector.shape_cast %74 : vector<2x4x128xf32> to vector<2x2x2x128xf32>
    %76 = vector.extract_strided_slice %75 {offsets = [0, 0, 0, 0], sizes = [2, 2, 1, 128], strides = [1, 1, 1, 1]} : vector<2x2x2x128xf32> to vector<2x2x1x128xf32>
    %77 = vector.shape_cast %76 : vector<2x2x1x128xf32> to vector<2x2x128xf32>
    %78 = vector.extract_strided_slice %75 {offsets = [0, 0, 1, 0], sizes = [2, 2, 1, 128], strides = [1, 1, 1, 1]} : vector<2x2x2x128xf32> to vector<2x2x1x128xf32>
    %79 = vector.shape_cast %78 : vector<2x2x1x128xf32> to vector<2x2x128xf32>
    %80 = arith.maximumf %77, %79 : vector<2x2x128xf32>
    %81 = vector.shape_cast %80 : vector<2x2x128xf32> to vector<2x256xf32>
    %82 = arith.truncf %81 : vector<2x256xf32> to vector<2x256xbf16>
    %c0_66 = arith.constant 0 : index
    %c0_67 = arith.constant 0 : index
    %c0_68 = arith.constant 0 : index
    %83 = vector.load %arg4[%c0_66, %c0_67, %c0_68] : memref<1x2x256xbf16, #tpu.memory_space<vmem>>, vector<1x2x256xbf16>
    %84 = vector.shape_cast %83 : vector<1x2x256xbf16> to vector<2x256xbf16>
    %85 = vector.shape_cast %82 : vector<2x256xbf16> to vector<1x2x256xbf16>
    tpu.vector_store %arg4[%c0_66, %c0_67, %c0_68], %85 {strides = array<i32>} : memref<1x2x256xbf16, #tpu.memory_space<vmem>>, vector<1x2x256xbf16>,
    return
  }
  func.func @transform_0(%arg0: i32) -> (i32, i32, i32, i32) {
    %c0_i32 = arith.constant 0 : i32
    %c0_i32_0 = arith.constant 0 : i32
    %c0_i32_1 = arith.constant 0 : i32
    %c0_i32_2 = arith.constant 0 : i32
    return %arg0, %c0_i32, %c0_i32_0, %c0_i32_1 : i32, i32, i32, i32
  }
  func.func @transform_1(%arg0: i32) -> (i32, i32, i32) {
    %c0_i32 = arith.constant 0 : i32
    %c0_i32_0 = arith.constant 0 : i32
    %c0_i32_1 = arith.constant 0 : i32
    %c0_i32_2 = arith.constant 0 : i32
    return %c0_i32, %c0_i32_0, %c0_i32_1 : i32, i32, i32
  }
  func.func @transform_2(%arg0: i32) -> (i32, i32) {
    %c0_i32 = arith.constant 0 : i32
    %c0_i32_0 = arith.constant 0 : i32
    %c0_i32_1 = arith.constant 0 : i32
    return %c0_i32, %c0_i32_0 : i32, i32
  }
  func.func @transform_3(%arg0: i32) -> (i32, i32, i32) {
    %c0_i32 = arith.constant 0 : i32
    %c0_i32_0 = arith.constant 0 : i32
    %c0_i32_1 = arith.constant 0 : i32
    return %arg0, %c0_i32, %c0_i32_0 : i32, i32, i32
  }
}

module attributes {stable_mosaic.version = 11 : i64} {
  func.func @_matmul_bias_act_kernel(%arg0: i32, %arg1: i32, %arg2: i32, %arg3: memref<8x512xbf16, #tpu.memory_space<vmem>>, %arg4: memref<512x128xbf16, #tpu.memory_space<vmem>>, %arg5: memref<1x128xf32, #tpu.memory_space<vmem>>, %arg6: memref<8x128xbf16, #tpu.memory_space<vmem>>, %arg7: memref<8x128xf32, #tpu.memory_space<vmem>>) attributes {dimension_semantics = [#tpu.dimension_semantics<parallel>, #tpu.dimension_semantics<parallel>, #tpu.dimension_semantics<arbitrary>], iteration_bounds = array<i64: 1, 2, 1>, scalar_prefetch = 0 : i64, scratch_operands = 1 : i64, tpu.core_type = #tpu.core_type<tc>, window_params = [{transform_indices = @transform_0, window_bounds = array<i64: 8, 512>}, {transform_indices = @transform_1, window_bounds = array<i64: 512, 128>}, {transform_indices = @transform_2, window_bounds = array<i64: 1, 128>}, {transform_indices = @transform_3, window_bounds = array<i64: 8, 128>}]} {
    %c0_i32 = arith.constant 0 : i32
    %0 = arith.cmpi eq, %arg2, %c0_i32 : i32
    %1 = arith.extui %0 : i1 to i32
    %c0_i32_0 = arith.constant 0 : i32
    %2 = arith.cmpi ne, %1, %c0_i32_0 : i32
    scf.if %2 {
      %cst_10 = arith.constant 0.000000e+00 : f32
      %12 = vector.broadcast %cst_10 : f32 to vector<8x128xf32>
      %c0_11 = arith.constant 0 : index
      %c0_12 = arith.constant 0 : index
      %13 = vector.load %arg7[%c0_11, %c0_12] : memref<8x128xf32, #tpu.memory_space<vmem>>, vector<8x128xf32>
      tpu.vector_store %arg7[%c0_11, %c0_12], %12 {strides = array<i32>} : memref<8x128xf32, #tpu.memory_space<vmem>>, vector<8x128xf32>,
    } else {
    }
    %c0 = arith.constant 0 : index
    %c0_1 = arith.constant 0 : index
    %3 = vector.load %arg7[%c0, %c0_1] : memref<8x128xf32, #tpu.memory_space<vmem>>, vector<8x128xf32>
    %c0_2 = arith.constant 0 : index
    %c0_3 = arith.constant 0 : index
    %4 = vector.load %arg3[%c0_2, %c0_3] : memref<8x512xbf16, #tpu.memory_space<vmem>>, vector<8x512xbf16>
    %c0_4 = arith.constant 0 : index
    %c0_5 = arith.constant 0 : index
    %5 = vector.load %arg4[%c0_4, %c0_5] : memref<512x128xbf16, #tpu.memory_space<vmem>>, vector<512x128xbf16>
    %cst = arith.constant dense<0.000000e+00> : vector<8x128xf32>
    %6 = tpu.matmul %4, %5, %cst {dimension_numbers = #tpu.dot_dimension_numbers<[1], [0], [0], [1], [0, 0, 1, 1], [], []>} : vector<8x512xbf16>, vector<512x128xbf16>, vector<8x128xf32> -> vector<8x128xf32>
    %7 = arith.addf %3, %6 : vector<8x128xf32>
    %c0_6 = arith.constant 0 : index
    %c0_7 = arith.constant 0 : index
    %8 = vector.load %arg7[%c0_6, %c0_7] : memref<8x128xf32, #tpu.memory_space<vmem>>, vector<8x128xf32>
    tpu.vector_store %arg7[%c0_6, %c0_7], %7 {strides = array<i32>} : memref<8x128xf32, #tpu.memory_space<vmem>>, vector<8x128xf32>,
    %c0_i32_8 = arith.constant 0 : i32
    %9 = arith.cmpi eq, %arg2, %c0_i32_8 : i32
    %10 = arith.extui %9 : i1 to i32
    %c0_i32_9 = arith.constant 0 : i32
    %11 = arith.cmpi ne, %10, %c0_i32_9 : i32
    scf.if %11 {
      %c0_10 = arith.constant 0 : index
      %c0_11 = arith.constant 0 : index
      %12 = vector.load %arg7[%c0_10, %c0_11] : memref<8x128xf32, #tpu.memory_space<vmem>>, vector<8x128xf32>
      %c0_12 = arith.constant 0 : index
      %c0_13 = arith.constant 0 : index
      %13 = vector.load %arg5[%c0_12, %c0_13] : memref<1x128xf32, #tpu.memory_space<vmem>>, vector<1x128xf32>
      %14 = vector.broadcast %13 : vector<1x128xf32> to vector<8x128xf32>
      %15 = arith.addf %12, %14 : vector<8x128xf32>
      %cst_14 = arith.constant 0.000000e+00 : f32
      %16 = vector.broadcast %cst_14 : f32 to vector<8x128xf32>
      %17 = arith.maximumf %15, %16 : vector<8x128xf32>
      %18 = arith.truncf %17 : vector<8x128xf32> to vector<8x128xbf16>
      %c0_15 = arith.constant 0 : index
      %c0_16 = arith.constant 0 : index
      %19 = vector.load %arg6[%c0_15, %c0_16] : memref<8x128xbf16, #tpu.memory_space<vmem>>, vector<8x128xbf16>
      tpu.vector_store %arg6[%c0_15, %c0_16], %18 {strides = array<i32>} : memref<8x128xbf16, #tpu.memory_space<vmem>>, vector<8x128xbf16>,
    } else {
    }
    return
  }
  func.func @transform_0(%arg0: i32, %arg1: i32, %arg2: i32) -> (i32, i32) {
    %c0_i32 = arith.constant 0 : i32
    return %arg0, %arg2 : i32, i32
  }
  func.func @transform_1(%arg0: i32, %arg1: i32, %arg2: i32) -> (i32, i32) {
    %c0_i32 = arith.constant 0 : i32
    return %arg2, %arg1 : i32, i32
  }
  func.func @transform_2(%arg0: i32, %arg1: i32, %arg2: i32) -> (i32, i32) {
    %c0_i32 = arith.constant 0 : i32
    %c0_i32_0 = arith.constant 0 : i32
    return %c0_i32, %arg1 : i32, i32
  }
  func.func @transform_3(%arg0: i32, %arg1: i32, %arg2: i32) -> (i32, i32) {
    %c0_i32 = arith.constant 0 : i32
    return %arg0, %arg1 : i32, i32
  }
}

module attributes {stable_mosaic.version = 11 : i64} {
  func.func @_matmul_bias_act_kernel(%arg0: i32, %arg1: i32, %arg2: i32, %arg3: memref<8x256xbf16, #tpu.memory_space<vmem>>, %arg4: memref<256x128xbf16, #tpu.memory_space<vmem>>, %arg5: memref<1x128xf32, #tpu.memory_space<vmem>>, %arg6: memref<8x128xf32, #tpu.memory_space<vmem>>, %arg7: memref<8x128xf32, #tpu.memory_space<vmem>>) attributes {dimension_semantics = [#tpu.dimension_semantics<parallel>, #tpu.dimension_semantics<parallel>, #tpu.dimension_semantics<arbitrary>], iteration_bounds = array<i64: 1, 1, 1>, scalar_prefetch = 0 : i64, scratch_operands = 1 : i64, tpu.core_type = #tpu.core_type<tc>, window_params = [{transform_indices = @transform_0, window_bounds = array<i64: 8, 256>}, {transform_indices = @transform_1, window_bounds = array<i64: 256, 128>}, {transform_indices = @transform_2, window_bounds = array<i64: 1, 128>}, {transform_indices = @transform_3, window_bounds = array<i64: 8, 128>}]} {
    %c0_i32 = arith.constant 0 : i32
    %0 = arith.cmpi eq, %arg2, %c0_i32 : i32
    %1 = arith.extui %0 : i1 to i32
    %c0_i32_0 = arith.constant 0 : i32
    %2 = arith.cmpi ne, %1, %c0_i32_0 : i32
    scf.if %2 {
      %cst_10 = arith.constant 0.000000e+00 : f32
      %12 = vector.broadcast %cst_10 : f32 to vector<8x128xf32>
      %c0_11 = arith.constant 0 : index
      %c0_12 = arith.constant 0 : index
      %13 = vector.load %arg7[%c0_11, %c0_12] : memref<8x128xf32, #tpu.memory_space<vmem>>, vector<8x128xf32>
      tpu.vector_store %arg7[%c0_11, %c0_12], %12 {strides = array<i32>} : memref<8x128xf32, #tpu.memory_space<vmem>>, vector<8x128xf32>,
    } else {
    }
    %c0 = arith.constant 0 : index
    %c0_1 = arith.constant 0 : index
    %3 = vector.load %arg7[%c0, %c0_1] : memref<8x128xf32, #tpu.memory_space<vmem>>, vector<8x128xf32>
    %c0_2 = arith.constant 0 : index
    %c0_3 = arith.constant 0 : index
    %4 = vector.load %arg3[%c0_2, %c0_3] : memref<8x256xbf16, #tpu.memory_space<vmem>>, vector<8x256xbf16>
    %c0_4 = arith.constant 0 : index
    %c0_5 = arith.constant 0 : index
    %5 = vector.load %arg4[%c0_4, %c0_5] : memref<256x128xbf16, #tpu.memory_space<vmem>>, vector<256x128xbf16>
    %cst = arith.constant dense<0.000000e+00> : vector<8x128xf32>
    %6 = tpu.matmul %4, %5, %cst {dimension_numbers = #tpu.dot_dimension_numbers<[1], [0], [0], [1], [0, 0, 1, 1], [], []>} : vector<8x256xbf16>, vector<256x128xbf16>, vector<8x128xf32> -> vector<8x128xf32>
    %7 = arith.addf %3, %6 : vector<8x128xf32>
    %c0_6 = arith.constant 0 : index
    %c0_7 = arith.constant 0 : index
    %8 = vector.load %arg7[%c0_6, %c0_7] : memref<8x128xf32, #tpu.memory_space<vmem>>, vector<8x128xf32>
    tpu.vector_store %arg7[%c0_6, %c0_7], %7 {strides = array<i32>} : memref<8x128xf32, #tpu.memory_space<vmem>>, vector<8x128xf32>,
    %c0_i32_8 = arith.constant 0 : i32
    %9 = arith.cmpi eq, %arg2, %c0_i32_8 : i32
    %10 = arith.extui %9 : i1 to i32
    %c0_i32_9 = arith.constant 0 : i32
    %11 = arith.cmpi ne, %10, %c0_i32_9 : i32
    scf.if %11 {
      %c0_10 = arith.constant 0 : index
      %c0_11 = arith.constant 0 : index
      %12 = vector.load %arg7[%c0_10, %c0_11] : memref<8x128xf32, #tpu.memory_space<vmem>>, vector<8x128xf32>
      %c0_12 = arith.constant 0 : index
      %c0_13 = arith.constant 0 : index
      %13 = vector.load %arg5[%c0_12, %c0_13] : memref<1x128xf32, #tpu.memory_space<vmem>>, vector<1x128xf32>
      %14 = vector.broadcast %13 : vector<1x128xf32> to vector<8x128xf32>
      %15 = arith.addf %12, %14 : vector<8x128xf32>
      %c0_14 = arith.constant 0 : index
      %c0_15 = arith.constant 0 : index
      %16 = vector.load %arg6[%c0_14, %c0_15] : memref<8x128xf32, #tpu.memory_space<vmem>>, vector<8x128xf32>
      tpu.vector_store %arg6[%c0_14, %c0_15], %15 {strides = array<i32>} : memref<8x128xf32, #tpu.memory_space<vmem>>, vector<8x128xf32>,
    } else {
    }
    return
  }
  func.func @transform_0(%arg0: i32, %arg1: i32, %arg2: i32) -> (i32, i32) {
    %c0_i32 = arith.constant 0 : i32
    return %arg0, %arg2 : i32, i32
  }
  func.func @transform_1(%arg0: i32, %arg1: i32, %arg2: i32) -> (i32, i32) {
    %c0_i32 = arith.constant 0 : i32
    return %arg2, %arg1 : i32, i32
  }
  func.func @transform_2(%arg0: i32, %arg1: i32, %arg2: i32) -> (i32, i32) {
    %c0_i32 = arith.constant 0 : i32
    %c0_i32_0 = arith.constant 0 : i32
    return %c0_i32, %arg1 : i32, i32
  }
  func.func @transform_3(%arg0: i32, %arg1: i32, %arg2: i32) -> (i32, i32) {
    %c0_i32 = arith.constant 0 : i32
    return %arg0, %arg1 : i32, i32
  }
}

</mosaic_0001>

<bundles_post_ra>
// kernel: cnn_forward.8
= control target key start
LH: loop header
LB: loop body
LE: loop exit
PB: predicated region body
PF: predicated region fallthrough
CT: control target
= control target key end

     0   :  { %s1271_s12 = smov 0   ;;  %s1273_s13 = smov 0   ;;  %s1524_s0 = inlined_call_operand.vmem [shape: bf16[8,512], index: 0, kind: input, shape index: {}]   ;;  %s1525_s1 = inlined_call_operand.vmem [shape: bf16[512,256], index: 1, kind: input, shape index: {}]   ;;  %s1526_s2 = inlined_call_operand.vmem [shape: f32[1,256], index: 2, kind: input, shape index: {}]   ;;  %s1527_s3 = inlined_call_operand.vmem [shape: bf16[8,256], index: 3, kind: output, shape index: {}]  }
   0x1   :  { %s1275_s14 = smov 0   ;;  %s1277_s15 = smov 0  }
   0x2   :  { %s1279_s16 = smov 0  }
   0x3 LB: > { %s28_s17 = sadd.s32 1, %s1245_s15  ;;  %p76_p1 = scmp.ne.s32.totalorder %s1237_s13, %s1233_s12  ;;  %s1249_s16 = sphi %s1279_s16, %s13_s16   ;;  %s1245_s15 = sphi %s1277_s15, %s1531_s15   ;;  %s1241_s14 = sphi %s1275_s14, %s1530_s14   ;;  %s1237_s13 = sphi %s1273_s13, %s1529_s13   ;;  %s1233_s12 = sphi %s1271_s12, %s1528_s12  }
   0x4   : > { %p30_p0 = scmp.ge.s32.totalorder %s28_s17, 2  ;;  %p77_p2 = scmp.eq.s32.totalorder %s1249_s16, 0 }
   0x5   : > { %s69_s19 = sadd.s32 1, %s1237_s13  ;;  %p1046_p5 = scmp.ge.s32.totalorder %s1249_s16, 2 }
   0x6   : > { %s1533_s17 = smov (%p30_p0, %s28_s17), 0  ;;  %p78_p3 = por %p77_p2, %p76_p1 }
   0x7   : > { %s65_s18 = ssub.s32 %s1245_s15, %s1533_s17  ;;  %169 = sbr.rel (%p1046_p5) target bundleno = 60 (0x3c), region = 20 }
   0x8   : > { %p67_p4 = scmp.eq.s32.totalorder %s65_s18, 0 }
   0xa   : > { %s1306_s20 = scalar_select %p67_p4, %s1237_s13, %s69_s19  }
   0xe   : > { %172 = sbr.rel (!%p78_p3) target bundleno = 60 (0x3c), region = 24  ;;  %s174_s21 = sand.u32 (%p78_p3), 1, %s1237_s13  }
   0xf   : > { %s1048_s22 = sshll.u32 (%p78_p3), %s1245_s15, 2  ;;  %s1047_s23 = sshll.u32 (%p78_p3), %s174_s21, 8 }
  0x10   : > { %s1314_s26 = scalar_lea.vmem (%p78_p3), %s1525_s1, %s1048_s22  ;;  %s1318_s27 = scalar_lea.vmem (%p78_p3), [#allocation3], %s1047_s23 }
  0x11   : > { %v197_v0 = vld [vmem:[%s1314_s26] sm:$0xf] (%p78_p3)  ;;  %v199_v1 = vld [vmem:[%s1314_s26 + $0x8] sm:$0xf] (%p78_p3)  ;;  %v201_v2 = vld [vmem:[%s1314_s26 + $0x10] sm:$0xf] (%p78_p3) }
  0x12   : > { %198 = vst [vmem:[%s1318_s27] sm:$0xf] (%p78_p3), %v197_v0  ;;  %200 = vst [vmem:[%s1318_s27 + $0x4] sm:$0xf] (%p78_p3), %v199_v1  ;;  %v203_v3 = vld [vmem:[%s1314_s26 + $0x18] sm:$0xf] (%p78_p3) }
  0x13   : > { %v205_v4 = vld [vmem:[%s1314_s26 + $0x20] sm:$0xf] (%p78_p3)  ;;  %202 = vst [vmem:[%s1318_s27 + $0x8] sm:$0xf] (%p78_p3), %v201_v2  ;;  %204 = vst [vmem:[%s1318_s27 + $0xc] sm:$0xf] (%p78_p3), %v203_v3 }
  0x14   : > { %206 = vst [vmem:[%s1318_s27 + $0x10] sm:$0xf] (%p78_p3), %v205_v4  ;;  %v207_v5 = vld [vmem:[%s1314_s26 + $0x28] sm:$0xf] (%p78_p3)  ;;  %v209_v6 = vld [vmem:[%s1314_s26 + $0x30] sm:$0xf] (%p78_p3) }
  0x15   : > { %v211_v7 = vld [vmem:[%s1314_s26 + $0x38] sm:$0xf]  ;;  %208 = vst [vmem:[%s1318_s27 + $0x14] sm:$0xf] %v207_v5  ;;  %210 = vst [vmem:[%s1318_s27 + $0x18] sm:$0xf] %v209_v6 }
  0x16   : > { %212 = vst [vmem:[%s1318_s27 + $0x1c] sm:$0xf] %v211_v7  ;;  %v213_v8 = vld [vmem:[%s1314_s26 + $0x40] sm:$0xf]  ;;  %v215_v9 = vld [vmem:[%s1314_s26 + $0x48] sm:$0xf] }
  0x17   : > { %v217_v10 = vld [vmem:[%s1314_s26 + $0x50] sm:$0xf]  ;;  %214 = vst [vmem:[%s1318_s27 + $0x20] sm:$0xf] %v213_v8  ;;  %216 = vst [vmem:[%s1318_s27 + $0x24] sm:$0xf] %v215_v9 }
  0x18   : > { %218 = vst [vmem:[%s1318_s27 + $0x28] sm:$0xf] %v217_v10  ;;  %v219_v11 = vld [vmem:[%s1314_s26 + $0x58] sm:$0xf]  ;;  %v221_v12 = vld [vmem:[%s1314_s26 + $0x60] sm:$0xf] }
  0x19   : > { %v223_v13 = vld [vmem:[%s1314_s26 + $0x68] sm:$0xf]  ;;  %220 = vst [vmem:[%s1318_s27 + $0x2c] sm:$0xf] %v219_v11  ;;  %222 = vst [vmem:[%s1318_s27 + $0x30] sm:$0xf] %v221_v12 }
  0x1a   : > { %224 = vst [vmem:[%s1318_s27 + $0x34] sm:$0xf] %v223_v13  ;;  %v225_v14 = vld [vmem:[%s1314_s26 + $0x70] sm:$0xf]  ;;  %v227_v15 = vld [vmem:[%s1314_s26 + $0x78] sm:$0xf] }
  0x1b   : > { %v229_v16 = vld [vmem:[%s1314_s26 + $0x80] sm:$0xf]  ;;  %226 = vst [vmem:[%s1318_s27 + $0x38] sm:$0xf] %v225_v14  ;;  %228 = vst [vmem:[%s1318_s27 + $0x3c] sm:$0xf] %v227_v15 }
  0x1c   : > { %230 = vst [vmem:[%s1318_s27 + $0x40] sm:$0xf] %v229_v16  ;;  %v231_v17 = vld [vmem:[%s1314_s26 + $0x88] sm:$0xf]  ;;  %v233_v18 = vld [vmem:[%s1314_s26 + $0x90] sm:$0xf] }
  0x1d   : > { %v235_v19 = vld [vmem:[%s1314_s26 + $0x98] sm:$0xf]  ;;  %232 = vst [vmem:[%s1318_s27 + $0x44] sm:$0xf] %v231_v17  ;;  %234 = vst [vmem:[%s1318_s27 + $0x48] sm:$0xf] %v233_v18 }
  0x1e   : > { %236 = vst [vmem:[%s1318_s27 + $0x4c] sm:$0xf] %v235_v19  ;;  %v237_v20 = vld [vmem:[%s1314_s26 + $0xa0] sm:$0xf]  ;;  %v239_v21 = vld [vmem:[%s1314_s26 + $0xa8] sm:$0xf] }
  0x1f   : > { %v241_v22 = vld [vmem:[%s1314_s26 + $0xb0] sm:$0xf]  ;;  %238 = vst [vmem:[%s1318_s27 + $0x50] sm:$0xf] %v237_v20  ;;  %240 = vst [vmem:[%s1318_s27 + $0x54] sm:$0xf] %v239_v21 }
  0x20   : > { %242 = vst [vmem:[%s1318_s27 + $0x58] sm:$0xf] %v241_v22  ;;  %v243_v23 = vld [vmem:[%s1314_s26 + $0xb8] sm:$0xf]  ;;  %v245_v24 = vld [vmem:[%s1314_s26 + $0xc0] sm:$0xf] }
  0x21   : > { %v247_v25 = vld [vmem:[%s1314_s26 + $0xc8] sm:$0xf]  ;;  %244 = vst [vmem:[%s1318_s27 + $0x5c] sm:$0xf] %v243_v23  ;;  %246 = vst [vmem:[%s1318_s27 + $0x60] sm:$0xf] %v245_v24 }
  0x22   : > { %248 = vst [vmem:[%s1318_s27 + $0x64] sm:$0xf] %v247_v25  ;;  %v249_v26 = vld [vmem:[%s1314_s26 + $0xd0] sm:$0xf]  ;;  %v251_v27 = vld [vmem:[%s1314_s26 + $0xd8] sm:$0xf] }
  0x23   : > { %v253_v28 = vld [vmem:[%s1314_s26 + $0xe0] sm:$0xf]  ;;  %250 = vst [vmem:[%s1318_s27 + $0x68] sm:$0xf] %v249_v26  ;;  %252 = vst [vmem:[%s1318_s27 + $0x6c] sm:$0xf] %v251_v27 }
  0x24   : > { %254 = vst [vmem:[%s1318_s27 + $0x70] sm:$0xf] %v253_v28  ;;  %v255_v29 = vld [vmem:[%s1314_s26 + $0xe8] sm:$0xf]  ;;  %v257_v30 = vld [vmem:[%s1314_s26 + $0xf0] sm:$0xf] }
  0x25   : > { %v259_v31 = vld [vmem:[%s1314_s26 + $0xf8] sm:$0xf]  ;;  %256 = vst [vmem:[%s1318_s27 + $0x74] sm:$0xf] %v255_v29  ;;  %258 = vst [vmem:[%s1318_s27 + $0x78] sm:$0xf] %v257_v30 }
  0x26   : > { %260 = vst [vmem:[%s1318_s27 + $0x7c] sm:$0xf] %v259_v31  ;;  %v261_v32 = vld [vmem:[%s1314_s26 + $0x100] sm:$0xf]  ;;  %v263_v33 = vld [vmem:[%s1314_s26 + $0x108] sm:$0xf] }
  0x27   : > { %v265_v34 = vld [vmem:[%s1314_s26 + $0x110] sm:$0xf]  ;;  %262 = vst [vmem:[%s1318_s27 + $0x80] sm:$0xf] %v261_v32  ;;  %264 = vst [vmem:[%s1318_s27 + $0x84] sm:$0xf] %v263_v33 }
  0x28   : > { %266 = vst [vmem:[%s1318_s27 + $0x88] sm:$0xf] %v265_v34  ;;  %v267_v35 = vld [vmem:[%s1314_s26 + $0x118] sm:$0xf]  ;;  %v269_v36 = vld [vmem:[%s1314_s26 + $0x120] sm:$0xf] }
  0x29   : > { %v271_v37 = vld [vmem:[%s1314_s26 + $0x128] sm:$0xf]  ;;  %268 = vst [vmem:[%s1318_s27 + $0x8c] sm:$0xf] %v267_v35  ;;  %270 = vst [vmem:[%s1318_s27 + $0x90] sm:$0xf] %v269_v36 }
  0x2a   : > { %272 = vst [vmem:[%s1318_s27 + $0x94] sm:$0xf] %v271_v37  ;;  %v273_v38 = vld [vmem:[%s1314_s26 + $0x130] sm:$0xf]  ;;  %v275_v39 = vld [vmem:[%s1314_s26 + $0x138] sm:$0xf] }
  0x2b   : > { %v277_v40 = vld [vmem:[%s1314_s26 + $0x140] sm:$0xf]  ;;  %274 = vst [vmem:[%s1318_s27 + $0x98] sm:$0xf] %v273_v38  ;;  %276 = vst [vmem:[%s1318_s27 + $0x9c] sm:$0xf] %v275_v39 }
  0x2c   : > { %278 = vst [vmem:[%s1318_s27 + $0xa0] sm:$0xf] %v277_v40  ;;  %v279_v41 = vld [vmem:[%s1314_s26 + $0x148] sm:$0xf]  ;;  %v281_v42 = vld [vmem:[%s1314_s26 + $0x150] sm:$0xf] }
  0x2d   : > { %v283_v43 = vld [vmem:[%s1314_s26 + $0x158] sm:$0xf]  ;;  %280 = vst [vmem:[%s1318_s27 + $0xa4] sm:$0xf] %v279_v41  ;;  %282 = vst [vmem:[%s1318_s27 + $0xa8] sm:$0xf] %v281_v42 }
  0x2e   : > { %284 = vst [vmem:[%s1318_s27 + $0xac] sm:$0xf] %v283_v43  ;;  %v285_v44 = vld [vmem:[%s1314_s26 + $0x160] sm:$0xf]  ;;  %v287_v45 = vld [vmem:[%s1314_s26 + $0x168] sm:$0xf] }
  0x2f   : > { %v289_v46 = vld [vmem:[%s1314_s26 + $0x170] sm:$0xf]  ;;  %286 = vst [vmem:[%s1318_s27 + $0xb0] sm:$0xf] %v285_v44  ;;  %288 = vst [vmem:[%s1318_s27 + $0xb4] sm:$0xf] %v287_v45 }
  0x30   : > { %290 = vst [vmem:[%s1318_s27 + $0xb8] sm:$0xf] %v289_v46  ;;  %v291_v47 = vld [vmem:[%s1314_s26 + $0x178] sm:$0xf]  ;;  %v293_v48 = vld [vmem:[%s1314_s26 + $0x180] sm:$0xf] }
  0x31   : > { %v295_v49 = vld [vmem:[%s1314_s26 + $0x188] sm:$0xf]  ;;  %292 = vst [vmem:[%s1318_s27 + $0xbc] sm:$0xf] %v291_v47  ;;  %294 = vst [vmem:[%s1318_s27 + $0xc0] sm:$0xf] %v293_v48 }
  0x32   : > { %296 = vst [vmem:[%s1318_s27 + $0xc4] sm:$0xf] %v295_v49  ;;  %v297_v50 = vld [vmem:[%s1314_s26 + $0x190] sm:$0xf]  ;;  %v299_v51 = vld [vmem:[%s1314_s26 + $0x198] sm:$0xf] }
  0x33   : > { %v301_v52 = vld [vmem:[%s1314_s26 + $0x1a0] sm:$0xf]  ;;  %298 = vst [vmem:[%s1318_s27 + $0xc8] sm:$0xf] %v297_v50  ;;  %300 = vst [vmem:[%s1318_s27 + $0xcc] sm:$0xf] %v299_v51 }
  0x34   : > { %302 = vst [vmem:[%s1318_s27 + $0xd0] sm:$0xf] %v301_v52  ;;  %v303_v53 = vld [vmem:[%s1314_s26 + $0x1a8] sm:$0xf]  ;;  %v305_v54 = vld [vmem:[%s1314_s26 + $0x1b0] sm:$0xf] }
  0x35   : > { %v307_v55 = vld [vmem:[%s1314_s26 + $0x1b8] sm:$0xf]  ;;  %304 = vst [vmem:[%s1318_s27 + $0xd4] sm:$0xf] %v303_v53  ;;  %306 = vst [vmem:[%s1318_s27 + $0xd8] sm:$0xf] %v305_v54 }
  0x36   : > { %308 = vst [vmem:[%s1318_s27 + $0xdc] sm:$0xf] %v307_v55  ;;  %v309_v56 = vld [vmem:[%s1314_s26 + $0x1c0] sm:$0xf]  ;;  %v311_v57 = vld [vmem:[%s1314_s26 + $0x1c8] sm:$0xf] }
  0x37   : > { %v313_v58 = vld [vmem:[%s1314_s26 + $0x1d0] sm:$0xf]  ;;  %310 = vst [vmem:[%s1318_s27 + $0xe0] sm:$0xf] %v309_v56  ;;  %312 = vst [vmem:[%s1318_s27 + $0xe4] sm:$0xf] %v311_v57 }
  0x38   : > { %314 = vst [vmem:[%s1318_s27 + $0xe8] sm:$0xf] %v313_v58  ;;  %v315_v59 = vld [vmem:[%s1314_s26 + $0x1d8] sm:$0xf]  ;;  %v317_v60 = vld [vmem:[%s1314_s26 + $0x1e0] sm:$0xf] }
  0x39   : > { %v319_v61 = vld [vmem:[%s1314_s26 + $0x1e8] sm:$0xf]  ;;  %316 = vst [vmem:[%s1318_s27 + $0xec] sm:$0xf] %v315_v59  ;;  %318 = vst [vmem:[%s1318_s27 + $0xf0] sm:$0xf] %v317_v60 }
  0x3a   : > { %320 = vst [vmem:[%s1318_s27 + $0xf4] sm:$0xf] %v319_v61  ;;  %v321_v62 = vld [vmem:[%s1314_s26 + $0x1f0] sm:$0xf]  ;;  %v323_v63 = vld [vmem:[%s1314_s26 + $0x1f8] sm:$0xf] }
  0x3b   : > { %322 = vst [vmem:[%s1318_s27 + $0xf8] sm:$0xf] %v321_v62  ;;  %324 = vst [vmem:[%s1318_s27 + $0xfc] sm:$0xf] %v323_v63 }
  0x3c PF: > { %p1049_p6 = scmp.ge.s32.totalorder %s1249_s16, 1  ;;  %p480_p7 = scmp.lt.s32.totalorder %s1249_s16, 3 }
  0x3e   : > { %p481_p8 = pnand %p1049_p6, %p480_p7 }
  0x3f   : > { %s487_s28 = sand.u32 (!%p481_p8), 1, %s1233_s12   ;;  %v1452_v0 = vld [vmem:[%s1524_s0] sm:$0xff] (!%p481_p8)  ;;  %v1457_v1 = vld [vmem:[%s1524_s0 + $0x8] sm:$0xff] (!%p481_p8)  ;;  %p536_p9 = scmp.lt.s32.totalorder (!%p481_p8), %s1241_s14, 1 }
  0x40   : > { %484 = sbr.rel (%p481_p8) target bundleno = 325 (0x145), region = 69  ;;  %s1050_s6 = sshll.u32 (!%p481_p8), %s487_s28, 8  ;;  %v1053_v2 = vcombine.high (!%p481_p8), %v1452_v0, %v1452_v0  ;;  %v1055_v3 = vcombine.high (!%p481_p8), %v1457_v1, %v1457_v1  ;;  %v1052_v36 = vcombine.low (!%p481_p8), %v1452_v0, %v1452_v0  ;;  %v1054_v37 = vcombine.low (!%p481_p8), %v1457_v1, %v1457_v1 }
  0x41   : > { %s1463_s7 = scalar_lea.vmem (!%p481_p8), [#allocation3], %s1050_s6 }
  0x42   : > { %v1175_v4 = vld [vmem:[%s1463_s7 + $0x40] sm:$0xff] (!%p481_p8)   ;;  %858 = vmatprep.mubr.bf16.mxu0 (!%p481_p8), %v1053_v2  ;;  %898 = vmatprep.mubr.bf16.mxu1 (!%p481_p8), %v1055_v3  ;;  %v1179_v8 = vld [vmem:[%s1463_s7 + $0x48] sm:$0xff] (!%p481_p8)   ;;  %v1183_v12 = vld [vmem:[%s1463_s7 + $0x50] sm:$0xff] (!%p481_p8)  }
  0x43   : > { %v1176_v5 = vld [vmem:[%s1463_s7 + $0xc0] sm:$0xff] (!%p481_p8)   ;;  %1091 = vmatprep.subr.bf16.mxu0 (!%p481_p8), %v1175_v4  ;;  %v1180_v9 = vld [vmem:[%s1463_s7 + $0xc8] sm:$0xff] (!%p481_p8)   ;;  %v1184_v13 = vld [vmem:[%s1463_s7 + $0xd0] sm:$0xff] (!%p481_p8)  }
  0x44   : > { %v1177_v6 = vld [vmem:[%s1463_s7] sm:$0xff] (!%p481_p8)   ;;  %1113 = vmatprep.subr.bf16.mxu1 (!%p481_p8), %v1176_v5  ;;  %v1181_v10 = vld [vmem:[%s1463_s7 + $0x8] sm:$0xff] (!%p481_p8)   ;;  %v1185_v14 = vld [vmem:[%s1463_s7 + $0x10] sm:$0xff] (!%p481_p8)  }
  0x45   : > { %v1178_v7 = vld [vmem:[%s1463_s7 + $0x80] sm:$0xff] (!%p481_p8)   ;;  %1092 = vmatpush3.bf16.msra.mxu0 (!%p481_p8), %v1177_v6  ;;  %v1182_v11 = vld [vmem:[%s1463_s7 + $0x88] sm:$0xff] (!%p481_p8)   ;;  %v1186_v15 = vld [vmem:[%s1463_s7 + $0x90] sm:$0xff] (!%p481_p8)  }
  0x46   : > { %1114 = vmatpush3.bf16.msra.mxu1 (!%p481_p8), %v1178_v7  ;;  %1093 = vmatprep.subr.bf16.mxu0 (!%p481_p8), %v1179_v8  ;;  %v1187_v16 = vld [vmem:[%s1463_s7 + $0x58] sm:$0xff] (!%p481_p8)   ;;  %v1191_v20 = vld [vmem:[%s1463_s7 + $0x60] sm:$0xff] (!%p481_p8)   ;;  %v1195_v24 = vld [vmem:[%s1463_s7 + $0x68] sm:$0xff] (!%p481_p8)  }
  0x47   : > { %1115 = vmatprep.subr.bf16.mxu1 %v1180_v9  ;;  %v1188_v17 = vld [vmem:[%s1463_s7 + $0xd8] sm:$0xff]   ;;  %v1192_v21 = vld [vmem:[%s1463_s7 + $0xe0] sm:$0xff]   ;;  %v1196_v25 = vld [vmem:[%s1463_s7 + $0xe8] sm:$0xff]   ;;  %s1535_s14 = smov (!%p536_p9, %s1241_s14), 1 }
  0x48   : > { %v1189_v18 = vld [vmem:[%s1463_s7 + $0x18] sm:$0xff]   ;;  %v1193_v22 = vld [vmem:[%s1463_s7 + $0x20] sm:$0xff]   ;;  %v1197_v26 = vld [vmem:[%s1463_s7 + $0x28] sm:$0xff]   ;;  %s538_s10 = scalar_lea.vmem %s1526_s2, %s1535_s14  ;;  %s1051_s11 = sshll.u32 %s1535_s14, 2 }
  0x49   : > { %1094 = vmatpush3.bf16.msra.mxu0 %v1181_v10  ;;  %v1190_v19 = vld [vmem:[%s1463_s7 + $0x98] sm:$0xff]   ;;  %v1194_v23 = vld [vmem:[%s1463_s7 + $0xa0] sm:$0xff]   ;;  %v1198_v27 = vld [vmem:[%s1463_s7 + $0xa8] sm:$0xff]   ;;  %s546_s19 = scalar_lea.vmem %s1527_s3, %s1051_s11 }
  0x4a   : > { %1116 = vmatpush3.bf16.msra.mxu1 %v1182_v11  ;;  %1095 = vmatprep.subr.bf16.mxu0 %v1183_v12  ;;  %v1199_v28 = vld [vmem:[%s1463_s7 + $0x70] sm:$0xff]   ;;  %v1203_v32 = vld [vmem:[%s1463_s7 + $0x78] sm:$0xff]   ;;  %v1088_v47 = vld [vmem:[%s538_s10] ss:$0 sm:$0xff] }
  0x4b   : > { %1117 = vmatprep.subr.bf16.mxu1 %v1184_v13  ;;  %v1200_v29 = vld [vmem:[%s1463_s7 + $0xf0] sm:$0xff]   ;;  %v1204_v33 = vld [vmem:[%s1463_s7 + $0xf8] sm:$0xff]  }
  0x4c   : > { %v1201_v30 = vld [vmem:[%s1463_s7 + $0x30] sm:$0xff]   ;;  %v1205_v34 = vld [vmem:[%s1463_s7 + $0x38] sm:$0xff]  }
  0x4d   : > { %1096 = vmatpush3.bf16.msra.mxu0 %v1185_v14  ;;  %v1202_v31 = vld [vmem:[%s1463_s7 + $0xb0] sm:$0xff]   ;;  %v1206_v35 = vld [vmem:[%s1463_s7 + $0xb8] sm:$0xff]  }
  0x4e   : > { %1118 = vmatpush3.bf16.msra.mxu1 %v1186_v15  ;;  %1097 = vmatprep.subr.bf16.mxu0 %v1187_v16 }
  0x4f   : > { %1119 = vmatprep.subr.bf16.mxu1 %v1188_v17 }
  0x51   : > { %1098 = vmatpush3.bf16.msra.mxu0 %v1189_v18 }
  0x52   : > { %1120 = vmatpush3.bf16.msra.mxu1 %v1190_v19  ;;  %1099 = vmatprep.subr.bf16.mxu0 %v1191_v20 }
  0x53   : > { %1121 = vmatprep.subr.bf16.mxu1 %v1192_v21 }
  0x55   : > { %1100 = vmatpush3.bf16.msra.mxu0 %v1193_v22 }
  0x56   : > { %1122 = vmatpush3.bf16.msra.mxu1 %v1194_v23  ;;  %1101 = vmatprep.subr.bf16.mxu0 %v1195_v24 }
  0x57   : > { %1123 = vmatprep.subr.bf16.mxu1 %v1196_v25 }
  0x59   : > { %1102 = vmatpush3.bf16.msra.mxu0 %v1197_v26 }
  0x5a   : > { %1124 = vmatpush3.bf16.msra.mxu1 %v1198_v27  ;;  %1103 = vmatprep.subr.bf16.mxu0 %v1199_v28 }
  0x5b   : > { %1125 = vmatprep.subr.bf16.mxu1 %v1200_v29 }
  0x5d   : > { %1104 = vmatpush3.bf16.msra.mxu0 %v1201_v30 }
  0x5e   : > { %1126 = vmatpush3.bf16.msra.mxu1 %v1202_v31  ;;  %1105 = vmatprep.subr.bf16.mxu0 %v1203_v32 }
  0x5f   : > { %1127 = vmatprep.subr.bf16.mxu1 %v1204_v33 }
  0x61   : > { %1106 = vmatpush3.bf16.msra.mxu0 %v1205_v34 }
  0x62   : > { %1128 = vmatpush3.bf16.msra.mxu1 %v1206_v35 }
  0x64   : > { %859 = vmatmul.mubr.bf16.vlgmr.msra.gmra.mrb[0].mxu0 %v1052_v36 }
  0x65   : > { %899 = vmatmul.mubr.bf16.vlgmr.msra.gmra.mrb[0].mxu1 %v1054_v37 }
 0x137   : > { %v1107_v38 = vpop.f32.mrb[0].mxu0 }
 0x138   : > { %v1129_v39 = vpop.f32.mrb[0].mxu1  ;;  %v1108_v40 = vpop.f32.mrb[1].mxu0 }
 0x139   : > { %v1109_v41 = vadd.f32 %v1108_v40, %v1107_v38  ;;  %v1130_v42 = vpop.f32.mrb[1].mxu1  ;;  %v1110_v43 = vpop.f32.mrb[2].mxu0 }
 0x13a   : > { %v1131_v44 = vadd.f32 %v1130_v42, %v1129_v39  ;;  %v1132_v45 = vpop.f32.mrb[2].mxu1  ;;  %v1111_v46 = vpop.f32.mrb[3].mxu0 }
 0x13b   : > { %v1133_v48 = vpop.f32.mrb[3].mxu1 }
 0x13c   : > { %v901_v49 = vadd.f32 %v1131_v44, %v1109_v41 }
 0x13e   : > { %v919_v50 = vadd.f32 %v1088_v47, %v901_v49 }
 0x140   : > { %v920_v51 = vmax.f32 %v919_v50, 0.0 }
 0x142   : > { %v921_v52 = vpack.c.bf16 %v920_v51, %v920_v51 }
 0x144   : > { %922 = vst [vmem:[%s546_s19] sm:$0xf] %v921_v52 }
 0x145 PF: > { %s13_s16 = sadd.s32 1, %s1249_s16   ;;  %s1528_s12 = smov %s1237_s13 }
 0x146   : > { %p10_p10 = scmp.ge.s32.totalorder %s13_s16, 4   ;;  %s1529_s13 = smov %s1306_s20 }
 0x147   : > { %s1530_s14 = smov %s1245_s15  ;;  %s1531_s15 = smov %s1533_s17 }
 0x148   :  { %12 = sbr.rel (!%p10_p10) target bundleno = 3 (0x3), region = 122 }

// kernel: cnn_forward.7
= control target key start
LH: loop header
LB: loop body
LE: loop exit
PB: predicated region body
PF: predicated region fallthrough
CT: control target
= control target key end

     0   :  { %s1859_s12 = smov 0   ;;  %s2086_s0 = inlined_call_operand.vmem [shape: bf16[2,6,6,32], index: 0, kind: input, shape index: {}]   ;;  %s2087_s1 = inlined_call_operand.vmem [shape: bf16[9,32,128], index: 1, kind: input, shape index: {}]   ;;  %s2088_s2 = inlined_call_operand.vmem [shape: f32[1,128], index: 2, kind: input, shape index: {}]   ;;  %s2089_s3 = inlined_call_operand.vmem [shape: bf16[2,2,256], index: 3, kind: output, shape index: {}]  }
   0x1 LB: > { %s1548_s13 = sadd.s32 4294967295, %s1832_s12   ;;  %p1552_p0 = scmp.ge.s32.totalorder %s1832_s12, 1  ;;  %s1832_s12 = sphi %s1859_s12, %s13_s12  }
   0x2   : > { %p137_p1 = scmp.lt.s32.totalorder %s1832_s12, 3 }
   0x4   : > { %p138_p2 = pnand %p1552_p0, %p137_p1 }
   0x5   : > { %v1796_v0 = vld [vmem:[%s2087_s1 + $0x10] sm:$0xff] (!%p138_p2)   ;;  %v1834_v1 = vmov (!%p138_p2), 0.0   ;;  %v1797_v2 = vld [vmem:[%s2087_s1] sm:$0xff] (!%p138_p2)   ;;  %v1798_v3 = vld [vmem:[%s2087_s1 + $0x18] sm:$0xff] (!%p138_p2)   ;;  %vm1835_vm0 = vmmov (!%p138_p2), 0   ;;  %p160_p3 = scmp.lt.s32.totalorder (!%p138_p2), %s1548_s13, 1  ;;  %v292_v5 = vlaneseq (!%p138_p2) }
   0x6   : > { %141 = sbr.rel (%p138_p2) target bundleno = 322 (0x142), region = 32  ;;  %1710 = vmatprep.subr.bf16.mxu0 (!%p138_p2), %v1834_v1  ;;  %1718 = vmatprep.subr.bf16.mxu1 (!%p138_p2), %v1834_v1  ;;  %v1799_v4 = vld [vmem:[%s2087_s1 + $0x8] sm:$0xff] (!%p138_p2)   ;;  %vm219_vm1 = vsmask.f32 (!%p138_p2), 1280  ;;  %vm220_vm2 = vsmask.f32 (!%p138_p2), 3336 }
   0x7   : > { %1711 = vmatpush3.bf16.msra.mxu0 (!%p138_p2), %v1796_v0  ;;  %1714 = vmatprep.mubr.msk.bf16.mxu0 (!%p138_p2), %vm1835_vm0, %v1834_v1  ;;  %vm222_vm3 = vsmask.f32 (!%p138_p2), 5392  ;;  %v1836_v6 = vmov (!%p138_p2), 1983009808   ;;  %vm224_vm4 = vsmask.f32 (!%p138_p2), 7448  ;;  %vm221_vm8 = vmor (!%p138_p2), %vm219_vm1, %vm220_vm2 }
   0x8   : > { %1719 = vmatpush3.bf16.msra.mxu1 (!%p138_p2), %v1797_v2  ;;  %1712 = vmatprep.subr.bf16.mxu0 (!%p138_p2), %v1834_v1  ;;  %v290_v7 = vunpack.c.l.s4 (!%p138_p2), %v1836_v6  ;;  %v1891_v8 = vshrl.u32 (!%p138_p2), %v292_v5, 7  ;;  %vm478_vm5 = vcmask (!%p138_p2), 1040384   ;;  %vm479_vm6 = vcmask (!%p138_p2), 1042434   ;;  %vm223_vm9 = vmor (!%p138_p2), %vm221_vm8, %vm222_vm3  ;;  %v1803_v49 = vld [vmem:[%s2087_s1 + $0x30] sm:$0xff] (!%p138_p2)  }
   0x9   : > { %1720 = vmatprep.subr.bf16.mxu1 (!%p138_p2), %v1834_v1  ;;  %1722 = vmatprep.mubr.msk.bf16.mxu1 (!%p138_p2), %vm1835_vm0, %v1834_v1  ;;  %vm481_vm7 = vcmask (!%p138_p2), 1044484   ;;  %vm316_vm10 = vcmask (!%p138_p2), 261120   ;;  %vm1910_vm11 = vmor (!%p138_p2), %vm223_vm9, %vm224_vm4  ;;  %vm483_vm13 = vcmask (!%p138_p2), 1046534   ;;  %vm1450_vm1 = vcmask (!%p138_p2), 1043459  }
   0xa   : > { %v291_v9 = vunpack.c.0.s8 (!%p138_p2), %v290_v7  ;;  %vm480_vm12 = vmor (!%p138_p2), %vm478_vm5, %vm479_vm6  ;;  %vm1452_vm2 = vcmask (!%p138_p2), 1045509   ;;  %vm1454_vm3 = vcmask (!%p138_p2), 1047559  }
   0xb   : > { %1713 = vmatpush3.bf16.msra.mxu0 (!%p138_p2), %v1798_v3  ;;  %vm482_vm14 = vmor (!%p138_p2), %vm480_vm12, %vm481_vm7 }
   0xc   : > { %1721 = vmatpush3.bf16.msra.mxu1 (!%p138_p2), %v1799_v4  ;;  %1726 = vmatprep.subr.bf16.mxu0 (!%p138_p2), %v1834_v1  ;;  %v1907_v23 = vsub.s32 (!%p138_p2), %v291_v9, %v1891_v8  ;;  %vm1933_vm15 = vmor (!%p138_p2), %vm482_vm14, %vm483_vm13  ;;  %v1805_v9 = vld [vmem:[%s2087_s1 + $0x38] sm:$0xff] (!%p138_p2)  }
   0xd   : > { %s2095_s13 = smov (!%p160_p3, %s1548_s13), 1  ;;  %1734 = vmatprep.subr.bf16.mxu1 %v1834_v1 }
   0xe   : > { %s1782_s22 = smul.u32 24, %s2095_s13  ;;  %s1554_s4 = sshll.u32 %s2095_s13, 1 }
   0xf   : > { %s168_s7 = scalar_lea.vmem %s2089_s3, %s1554_s4 }
  0x10   : > { %s1896_s25 = scalar_lea.vmem %s2086_s0, %s1782_s22 }
  0x11   : > { %v1555_v10 = vld.sshfl [vmem:[%s1896_s25] sm:$0x13 pattern:$0x76325410] }
  0x12   : > { %v1556_v11 = vld.sshfl [vmem:[%s1896_s25 + $0x4] sm:$0x13 pattern:$0x76325410]  ;;  %v194_v12 = vcombine.high %v1555_v10, %v1555_v10  ;;  %v227_v13 = vshrl.u32 %v1555_v10, 16  ;;  %v230_v14 = vshll.u32 %v1555_v10, 16 }
  0x13   : > { %v1557_v15 = vld.sshfl [vmem:[%s1896_s25 + $0x8] sm:$0x13 pattern:$0x76325410]  ;;  %v202_v16 = vcombine.high %v1556_v11, %v1556_v11  ;;  %v241_v17 = vshrl.u32 %v1556_v11, 16  ;;  %v244_v18 = vshll.u32 %v1556_v11, 16 }
  0x14   : > { %v1558_v19 = vld.sshfl [vmem:[%s1896_s25 + $0xc] sm:$0x13 pattern:$0x76325410]  ;;  %v210_v20 = vcombine.high %v1557_v15, %v1557_v15  ;;  %v229_v21 = vrot.slane %v227_v13, 6  ;;  %v232_v22 = vrot.slane %v230_v14, 7 }
  0x15   : > { %v218_v24 = vcombine.high %v1558_v19, %v1558_v19  ;;  %v236_v25 = vshll.u32 %v194_v12, 16  ;;  %v243_v26 = vrot.slane %v241_v17, 6  ;;  %v246_v27 = vrot.slane %v244_v18, 7 }
  0x16   : > { %v233_v28 = vor.u32 %v232_v22, %v229_v21  ;;  %v250_v29 = vshll.u32 %v202_v16, 16  ;;  %v255_v30 = vshrl.u32 %v1557_v15, 16  ;;  %v258_v31 = vshll.u32 %v1557_v15, 16  ;;  %v1802_v21 = vld [vmem:[%s2087_s1 + $0x20] sm:$0xff]  }
  0x17   : > { %v238_v33 = vrot.slane %v236_v25, 7  ;;  %v247_v34 = vor.u32 %v246_v27, %v243_v26  ;;  %v264_v35 = vshll.u32 %v210_v20, 16  ;;  %v269_v36 = vshrl.u32 %v1558_v19, 16 }
  0x18   : > { %v234_v37 = vrot.slane %v233_v28, 2  ;;  %v252_v38 = vrot.slane %v250_v29, 7  ;;  %v257_v39 = vrot.slane %v255_v30, 6  ;;  %v260_v40 = vrot.slane %v258_v31, 7 }
  0x19   : > { %v1820_v41 = vld.sshfl [vmem:[%s1896_s25] sm:$0xf pattern:$0x76325410]  ;;  %v248_v42 = vrot.slane %v247_v34, 2  ;;  %v271_v43 = vrot.slane %v269_v36, 6 }
  0x1a   : > { %v272_v44 = vshll.u32 %v1558_v19, 16  ;;  %v1821_v45 = vld.sshfl [vmem:[%s1896_s25 + $0x8] sm:$0xf pattern:$0x76325410]  ;;  %v261_v46 = vor.u32 %v260_v40, %v257_v39  ;;  %v266_v47 = vrot.slane %v264_v35, 7  ;;  %v239_v50 = vsel %vm1910_vm11, %v234_v37, %v238_v33 }
  0x1b   : > { %v278_v48 = vshll.u32 %v218_v24, 16  ;;  %v1925_v51 = vsel %vm1910_vm11, %v248_v42, %v252_v38  ;;  %v1569_v55 = vld.sshfl [vmem:[%s1896_s25] sm:$0x12 pattern:$0x76325410]  ;;  %v381_v57 = vcombine.low %v1820_v41, %v1821_v45  ;;  %v1804_v33 = vld [vmem:[%s2087_s1 + $0x28] sm:$0xff]  }
  0x1c   : > { %v274_v52 = vrot.slane %v272_v44, 7  ;;  %v262_v53 = vrot.slane %v261_v46, 2  ;;  %v1570_v58 = vld.sshfl [vmem:[%s1896_s25 + $0x4] sm:$0x12 pattern:$0x76325410]  ;;  %v453_v59 = vcombine.high %v1569_v55, %v1569_v55  ;;  %v287_v61 = vcombine.low %v239_v50, %v1925_v51 }
  0x1d   : > { %v280_v54 = vrot.slane %v278_v48, 7  ;;  %v1573_v60 = vrot.slane %v1569_v55, 9  ;;  %v1571_v62 = vld.sshfl [vmem:[%s1896_s25 + $0x8] sm:$0x12 pattern:$0x76325410]  ;;  %v461_v63 = vcombine.high %v1570_v58, %v1570_v58  ;;  %1723 = vmatmul.mubr.msk.bf16.vlgmr.msra.gmra.mrb[0].mxu1 %vm316_vm10, %v381_v57 }
  0x1e   : > { %v275_v56 = vor.u32 %v274_v52, %v271_v43  ;;  %v1574_v2 = vrot.slane %v1570_v58, 9  ;;  %v1939_v3 = vsel %vm1910_vm11, %v262_v53, %v266_v47  ;;  %v1572_v5 = vld.sshfl [vmem:[%s1896_s25 + $0xc] sm:$0x12 pattern:$0x76325410]  ;;  %v469_v6 = vcombine.high %v1571_v62, %v1571_v62  ;;  %1735 = vmatpush3.bf16.msra.mxu1 %v1803_v49  ;;  %1738 = vmatprep.mubr.msk.bf16.mxu1 %vm1835_vm0, %v1834_v1  ;;  %v1809_v36 = vld [vmem:[%s2087_s1 + $0x50] sm:$0xff]  }
  0x1f   : > { %v487_v7 = vrot.slane %v453_v59, 7  ;;  %v477_v10 = vcombine.high %v1572_v5, %v1572_v5  ;;  %v491_v11 = vrot.slane %v461_v63, 7  ;;  %v1575_v12 = vrot.slane %v1571_v62, 9  ;;  %1736 = vmatprep.subr.bf16.mxu1 %v1834_v1  ;;  %v1811_v49 = vld [vmem:[%s2087_s1 + $0x58] sm:$0xff]   ;;  %v1806_v55 = vld [vmem:[%s2087_s1 + $0x40] sm:$0xff]  }
  0x20   : > { %v276_v4 = vrot.slane %v275_v56, 2  ;;  %v1576_v13 = vrot.slane %v1572_v5, 9  ;;  %v495_v16 = vrot.slane %v469_v6, 7  ;;  %v295_v18 = vrot.slane %v287_v61, %v1907_v23  ;;  %v1810_v5 = vld [vmem:[%s2087_s1 + $0x48] sm:$0xff]  }
  0x21   : > { %v488_v15 = vsel %vm1933_vm15, %v1573_v60, %v487_v7  ;;  %v492_v19 = vsel %vm1933_vm15, %v1574_v2, %v491_v11  ;;  %v499_v20 = vrot.slane %v477_v10, 7  ;;  %v1822_v25 = vld.sshfl [vmem:[%s1896_s25 + $0x4] sm:$0xf pattern:$0x76325410]  ;;  %v771_v56 = vcombine.low %v1925_v51, %v1939_v3  ;;  %v1813_v51 = vld [vmem:[%s2087_s1 + $0x70] sm:$0xff]  }
  0x22   : > { %v1950_v14 = vsel %vm1910_vm11, %v276_v4, %v280_v54  ;;  %v496_v22 = vsel %vm1933_vm15, %v1575_v12, %v495_v16  ;;  %v506_v24 = vcombine.low %v488_v15, %v492_v19  ;;  %v1823_v26 = vld.sshfl [vmem:[%s1896_s25 + $0xc] sm:$0xf pattern:$0x76325410]  ;;  %1737 = vmatpush3.bf16.msra.mxu1 %v1805_v9  ;;  %v1815_v16 = vld [vmem:[%s2087_s1 + $0x78] sm:$0xff]  }
  0x23   : > { %v288_v17 = vcombine.low %v1939_v3, %v1950_v14  ;;  %v500_v28 = vsel %vm1933_vm15, %v1576_v13, %v499_v20  ;;  %1750 = vmatprep.subr.bf16.mxu1 %v1834_v1  ;;  %v1602_v31 = vld.sshfl [vmem:[%s1896_s25 + $0x10] sm:$0x13 pattern:$0x76325410]  ;;  %v611_v35 = vcombine.low %v1822_v25, %v1823_v26  ;;  %v907_v46 = vcombine.low %v492_v19, %v496_v22 }
  0x24   : > { %v507_v29 = vcombine.low %v496_v22, %v500_v28  ;;  %v514_v34 = vrot.slane %v506_v24, %v1907_v23  ;;  %v709_v37 = vcombine.high %v1602_v31, %v1602_v31  ;;  %v753_v38 = vshrl.u32 %v1602_v31, 16  ;;  %v1617_v39 = vld.sshfl [vmem:[%s1896_s25 + $0x10] sm:$0x12 pattern:$0x76325410] }
  0x25   : > { %v1968_v27 = vrot.slane %v288_v17, %v1907_v23  ;;  %v756_v41 = vshll.u32 %v1602_v31, 16  ;;  %v885_v42 = vcombine.high %v1617_v39, %v1617_v39  ;;  %v1621_v43 = vrot.slane %v1617_v39, 9  ;;  %1739 = vmatmul.mubr.msk.bf16.vlgmr.msra.gmra.mrb[4].mxu1 %vm316_vm10, %v611_v35  ;;  %v1647_v60 = vld.sshfl [vmem:[%s1896_s25 + $0x14] sm:$0x13 pattern:$0x76325410] }
  0x26   : > { %v1985_v40 = vrot.slane %v507_v29, %v1907_v23  ;;  %v755_v44 = vrot.slane %v753_v38, 6  ;;  %v762_v45 = vshll.u32 %v709_v37, 16  ;;  %1751 = vmatpush3.bf16.msra.mxu1 %v1809_v36  ;;  %1754 = vmatprep.mubr.msk.bf16.mxu1 %vm1835_vm0, %v1834_v1  ;;  %v915_v58 = vrot.slane %v907_v46, %v1907_v23  ;;  %v1662_v4 = vld.sshfl [vmem:[%s1896_s25 + $0x14] sm:$0x12 pattern:$0x76325410] }
  0x27   : > { %v303_v30 = vcombine.low %v295_v18, %v1968_v27  ;;  %v758_v47 = vrot.slane %v756_v41, 7  ;;  %v900_v48 = vrot.slane %v885_v42, 7  ;;  %1752 = vmatprep.subr.bf16.mxu1 %v1834_v1  ;;  %v1110_v62 = vcombine.high %v1647_v60, %v1647_v60  ;;  %v1824_v17 = vld.sshfl [vmem:[%s1896_s25 + $0x8] sm:$0xf pattern:$0x76325410] }
  0x28   : > { %v522_v50 = vcombine.low %v514_v34, %v1985_v40  ;;  %v764_v53 = vrot.slane %v762_v45, 7  ;;  %v1154_v63 = vshrl.u32 %v1647_v60, 16  ;;  %v1157_v3 = vshll.u32 %v1647_v60, 16  ;;  %v1818_v34 = vld [vmem:[%s2087_s1 + $0x80] sm:$0xff]   ;;  %v1819_v36 = vld [vmem:[%s2087_s1 + $0x88] sm:$0xff]  }
  0x29   : > { %1715 = vmatmul.mubr.msk.bf16.vlgmr.msra.gmra.mrb[0].mxu0 %vm316_vm10, %v303_v30  ;;  %v759_v52 = vor.u32 %v758_v47, %v755_v44  ;;  %v2000_v54 = vsel %vm1933_vm15, %v1621_v43, %v900_v48  ;;  %v779_v7 = vrot.slane %v771_v56, %v1907_v23  ;;  %v1163_v12 = vshll.u32 %v1110_v62, 16 }
  0x2a   : > { %1727 = vmatpush3.bf16.msra.mxu0 %v1802_v21  ;;  %1730 = vmatprep.mubr.msk.bf16.mxu0 %vm1835_vm0, %v1834_v1  ;;  %v908_v57 = vcombine.low %v500_v28, %v2000_v54  ;;  %v1156_v10 = vrot.slane %v1154_v63, 6  ;;  %v1159_v11 = vrot.slane %v1157_v3, 7  ;;  %v1286_v13 = vcombine.high %v1662_v4, %v1662_v4  ;;  %v1812_v21 = vld [vmem:[%s2087_s1 + $0x60] sm:$0xff]   ;;  %v1814_v28 = vld [vmem:[%s2087_s1 + $0x68] sm:$0xff]  }
  0x2b   : > { %1728 = vmatprep.subr.bf16.mxu0 %v1834_v1  ;;  %v760_v59 = vrot.slane %v759_v52, 2  ;;  %1753 = vmatpush3.bf16.msra.mxu1 %v1811_v49  ;;  %v1165_v19 = vrot.slane %v1163_v12, 7  ;;  %v1666_v22 = vrot.slane %v1662_v4, 9 }
  0x2c   : > { %v922_v61 = vrot.slane %v908_v57, %v1907_v23  ;;  %1766 = vmatprep.subr.bf16.mxu1 %v1834_v1  ;;  %v1160_v18 = vor.u32 %v1159_v11, %v1156_v10  ;;  %v1301_v24 = vrot.slane %v1286_v13, 7 }
  0x2d   : > { %v765_v2 = vsel %vm1910_vm11, %v760_v59, %v764_v53 }
  0x2e   : > { %1729 = vmatpush3.bf16.msra.mxu0 %v1804_v33  ;;  %v772_v6 = vcombine.low %v1950_v14, %v765_v2  ;;  %v923_v9 = vcombine.low %v915_v58, %v922_v61  ;;  %v1825_v14 = vld.sshfl [vmem:[%s1896_s25 + $0x10] sm:$0xf pattern:$0x76325410]  ;;  %v1161_v25 = vrot.slane %v1160_v18, 2  ;;  %v1302_v30 = vsel %vm1933_vm15, %v1666_v22, %v1301_v24 }
  0x2f   : > { %1742 = vmatprep.subr.bf16.mxu0 %v1834_v1  ;;  %v1012_v33 = vcombine.low %v1824_v17, %v1825_v14  ;;  %v1309_v32 = vcombine.low %v2000_v54, %v1302_v30  ;;  %v1674_v22 = vld [vmem:[%s2088_s2] ss:$0 sm:$0xff] }
  0x30   : > { %v786_v15 = vrot.slane %v772_v6, %v1907_v23  ;;  %1755 = vmatmul.mubr.msk.bf16.vlgmr.msra.gmra.mrb[8].mxu1 %vm316_vm10, %v923_v9  ;;  %v1166_v26 = vsel %vm1910_vm11, %v1161_v25, %v1165_v19 }
  0x31   : > { %1731 = vmatmul.mubr.msk.bf16.vlgmr.msra.gmra.mrb[4].mxu0 %vm316_vm10, %v522_v50  ;;  %1767 = vmatpush3.bf16.msra.mxu1 %v1813_v51  ;;  %v1173_v29 = vcombine.low %v765_v2, %v1166_v26  ;;  %v1323_v0 = vrot.slane %v1309_v32, %v1907_v23 }
  0x32   : > { %1743 = vmatpush3.bf16.msra.mxu0 %v1806_v55  ;;  %1746 = vmatprep.mubr.msk.bf16.mxu0 %vm1835_vm0, %v1834_v1  ;;  %v787_v20 = vcombine.low %v779_v7, %v786_v15 }
  0x33   : > { %1744 = vmatprep.subr.bf16.mxu0 %v1834_v1  ;;  %1770 = vmatprep.mubr.msk.bf16.mxu1 %vm1835_vm0, %v1834_v1  ;;  %v1187_v31 = vrot.slane %v1173_v29, %v1907_v23 }
  0x34   : > { %1768 = vmatprep.subr.bf16.mxu1 %v1834_v1 }
  0x35   : > { %1769 = vmatpush3.bf16.msra.mxu1 %v1815_v16  ;;  %v1188_v35 = vcombine.low %v1968_v27, %v1187_v31  ;;  %v1324_v27 = vcombine.low %v1985_v40, %v1323_v0 }
  0x36   : > { %1745 = vmatpush3.bf16.msra.mxu0 %v1810_v5 }
  0x37   : > { %1758 = vmatprep.subr.bf16.mxu0 %v1834_v1 }
  0x38   : > { %1771 = vmatmul.mubr.msk.bf16.vlgmr.msra.gmra.mrb[12].mxu1 %vm316_vm10, %v1188_v35 }
  0x39   : > { %1747 = vmatmul.mubr.msk.bf16.vlgmr.msra.gmra.mrb[8].mxu0 %vm316_vm10, %v787_v20 }
  0x3a   : > { %1759 = vmatpush3.bf16.msra.mxu0 %v1812_v21  ;;  %1762 = vmatprep.mubr.msk.bf16.mxu0 %vm1835_vm0, %v1834_v1 }
  0x3b   : > { %1760 = vmatprep.subr.bf16.mxu0 %v1834_v1 }
  0x3e   : > { %1761 = vmatpush3.bf16.msra.mxu0 %v1814_v28 }
  0x3f   : > { %1774 = vmatprep.subr.bf16.mxu0 %v1834_v1 }
  0x41   : > { %1763 = vmatmul.mubr.msk.bf16.vlgmr.msra.gmra.mrb[12].mxu0 %vm316_vm10, %v1012_v33 }
  0x42   : > { %1775 = vmatpush3.bf16.msra.mxu0 %v1818_v34  ;;  %1778 = vmatprep.mubr.msk.bf16.mxu0 %vm1835_vm0, %v1834_v1  ;;  %vm1448_vm0 = vcmask 1041409  }
  0x43   : > { %1776 = vmatprep.subr.bf16.mxu0 %v1834_v1 }
  0x46   : > { %1777 = vmatpush3.bf16.msra.mxu0 %v1819_v36 }
  0x49   : > { %1779 = vmatmul.mubr.msk.bf16.vlgmr.msra.gmra.mrb[16].mxu0 %vm316_vm10, %v1324_v27 }
  0xf0   : > { %v431_v37 = vpop.f32.mrb[0].mxu1 }
  0xf1   : > { %v1724_v38 = vpop.f32.mrb[1].mxu1 }
  0xf2   : > { %v434_v39 = vpop.f32.mrb[2].mxu1 }
  0xf3   : > { %v1725_v41 = vpop.f32.mrb[3].mxu1 }
  0xf8   : > { %v661_v46 = vpop.f32.mrb[4].mxu1 }
  0xf9   : > { %v1740_v49 = vpop.f32.mrb[5].mxu1 }
  0xfa   : > { %v664_v50 = vpop.f32.mrb[6].mxu1 }
  0xfb   : > { %v1741_v52 = vpop.f32.mrb[7].mxu1 }
  0xfc   : > { %v354_v42 = vpop.f32.mrb[0].mxu0 }
  0xfd   : > { %v432_v43 = vadd.f32 %v431_v37, %v354_v42  ;;  %v1716_v44 = vpop.f32.mrb[1].mxu0 }
  0xfe   : > { %v357_v45 = vpop.f32.mrb[2].mxu0 }
  0xff   : > { %v435_v47 = vadd.f32 %v434_v39, %v357_v45  ;;  %v1717_v48 = vpop.f32.mrb[3].mxu0 }
 0x103   : > { %v973_v59 = vpop.f32.mrb[8].mxu1 }
 0x104   : > { %v572_v53 = vpop.f32.mrb[4].mxu0  ;;  %v1756_v60 = vpop.f32.mrb[9].mxu1 }
 0x105   : > { %v579_v54 = vadd.f32 %v572_v53, %v432_v43  ;;  %v1732_v40 = vpop.f32.mrb[5].mxu0  ;;  %v976_v62 = vpop.f32.mrb[10].mxu1 }
 0x106   : > { %v575_v55 = vpop.f32.mrb[6].mxu0  ;;  %v1757_v63 = vpop.f32.mrb[11].mxu1 }
 0x107   : > { %v580_v56 = vadd.f32 %v575_v55, %v435_v47  ;;  %v668_v57 = vadd.f32 %v661_v46, %v579_v54  ;;  %v1733_v58 = vpop.f32.mrb[7].mxu0  ;;  %v1837_v47 = vmov 1934713408  }
 0x108   : > { %v1467_v48 = vunpack.c.l.s4 %v1837_v47  ;;  %v1838_v58 = vmov 1966171168  }
 0x109   : > { %v669_v61 = vadd.f32 %v664_v50, %v580_v56 }
 0x10a   : > { %v1468_v55 = vunpack.c.0.s8 %v1467_v48 }
 0x10b   : > { %v1238_v10 = vpop.f32.mrb[12].mxu1 }
 0x10c   : > { %v837_v2 = vpop.f32.mrb[8].mxu0  ;;  %v1772_v12 = vpop.f32.mrb[13].mxu1 }
 0x10d   : > { %v844_v51 = vadd.f32 %v837_v2, %v668_v57  ;;  %v1748_v3 = vpop.f32.mrb[9].mxu0  ;;  %v1241_v16 = vpop.f32.mrb[14].mxu1 }
 0x10e   : > { %v840_v4 = vpop.f32.mrb[10].mxu0  ;;  %v1773_v14 = vpop.f32.mrb[15].mxu1 }
 0x10f   : > { %v845_v5 = vadd.f32 %v840_v4, %v669_v61  ;;  %v980_v6 = vadd.f32 %v973_v59, %v844_v51  ;;  %v1749_v7 = vpop.f32.mrb[11].mxu0  ;;  %v1480_v59 = vunpack.c.l.s4 %v1838_v58 }
 0x111   : > { %v981_v9 = vadd.f32 %v976_v62, %v845_v5  ;;  %v1471_v62 = vsub.s32 %v1468_v55, %v1891_v8  ;;  %v1481_v3 = vunpack.c.0.s8 %v1480_v59 }
 0x114   : > { %v1062_v11 = vpop.f32.mrb[12].mxu0 }
 0x115   : > { %v1069_v13 = vadd.f32 %v1062_v11, %v980_v6  ;;  %v1764_v15 = vpop.f32.mrb[13].mxu0  ;;  %v1484_v6 = vsub.s32 %v1481_v3, %v1891_v8 }
 0x116   : > { %v1065_v17 = vpop.f32.mrb[14].mxu0 }
 0x117   : > { %v1070_v18 = vadd.f32 %v1065_v17, %v981_v9  ;;  %v1245_v19 = vadd.f32 %v1238_v10, %v1069_v13  ;;  %v1765_v20 = vpop.f32.mrb[15].mxu0 }
 0x119   : > { %v1246_v21 = vadd.f32 %v1241_v16, %v1070_v18 }
 0x11c   : > { %v1374_v24 = vpop.f32.mrb[16].mxu0 }
 0x11d   : > { %v1381_v25 = vadd.f32 %v1374_v24, %v1245_v19  ;;  %v1780_v26 = vpop.f32.mrb[17].mxu0 }
 0x11e   : > { %v1377_v28 = vpop.f32.mrb[18].mxu0 }
 0x11f   : > { %v1389_v29 = vadd.f32 %v1674_v22, %v1381_v25  ;;  %v1382_v30 = vadd.f32 %v1377_v28, %v1246_v21  ;;  %v1781_v31 = vpop.f32.mrb[19].mxu0 }
 0x121   : > { %v1391_v33 = vmax.f32 %v1389_v29, 0.0  ;;  %v1390_v32 = vadd.f32 %v1674_v22, %v1382_v30 }
 0x123   : > { %v1395_v34 = vcombine.high %v1391_v33, %v1391_v33  ;;  %v1392_v35 = vmax.f32 %v1390_v32, 0.0 }
 0x125   : > { %v1399_v0 = vmax.f32 %v1391_v33, %v1395_v34  ;;  %v1396_v36 = vcombine.high %v1392_v35, %v1392_v35 }
 0x127   : > { %v1409_v27 = vrot.slane %v1399_v0, %v1907_v23  ;;  %v1400_v37 = vmax.f32 %v1392_v35, %v1396_v36 }
 0x129   : > { %v1410_v38 = vcombine.high %v1409_v27, %v1409_v27  ;;  %v1417_v39 = vrot.slane %v1400_v37, %v1907_v23  ;;  %v1675_v41 = vrot.slane %v1409_v27, 9 }
 0x12b   : > { %v1676_v42 = vrot.slane %v1410_v38, 9  ;;  %v1418_v43 = vcombine.high %v1417_v39, %v1417_v39  ;;  %v1677_v45 = vrot.slane %v1417_v39, 9  ;;  %v1435_v49 = vmax.f32 %v1409_v27, %v1675_v41 }
 0x12d   : > { %v1436_v44 = vmax.f32 %v1410_v38, %v1676_v42  ;;  %v1678_v46 = vrot.slane %v1418_v43, 9  ;;  %v1437_v54 = vmax.f32 %v1417_v39, %v1677_v45 }
 0x12f   : > { %v1447_v50 = vrot.slane %v1436_v44, 7  ;;  %v1438_v52 = vmax.f32 %v1418_v43, %v1678_v46 }
 0x131   : > { %v1449_v53 = vsel %vm1448_vm0, %v1447_v50, %v1435_v49  ;;  %v1458_v40 = vrot.slane %v1438_v52, 7 }
 0x132   : > { %v1451_v23 = vsel %vm1450_vm1, %v1447_v50, %v1449_v53 }
 0x133   : > { %v1453_v56 = vsel %vm1452_vm2, %v1447_v50, %v1451_v23  ;;  %v1459_v57 = vsel %vm1448_vm0, %v1458_v40, %v1437_v54 }
 0x134   : > { %v1460_v60 = vsel %vm1450_vm1, %v1458_v40, %v1459_v57  ;;  %v1455_v63 = vsel %vm1454_vm3, %v1447_v50, %v1453_v56 }
 0x135   : > { %v1461_v61 = vsel %vm1452_vm2, %v1458_v40, %v1460_v60 }
 0x136   : > { %v1462_v2 = vsel %vm1454_vm3, %v1458_v40, %v1461_v61 }
 0x137   : > { %v1465_v51 = vcombine.low %v1455_v63, %v1462_v2 }
 0x139   : > { %v1472_v4 = vrot.slane %v1465_v51, %v1471_v62 }
 0x13b   : > { %v1473_v5 = vcombine.high %v1472_v4, %v1834_v1 }
 0x13d   : > { %v1679_v7 = vpack.c.bf16 %v1473_v5, %v1472_v4 }
 0x13f   : > { %v1485_v9 = vrot.slane %v1679_v7, %v1484_v6 }
 0x141   : > { %1680 = vst.sshfl [vmem:[%s168_s7] sm:$0x5 pattern:$0x73625140] %v1485_v9 }
 0x142 PF: > { %s13_s12 = sadd.s32 1, %s1832_s12  }
 0x143   : > { %p10_p4 = scmp.ge.s32.totalorder %s13_s12, 4  }
 0x145   :  { %12 = sbr.rel (!%p10_p4) target bundleno = 1 (0x1), region = 72 }

// kernel: cnn_forward.6
= control target key start
LH: loop header
LB: loop body
LE: loop exit
PB: predicated region body
PF: predicated region fallthrough
CT: control target
= control target key end

     0   :  { %s2602_s12 = smov 0   ;;  %s3156_s0 = inlined_call_operand.vmem [shape: bf16[2,10,10,16], index: 0, kind: input, shape index: {}]   ;;  %s3157_s1 = inlined_call_operand.vmem [shape: bf16[9,16,32], index: 1, kind: input, shape index: {}]   ;;  %s3158_s2 = inlined_call_operand.vmem [shape: f32[1,32], index: 2, kind: input, shape index: {}]   ;;  %s3159_s3 = inlined_call_operand.vmem [shape: bf16[2,4,128], index: 3, kind: output, shape index: {}]  }
   0x1 LB: > { %s2120_s13 = sadd.s32 4294967295, %s2575_s12   ;;  %p2124_p0 = scmp.ge.s32.totalorder %s2575_s12, 1  ;;  %s2575_s12 = sphi %s2602_s12, %s13_s12  }
   0x2   : > { %p137_p1 = scmp.lt.s32.totalorder %s2575_s12, 3 }
   0x4   : > { %p138_p2 = pnand %p2124_p0, %p137_p1 }
   0x5   : > { %v2548_v0 = vld [vmem:[%s3157_s1 + $0x8] sm:$0xff] (!%p138_p2)   ;;  %p160_p3 = scmp.lt.s32.totalorder (!%p138_p2), %s2120_s13, 1  ;;  %v2616_v1 = vld [vmem:[%s3157_s1 + $0x20] sm:$0xff] (!%p138_p2)   ;;  %vm189_vm0 = vsmask.f32 (!%p138_p2), 3328  ;;  %vm325_vm2 = vcmask (!%p138_p2), 130048  }
   0x6   : > { %141 = sbr.rel (%p138_p2) target bundleno = 489 (0x1e9), region = 32  ;;  %2378 = vmatprep.subr.bf16.mxu1 (!%p138_p2), %v2548_v0  ;;  %v2623_v2 = vld [vmem:[%s3157_s1] sm:$0xff] (!%p138_p2)   ;;  %2418 = vmatprep.subr.bf16.mxu0 (!%p138_p2), %v2616_v1  ;;  %v2632_v3 = vld [vmem:[%s3157_s1 + $0x28] sm:$0xff] (!%p138_p2)   ;;  %vm190_vm1 = vsmask.f32 (!%p138_p2), 7440  ;;  %vm530_vm4 = vcmask (!%p138_p2), 1042432  }
   0x7   : > { %2379 = vmatpush3.bf16.msra.mxu1 (!%p138_p2), %v2548_v0  ;;  %2419 = vmatpush3.bf16.msra.mxu0 (!%p138_p2), %v2616_v1  ;;  %vm2669_vm3 = vmor (!%p138_p2), %vm189_vm0, %vm190_vm1  ;;  %vm531_vm5 = vcmask (!%p138_p2), 1046532   ;;  %vm1908_vm7 = vcmask (!%p138_p2), 1041409   ;;  %vm1910_vm8 = vcmask (!%p138_p2), 1043459   ;;  %vm1912_vm9 = vcmask (!%p138_p2), 1045509   ;;  %s2579_s11 = smov (!%p138_p2), 32   ;;  %s2580_s14 = smov (!%p138_p2), 96  }
   0x8   : > { %2388 = vmatprep.subr.bf16.mxu1 (!%p138_p2), %v2623_v2  ;;  %2428 = vmatprep.subr.bf16.mxu0 (!%p138_p2), %v2632_v3  ;;  %vm2779_vm6 = vmor (!%p138_p2), %vm530_vm4, %vm531_vm5  ;;  %vm1914_vm10 = vcmask (!%p138_p2), 1047559   ;;  %s2581_s15 = smov (!%p138_p2), 64   ;;  %vm2059_vm11 = vcmask (!%p138_p2), 261120   ;;  %vm2061_vm12 = vcmask (!%p138_p2), 523264   ;;  %vm2063_vm13 = vcmask (!%p138_p2), 785408  }
   0xd   : > { %s3165_s13 = smov (!%p160_p3, %s2120_s13), 1 }
   0xe   : > { %s2534_s20 = smul.u32 80, %s3165_s13  ;;  %s2126_s16 = sshll.u32 %s3165_s13, 1 }
   0xf   : > { %s168_s19 = scalar_lea.vmem %s3159_s3, %s2126_s16 }
  0x10   : > { %s2637_s25 = scalar_lea.vmem %s3156_s0, %s2534_s20 }
  0x11   : > { %v2641_v4 = vld [vmem:[%s2637_s25] sm:$0xf]  ;;  %v2644_v5 = vld [vmem:[%s2637_s25 + $0x8] sm:$0xf]  ;;  %v2647_v6 = vld [vmem:[%s2637_s25 + $0x4] sm:$0x1] }
  0x12   : > { %v2650_v7 = vld [vmem:[%s2637_s25 + $0xc] sm:$0x1]  ;;  %v193_v8 = vshrl.u32 %v2641_v4, 16  ;;  %v196_v9 = vshll.u32 %v2641_v4, 16  ;;  %v202_v10 = vshll.u32 %v2647_v6, 16  ;;  %v207_v11 = vshrl.u32 %v2644_v5, 16 }
  0x13   : > { %v210_v12 = vshll.u32 %v2644_v5, 16  ;;  %v216_v13 = vshll.u32 %v2650_v7, 16  ;;  %v2185_v14 = vld [vmem:[%s2637_s25 + $0x8] sm:$0xf]  ;;  %v2660_v19 = vld [vmem:[%s2637_s25 + $0xc] sm:$0x1] }
  0x14   : > { %v195_v15 = vrot.slane %v193_v8, 4  ;;  %v198_v16 = vrot.slane %v196_v9, 5  ;;  %v204_v17 = vrot.slane %v202_v10, 5  ;;  %v209_v18 = vrot.slane %v207_v11, 4  ;;  %v2187_v22 = vld [vmem:[%s2637_s25 + $0x10] sm:$0xf] }
  0x15   : > { %v212_v20 = vrot.slane %v210_v12, 5  ;;  %v218_v21 = vrot.slane %v216_v13, 5  ;;  %v2664_v23 = vld [vmem:[%s2637_s25 + $0x14] sm:$0x1]  ;;  %v811_v25 = vshrl.u32 %v2185_v14, 16  ;;  %v814_v26 = vshll.u32 %v2185_v14, 16 }
  0x16   : > { %v199_v24 = vor.u32 %v198_v16, %v195_v15  ;;  %v820_v27 = vshll.u32 %v2660_v19, 16  ;;  %v825_v30 = vshrl.u32 %v2187_v22, 16  ;;  %v828_v31 = vshll.u32 %v2187_v22, 16  ;;  %v2675_v33 = vld [vmem:[%s2637_s25 + $0x10] sm:$0xf] }
  0x17   : > { %v213_v29 = vor.u32 %v212_v20, %v209_v18  ;;  %v834_v32 = vshll.u32 %v2664_v23, 16  ;;  %v535_v35 = vrot.slane %v2647_v6, 5  ;;  %v813_v36 = vrot.slane %v811_v25, 4  ;;  %v2679_v38 = vld [vmem:[%s2637_s25 + $0x18] sm:$0xf] }
  0x18   : > { %v200_v34 = vrot.slane %v199_v24, 4  ;;  %v816_v37 = vrot.slane %v814_v26, 5  ;;  %v539_v40 = vrot.slane %v2650_v7, 5  ;;  %v827_v41 = vrot.slane %v825_v30, 4  ;;  %v2683_v43 = vld [vmem:[%s2637_s25 + $0x14] sm:$0x1] }
  0x19   : > { %v214_v39 = vrot.slane %v213_v29, 4  ;;  %v830_v42 = vrot.slane %v828_v31, 5  ;;  %v822_v46 = vrot.slane %v820_v27, 5  ;;  %v836_v47 = vrot.slane %v834_v32, 5  ;;  %v2690_v50 = vld [vmem:[%s2637_s25 + $0x1c] sm:$0x1] }
  0x1a   : > { %v205_v44 = vsel %vm2669_vm3, %v200_v34, %v204_v17  ;;  %v817_v45 = vor.u32 %v816_v37, %v813_v36  ;;  %v221_v51 = vshrl.u32 %v2675_v33, 16  ;;  %v224_v52 = vshll.u32 %v2675_v33, 16  ;;  %v2189_v61 = vld [vmem:[%s2637_s25 + $0x18] sm:$0xf]  ;;  %v2704_v9 = vld [vmem:[%s2637_s25 + $0x1c] sm:$0x1] }
  0x1b   : > { %v219_v48 = vsel %vm2669_vm3, %v214_v39, %v218_v21  ;;  %v831_v49 = vor.u32 %v830_v42, %v827_v41  ;;  %v230_v55 = vshll.u32 %v2683_v43, 16  ;;  %v235_v56 = vshrl.u32 %v2679_v38, 16  ;;  %v2191_v14 = vld [vmem:[%s2637_s25 + $0x20] sm:$0xf]  ;;  %v2710_v15 = vld [vmem:[%s2637_s25 + $0x24] sm:$0x1] }
  0x1c   : > { %v2129_v53 = vcombine.low %v205_v44, %v219_v48  ;;  %v818_v54 = vrot.slane %v817_v45, 4  ;;  %v223_v58 = vrot.slane %v221_v51, 4  ;;  %v226_v59 = vrot.slane %v224_v52, 5  ;;  %v2717_v31 = vld [vmem:[%s2637_s25 + $0x20] sm:$0xf] }
  0x1d   : > { %v832_v57 = vrot.slane %v831_v49, 4  ;;  %v238_v60 = vshll.u32 %v2679_v38, 16  ;;  %v1054_v63 = vrot.slane %v2660_v19, 5  ;;  %v237_v0 = vrot.slane %v235_v56, 4  ;;  %v2722_v39 = vld [vmem:[%s2637_s25 + $0x24] sm:$0x1] }
  0x1e   : > { %2380 = vmatprep.mubr.msk.bf16.mxu1 %vm325_vm2, %v2129_v53  ;;  %v823_v62 = vsel %vm2669_vm3, %v818_v54, %v822_v46  ;;  %v244_v8 = vshll.u32 %v2690_v50, 16  ;;  %v227_v11 = vor.u32 %v226_v59, %v223_v58  ;;  %v232_v12 = vrot.slane %v230_v55, 5  ;;  %v2726_v46 = vld [vmem:[%s2637_s25 + $0x28] sm:$0xf]  ;;  %v2732_v51 = vld [vmem:[%s2637_s25 + $0x2c] sm:$0x1] }
  0x1f   : > { %v837_v10 = vsel %vm2669_vm3, %v832_v57, %v836_v47  ;;  %v240_v13 = vrot.slane %v238_v60, 5  ;;  %v1058_v17 = vrot.slane %v2664_v23, 5  ;;  %v839_v20 = vshrl.u32 %v2189_v61, 16  ;;  %v2738_v57 = vld [vmem:[%s2637_s25 + $0x30] sm:$0xf] }
  0x20   : > { %v2203_v16 = vcombine.low %v823_v62, %v837_v10  ;;  %v246_v18 = vrot.slane %v244_v8, 5  ;;  %v228_v21 = vrot.slane %v227_v11, 4  ;;  %v842_v24 = vshll.u32 %v2189_v61, 16  ;;  %v2743_v58 = vld [vmem:[%s3157_s1 + $0x10] sm:$0xff]  }
  0x21   : > { %v241_v22 = vor.u32 %v240_v13, %v237_v0  ;;  %v848_v25 = vshll.u32 %v2704_v9, 16  ;;  %v841_v26 = vrot.slane %v839_v20, 4  ;;  %v853_v27 = vshrl.u32 %v2191_v14, 16  ;;  %v2748_v0 = vld [vmem:[%s2637_s25 + $0x38] sm:$0xf] }
  0x22   : > { %2420 = vmatprep.mubr.msk.bf16.mxu0 %vm325_vm2, %v2203_v16  ;;  %v856_v29 = vshll.u32 %v2191_v14, 16  ;;  %v862_v30 = vshll.u32 %v2710_v15, 16  ;;  %v233_v32 = vsel %vm2669_vm3, %v228_v21, %v232_v12  ;;  %v844_v36 = vrot.slane %v842_v24, 5  ;;  %v2753_v13 = vld [vmem:[%s2637_s25 + $0x34] sm:$0x1] }
  0x23   : > { %v242_v34 = vrot.slane %v241_v22, 4  ;;  %v850_v37 = vrot.slane %v848_v25, 5  ;;  %v855_v41 = vrot.slane %v853_v27, 4  ;;  %v1062_v45 = vrot.slane %v2704_v9, 5  ;;  %v2759_v20 = vld [vmem:[%s2637_s25 + $0x3c] sm:$0x1] }
  0x24   : > { %v858_v42 = vrot.slane %v856_v29, 5  ;;  %v864_v44 = vrot.slane %v862_v30, 5  ;;  %v845_v48 = vor.u32 %v844_v36, %v841_v26  ;;  %v1066_v49 = vrot.slane %v2710_v15, 5  ;;  %v2765_v22 = vld [vmem:[%s3157_s1 + $0x30] sm:$0xff]   ;;  %v2212_v27 = vld [vmem:[%s2637_s25 + $0x8] sm:$0xe] }
  0x25   : > { %v247_v47 = vsel %vm2669_vm3, %v242_v34, %v246_v18  ;;  %v249_v52 = vshrl.u32 %v2717_v31, 16  ;;  %v252_v55 = vshll.u32 %v2717_v31, 16  ;;  %v258_v56 = vshll.u32 %v2722_v39, 16  ;;  %v2213_v29 = vld [vmem:[%s2637_s25 + $0x10] sm:$0xe] }
  0x26   : > { %v2130_v53 = vcombine.low %v233_v32, %v247_v47  ;;  %v859_v54 = vor.u32 %v858_v42, %v855_v41  ;;  %v846_v59 = vrot.slane %v845_v48, 4  ;;  %v263_v61 = vshrl.u32 %v2726_v46, 16 }
  0x27   : > { %v251_v60 = vrot.slane %v249_v52, 4  ;;  %v266_v62 = vshll.u32 %v2726_v46, 16  ;;  %v254_v10 = vrot.slane %v252_v55, 5  ;;  %v260_v11 = vrot.slane %v258_v56, 5  ;;  %v2215_v52 = vld [vmem:[%s2637_s25 + $0x20] sm:$0xe] }
  0x28   : > { %2381 = vmatmul.mubr.msk.bf16.vlgmr.msra.gmra.mrb[0].mxu1 %vm325_vm2, %v2130_v53  ;;  %v860_v8 = vrot.slane %v859_v54, 4  ;;  %v272_v12 = vshll.u32 %v2732_v51, 16  ;;  %v851_v14 = vsel %vm2669_vm3, %v846_v59, %v850_v37  ;;  %v265_v16 = vrot.slane %v263_v61, 4  ;;  %v2214_v37 = vld [vmem:[%s2637_s25 + $0x18] sm:$0xe] }
  0x29   : > { %2389 = vmatpush3.bf16.msra.mxu1 %v2623_v2  ;;  %v268_v18 = vrot.slane %v266_v62, 5  ;;  %v277_v21 = vshrl.u32 %v2738_v57, 16  ;;  %v255_v25 = vor.u32 %v254_v10, %v251_v60  ;;  %v280_v26 = vshll.u32 %v2738_v57, 16  ;;  %v2216_v59 = vld [vmem:[%s2637_s25 + $0x28] sm:$0xe] }
  0x2a   : > { %v865_v24 = vsel %vm2669_vm3, %v860_v8, %v864_v44  ;;  %v274_v2 = vrot.slane %v272_v12, 5  ;;  %2398 = vmatprep.subr.bf16.mxu1 %v2743_v58  ;;  %v286_v36 = vshll.u32 %v2753_v13, 16  ;;  %v291_v44 = vshrl.u32 %v2748_v0, 16  ;;  %v2791_v10 = vld [vmem:[%s2637_s25 + $0x2c] sm:$0x1] }
  0x2b   : > { %v2204_v30 = vcombine.low %v851_v14, %v865_v24  ;;  %v269_v32 = vor.u32 %v268_v18, %v265_v16  ;;  %v279_v34 = vrot.slane %v277_v21, 4  ;;  %v256_v41 = vrot.slane %v255_v25, 4  ;;  %v2801_v25 = vld [vmem:[%s2637_s25 + $0x34] sm:$0x1] }
  0x2c   : > { %v282_v42 = vrot.slane %v280_v26, 5  ;;  %v294_v47 = vshll.u32 %v2748_v0, 16  ;;  %v288_v54 = vrot.slane %v286_v36, 5  ;;  %v300_v55 = vshll.u32 %v2759_v20, 16  ;;  %v2217_v26 = vld [vmem:[%s2637_s25 + $0x30] sm:$0xe] }
  0x2d   : > { %2421 = vmatmul.mubr.msk.bf16.vlgmr.msra.gmra.mrb[0].mxu0 %vm325_vm2, %v2204_v30  ;;  %v270_v53 = vrot.slane %v269_v32, 4  ;;  %v2220_v56 = vrot.slane %v2212_v27, 9  ;;  %v261_v60 = vsel %vm2669_vm3, %v256_v41, %v260_v11  ;;  %v293_v62 = vrot.slane %v291_v44, 4  ;;  %v2809_v27 = vld [vmem:[%s2637_s25 + $0x3c] sm:$0x1] }
  0x2e   : > { %2429 = vmatpush3.bf16.msra.mxu0 %v2632_v3  ;;  %v283_v61 = vor.u32 %v282_v42, %v279_v34  ;;  %v296_v8 = vrot.slane %v294_v47, 5  ;;  %v302_v14 = vrot.slane %v300_v55, 5  ;;  %v2221_v3 = vrot.slane %v2213_v29, 9  ;;  %v2819_v34 = vld [vmem:[%s2637_s25 + $0x44] sm:$0x1] }
  0x2f   : > { %v275_v12 = vsel %vm2669_vm3, %v270_v53, %v274_v2  ;;  %v1055_v16 = vsel %vm2779_vm6, %v2220_v56, %v1054_v63  ;;  %2438 = vmatprep.subr.bf16.mxu0 %v2765_v22  ;;  %v2222_v24 = vrot.slane %v2214_v37, 9  ;;  %v2223_v2 = vrot.slane %v2215_v52, 9  ;;  %v2219_v44 = vld [vmem:[%s2637_s25 + $0x40] sm:$0xe]  ;;  %v507_v55 = vld [vmem:[%s2637_s25 + $0x8] sm:$0xe] }
  0x30   : > { %v2131_v11 = vcombine.low %v261_v60, %v275_v12  ;;  %v284_v18 = vrot.slane %v283_v61, 4  ;;  %v297_v21 = vor.u32 %v296_v8, %v293_v62  ;;  %v1059_v19 = vsel %vm2779_vm6, %v2221_v3, %v1058_v17  ;;  %v2218_v17 = vld [vmem:[%s2637_s25 + $0x38] sm:$0xe]  ;;  %v506_v47 = vld [vmem:[%s2637_s25] sm:$0xe] }
  0x31   : > { %v2224_v63 = vrot.slane %v2216_v59, 9  ;;  %v2230_v32 = vcombine.low %v1055_v16, %v1059_v19  ;;  %v1063_v23 = vsel %vm2779_vm6, %v2222_v24, %v1062_v45  ;;  %v1067_v36 = vsel %vm2779_vm6, %v2223_v2, %v1066_v49  ;;  %v2844_v60 = vld [vmem:[%s3157_s1 + $0x38] sm:$0xff]   ;;  %v510_v8 = vld [vmem:[%s2637_s25 + $0x20] sm:$0xe]  ;;  %v511_v3 = vld [vmem:[%s2637_s25 + $0x28] sm:$0xe] }
  0x32   : > { %2384 = vmatprep.mubr.msk.bf16.mxu1 %vm325_vm2, %v2131_v11  ;;  %v289_v29 = vsel %vm2669_vm3, %v284_v18, %v288_v54  ;;  %v298_v30 = vrot.slane %v297_v21, 4  ;;  %v1070_v37 = vrot.slane %v2791_v10, 5  ;;  %v2225_v41 = vrot.slane %v2217_v26, 9  ;;  %v509_v62 = vld [vmem:[%s2637_s25 + $0x18] sm:$0xe] }
  0x33   : > { %v1074_v42 = vrot.slane %v2801_v25, 5  ;;  %2430 = vmatprep.mubr.msk.bf16.mxu0 %vm325_vm2, %v2230_v32  ;;  %v2231_v45 = vcombine.low %v1063_v23, %v1067_v36  ;;  %v2138_v15 = vcombine.low %v2641_v4, %v2644_v5  ;;  %v2226_v54 = vrot.slane %v2218_v17, 9  ;;  %v508_v4 = vld [vmem:[%s2637_s25 + $0x10] sm:$0xe]  ;;  %v2894_v32 = vld [vmem:[%s2637_s25 + $0x38] sm:$0xe] }
  0x34   : > { %v303_v9 = vsel %vm2669_vm3, %v298_v30, %v302_v14  ;;  %v1071_v52 = vsel %vm2779_vm6, %v2224_v63, %v1070_v37  ;;  %v1078_v59 = vrot.slane %v2809_v27, 5  ;;  %v2227_v5 = vrot.slane %v2219_v44, 9  ;;  %v2260_v63 = vld [vmem:[%s2637_s25 + $0x18] sm:$0xf]  ;;  %v2897_v23 = vld [vmem:[%s2637_s25 + $0x14] sm:$0x1] }
  0x35   : > { %v2132_v49 = vcombine.low %v289_v29, %v303_v9  ;;  %v1075_v53 = vsel %vm2779_vm6, %v2225_v41, %v1074_v42  ;;  %v1082_v61 = vrot.slane %v2819_v34, 5  ;;  %v543_v12 = vrot.slane %v2683_v43, 5  ;;  %v2906_v36 = vld [vmem:[%s2637_s25 + $0x1c] sm:$0x1]  ;;  %v2262_v42 = vld [vmem:[%s2637_s25 + $0x20] sm:$0xf] }
  0x36   : > { %v2232_v56 = vcombine.low %v1071_v52, %v1075_v53  ;;  %v2147_v14 = vrot.slane %v506_v47, 9  ;;  %v2148_v16 = vrot.slane %v507_v55, 9  ;;  %v547_v11 = vrot.slane %v2690_v50, 5  ;;  %v2264_v47 = vld [vmem:[%s2637_s25 + $0x28] sm:$0xf] }
  0x37   : > { %2385 = vmatmul.mubr.msk.bf16.gmra.mrb[4].mxu1 %vm325_vm2, %v2132_v49  ;;  %v1079_v18 = vsel %vm2779_vm6, %v2226_v54, %v1078_v59  ;;  %v1083_v21 = vsel %vm2779_vm6, %v2227_v5, %v1082_v61  ;;  %v2149_v24 = vrot.slane %v508_v4, 9  ;;  %v2150_v26 = vrot.slane %v509_v62, 9  ;;  %v2927_v53 = vld [vmem:[%s2637_s25 + $0x24] sm:$0x1]  ;;  %v2938_v5 = vld [vmem:[%s2637_s25 + $0x2c] sm:$0x1] }
  0x38   : > { %2390 = vmatprep.mubr.msk.bf16.mxu1 %vm325_vm2, %v2138_v15  ;;  %v2866_v43 = vsel %vm2779_vm6, %v2147_v14, %v535_v35  ;;  %v2872_v50 = vsel %vm2779_vm6, %v2148_v16, %v539_v40  ;;  %v2151_v19 = vrot.slane %v510_v8, 9  ;;  %v2139_v6 = vcombine.low %v2675_v33, %v2679_v38  ;;  %v2881_v35 = vld [vmem:[%s3157_s1 + $0x18] sm:$0xff]   ;;  %v2885_v40 = vld [vmem:[%s2637_s25 + $0x30] sm:$0xe]  ;;  %v2560_v8 = vld [vmem:[%s2637_s25 + $0x20] ss:$8 sps:$4 sm:$0xff]  }
  0x39   : > { %2431 = vmatmul.mubr.msk.bf16.vlgmr.msra.gmra.mrb[0].mxu0 %vm325_vm2, %v2231_v45  ;;  %v551_v7 = vrot.slane %v2722_v39, 5  ;;  %v2152_v2 = vrot.slane %v511_v3, 9  ;;  %v2233_v29 = vcombine.low %v1079_v18, %v1083_v21  ;;  %v2140_v30 = vcombine.low %v2717_v31, %v2726_v46  ;;  %v2558_v38 = vld [vmem:[%s2637_s25 + $0x10] ss:$8 sps:$4 sm:$0xff]  }
  0x3a   : > { %2439 = vmatpush3.bf16.msra.mxu0 %v2765_v22  ;;  %2434 = vmatprep.mubr.msk.bf16.mxu0 %vm325_vm2, %v2232_v56  ;;  %v2258_v22 = vld [vmem:[%s2637_s25 + $0x10] sm:$0xf]  ;;  %v2141_v33 = vcombine.low %v2738_v57, %v2748_v0  ;;  %v2157_v39 = vcombine.low %v2866_v43, %v2872_v50  ;;  %v2903_v17 = vsel %vm2779_vm6, %v2149_v24, %v543_v12  ;;  %v555_v46 = vrot.slane %v2732_v51, 5 }
  0x3b   : > { %2448 = vmatprep.subr.bf16.mxu0 %v2844_v60  ;;  %v1330_v37 = vshrl.u32 %v2258_v22, 16  ;;  %v1333_v31 = vshll.u32 %v2258_v22, 16  ;;  %v2153_v57 = vrot.slane %v2885_v40, 9  ;;  %v559_v0 = vrot.slane %v2753_v13, 5  ;;  %v2949_v40 = vld [vmem:[%s2637_s25 + $0x34] sm:$0x1] }
  0x3c   : > { %v1344_v41 = vshrl.u32 %v2260_v63, 16  ;;  %v2154_v44 = vrot.slane %v2894_v32, 9  ;;  %v1339_v15 = vshll.u32 %v2897_v23, 16  ;;  %v2920_v51 = vsel %vm2779_vm6, %v2150_v26, %v547_v11  ;;  %v2562_v11 = vld [vmem:[%s2637_s25 + $0x30] ss:$8 sps:$4 sm:$0xff]  }
  0x3d   : > { %v1332_v9 = vrot.slane %v1330_v37, 4  ;;  %v1335_v45 = vrot.slane %v1333_v31, 5  ;;  %v2924_v13 = vsel %vm2779_vm6, %v2151_v19, %v551_v7  ;;  %v1347_v52 = vshll.u32 %v2260_v63, 16  ;;  %v2268_v63 = vld [vmem:[%s2637_s25 + $0x38] sm:$0xf] }
  0x3e   : > { %v1346_v49 = vrot.slane %v1344_v41, 4  ;;  %v1353_v54 = vshll.u32 %v2906_v36, 16  ;;  %v1358_v55 = vshrl.u32 %v2262_v42, 16  ;;  %v1361_v56 = vshll.u32 %v2262_v42, 16  ;;  %v2967_v37 = vld [vmem:[%s2637_s25 + $0x3c] sm:$0x1] }
  0x3f   : > { %2391 = vmatmul.mubr.msk.bf16.vlgmr.msra.gmra.mrb[0].mxu1 %vm325_vm2, %v2139_v6  ;;  %v2935_v59 = vsel %vm2779_vm6, %v2152_v2, %v555_v46  ;;  %v1349_v4 = vrot.slane %v1347_v52, 5  ;;  %v1372_v61 = vshrl.u32 %v2264_v47, 16  ;;  %v1375_v62 = vshll.u32 %v2264_v47, 16  ;;  %v2266_v6 = vld [vmem:[%s2637_s25 + $0x30] sm:$0xf] }
  0x40   : > { %2399 = vmatpush3.bf16.msra.mxu1 %v2743_v58  ;;  %2394 = vmatprep.mubr.msk.bf16.mxu1 %vm325_vm2, %v2140_v30  ;;  %v1336_v58 = vor.u32 %v1335_v45, %v1332_v9  ;;  %v1341_v12 = vrot.slane %v1339_v15, 5  ;;  %v1360_v14 = vrot.slane %v1358_v55, 4  ;;  %v1363_v16 = vrot.slane %v1361_v56, 5  ;;  %v2270_v41 = vld [vmem:[%s2637_s25 + $0x40] sm:$0xf] }
  0x41   : > { %2435 = vmatmul.mubr.msk.bf16.gmra.mrb[4].mxu0 %vm325_vm2, %v2233_v29  ;;  %2408 = vmatprep.subr.bf16.mxu1 %v2881_v35  ;;  %v1367_v3 = vshll.u32 %v2927_v53, 16  ;;  %v1350_v21 = vor.u32 %v1349_v4, %v1346_v49  ;;  %v1374_v24 = vrot.slane %v1372_v61, 4  ;;  %v1377_v43 = vrot.slane %v1375_v62, 5  ;;  %v2272_v47 = vld [vmem:[%s2637_s25 + $0x48] sm:$0xf] }
  0x42   : > { %2440 = vmatprep.mubr.msk.bf16.mxu0 %vm325_vm2, %v2558_v38  ;;  %v1337_v18 = vrot.slane %v1336_v58, 4  ;;  %v563_v50 = vrot.slane %v2759_v20, 5  ;;  %v1355_v26 = vrot.slane %v1353_v54, 5  ;;  %v1364_v19 = vor.u32 %v1363_v16, %v1360_v14  ;;  %v2962_v38 = vld [vmem:[%s3157_s1 + $0x40] sm:$0xff]   ;;  %v2991_v62 = vld [vmem:[%s2637_s25 + $0x4c] sm:$0x1] }
  0x43   : > { %v1381_v22 = vshll.u32 %v2938_v5, 16  ;;  %v2158_v7 = vcombine.low %v2903_v17, %v2920_v51  ;;  %v1351_v2 = vrot.slane %v1350_v21, 4  ;;  %v1386_v29 = vshrl.u32 %v2266_v6, 16  ;;  %v2982_v52 = vld [vmem:[%s2637_s25 + $0x44] sm:$0x1] }
  0x44   : > { %v2159_v30 = vcombine.low %v2924_v13, %v2935_v59  ;;  %v2957_v20 = vsel %vm2779_vm6, %v2153_v57, %v559_v0  ;;  %v2964_v17 = vrot.slane %v1367_v3, 5  ;;  %v1389_v31 = vshll.u32 %v2266_v6, 16  ;;  %v2563_v58 = vld [vmem:[%s2637_s25 + $0x40] ss:$8 sps:$4 sm:$0xff]  }
  0x45   : > { %v1378_v46 = vor.u32 %v1377_v43, %v1374_v24  ;;  %v1388_v57 = vrot.slane %v1386_v29, 4  ;;  %v1400_v0 = vshrl.u32 %v2268_v63, 16  ;;  %v1356_v42 = vsel %vm2669_vm3, %v1351_v2, %v1355_v26 }
  0x46   : > { %v1365_v9 = vrot.slane %v1364_v19, 4  ;;  %v1391_v45 = vrot.slane %v1389_v31, 5  ;;  %v1395_v15 = vshll.u32 %v2949_v40, 16  ;;  %v1403_v13 = vshll.u32 %v2268_v63, 16  ;;  %v2285_v19 = vld [vmem:[%s2637_s25 + $0x10] sm:$0xe] }
  0x47   : > { %2395 = vmatmul.mubr.msk.bf16.gmra.mrb[4].mxu1 %vm325_vm2, %v2141_v33  ;;  %v1342_v33 = vsel %vm2669_vm3, %v1337_v18, %v1341_v12  ;;  %v1402_v51 = vrot.slane %v1400_v0, 4  ;;  %v1409_v49 = vshll.u32 %v2967_v37, 16  ;;  %v564_v54 = vsel %vm2779_vm6, %v2154_v44, %v563_v50  ;;  %v2195_v31 = vld [vmem:[%s2637_s25 + $0x30] sm:$0xf] }
  0x48   : > { %2400 = vmatprep.mubr.msk.bf16.mxu1 %vm325_vm2, %v2157_v39  ;;  %v1383_v39 = vrot.slane %v1381_v22, 5  ;;  %v1392_v55 = vor.u32 %v1391_v45, %v1388_v57  ;;  %v1417_v56 = vshll.u32 %v2270_v41, 16  ;;  %v2276_v59 = vcombine.low %v1342_v33, %v1356_v42  ;;  %v2565_v0 = vld [vmem:[%s2637_s25 + $0x8] ss:$8 sps:$4 sm:$0xff]  }
  0x49   : > { %2441 = vmatmul.mubr.msk.bf16.vlgmr.msra.gmra.mrb[0].mxu0 %vm325_vm2, %v2560_v8  ;;  %v1379_v4 = vrot.slane %v1378_v46, 4  ;;  %v1405_v61 = vrot.slane %v1403_v13, 5  ;;  %v1428_v8 = vshrl.u32 %v2272_v47, 16  ;;  %v1397_v12 = vrot.slane %v1395_v15, 5 }
  0x4a   : > { %2449 = vmatpush3.bf16.msra.mxu0 %v2844_v60  ;;  %2444 = vmatprep.mubr.msk.bf16.mxu0 %vm325_vm2, %v2562_v11  ;;  %v1414_v60 = vshrl.u32 %v2270_v41, 16  ;;  %v1419_v16 = vrot.slane %v1417_v56, 5  ;;  %v1431_v3 = vshll.u32 %v2272_v47, 16  ;;  %v1393_v32 = vrot.slane %v1392_v55, 4 }
  0x4b   : > { %2458 = vmatprep.subr.bf16.mxu0 %v2962_v38  ;;  %v1406_v11 = vor.u32 %v1405_v61, %v1402_v51  ;;  %v1423_v44 = vshll.u32 %v2982_v52, 16  ;;  %v1430_v18 = vrot.slane %v1428_v8, 4  ;;  %v1411_v21 = vrot.slane %v1409_v49, 5 }
  0x4c   : > { %v1416_v14 = vrot.slane %v1414_v60, 4  ;;  %v1433_v24 = vrot.slane %v1431_v3, 5  ;;  %v1437_v43 = vshll.u32 %v2991_v62, 16  ;;  %v2160_v22 = vcombine.low %v2957_v20, %v564_v54  ;;  %v2193_v20 = vld [vmem:[%s2637_s25 + $0x28] sm:$0xf] }
  0x4d   : > { %v1407_v50 = vrot.slane %v1406_v11, 4  ;;  %v1573_v2 = vrot.slane %v2897_v23, 5  ;;  %v1384_v63 = vsel %vm2669_vm3, %v1379_v4, %v1383_v39  ;;  %v1398_v29 = vsel %vm2669_vm3, %v1393_v32, %v1397_v12  ;;  %v2566_v3 = vld [vmem:[%s2637_s25 + $0x18] ss:$8 sps:$4 sm:$0xff]  }
  0x4e   : > { %v1420_v26 = vor.u32 %v1419_v16, %v1416_v14  ;;  %v1434_v6 = vor.u32 %v1433_v24, %v1430_v18  ;;  %v1439_v46 = vrot.slane %v1437_v43, 5  ;;  %v2293_v23 = vrot.slane %v2285_v19, 9  ;;  %v2197_v14 = vld [vmem:[%s2637_s25 + $0x38] sm:$0xf]  ;;  %v2199_v16 = vld [vmem:[%s2637_s25 + $0x40] sm:$0xf] }
  0x4f   : > { %2401 = vmatmul.mubr.msk.bf16.vlgmr.msra.gmra.mrb[0].mxu1 %vm325_vm2, %v2158_v7  ;;  %v2286_v7 = vld [vmem:[%s2637_s25 + $0x18] sm:$0xe]  ;;  %v1412_v33 = vsel %vm2669_vm3, %v1407_v50, %v1411_v21  ;;  %v1577_v57 = vrot.slane %v2906_v36, 5  ;;  %v870_v15 = vshll.u32 %v2193_v20, 16  ;;  %v881_v47 = vshrl.u32 %v2195_v31, 16 }
  0x50   : > { %2409 = vmatpush3.bf16.msra.mxu1 %v2881_v35  ;;  %2404 = vmatprep.mubr.msk.bf16.mxu1 %vm325_vm2, %v2159_v30  ;;  %v1370_v35 = vsel %vm2669_vm3, %v1365_v9, %v2964_v17  ;;  %v1425_v30 = vrot.slane %v1423_v44, 5  ;;  %v1421_v41 = vrot.slane %v1420_v26, 4  ;;  %v1435_v17 = vrot.slane %v1434_v6, 4  ;;  %v2287_v36 = vld [vmem:[%s2637_s25 + $0x20] sm:$0xe] }
  0x51   : > { %2445 = vmatmul.mubr.msk.bf16.gmra.mrb[4].mxu0 %vm325_vm2, %v2563_v58  ;;  %2468 = vmatprep.subr.bf16.mxu1 %v2616_v1  ;;  %v2294_v42 = vrot.slane %v2286_v7, 9  ;;  %v867_v9 = vshrl.u32 %v2193_v20, 16  ;;  %v2277_v45 = vcombine.low %v1370_v35, %v1384_v63  ;;  %v2278_v39 = vcombine.low %v1398_v29, %v1412_v33  ;;  %v2290_v50 = vld [vmem:[%s2637_s25 + $0x38] sm:$0xe]  ;;  %v2567_v26 = vld [vmem:[%s2637_s25 + $0x28] ss:$8 sps:$4 sm:$0xff]  }
  0x52   : > { %2450 = vmatprep.mubr.msk.bf16.mxu0 %vm325_vm2, %v2276_v59  ;;  %v884_v13 = vshll.u32 %v2195_v31, 16  ;;  %v1574_v49 = vsel %vm2779_vm6, %v2293_v23, %v1573_v2  ;;  %v872_v58 = vrot.slane %v870_v15, 5  ;;  %v883_v54 = vrot.slane %v881_v47, 4  ;;  %v2288_v59 = vld [vmem:[%s2637_s25 + $0x28] sm:$0xe] }
  0x53   : > { %v869_v51 = vrot.slane %v867_v9, 4  ;;  %v1426_v55 = vsel %vm2669_vm3, %v1421_v41, %v1425_v30  ;;  %v1440_v60 = vsel %vm2669_vm3, %v1435_v17, %v1439_v46  ;;  %v1578_v56 = vsel %vm2779_vm6, %v2294_v42, %v1577_v57  ;;  %v2291_v41 = vld [vmem:[%s2637_s25 + $0x40] sm:$0xe]  ;;  %v2292_v17 = vld [vmem:[%s2637_s25 + $0x48] sm:$0xe] }
  0x54   : > { %v886_v4 = vrot.slane %v884_v13, 5  ;;  %v876_v8 = vshll.u32 %v2791_v10, 16  ;;  %v890_v12 = vshll.u32 %v2801_v25, 16  ;;  %v2295_v32 = vrot.slane %v2287_v36, 9  ;;  %v2289_v10 = vld [vmem:[%s2637_s25 + $0x30] sm:$0xe] }
  0x55   : > { %v873_v61 = vor.u32 %v872_v58, %v869_v51  ;;  %v1581_v11 = vrot.slane %v2927_v53, 5  ;;  %v2279_v18 = vcombine.low %v1426_v55, %v1440_v60  ;;  %v2303_v21 = vcombine.low %v1574_v49, %v1578_v56 }
  0x56   : > { %v887_v44 = vor.u32 %v886_v4, %v883_v54  ;;  %v2296_v24 = vrot.slane %v2288_v59, 9  ;;  %v1585_v43 = vrot.slane %v2938_v5, 5  ;;  %v895_v25 = vshrl.u32 %v2197_v14, 16 }
  0x57   : > { %2405 = vmatmul.mubr.msk.bf16.gmra.mrb[4].mxu1 %vm325_vm2, %v2160_v22  ;;  %v898_v19 = vshll.u32 %v2197_v14, 16  ;;  %v909_v22 = vshrl.u32 %v2199_v16, 16  ;;  %v912_v6 = vshll.u32 %v2199_v16, 16  ;;  %v878_v7 = vrot.slane %v876_v8, 5 }
  0x58   : > { %2410 = vmatprep.mubr.msk.bf16.mxu1 %vm325_vm2, %v2565_v0  ;;  %v888_v2 = vrot.slane %v887_v44, 4  ;;  %v892_v35 = vrot.slane %v890_v12, 5  ;;  %v2297_v63 = vrot.slane %v2289_v10, 9  ;;  %v1589_v53 = vrot.slane %v2949_v40, 5  ;;  %v2568_v0 = vld [vmem:[%s2637_s25 + $0x38] ss:$8 sps:$4 sm:$0xff]  }
  0x59   : > { %2451 = vmatmul.mubr.msk.bf16.vlgmr.msra.gmra.mrb[0].mxu0 %vm325_vm2, %v2277_v45  ;;  %v2298_v29 = vrot.slane %v2290_v50, 9  ;;  %v1593_v30 = vrot.slane %v2967_v37, 5  ;;  %v897_v5 = vrot.slane %v895_v25, 4  ;;  %v900_v20 = vrot.slane %v898_v19, 5 }
  0x5a   : > { %2459 = vmatpush3.bf16.msra.mxu0 %v2962_v38  ;;  %2454 = vmatprep.mubr.msk.bf16.mxu0 %vm325_vm2, %v2278_v39  ;;  %v874_v38 = vrot.slane %v873_v61, 4  ;;  %v911_v31 = vrot.slane %v909_v22, 4  ;;  %v914_v33 = vrot.slane %v912_v6, 5  ;;  %v904_v46 = vshll.u32 %v2809_v27, 16 }
  0x5b   : > { %v893_v37 = vsel %vm2669_vm3, %v888_v2, %v892_v35  ;;  %v1586_v23 = vsel %vm2779_vm6, %v2296_v24, %v1585_v43  ;;  %v1590_v57 = vsel %vm2779_vm6, %v2297_v63, %v1589_v53  ;;  %v1594_v27 = vsel %vm2779_vm6, %v2298_v29, %v1593_v30 }
  0x5c   : > { %v879_v40 = vsel %vm2669_vm3, %v874_v38, %v878_v7  ;;  %v918_v42 = vshll.u32 %v2819_v34, 16  ;;  %v901_v45 = vor.u32 %v900_v20, %v897_v5  ;;  %v915_v15 = vor.u32 %v914_v33, %v911_v31 }
  0x5d   : > { %v2205_v9 = vcombine.low %v879_v40, %v893_v37  ;;  %v2305_v39 = vcombine.low %v1590_v57, %v1594_v27  ;;  %v2299_v51 = vrot.slane %v2291_v41, 9  ;;  %v1597_v13 = vrot.slane %v2982_v52, 5 }
  0x5e   : > { %v2300_v49 = vrot.slane %v2292_v17, 9  ;;  %v1601_v36 = vrot.slane %v2991_v62, 5  ;;  %v906_v58 = vrot.slane %v904_v46, 5  ;;  %v920_v54 = vrot.slane %v918_v42, 5 }
  0x5f   : > { %2411 = vmatmul.mubr.msk.bf16.vlgmr.msra.gmra.mrb[0].mxu1 %vm325_vm2, %v2566_v3  ;;  %v902_v55 = vrot.slane %v901_v45, 4  ;;  %v916_v60 = vrot.slane %v915_v15, 4  ;;  %v1598_v34 = vsel %vm2779_vm6, %v2299_v51, %v1597_v13  ;;  %v2577_v16 = vmov 1983009808  }
  0x60   : > { %2469 = vmatpush3.bf16.msra.mxu1 %v2616_v1  ;;  %2414 = vmatprep.mubr.msk.bf16.mxu1 %vm325_vm2, %v2567_v26  ;;  %v1582_v1 = vsel %vm2779_vm6, %v2295_v32, %v1581_v11  ;;  %v1602_v52 = vsel %vm2779_vm6, %v2300_v49, %v1601_v36  ;;  %v1741_v3 = vunpack.c.l.s4 %v2577_v16  ;;  %v1743_v48 = vlaneseq  ;;  %v3086_v32 = vld [vmem:[%s3158_s2] ss:$0 sm:$0xff] }
  0x61   : > { %2455 = vmatmul.mubr.msk.bf16.gmra.mrb[4].mxu0 %vm325_vm2, %v2279_v18  ;;  %v2304_v47 = vcombine.low %v1582_v1, %v1586_v23  ;;  %v907_v62 = vsel %vm2669_vm3, %v902_v55, %v906_v58  ;;  %v921_v56 = vsel %vm2669_vm3, %v916_v60, %v920_v54  ;;  %v2306_v59 = vcombine.low %v1598_v34, %v1602_v52 }
  0x62   : > { %2460 = vmatprep.mubr.msk.bf16.mxu0 %vm325_vm2, %v2303_v21  ;;  %v2206_v4 = vcombine.low %v907_v62, %v921_v56  ;;  %v1742_v10 = vunpack.c.0.s8 %v1741_v3  ;;  %v3089_v50 = vshrl.u32 %v1743_v48, 7 }
  0x64   : > { %v3095_v2 = vsub.s32 %v1742_v10, %v3089_v50 }
  0x67   : > { %2415 = vmatmul.mubr.msk.bf16.gmra.mrb[4].mxu1 %vm325_vm2, %v2568_v0 }
  0x68   : > { %2424 = vmatprep.mubr.msk.bf16.mxu1 %vm325_vm2, %v2205_v9 }
  0x69   : > { %2461 = vmatmul.mubr.msk.bf16.vlgmr.msra.gmra.mrb[0].mxu0 %vm325_vm2, %v2304_v47 }
  0x6a   : > { %2464 = vmatprep.mubr.msk.bf16.mxu0 %vm325_vm2, %v2305_v39 }
  0x71   : > { %2465 = vmatmul.mubr.msk.bf16.gmra.mrb[4].mxu0 %vm325_vm2, %v2306_v59 }
  0x73   : > { %2425 = vmatmul.mubr.msk.bf16.vlgmr.msra.gmra.mrb[4].mxu1 %vm325_vm2, %v2206_v4 }
 0x132   : > { %v2412_v61 = vpop.f32.mrb[0].mxu1 }
 0x133   : > { %v755_v8 = vpop.f32.mrb[1].mxu1 }
 0x134   : > { %v2413_v12 = vpop.f32.mrb[2].mxu1 }
 0x135   : > { %v758_v14 = vpop.f32.mrb[3].mxu1 }
 0x13c   : > { %v2462_v28 = vpop.f32.mrb[0].mxu0 }
 0x13d   : > { %v2470_v11 = vadd.f32 %v2462_v28, %v2412_v61  ;;  %v1670_v44 = vpop.f32.mrb[1].mxu0 }
 0x13e   : > { %v2471_v18 = vadd.f32 %v1670_v44, %v755_v8  ;;  %v2463_v21 = vpop.f32.mrb[2].mxu0 }
 0x13f   : > { %v1717_v24 = vadd.f32 %v2470_v11, %v3086_v32  ;;  %v2472_v43 = vadd.f32 %v2463_v21, %v2413_v12  ;;  %v1673_v26 = vpop.f32.mrb[3].mxu0 }
 0x140   : > { %v1715_v25 = vadd.f32 %v2471_v18, %v3086_v32  ;;  %v2473_v19 = vadd.f32 %v1673_v26, %v758_v14 }
 0x141   : > { %v1718_v22 = vadd.f32 %v2472_v43, %v3086_v32  ;;  %v1725_v38 = vmax.f32 %v1717_v24, 0.0 }
 0x142   : > { %v1716_v6 = vadd.f32 %v2473_v19, %v3086_v32  ;;  %v1723_v35 = vmax.f32 %v1715_v25, 0.0 }
 0x143   : > { %v1726_v7 = vmax.f32 %v1718_v22, 0.0 }
 0x144   : > { %v1724_v63 = vmax.f32 %v1716_v6, 0.0  ;;  %v2466_v53 = vpop.f32.mrb[4].mxu0 }
 0x145   : > { %v1732_v29 = vmax.f32 %v1725_v38, %v1726_v7  ;;  %v1686_v30 = vpop.f32.mrb[5].mxu0 }
 0x146   : > { %v1731_v5 = vmax.f32 %v1723_v35, %v1724_v63  ;;  %v2426_v20 = vpop.f32.mrb[4].mxu1  ;;  %v2467_v31 = vpop.f32.mrb[6].mxu0 }
 0x147   : > { %v1756_v33 = vcombine.high %v1732_v29, %v1732_v29  ;;  %v1763_v46 = vrot.slane %v1732_v29, %v3095_v2  ;;  %v2474_v40 = vadd.f32 %v2466_v53, %v2426_v20  ;;  %v1005_v37 = vpop.f32.mrb[5].mxu1  ;;  %v1689_v1 = vpop.f32.mrb[7].mxu0 }
 0x148   : > { %v1739_v23 = vcombine.high %v1731_v5, %v1731_v5  ;;  %v1746_v57 = vrot.slane %v1731_v5, %v3095_v2  ;;  %v2475_v27 = vadd.f32 %v1686_v30, %v1005_v37  ;;  %v2427_v0 = vpop.f32.mrb[6].mxu1 }
 0x149   : > { %v1770_v41 = vrot.slane %v1756_v33, %v3095_v2  ;;  %v1771_v17 = vcombine.high %v1763_v46, %v1763_v46  ;;  %v2317_v42 = vrot.slane %v1763_v46, 9  ;;  %v1008_v9 = vpop.f32.mrb[7].mxu1  ;;  %v1721_v54 = vadd.f32 %v2474_v40, %v3086_v32 }
 0x14a   : > { %v1753_v45 = vrot.slane %v1739_v23, %v3095_v2  ;;  %v1754_v15 = vcombine.high %v1746_v57, %v1746_v57  ;;  %v2313_v47 = vrot.slane %v1746_v57, 9  ;;  %v1719_v52 = vadd.f32 %v2475_v27, %v3086_v32 }
 0x14b   : > { %v1772_v39 = vcombine.high %v1770_v41, %v1770_v41  ;;  %v2318_v51 = vrot.slane %v1771_v17, 9  ;;  %v2319_v13 = vrot.slane %v1770_v41, 9  ;;  %v1875_v60 = vmax.f32 %v1763_v46, %v2317_v42 }
 0x14c   : > { %v1755_v49 = vcombine.high %v1753_v45, %v1753_v45  ;;  %v2314_v36 = vrot.slane %v1754_v15, 9  ;;  %v2315_v58 = vrot.slane %v1753_v45, 9  ;;  %v1871_v59 = vmax.f32 %v1746_v57, %v2313_v47 }
 0x14d   : > { %v2320_v55 = vrot.slane %v1772_v39, 9  ;;  %v1876_v34 = vmax.f32 %v1771_v17, %v2318_v51  ;;  %v1877_v62 = vmax.f32 %v1770_v41, %v2319_v13  ;;  %v2476_v12 = vadd.f32 %v2467_v31, %v2427_v0 }
 0x14e   : > { %v2316_v56 = vrot.slane %v1755_v49, 9  ;;  %v1872_v4 = vmax.f32 %v1754_v15, %v2314_v36  ;;  %v2477_v14 = vadd.f32 %v1689_v1, %v1008_v9  ;;  %v1873_v16 = vmax.f32 %v1753_v45, %v2315_v58 }
 0x14f   : > { %v1878_v61 = vmax.f32 %v1772_v39, %v2320_v55  ;;  %v1925_v8 = vrot.slane %v1876_v34, 7  ;;  %v1729_v28 = vmax.f32 %v1721_v54, 0.0  ;;  %v1722_v44 = vadd.f32 %v2476_v12, %v3086_v32 }
 0x150   : > { %v1874_v3 = vmax.f32 %v1755_v49, %v2316_v56  ;;  %v1907_v48 = vrot.slane %v1872_v4, 7  ;;  %v1720_v18 = vadd.f32 %v2477_v14, %v3086_v32  ;;  %v1727_v43 = vmax.f32 %v1719_v52, 0.0 }
 0x151   : > { %v1932_v11 = vrot.slane %v1878_v61, 7  ;;  %v1926_v21 = vsel %vm1908_vm7, %v1925_v8, %v1875_v60  ;;  %v1730_v25 = vmax.f32 %v1722_v44, 0.0  ;;  %v2578_v15 = vmov 1934713408  }
 0x152   : > { %v1918_v24 = vrot.slane %v1874_v3, 7  ;;  %v1909_v10 = vsel %vm1908_vm7, %v1907_v48, %v1871_v59  ;;  %v1927_v26 = vsel %vm1910_vm8, %v1925_v8, %v1926_v21  ;;  %v1728_v19 = vmax.f32 %v1720_v18, 0.0 }
 0x153   : > { %v1911_v22 = vsel %vm1910_vm8, %v1907_v48, %v1909_v10  ;;  %v1928_v6 = vsel %vm1912_vm9, %v1925_v8, %v1927_v26  ;;  %v1933_v35 = vsel %vm1908_vm7, %v1932_v11, %v1877_v62  ;;  %v1734_v63 = vmax.f32 %v1729_v28, %v1730_v25 }
 0x154   : > { %v1913_v38 = vsel %vm1912_vm9, %v1907_v48, %v1911_v22  ;;  %v3112_v7 = vsel %vm1914_vm10, %v1925_v8, %v1928_v6  ;;  %v1919_v32 = vsel %vm1908_vm7, %v1918_v24, %v1873_v16  ;;  %v1733_v53 = vmax.f32 %v1727_v43, %v1728_v19 }
 0x155   : > { %v1915_v29 = vsel %vm1914_vm10, %v1907_v48, %v1913_v38  ;;  %v1920_v30 = vsel %vm1910_vm8, %v1918_v24, %v1919_v32  ;;  %v1934_v31 = vsel %vm1910_vm8, %v1932_v11, %v1933_v35  ;;  %v1790_v33 = vcombine.high %v1734_v63, %v1734_v63 }
 0x156   : > { %v1973_v5 = vcombine.low %v1915_v29, %v3112_v7  ;;  %v1921_v20 = vsel %vm1912_vm9, %v1918_v24, %v1920_v30  ;;  %v1797_v46 = vrot.slane %v1734_v63, %v3095_v2  ;;  %v1773_v40 = vcombine.high %v1733_v53, %v1733_v53 }
 0x157   : > { %v1780_v37 = vrot.slane %v1733_v53, %v3095_v2  ;;  %v1935_v1 = vsel %vm1912_vm9, %v1932_v11, %v1934_v31  ;;  %v1804_v23 = vrot.slane %v1790_v33, %v3095_v2  ;;  %v1922_v41 = vsel %vm1914_vm10, %v1918_v24, %v1921_v20 }
 0x158   : > { %v1805_v57 = vcombine.high %v1797_v46, %v1797_v46  ;;  %v1787_v27 = vrot.slane %v1773_v40, %v3095_v2  ;;  %v1936_v17 = vsel %vm1914_vm10, %v1932_v11, %v1935_v1  ;;  %v2325_v9 = vrot.slane %v1797_v46, 9 }
 0x159   : > { %v1788_v0 = vcombine.high %v1780_v37, %v1780_v37  ;;  %v1806_v42 = vcombine.high %v1804_v23, %v1804_v23  ;;  %v1975_v47 = vunpack.c.l.s4 %v2578_v15  ;;  %v2321_v51 = vrot.slane %v1780_v37, 9 }
 0x15a   : > { %v2326_v45 = vrot.slane %v1805_v57, 9  ;;  %v1789_v39 = vcombine.high %v1787_v27, %v1787_v27  ;;  %v2327_v49 = vrot.slane %v1804_v23, 9  ;;  %v1991_v54 = vcombine.low %v1922_v41, %v1936_v17 }
 0x15b   : > { %v2322_v13 = vrot.slane %v1788_v0, 9  ;;  %v2328_v36 = vrot.slane %v1806_v42, 9  ;;  %v2323_v55 = vrot.slane %v1787_v27, 9  ;;  %v1883_v52 = vmax.f32 %v1797_v46, %v2325_v9 }
 0x15c   : > { %v1884_v58 = vmax.f32 %v1805_v57, %v2326_v45  ;;  %v2324_v60 = vrot.slane %v1789_v39, 9  ;;  %v1976_v59 = vunpack.c.0.s8 %v1975_v47  ;;  %v1879_v4 = vmax.f32 %v1780_v37, %v2321_v51 }
 0x15d   : > { %v1880_v34 = vmax.f32 %v1788_v0, %v2322_v13  ;;  %v1886_v62 = vmax.f32 %v1806_v42, %v2328_v36  ;;  %v1885_v12 = vmax.f32 %v1804_v23, %v2327_v49  ;;  %v1881_v3 = vmax.f32 %v1787_v27, %v2323_v55 }
 0x15e   : > { %v1953_v56 = vrot.slane %v1884_v58, 7  ;;  %v1882_v61 = vmax.f32 %v1789_v39, %v2324_v60  ;;  %v1979_v21 = vsub.s32 %v1976_v59, %v3089_v50 }
 0x15f   : > { %v1939_v8 = vrot.slane %v1880_v34, 7  ;;  %v1960_v14 = vrot.slane %v1886_v62, 7 }
 0x160   : > { %v1954_v16 = vsel %vm1908_vm7, %v1953_v56, %v1883_v52  ;;  %v1946_v48 = vrot.slane %v1882_v61, 7  ;;  %v1980_v35 = vrot.slane %v1973_v5, %v1979_v21  ;;  %v1998_v20 = vrot.slane %v1991_v54, %v1979_v21 }
 0x161   : > { %v1940_v28 = vsel %vm1908_vm7, %v1939_v8, %v1879_v4  ;;  %v1955_v11 = vsel %vm1910_vm8, %v1953_v56, %v1954_v16  ;;  %v1961_v24 = vsel %vm1908_vm7, %v1960_v14, %v1885_v12 }
 0x162   : > { %v1941_v44 = vsel %vm1910_vm8, %v1939_v8, %v1940_v28  ;;  %v1956_v18 = vsel %vm1912_vm9, %v1953_v56, %v1955_v11  ;;  %v1947_v26 = vsel %vm1908_vm7, %v1946_v48, %v1881_v3  ;;  %v1962_v25 = vsel %vm1910_vm8, %v1960_v14, %v1961_v24 }
 0x163   : > { %v1942_v43 = vsel %vm1912_vm9, %v1939_v8, %v1941_v44  ;;  %v1957_v10 = vsel %vm1914_vm10, %v1953_v56, %v1956_v18  ;;  %v1948_v22 = vsel %vm1910_vm8, %v1946_v48, %v1947_v26  ;;  %v1963_v6 = vsel %vm1912_vm9, %v1960_v14, %v1962_v25 }
 0x164   : > { %v1943_v19 = vsel %vm1914_vm10, %v1939_v8, %v1942_v43  ;;  %v1949_v7 = vsel %vm1912_vm9, %v1946_v48, %v1948_v22  ;;  %v1964_v50 = vsel %vm1914_vm10, %v1960_v14, %v1963_v6 }
 0x165   : > { %v1982_v38 = vcombine.low %v1943_v19, %v1957_v10  ;;  %v1950_v32 = vsel %vm1914_vm10, %v1946_v48, %v1949_v7 }
 0x166   : > { %v2000_v53 = vcombine.low %v1950_v32, %v1964_v50 }
 0x167   : > { %v1989_v63 = vrot.slane %v1982_v38, %v1979_v21 }
 0x168   : > { %v2007_v31 = vrot.slane %v2000_v53, %v1979_v21 }
 0x169   : > { %v2329_v29 = vcombine.high %v1980_v35, %v1989_v63  ;;  %v2011_v30 = vcombine.low %v1980_v35, %v1989_v63 }
 0x16a   : > { %v2330_v46 = vcombine.high %v1998_v20, %v2007_v31  ;;  %v2035_v40 = vcombine.low %v1998_v20, %v2007_v31 }
 0x16b   : > { %v2029_v33 = vrot.slane %v2329_v29, %v3095_v2  ;;  %v2018_v37 = vrot.slane %v2011_v30, %v3095_v2 }
 0x16c   : > { %v2055_v1 = vrot.slane %v2330_v46, %v3095_v2  ;;  %v2042_v5 = vrot.slane %v2035_v40, %v3095_v2 }
 0x16d   : > { %2030 = vrot.lane.b32.xlu0 %v2029_v33, %s2579_s11 }
 0x16e   : > { %2056 = vrot.lane.b32.xlu1 %v2055_v1, %s2580_s14 }
 0x171   : > { %2043 = vrot.lane.b32.xlu0 %v2042_v5, %s2581_s15 }
 0x1df   : > { %v2031_v23 = vpop.permute.xlu0 %2030 }
 0x1e0   : > { %v2060_v57 = vsel %vm2059_vm11, %v2018_v37, %v2031_v23  ;;  %v2057_v0 = vpop.permute.xlu1 %2056 }
 0x1e3   : > { %v2044_v27 = vpop.permute.xlu0 %2043 }
 0x1e4   : > { %v2062_v41 = vsel %vm2061_vm12, %v2060_v57, %v2044_v27 }
 0x1e5   : > { %v2064_v17 = vsel %vm2063_vm13, %v2062_v41, %v2057_v0 }
 0x1e6   : > { %v2065_v42 = vpack.c.bf16 %v2064_v17, %v2064_v17 }
 0x1e8   : > { %2066 = vst [vmem:[%s168_s19] sm:$0x3] %v2065_v42 }
 0x1e9 PF: > { %s13_s12 = sadd.s32 1, %s2575_s12  }
 0x1ea   : > { %p10_p4 = scmp.ge.s32.totalorder %s13_s12, 4  }
 0x1ec   :  { %12 = sbr.rel (!%p10_p4) target bundleno = 1 (0x1), region = 72 }

// kernel: cnn_forward.9
= control target key start
LH: loop header
LB: loop body
LE: loop exit
PB: predicated region body
PF: predicated region fallthrough
CT: control target
= control target key end

     0   :  { %s352_s1 = inlined_call_operand.vmem [shape: bf16[256,128], index: 1, kind: input, shape index: {}]   ;;  %s353_s0 = inlined_call_operand.vmem [shape: bf16[8,256], index: 0, kind: input, shape index: {}]   ;;  %s354_s2 = inlined_call_operand.vmem [shape: f32[1,128], index: 2, kind: input, shape index: {}]   ;;  %s355_s3 = inlined_call_operand.vmem [shape: f32[8,128], index: 3, kind: output, shape index: {}]  }
   0x1   :  { %v257_v0 = vld [vmem:[%s352_s1 + $0x40] sm:$0xff]   ;;  %v259_v2 = vld [vmem:[%s352_s1 + $0x48] sm:$0xff]   ;;  %v261_v4 = vld [vmem:[%s352_s1 + $0x50] sm:$0xff]  }
   0x2   :  { %v258_v1 = vld [vmem:[%s352_s1] sm:$0xff]   ;;  %235 = vmatprep.subr.bf16.mxu0 %v257_v0  ;;  %v260_v3 = vld [vmem:[%s352_s1 + $0x8] sm:$0xff]   ;;  %v262_v5 = vld [vmem:[%s352_s1 + $0x10] sm:$0xff]  }
   0x3   :  { %236 = vmatpush3.bf16.msra.mxu0 %v258_v1  ;;  %v263_v6 = vld [vmem:[%s352_s1 + $0x58] sm:$0xff]   ;;  %v265_v8 = vld [vmem:[%s352_s1 + $0x60] sm:$0xff]   ;;  %v267_v10 = vld [vmem:[%s352_s1 + $0x68] sm:$0xff]  }
   0x4   :  { %237 = vmatprep.subr.bf16.mxu0 %v259_v2  ;;  %v264_v7 = vld [vmem:[%s352_s1 + $0x18] sm:$0xff]   ;;  %v266_v9 = vld [vmem:[%s352_s1 + $0x20] sm:$0xff]   ;;  %v268_v13 = vld [vmem:[%s352_s1 + $0x28] sm:$0xff]  }
   0x5   :  { %v21_v11 = vld [vmem:[%s353_s0] sm:$0xff]  ;;  %v269_v14 = vld [vmem:[%s352_s1 + $0x70] sm:$0xff]   ;;  %v271_v16 = vld [vmem:[%s352_s1 + $0x78] sm:$0xff]  }
   0x6   :  { %v217_v12 = vcombine.high %v21_v11, %v21_v11  ;;  %v270_v15 = vld [vmem:[%s352_s1 + $0x30] sm:$0xff]   ;;  %v272_v17 = vld [vmem:[%s352_s1 + $0x38] sm:$0xff]   ;;  %v216_v18 = vcombine.low %v21_v11, %v21_v11  ;;  %v234_v21 = vld [vmem:[%s354_s2] ss:$0 sm:$0xff] }
   0x7   :  { %238 = vmatpush3.bf16.msra.mxu0 %v260_v3 }
   0x8   :  { %239 = vmatprep.subr.bf16.mxu0 %v261_v4  ;;  %189 = vmatprep.mubr.bf16.mxu0 %v217_v12 }
   0xb   :  { %240 = vmatpush3.bf16.msra.mxu0 %v262_v5 }
   0xc   :  { %241 = vmatprep.subr.bf16.mxu0 %v263_v6 }
   0xf   :  { %242 = vmatpush3.bf16.msra.mxu0 %v264_v7 }
  0x10   :  { %243 = vmatprep.subr.bf16.mxu0 %v265_v8 }
  0x13   :  { %244 = vmatpush3.bf16.msra.mxu0 %v266_v9 }
  0x14   :  { %245 = vmatprep.subr.bf16.mxu0 %v267_v10 }
  0x17   :  { %246 = vmatpush3.bf16.msra.mxu0 %v268_v13 }
  0x18   :  { %247 = vmatprep.subr.bf16.mxu0 %v269_v14 }
  0x1b   :  { %248 = vmatpush3.bf16.msra.mxu0 %v270_v15 }
  0x1c   :  { %249 = vmatprep.subr.bf16.mxu0 %v271_v16 }
  0x1f   :  { %250 = vmatpush3.bf16.msra.mxu0 %v272_v17 }
  0x22   :  { %190 = vmatmul.mubr.bf16.vlgmr.msra.gmra.mrb[0].mxu0 %v216_v18 }
  0xf5   :  { %v251_v19 = vpop.f32.mrb[0].mxu0 }
  0xf6   :  { %v252_v20 = vpop.f32.mrb[1].mxu0 }
  0xf7   :  { %v253_v22 = vadd.f32 %v252_v20, %v251_v19  ;;  %v254_v23 = vpop.f32.mrb[2].mxu0 }
  0xf8   :  { %v255_v24 = vpop.f32.mrb[3].mxu0 }
  0xf9   :  { %v210_v25 = vadd.f32 %v253_v22, %v234_v21 }
  0xfb   :  { %211 = vst [vmem:[%s355_s3] sm:$0xff] %v210_v25 }

// kernel: cnn_forward.5
= control target key start
LH: loop header
LB: loop body
LE: loop exit
PB: predicated region body
PF: predicated region fallthrough
CT: control target
= control target key end

     0   :  { %s7650_s12 = smov 0   ;;  %s10012_s0 = inlined_call_operand.vmem [shape: bf16[2,18,18,3], index: 0, kind: input, shape index: {}]   ;;  %s10013_s1 = inlined_call_operand.vmem [shape: bf16[9,3,16], index: 1, kind: input, shape index: {}]   ;;  %s10014_s2 = inlined_call_operand.vmem [shape: f32[1,16], index: 2, kind: input, shape index: {}]   ;;  %s10015_s3 = inlined_call_operand.vmem [shape: bf16[2,8,128], index: 3, kind: output, shape index: {}]  }
   0x1 LB: > { %s6156_s13 = sadd.s32 4294967295, %s7618_s12   ;;  %p6160_p0 = scmp.ge.s32.totalorder %s7618_s12, 1  ;;  %s7618_s12 = sphi %s7650_s12, %s13_s12  }
   0x2   : > { %p137_p1 = scmp.lt.s32.totalorder %s7618_s12, 3 }
   0x4   : > { %p138_p2 = pnand %p6160_p0, %p137_p1 }
   0x6   : > { %141 = sbr.rel (%p138_p2) target bundleno = 791 (0x317), region = 32 }
   0xd   : > { %v6163_v0 = vld [vmem:[%s10013_s1 + $0x2] sm:$0x3]  ;;  %vm706_vm0 = vcmask 1040384   ;;  %vm707_vm1 = vcmask 1041408   ;;  %p160_p3 = scmp.lt.s32.totalorder %s6156_s13, 1  ;;  %v7620_v1 = vmov 65535  }
   0xe   : > { %v708_v2 = vsel %vm706_vm0, 4294967295, %v7620_v1  ;;  %v6390_v3 = vld [vmem:[%s10013_s1 + $0x8] sm:$0x3]  ;;  %v203_v5 = vld [vmem:[%s10013_s1] sm:$0x3]  ;;  %vm657_vm4 = vcmask 23552  }
   0xf   : > { %v7664_v4 = vsel %vm707_vm1, %v708_v2, 0  ;;  %s10146_s13 = smov (!%p160_p3, %s6156_s13), 1  ;;  %v6455_v9 = vld [vmem:[%s10013_s1 + $0xa] sm:$0x3]  ;;  %vm220_vm2 = vsmask.f32 3328 }
  0x10   : > { %v711_v6 = vand.u32 %v6163_v0, %v7664_v4  ;;  %v7673_v7 = vand.u32 %v6390_v3, %v7664_v4  ;;  %v7676_v8 = vand.u32 %v7664_v4, %v203_v5  ;;  %s7491_s22 = smul.u32 216, %s10146_s13  ;;  %v7683_v10 = vand.u32 %v6455_v9, %v7664_v4  ;;  %v6520_v26 = vld [vmem:[%s10013_s1 + $0xc] sm:$0x3]  ;;  %v6244_v31 = vld [vmem:[%s10013_s1 + $0x4] sm:$0x3]  ;;  %s7623_s11 = smov 16  }
  0x11   : > { %vm221_vm3 = vsmask.f32 7440  ;;  %v7722_v42 = vand.u32 %v6520_v26, %v7664_v4  ;;  %v7725_v46 = vand.u32 %v6244_v31, %v7664_v4  ;;  %vm1214_vm6 = vcmask 1042432   ;;  %s7624_s14 = smov 48   ;;  %s7625_s15 = smov 32  }
  0x12   : > { %10049 = vst [vmem:[#allocation2_spill] sm:$0xff] %v7673_v7  ;;  %6927 = vmatprep.subr.bf16.mxu1 %v711_v6  ;;  %7063 = vmatprep.subr.bf16.mxu0 %v7673_v7  ;;  %s7690_s25 = scalar_lea.vmem %s10012_s0, %s7491_s22  ;;  %vm7716_vm5 = vmor %vm220_vm2, %vm221_vm3  ;;  %vm1215_vm7 = vcmask 1046532   ;;  %vm5496_vm9 = vcmask 1041409   ;;  %vm5498_vm10 = vcmask 1043459   ;;  %vm5500_vm11 = vcmask 1045509   ;;  %s7626_s16 = smov 64  }
  0x13   : > { %6928 = vmatpush3.bf16.msra.mxu1 %v711_v6  ;;  %7064 = vmatpush3.bf16.msra.mxu0 %v7673_v7  ;;  %v171_v11 = vld [vmem:[%s7690_s25] sm:$0xf]  ;;  %v172_v12 = vld [vmem:[%s7690_s25 + $0x4] sm:$0xf]  ;;  %v204_v13 = vld [vmem:[%s7690_s25 + $0x8] sm:$0x1] }
  0x14   : > { %6961 = vmatprep.subr.bf16.mxu1 %v7676_v8  ;;  %7097 = vmatprep.subr.bf16.mxu0 %v7683_v10  ;;  %v224_v14 = vshrl.u32 %v171_v11, 16  ;;  %v227_v15 = vshll.u32 %v171_v11, 16  ;;  %v233_v16 = vshll.u32 %v172_v12, 16  ;;  %v237_v17 = vshrl.u32 %v172_v12, 16  ;;  %v6342_v18 = vld [vmem:[%s7690_s25 + $0xc] sm:$0xf]  ;;  %vm7937_vm8 = vmor %vm1214_vm6, %vm1215_vm7 }
  0x15   : > { %v243_v19 = vshll.u32 %v204_v13, 16  ;;  %v7699_v20 = vld [vmem:[%s7690_s25 + $0x10] sm:$0xf]  ;;  %v7702_v21 = vld [vmem:[%s7690_s25 + $0x14] sm:$0x1]  ;;  %v2031_v28 = vshrl.u32 %v6342_v18, 16 }
  0x16   : > { %v226_v22 = vrot.slane %v224_v14, 4  ;;  %v229_v23 = vrot.slane %v227_v15, 5  ;;  %v235_v24 = vrot.slane %v233_v16, 5  ;;  %v239_v25 = vrot.slane %v237_v17, 4  ;;  %v173_v36 = vld [vmem:[%s7690_s25 + $0xc] sm:$0xf] }
  0x17   : > { %v245_v27 = vrot.slane %v243_v19, 5  ;;  %v2034_v29 = vshll.u32 %v6342_v18, 16  ;;  %v2040_v30 = vshll.u32 %v7699_v20, 16  ;;  %v2044_v34 = vshrl.u32 %v7699_v20, 16  ;;  %v174_v41 = vld [vmem:[%s7690_s25 + $0x10] sm:$0xf] }
  0x18   : > { %v230_v32 = vor.u32 %v229_v23, %v226_v22  ;;  %v240_v33 = vor.u32 %v239_v25, %v235_v24  ;;  %v2050_v35 = vshll.u32 %v7702_v21, 16  ;;  %v2033_v38 = vrot.slane %v2031_v28, 4  ;;  %v205_v49 = vld [vmem:[%s7690_s25 + $0x14] sm:$0x1]  ;;  %v6345_v60 = vld [vmem:[%s7690_s25 + $0x18] sm:$0xf] }
  0x19   : > { %v2036_v39 = vrot.slane %v2034_v29, 5  ;;  %v2042_v40 = vrot.slane %v2040_v30, 5  ;;  %v2046_v45 = vrot.slane %v2044_v34, 4  ;;  %v248_v50 = vshrl.u32 %v173_v36, 16  ;;  %v7734_v1 = vld [vmem:[%s7690_s25 + $0x1c] sm:$0xf] }
  0x1a   : > { %v231_v43 = vrot.slane %v230_v32, 4  ;;  %v241_v44 = vrot.slane %v240_v33, 4  ;;  %v2052_v48 = vrot.slane %v2050_v35, 5  ;;  %v251_v51 = vshll.u32 %v173_v36, 16  ;;  %v7742_v9 = vld [vmem:[%s7690_s25 + $0x20] sm:$0x1] }
  0x1b   : > { %v2037_v47 = vor.u32 %v2036_v39, %v2033_v38  ;;  %v2047_v54 = vor.u32 %v2046_v45, %v2042_v40  ;;  %v257_v55 = vshll.u32 %v174_v41, 16  ;;  %v250_v58 = vrot.slane %v248_v50, 4  ;;  %v175_v25 = vld [vmem:[%s7690_s25 + $0x18] sm:$0xf]  ;;  %v176_v30 = vld [vmem:[%s7690_s25 + $0x1c] sm:$0xf] }
  0x1c   : > { %v236_v52 = vsel %vm7716_vm5, %v231_v43, %v235_v24  ;;  %v246_v53 = vsel %vm7716_vm5, %v241_v44, %v245_v27  ;;  %v253_v59 = vrot.slane %v251_v51, 5  ;;  %v261_v63 = vshrl.u32 %v174_v41, 16  ;;  %v206_v38 = vld [vmem:[%s7690_s25 + $0x20] sm:$0x1]  ;;  %s7627_s17 = smov 80   ;;  %s7628_s18 = smov 96  }
  0x1d   : > { %v6164_v56 = vcombine.low %v236_v52, %v246_v53  ;;  %v2038_v57 = vrot.slane %v2037_v47, 4  ;;  %v2048_v61 = vrot.slane %v2047_v54, 4  ;;  %v259_v62 = vrot.slane %v257_v55, 5  ;;  %v6348_v47 = vld [vmem:[%s7690_s25 + $0x24] sm:$0xf]  ;;  %s7629_s19 = smov 112  }
  0x1e   : > { %v267_v0 = vshll.u32 %v205_v49, 16  ;;  %v2774_v3 = vrot.slane %v7699_v20, 5  ;;  %v2777_v5 = vrot.slane %v7702_v21, 5  ;;  %v254_v6 = vor.u32 %v253_v59, %v250_v58  ;;  %v7765_v52 = vld [vmem:[%s7690_s25 + $0x28] sm:$0xf]  ;;  %s6162_s20 = sshll.u32 %s10146_s13, 2 }
  0x1f   : > { %6929 = vmatprep.mubr.msk.bf16.mxu1 %vm657_vm4, %v6164_v56  ;;  %v2043_v2 = vsel %vm7716_vm5, %v2038_v57, %v2042_v40  ;;  %v2053_v11 = vsel %vm7716_vm5, %v2048_v61, %v2052_v48  ;;  %v263_v12 = vrot.slane %v261_v63, 4  ;;  %v2055_v14 = vshrl.u32 %v6345_v60, 16  ;;  %v7771_v59 = vld [vmem:[%s7690_s25 + $0x2c] sm:$0x1]  ;;  %v7970_v21 = vld [vmem:[%s7690_s25 + $0x7c] sm:$0xf]  ;;  %s168_s23 = scalar_lea.vmem %s10015_s3, %s6162_s20 }
  0x20   : > { %v269_v13 = vrot.slane %v267_v0, 5  ;;  %v6391_v15 = vcombine.low %v2043_v2, %v2053_v11  ;;  %v255_v16 = vrot.slane %v254_v6, 4  ;;  %v2058_v17 = vshll.u32 %v6345_v60, 16  ;;  %v177_v6 = vld [vmem:[%s7690_s25 + $0x24] sm:$0xf] }
  0x21   : > { %v2064_v18 = vshll.u32 %v7734_v1, 16  ;;  %v264_v19 = vor.u32 %v263_v12, %v259_v62  ;;  %v2057_v22 = vrot.slane %v2055_v14, 4  ;;  %v2068_v23 = vshrl.u32 %v7734_v1, 16 }
  0x22   : > { %v2074_v24 = vshll.u32 %v7742_v9, 16  ;;  %7065 = vmatprep.mubr.msk.bf16.mxu0 %vm657_vm4, %v6391_v15  ;;  %v260_v26 = vsel %vm7716_vm5, %v255_v16, %v259_v62  ;;  %v2060_v27 = vrot.slane %v2058_v17, 5  ;;  %v2781_v29 = vrot.slane %v7734_v1, 5  ;;  %v178_v15 = vld [vmem:[%s7690_s25 + $0x28] sm:$0xf] }
  0x23   : > { %v2066_v28 = vrot.slane %v2064_v18, 5  ;;  %v265_v31 = vrot.slane %v264_v19, 4  ;;  %v2070_v32 = vrot.slane %v2068_v23, 4  ;;  %v2784_v34 = vrot.slane %v7742_v9, 5  ;;  %v207_v23 = vld [vmem:[%s7690_s25 + $0x2c] sm:$0x1] }
  0x24   : > { %v2076_v33 = vrot.slane %v2074_v24, 5  ;;  %v2061_v35 = vor.u32 %v2060_v27, %v2057_v22  ;;  %v7758_v36 = vrot.slane %v2781_v29, 4  ;;  %v272_v39 = vshrl.u32 %v175_v25, 16 }
  0x25   : > { %v275_v40 = vshll.u32 %v175_v25, 16  ;;  %v270_v41 = vsel %vm7716_vm5, %v265_v31, %v269_v13  ;;  %v2071_v43 = vor.u32 %v2070_v32, %v2066_v28  ;;  %v281_v44 = vshll.u32 %v176_v30, 16  ;;  %v6351_v31 = vld [vmem:[%s7690_s25 + $0x30] sm:$0xf] }
  0x26   : > { %v285_v45 = vshrl.u32 %v176_v30, 16  ;;  %v6165_v48 = vcombine.low %v260_v26, %v270_v41  ;;  %v2062_v49 = vrot.slane %v2061_v35, 4  ;;  %v274_v50 = vrot.slane %v272_v39, 4  ;;  %v7791_v39 = vld [vmem:[%s7690_s25 + $0x34] sm:$0xf] }
  0x27   : > { %v277_v51 = vrot.slane %v275_v40, 5  ;;  %v2072_v53 = vrot.slane %v2071_v43, 4  ;;  %v283_v54 = vrot.slane %v281_v44, 5  ;;  %v291_v56 = vshll.u32 %v206_v38, 16 }
  0x28   : > { %v287_v55 = vrot.slane %v285_v45, 4  ;;  %6930 = vmatmul.mubr.msk.bf16.vlgmr.msra.gmra.mrb[0].mxu1 %vm657_vm4, %v6165_v48  ;;  %v2067_v57 = vsel %vm7716_vm5, %v2062_v49, %v2066_v28  ;;  %v2079_v60 = vshrl.u32 %v6348_v47, 16  ;;  %v2082_v61 = vshll.u32 %v6348_v47, 16  ;;  %v7798_v47 = vld [vmem:[%s7690_s25 + $0x38] sm:$0x1] }
  0x29   : > { %v278_v58 = vor.u32 %v277_v51, %v274_v50  ;;  %6962 = vmatpush3.bf16.msra.mxu1 %v7676_v8  ;;  %v2077_v62 = vsel %vm7716_vm5, %v2072_v53, %v2076_v33  ;;  %v293_v0 = vrot.slane %v291_v56, 5  ;;  %v2088_v2 = vshll.u32 %v7765_v52, 16 }
  0x2a   : > { %v288_v63 = vor.u32 %v287_v55, %v283_v54  ;;  %v6392_v11 = vcombine.low %v2067_v57, %v2077_v62  ;;  %v2081_v13 = vrot.slane %v2079_v60, 4  ;;  %v2084_v14 = vrot.slane %v2082_v61, 5  ;;  %6995 = vmatprep.subr.bf16.mxu1 %v7725_v46  ;;  %v179_v60 = vld [vmem:[%s7690_s25 + $0x30] sm:$0xf] }
  0x2b   : > { %v279_v12 = vrot.slane %v278_v58, 4  ;;  %v2090_v17 = vrot.slane %v2088_v2, 5  ;;  %v2092_v8 = vshrl.u32 %v7765_v52, 16  ;;  %v2098_v18 = vshll.u32 %v7771_v59, 16  ;;  %v180_v2 = vld [vmem:[%s7690_s25 + $0x34] sm:$0xf] }
  0x2c   : > { %v289_v16 = vrot.slane %v288_v63, 4  ;;  %7066 = vmatmul.mubr.msk.bf16.vlgmr.msra.gmra.mrb[0].mxu0 %vm657_vm4, %v6392_v11  ;;  %v2085_v22 = vor.u32 %v2084_v14, %v2081_v13  ;;  %v296_v24 = vshrl.u32 %v177_v6, 16  ;;  %v299_v25 = vshll.u32 %v177_v6, 16  ;;  %v208_v14 = vld [vmem:[%s7690_s25 + $0x38] sm:$0x1] }
  0x2d   : > { %v284_v19 = vsel %vm7716_vm5, %v279_v12, %v283_v54  ;;  %7098 = vmatpush3.bf16.msra.mxu0 %v7683_v10  ;;  %v2094_v27 = vrot.slane %v2092_v8, 4  ;;  %v2100_v28 = vrot.slane %v2098_v18, 5  ;;  %v305_v30 = vshll.u32 %v178_v15, 16 }
  0x2e   : > { %v294_v26 = vsel %vm7716_vm5, %v289_v16, %v293_v0  ;;  %v2086_v33 = vrot.slane %v2085_v22, 4  ;;  %v298_v35 = vrot.slane %v296_v24, 4  ;;  %v301_v38 = vrot.slane %v299_v25, 5  ;;  %7131 = vmatprep.subr.bf16.mxu0 %v7722_v42  ;;  %v6354_v24 = vld [vmem:[%s7690_s25 + $0x3c] sm:$0xf] }
  0x2f   : > { %v6166_v32 = vcombine.low %v284_v19, %v294_v26  ;;  %v2095_v40 = vor.u32 %v2094_v27, %v2090_v17  ;;  %v307_v41 = vrot.slane %v305_v30, 5  ;;  %v309_v43 = vshrl.u32 %v178_v15, 16  ;;  %v7815_v30 = vld [vmem:[%s7690_s25 + $0x40] sm:$0xf] }
  0x30   : > { %v315_v10 = vshll.u32 %v207_v23, 16  ;;  %v2091_v44 = vsel %vm7716_vm5, %v2086_v33, %v2090_v17  ;;  %v302_v45 = vor.u32 %v301_v38, %v298_v35  ;;  %v2103_v48 = vshrl.u32 %v6351_v31, 16 }
  0x31   : > { %6933 = vmatprep.mubr.msk.bf16.mxu1 %vm657_vm4, %v6166_v32  ;;  %v2106_v49 = vshll.u32 %v6351_v31, 16  ;;  %v2096_v50 = vrot.slane %v2095_v40, 4  ;;  %v311_v51 = vrot.slane %v309_v43, 4  ;;  %v2112_v54 = vshll.u32 %v7791_v39, 16  ;;  %v7820_v43 = vld [vmem:[%s7690_s25 + $0x44] sm:$0x1] }
  0x32   : > { %v317_v53 = vrot.slane %v315_v10, 5  ;;  %v303_v55 = vrot.slane %v302_v45, 4  ;;  %v2105_v56 = vrot.slane %v2103_v48, 4  ;;  %v2116_v58 = vshrl.u32 %v7791_v39, 16 }
  0x33   : > { %v2108_v57 = vrot.slane %v2106_v49, 5  ;;  %v2101_v61 = vsel %vm7716_vm5, %v2096_v50, %v2100_v28  ;;  %v312_v62 = vor.u32 %v311_v51, %v307_v41  ;;  %v2114_v63 = vrot.slane %v2112_v54, 5  ;;  %v181_v50 = vld [vmem:[%s7690_s25 + $0x3c] sm:$0xf] }
  0x34   : > { %v2122_v0 = vshll.u32 %v7798_v47, 16  ;;  %v6393_v6 = vcombine.low %v2091_v44, %v2101_v61  ;;  %v308_v11 = vsel %vm7716_vm5, %v303_v55, %v307_v41  ;;  %v2118_v13 = vrot.slane %v2116_v58, 4 }
  0x35   : > { %v2109_v12 = vor.u32 %v2108_v57, %v2105_v56  ;;  %v313_v15 = vrot.slane %v312_v62, 4  ;;  %v320_v17 = vshrl.u32 %v179_v60, 16  ;;  %v323_v8 = vshll.u32 %v179_v60, 16  ;;  %v182_v56 = vld [vmem:[%s7690_s25 + $0x40] sm:$0xf] }
  0x36   : > { %v2124_v16 = vrot.slane %v2122_v0, 5  ;;  %7069 = vmatprep.mubr.msk.bf16.mxu0 %vm657_vm4, %v6393_v6  ;;  %v2119_v19 = vor.u32 %v2118_v13, %v2114_v63  ;;  %v329_v22 = vshll.u32 %v180_v2, 16  ;;  %v333_v23 = vshrl.u32 %v180_v2, 16  ;;  %v209_v13 = vld [vmem:[%s7690_s25 + $0x44] sm:$0x1] }
  0x37   : > { %v2110_v18 = vrot.slane %v2109_v12, 4  ;;  %v318_v25 = vsel %vm7716_vm5, %v313_v15, %v317_v53  ;;  %v322_v26 = vrot.slane %v320_v17, 4  ;;  %v325_v27 = vrot.slane %v323_v8, 5  ;;  %v6357_v15 = vld [vmem:[%s7690_s25 + $0x48] sm:$0xf] }
  0x38   : > { %v339_v28 = vshll.u32 %v208_v14, 16  ;;  %v6167_v31 = vcombine.low %v308_v11, %v318_v25  ;;  %v2120_v33 = vrot.slane %v2119_v19, 4  ;;  %v331_v35 = vrot.slane %v329_v22, 5  ;;  %v7838_v19 = vld [vmem:[%s7690_s25 + $0x4c] sm:$0xf] }
  0x39   : > { %v2115_v32 = vsel %vm7716_vm5, %v2110_v18, %v2114_v63  ;;  %v326_v38 = vor.u32 %v325_v27, %v322_v26  ;;  %v335_v40 = vrot.slane %v333_v23, 4  ;;  %v2127_v10 = vshrl.u32 %v6354_v24, 16 }
  0x3a   : > { %v341_v41 = vrot.slane %v339_v28, 5  ;;  %6934 = vmatmul.mubr.msk.bf16.gmra.mrb[4].mxu1 %vm657_vm4, %v6167_v31  ;;  %v2125_v44 = vsel %vm7716_vm5, %v2120_v33, %v2124_v16  ;;  %v2130_v45 = vshll.u32 %v6354_v24, 16  ;;  %v2136_v48 = vshll.u32 %v7815_v30, 16 }
  0x3b   : > { %v2140_v49 = vshrl.u32 %v7815_v30, 16  ;;  %v6394_v51 = vcombine.low %v2115_v32, %v2125_v44  ;;  %v327_v53 = vrot.slane %v326_v38, 4  ;;  %v336_v54 = vor.u32 %v335_v40, %v331_v35 }
  0x3c   : > { %v2129_v55 = vrot.slane %v2127_v10, 4  ;;  %v2132_v57 = vrot.slane %v2130_v45, 5  ;;  %v2138_v58 = vrot.slane %v2136_v48, 5  ;;  %v2146_v61 = vshll.u32 %v7820_v43, 16 }
  0x3d   : > { %v2142_v60 = vrot.slane %v2140_v49, 4  ;;  %7070 = vmatmul.mubr.msk.bf16.gmra.mrb[4].mxu0 %vm657_vm4, %v6394_v51  ;;  %v332_v62 = vsel %vm7716_vm5, %v327_v53, %v331_v35  ;;  %v337_v63 = vrot.slane %v336_v54, 4  ;;  %v344_v0 = vshrl.u32 %v181_v50, 16  ;;  %v7846_v35 = vld [vmem:[%s7690_s25 + $0x50] sm:$0x1] }
  0x3e   : > { %v347_v2 = vshll.u32 %v181_v50, 16  ;;  %v2133_v6 = vor.u32 %v2132_v57, %v2129_v55  ;;  %v2148_v12 = vrot.slane %v2146_v61, 5  ;;  %v353_v14 = vshll.u32 %v182_v56, 16  ;;  %v7853_v49 = vld [vmem:[%s7690_s25 + $0x4c] sm:$0xf] }
  0x3f   : > { %v2143_v11 = vor.u32 %v2142_v60, %v2138_v58  ;;  %v342_v16 = vsel %vm7716_vm5, %v337_v63, %v341_v41  ;;  %v346_v17 = vrot.slane %v344_v0, 4  ;;  %v357_v18 = vshrl.u32 %v182_v56, 16  ;;  %v7850_v41 = vld [vmem:[%s7690_s25 + $0x48] sm:$0xf] }
  0x40   : > { %v349_v8 = vrot.slane %v347_v2, 5  ;;  %v6168_v22 = vcombine.low %v332_v62, %v342_v16  ;;  %v2134_v23 = vrot.slane %v2133_v6, 4  ;;  %v355_v25 = vrot.slane %v353_v14, 5  ;;  %v6360_v2 = vld [vmem:[%s7690_s25 + $0x54] sm:$0xf] }
  0x41   : > { %v2144_v24 = vrot.slane %v2143_v11, 4  ;;  %v359_v27 = vrot.slane %v357_v18, 4  ;;  %v363_v28 = vshll.u32 %v209_v13, 16  ;;  %v2151_v31 = vshrl.u32 %v6357_v15, 16 }
  0x42   : > { %v350_v26 = vor.u32 %v349_v8, %v346_v17  ;;  %6937 = vmatprep.mubr.msk.bf16.mxu1 %vm657_vm4, %v6168_v22  ;;  %v2139_v32 = vsel %vm7716_vm5, %v2134_v23, %v2138_v58  ;;  %v2154_v38 = vshll.u32 %v6357_v15, 16  ;;  %v2160_v40 = vshll.u32 %v7838_v19, 16  ;;  %v210_v58 = vld [vmem:[%s7690_s25 + $0x50] sm:$0x1]  ;;  %v7869_v8 = vld [vmem:[%s7690_s25 + $0x58] sm:$0xf] }
  0x43   : > { %v2149_v33 = vsel %vm7716_vm5, %v2144_v24, %v2148_v12  ;;  %v360_v45 = vor.u32 %v359_v27, %v355_v25  ;;  %v365_v48 = vrot.slane %v363_v28, 5  ;;  %v2153_v50 = vrot.slane %v2151_v31, 4  ;;  %v7875_v28 = vld [vmem:[%s7690_s25 + $0x5c] sm:$0x1] }
  0x44   : > { %v6395_v10 = vcombine.low %v2139_v32, %v2149_v33  ;;  %v351_v44 = vrot.slane %v350_v26, 4  ;;  %v2156_v51 = vrot.slane %v2154_v38, 5  ;;  %v2162_v53 = vrot.slane %v2160_v40, 5 }
  0x45   : > { %v2164_v54 = vshrl.u32 %v7838_v19, 16  ;;  %v361_v56 = vrot.slane %v360_v45, 4  ;;  %v2170_v57 = vshll.u32 %v7846_v35, 16  ;;  %v368_v60 = vshrl.u32 %v7850_v41, 16 }
  0x46   : > { %7073 = vmatprep.mubr.msk.bf16.mxu0 %vm657_vm4, %v6395_v10  ;;  %v356_v55 = vsel %vm7716_vm5, %v351_v44, %v355_v25  ;;  %v2157_v61 = vor.u32 %v2156_v51, %v2153_v50  ;;  %v371_v63 = vshll.u32 %v7850_v41, 16  ;;  %v377_v0 = vshll.u32 %v7853_v49, 16  ;;  %v7879_v10 = vld [vmem:[%s7690_s25 + $0x54] sm:$0xf]  ;;  %v7885_v51 = vld [vmem:[%s7690_s25 + $0x58] sm:$0xf] }
  0x47   : > { %v2166_v62 = vrot.slane %v2164_v54, 4  ;;  %v366_v6 = vsel %vm7716_vm5, %v361_v56, %v365_v48  ;;  %v2172_v11 = vrot.slane %v2170_v57, 5  ;;  %v370_v12 = vrot.slane %v368_v60, 4 }
  0x48   : > { %v381_v13 = vshrl.u32 %v7853_v49, 16  ;;  %v6169_v14 = vcombine.low %v356_v55, %v366_v6  ;;  %v2158_v15 = vrot.slane %v2157_v61, 4  ;;  %v373_v17 = vrot.slane %v371_v63, 5  ;;  %v211_v61 = vld [vmem:[%s7690_s25 + $0x5c] sm:$0x1] }
  0x49   : > { %v2167_v16 = vor.u32 %v2166_v62, %v2162_v53  ;;  %v379_v18 = vrot.slane %v377_v0, 5  ;;  %v387_v23 = vshll.u32 %v210_v58, 16  ;;  %v2175_v24 = vshrl.u32 %v6360_v2, 16 }
  0x4a   : > { %v383_v22 = vrot.slane %v381_v13, 4  ;;  %6938 = vmatmul.mubr.msk.bf16.gmra.mrb[8].mxu1 %vm657_vm4, %v6169_v14  ;;  %v2163_v25 = vsel %vm7716_vm5, %v2158_v15, %v2162_v53  ;;  %v374_v27 = vor.u32 %v373_v17, %v370_v12  ;;  %v2178_v31 = vshll.u32 %v6360_v2, 16 }
  0x4b   : > { %v2168_v26 = vrot.slane %v2167_v16, 4  ;;  %v389_v33 = vrot.slane %v387_v23, 5  ;;  %v2177_v38 = vrot.slane %v2175_v24, 4  ;;  %v2184_v40 = vshll.u32 %v7869_v8, 16  ;;  %v7899_v16 = vld [vmem:[%s7690_s25 + $0x64] sm:$0xf] }
  0x4c   : > { %v384_v32 = vor.u32 %v383_v22, %v379_v18  ;;  %v375_v45 = vrot.slane %v374_v27, 4  ;;  %v2180_v48 = vrot.slane %v2178_v31, 5  ;;  %v2188_v50 = vshrl.u32 %v7869_v8, 16 }
  0x4d   : > { %v2173_v44 = vsel %vm7716_vm5, %v2168_v26, %v2172_v11  ;;  %v2186_v55 = vrot.slane %v2184_v40, 5  ;;  %v2194_v56 = vshll.u32 %v7875_v28, 16  ;;  %v392_v62 = vshrl.u32 %v7879_v10, 16  ;;  %v6363_v11 = vld [vmem:[%s7690_s25 + $0x60] sm:$0xf] }
  0x4e   : > { %v6396_v53 = vcombine.low %v2163_v25, %v2173_v44  ;;  %v385_v54 = vrot.slane %v384_v32, 4  ;;  %v380_v57 = vsel %vm7716_vm5, %v375_v45, %v379_v18  ;;  %v2181_v58 = vor.u32 %v2180_v48, %v2177_v38  ;;  %v7906_v26 = vld [vmem:[%s7690_s25 + $0x68] sm:$0x1]  ;;  %v7910_v44 = vld [vmem:[%s7690_s25 + $0x60] sm:$0xf] }
  0x4f   : > { %v2190_v60 = vrot.slane %v2188_v50, 4  ;;  %v2196_v0 = vrot.slane %v2194_v56, 5  ;;  %v395_v2 = vshll.u32 %v7879_v10, 16  ;;  %v401_v6 = vshll.u32 %v7885_v51, 16 }
  0x50   : > { %7074 = vmatmul.mubr.msk.bf16.gmra.mrb[8].mxu0 %vm657_vm4, %v6396_v53  ;;  %v390_v63 = vsel %vm7716_vm5, %v385_v54, %v389_v33  ;;  %v2182_v13 = vrot.slane %v2181_v58, 4  ;;  %v394_v15 = vrot.slane %v392_v62, 4  ;;  %v405_v22 = vshrl.u32 %v7885_v51, 16  ;;  %v7916_v54 = vld [vmem:[%s7690_s25 + $0x64] sm:$0xf] }
  0x51   : > { %v6170_v12 = vcombine.low %v380_v57, %v390_v63  ;;  %v2191_v14 = vor.u32 %v2190_v60, %v2186_v55  ;;  %v397_v17 = vrot.slane %v395_v2, 5  ;;  %v403_v18 = vrot.slane %v401_v6, 5  ;;  %v212_v6 = vld [vmem:[%s7690_s25 + $0x68] sm:$0x1] }
  0x52   : > { %v411_v23 = vshll.u32 %v211_v61, 16  ;;  %v2187_v24 = vsel %vm7716_vm5, %v2182_v13, %v2186_v55  ;;  %v2199_v27 = vshrl.u32 %v6363_v11, 16  ;;  %v2202_v31 = vshll.u32 %v6363_v11, 16 }
  0x53   : > { %6941 = vmatprep.mubr.msk.bf16.mxu1 %vm657_vm4, %v6170_v12  ;;  %v2192_v25 = vrot.slane %v2191_v14, 4  ;;  %v398_v32 = vor.u32 %v397_v17, %v394_v15  ;;  %v407_v33 = vrot.slane %v405_v22, 4  ;;  %v2208_v40 = vshll.u32 %v7899_v16, 16  ;;  %v6423_v22 = vld [vmem:[%s7690_s25 + $0xc] sm:$0xe] }
  0x54   : > { %v413_v38 = vrot.slane %v411_v23, 5  ;;  %v2201_v48 = vrot.slane %v2199_v27, 4  ;;  %v2204_v50 = vrot.slane %v2202_v31, 5  ;;  %v2212_v53 = vshrl.u32 %v7899_v16, 16 }
  0x55   : > { %v2197_v45 = vsel %vm7716_vm5, %v2192_v25, %v2196_v0  ;;  %v399_v56 = vrot.slane %v398_v32, 4  ;;  %v408_v57 = vor.u32 %v407_v33, %v403_v18  ;;  %v2210_v58 = vrot.slane %v2208_v40, 5 }
  0x56   : > { %v6397_v55 = vcombine.low %v2187_v24, %v2197_v45  ;;  %v2205_v60 = vor.u32 %v2204_v50, %v2201_v48  ;;  %v2214_v61 = vrot.slane %v2212_v53, 4  ;;  %v2218_v62 = vshll.u32 %v7906_v26, 16 }
  0x57   : > { %v416_v63 = vshrl.u32 %v7910_v44, 16  ;;  %v404_v0 = vsel %vm7716_vm5, %v399_v56, %v403_v18  ;;  %v409_v2 = vrot.slane %v408_v57, 4  ;;  %v419_v11 = vshll.u32 %v7910_v44, 16  ;;  %v7931_v18 = vld [vmem:[%s7690_s25 + $0x6c] sm:$0xf] }
  0x58   : > { %7077 = vmatprep.mubr.msk.bf16.mxu0 %vm657_vm4, %v6397_v55  ;;  %v425_v12 = vshll.u32 %v7916_v54, 16  ;;  %v2206_v13 = vrot.slane %v2205_v60, 4  ;;  %v2215_v14 = vor.u32 %v2214_v61, %v2210_v58  ;;  %v2220_v15 = vrot.slane %v2218_v62, 5  ;;  %v7944_v55 = vld [vmem:[%s7690_s25 + $0x70] sm:$0xf] }
  0x59   : > { %v418_v17 = vrot.slane %v416_v63, 4  ;;  %v414_v23 = vsel %vm7716_vm5, %v409_v2, %v413_v38  ;;  %v421_v24 = vrot.slane %v419_v11, 5  ;;  %v429_v27 = vshrl.u32 %v7916_v54, 16  ;;  %v213_v2 = vld [vmem:[%s7690_s25 + $0x74] sm:$0x1] }
  0x5a   : > { %v427_v25 = vrot.slane %v425_v12, 5  ;;  %v6171_v31 = vcombine.low %v404_v0, %v414_v23  ;;  %v2211_v32 = vsel %vm7716_vm5, %v2206_v13, %v2210_v58  ;;  %v2216_v33 = vrot.slane %v2215_v14, 4  ;;  %v214_v23 = vld [vmem:[%s7690_s25 + $0x80] sm:$0x1] }
  0x5b   : > { %v435_v40 = vshll.u32 %v212_v6, 16  ;;  %v422_v38 = vor.u32 %v421_v24, %v418_v17  ;;  %v431_v48 = vrot.slane %v429_v27, 4  ;;  %v6439_v50 = vrot.slane %v6423_v22, 9  ;;  %v6424_v6 = vld [vmem:[%s7690_s25 + $0x18] sm:$0xe] }
  0x5c   : > { %v2776_v53 = vrot.slane %v2774_v3, 4  ;;  %6942 = vmatmul.mubr.msk.bf16.gmra.mrb[12].mxu1 %vm657_vm4, %v6171_v31  ;;  %v2221_v56 = vsel %vm7716_vm5, %v2216_v33, %v2220_v15  ;;  %v440_v58 = vshrl.u32 %v7931_v18, 16  ;;  %v443_v60 = vshll.u32 %v7931_v18, 16  ;;  %v7963_v15 = vld [vmem:[%s7690_s25 + $0x78] sm:$0xf] }
  0x5d   : > { %v437_v57 = vrot.slane %v435_v40, 5  ;;  %v6398_v61 = vcombine.low %v2211_v32, %v2221_v56  ;;  %v423_v62 = vrot.slane %v422_v38, 4  ;;  %v432_v63 = vor.u32 %v431_v48, %v427_v25  ;;  %v6425_v38 = vld [vmem:[%s7690_s25 + $0x24] sm:$0xe] }
  0x5e   : > { %v2775_v0 = vsel %vm7937_vm8, %v6439_v50, %v2774_v3  ;;  %v2778_v11 = vsel %vm7937_vm8, %v2776_v53, %v2777_v5  ;;  %v442_v12 = vrot.slane %v440_v58, 4  ;;  %v445_v13 = vrot.slane %v443_v60, 5 }
  0x5f   : > { %v449_v14 = vshll.u32 %v7944_v55, 16  ;;  %7078 = vmatmul.mubr.msk.bf16.gmra.mrb[12].mxu0 %vm657_vm4, %v6398_v61  ;;  %v428_v20 = vsel %vm7716_vm5, %v423_v62, %v427_v25  ;;  %v433_v3 = vrot.slane %v432_v63, 4  ;;  %v6456_v17 = vcombine.low %v2775_v0, %v2778_v11  ;;  %v7989_v61 = vld [vmem:[%s7690_s25 + $0x84] sm:$0xf] }
  0x60   : > { %v453_v22 = vshrl.u32 %v7944_v55, 16  ;;  %v446_v5 = vor.u32 %v445_v13, %v442_v12  ;;  %v459_v27 = vshll.u32 %v213_v2, 16  ;;  %v6440_v31 = vrot.slane %v6424_v6, 9 }
  0x61   : > { %v451_v24 = vrot.slane %v449_v14, 5  ;;  %v438_v32 = vsel %vm7716_vm5, %v433_v3, %v437_v57  ;;  %7099 = vmatprep.mubr.msk.bf16.mxu0 %vm657_vm4, %v6456_v17  ;;  %v2785_v25 = vsel %vm7937_vm8, %v7758_v36, %v2784_v34  ;;  %v464_v40 = vshrl.u32 %v7963_v15, 16 }
  0x62   : > { %v455_v33 = vrot.slane %v453_v22, 4  ;;  %v6172_v48 = vcombine.low %v428_v20, %v438_v32  ;;  %v447_v50 = vrot.slane %v446_v5, 4  ;;  %v461_v53 = vrot.slane %v459_v27, 5  ;;  %v215_v20 = vld [vmem:[%s7690_s25 + $0x8c] sm:$0x1] }
  0x63   : > { %v2782_v56 = vsel %vm7937_vm8, %v6440_v31, %v2781_v29  ;;  %v466_v60 = vrot.slane %v464_v40, 4  ;;  %v467_v9 = vshll.u32 %v7963_v15, 16  ;;  %v473_v36 = vshll.u32 %v7970_v21, 16  ;;  %v7997_v29 = vld [vmem:[%s7690_s25 + $0x88] sm:$0xf] }
  0x64   : > { %v456_v57 = vor.u32 %v455_v33, %v451_v24  ;;  %v6457_v58 = vcombine.low %v2782_v56, %v2785_v25  ;;  %6945 = vmatprep.mubr.msk.bf16.mxu1 %vm657_vm4, %v6172_v48  ;;  %v452_v34 = vsel %vm7716_vm5, %v447_v50, %v451_v24  ;;  %v477_v1 = vshrl.u32 %v7970_v21, 16  ;;  %v6426_v5 = vld [vmem:[%s7690_s25 + $0x30] sm:$0xe] }
  0x65   : > { %v483_v62 = vshll.u32 %v214_v23, 16  ;;  %v469_v0 = vrot.slane %v467_v9, 5  ;;  %v6441_v2 = vrot.slane %v6425_v38, 9  ;;  %v2788_v6 = vrot.slane %v7765_v52, 5  ;;  %v8016_v40 = vld [vmem:[%s7690_s25 + $0x90] sm:$0xf] }
  0x66   : > { %v457_v63 = vrot.slane %v456_v57, 4  ;;  %v475_v11 = vrot.slane %v473_v36, 5  ;;  %v479_v12 = vrot.slane %v477_v1, 4  ;;  %v2791_v14 = vrot.slane %v7771_v59, 5  ;;  %v8026_v1 = vld [vmem:[%s7690_s25 + $0x94] sm:$0xf] }
  0x67   : > { %v485_v13 = vrot.slane %v483_v62, 5  ;;  %7100 = vmatmul.mubr.msk.bf16.vlgmr.msra.gmra.mrb[0].mxu0 %vm657_vm4, %v6457_v58  ;;  %v470_v17 = vor.u32 %v469_v0, %v466_v60  ;;  %v2789_v22 = vsel %vm7937_vm8, %v6441_v2, %v2788_v6  ;;  %v2790_v23 = vrot.slane %v2788_v6, 4  ;;  %v216_v62 = vld [vmem:[%s7690_s25 + $0x98] sm:$0x1] }
  0x68   : > { %v462_v3 = vsel %vm7716_vm5, %v457_v63, %v461_v53  ;;  %7132 = vmatpush3.bf16.msra.mxu0 %v7722_v42  ;;  %v480_v52 = vor.u32 %v479_v12, %v475_v11  ;;  %v488_v27 = vshrl.u32 %v7989_v61, 16  ;;  %v491_v59 = vshll.u32 %v7989_v61, 16 }
  0x69   : > { %v6173_v24 = vcombine.low %v452_v34, %v462_v3  ;;  %v471_v31 = vrot.slane %v470_v17, 4  ;;  %v2792_v32 = vsel %vm7937_vm8, %v2790_v23, %v2791_v14  ;;  %v497_v33 = vshll.u32 %v7997_v29, 16  ;;  %v8035_v3 = vld [vmem:[%s7690_s25 + $0x9c] sm:$0xf] }
  0x6a   : > { %v501_v25 = vshrl.u32 %v7997_v29, 16  ;;  %v481_v42 = vrot.slane %v480_v52, 4  ;;  %v6458_v38 = vcombine.low %v2789_v22, %v2792_v32  ;;  %v490_v48 = vrot.slane %v488_v27, 4  ;;  %v8046_v27 = vld [vmem:[%s7690_s25 + $0xa0] sm:$0xf] }
  0x6b   : > { %6946 = vmatmul.mubr.msk.bf16.gmra.mrb[16].mxu1 %vm657_vm4, %v6173_v24  ;;  %v493_v50 = vrot.slane %v491_v59, 5  ;;  %v476_v53 = vsel %vm7716_vm5, %v471_v31, %v475_v11  ;;  %v499_v56 = vrot.slane %v497_v33, 5  ;;  %v507_v58 = vshll.u32 %v215_v20, 16  ;;  %v6427_v11 = vld [vmem:[%s7690_s25 + $0x3c] sm:$0xe] }
  0x6c   : > { %v503_v57 = vrot.slane %v501_v25, 4  ;;  %v486_v60 = vsel %vm7716_vm5, %v481_v42, %v485_v13  ;;  %7103 = vmatprep.mubr.msk.bf16.mxu0 %vm657_vm4, %v6458_v38  ;;  %v6442_v34 = vrot.slane %v6426_v5, 9  ;;  %v2795_v36 = vrot.slane %v7791_v39, 5 }
  0x6d   : > { %v494_v9 = vor.u32 %v493_v50, %v490_v48  ;;  %v6174_v63 = vcombine.low %v476_v53, %v486_v60  ;;  %v509_v2 = vrot.slane %v507_v58, 5  ;;  %v2798_v6 = vrot.slane %v7798_v47, 5  ;;  %v217_v50 = vld [vmem:[%s7690_s25 + $0xa4] sm:$0x1]  ;;  %v6428_v53 = vld [vmem:[%s7690_s25 + $0x48] sm:$0xe] }
  0x6e   : > { %v504_v0 = vor.u32 %v503_v57, %v499_v56  ;;  %v2796_v13 = vsel %vm7937_vm8, %v6442_v34, %v2795_v36  ;;  %v2797_v14 = vrot.slane %v2795_v36, 4  ;;  %v512_v20 = vshrl.u32 %v8016_v40, 16 }
  0x6f   : > { %v495_v12 = vrot.slane %v494_v9, 4  ;;  %6949 = vmatprep.mubr.msk.bf16.mxu1 %vm657_vm4, %v6174_v63  ;;  %v515_v17 = vshll.u32 %v8016_v40, 16  ;;  %v521_v22 = vshll.u32 %v8026_v1, 16  ;;  %v525_v47 = vshrl.u32 %v8026_v1, 16 }
  0x70   : > { %v505_v39 = vrot.slane %v504_v0, 4  ;;  %v2799_v5 = vsel %vm7937_vm8, %v2797_v14, %v2798_v6  ;;  %v514_v24 = vrot.slane %v512_v20, 4  ;;  %v531_v52 = vshll.u32 %v216_v62, 16 }
  0x71   : > { %v500_v23 = vsel %vm7716_vm5, %v495_v12, %v499_v56  ;;  %v6459_v31 = vcombine.low %v2796_v13, %v2799_v5  ;;  %v517_v32 = vrot.slane %v515_v17, 5  ;;  %v523_v33 = vrot.slane %v521_v22, 5  ;;  %v8067_v17 = vld [vmem:[%s7690_s25 + $0xa8] sm:$0xf] }
  0x72   : > { %v510_v59 = vsel %vm7716_vm5, %v505_v39, %v509_v2  ;;  %v527_v42 = vrot.slane %v525_v47, 4  ;;  %v533_v38 = vrot.slane %v531_v52, 5  ;;  %v6443_v48 = vrot.slane %v6427_v11, 9 }
  0x73   : > { %v6175_v25 = vcombine.low %v500_v23, %v510_v59  ;;  %7104 = vmatmul.mubr.msk.bf16.gmra.mrb[4].mxu0 %vm657_vm4, %v6459_v31  ;;  %v518_v56 = vor.u32 %v517_v32, %v514_v24  ;;  %v2802_v57 = vrot.slane %v7815_v30, 5  ;;  %v2805_v58 = vrot.slane %v7820_v43, 5  ;;  %v8072_v24 = vld [vmem:[%s7690_s25 + $0xac] sm:$0xf] }
  0x74   : > { %v536_v60 = vshrl.u32 %v8035_v3, 16  ;;  %v528_v9 = vor.u32 %v527_v42, %v523_v33  ;;  %v539_v34 = vshll.u32 %v8035_v3, 16  ;;  %v545_v36 = vshll.u32 %v8046_v27, 16 }
  0x75   : > { %6950 = vmatmul.mubr.msk.bf16.gmra.mrb[20].mxu1 %vm657_vm4, %v6175_v25  ;;  %v549_v62 = vshrl.u32 %v8046_v27, 16  ;;  %v519_v63 = vrot.slane %v518_v56, 4  ;;  %v2803_v0 = vsel %vm7937_vm8, %v6443_v48, %v2802_v57  ;;  %v2804_v30 = vrot.slane %v2802_v57, 4  ;;  %v6429_v25 = vld [vmem:[%s7690_s25 + $0x54] sm:$0xe] }
  0x76   : > { %v538_v2 = vrot.slane %v536_v60, 4  ;;  %v529_v43 = vrot.slane %v528_v9, 4  ;;  %v541_v6 = vrot.slane %v539_v34, 5  ;;  %v547_v11 = vrot.slane %v545_v36, 5  ;;  %v8087_v57 = vld [vmem:[%s7690_s25 + $0xb4] sm:$0xf] }
  0x77   : > { %v551_v12 = vrot.slane %v549_v62, 4  ;;  %v524_v13 = vsel %vm7716_vm5, %v519_v63, %v523_v33  ;;  %v2806_v14 = vsel %vm7937_vm8, %v2804_v30, %v2805_v58  ;;  %v555_v20 = vshll.u32 %v217_v50, 16  ;;  %v218_v33 = vld [vmem:[%s7690_s25 + $0xb0] sm:$0x1]  ;;  %v8096_v30 = vld [vmem:[%s7690_s25 + $0xb8] sm:$0xf] }
  0x78   : > { %v6444_v39 = vrot.slane %v6428_v53, 9  ;;  %v534_v22 = vsel %vm7716_vm5, %v529_v43, %v533_v38  ;;  %v6460_v47 = vcombine.low %v2803_v0, %v2806_v14  ;;  %v542_v23 = vor.u32 %v541_v6, %v538_v2 }
  0x79   : > { %v552_v5 = vor.u32 %v551_v12, %v547_v11  ;;  %v6176_v52 = vcombine.low %v524_v13, %v534_v22  ;;  %v557_v59 = vrot.slane %v555_v20, 5  ;;  %v2809_v31 = vrot.slane %v7838_v19, 5  ;;  %v8102_v20 = vld [vmem:[%s7690_s25 + $0xbc] sm:$0x1] }
  0x7a   : > { %v2812_v32 = vrot.slane %v7846_v35, 5  ;;  %7107 = vmatprep.mubr.msk.bf16.mxu0 %vm657_vm4, %v6460_v47  ;;  %v543_v42 = vrot.slane %v542_v23, 4  ;;  %v560_v38 = vshrl.u32 %v8067_v17, 16  ;;  %v563_v50 = vshll.u32 %v8067_v17, 16 }
  0x7b   : > { %v553_v48 = vrot.slane %v552_v5, 4  ;;  %6953 = vmatprep.mubr.msk.bf16.mxu1 %vm657_vm4, %v6176_v52  ;;  %v2810_v53 = vsel %vm7937_vm8, %v6444_v39, %v2809_v31  ;;  %v2811_v56 = vrot.slane %v2809_v31, 4  ;;  %v569_v19 = vshll.u32 %v8072_v24, 16  ;;  %v6430_v52 = vld [vmem:[%s7690_s25 + $0x60] sm:$0xe] }
  0x7c   : > { %v573_v35 = vshrl.u32 %v8072_v24, 16  ;;  %v548_v58 = vsel %vm7716_vm5, %v543_v42, %v547_v11  ;;  %v562_v9 = vrot.slane %v560_v38, 4  ;;  %v565_v34 = vrot.slane %v563_v50, 5 }
  0x7d   : > { %v558_v60 = vsel %vm7716_vm5, %v553_v48, %v557_v59  ;;  %v2813_v62 = vsel %vm7937_vm8, %v2811_v56, %v2812_v32  ;;  %v571_v63 = vrot.slane %v569_v19, 5  ;;  %v579_v6 = vshll.u32 %v218_v33, 16  ;;  %v6431_v48 = vld [vmem:[%s7690_s25 + $0x6c] sm:$0xe]  ;;  %v6367_v19 = vld [vmem:[%s7690_s25 + $0x70] sm:$0xf] }
  0x7e   : > { %v6177_v36 = vcombine.low %v548_v58, %v558_v60  ;;  %v575_v0 = vrot.slane %v573_v35, 4  ;;  %v6461_v2 = vcombine.low %v2810_v53, %v2813_v62  ;;  %v566_v43 = vor.u32 %v565_v34, %v562_v9  ;;  %v6368_v35 = vld [vmem:[%s7690_s25 + $0x74] sm:$0x1] }
  0x7f   : > { %v6445_v12 = vrot.slane %v6429_v25, 9  ;;  %v2816_v13 = vrot.slane %v7869_v8, 5  ;;  %v2819_v14 = vrot.slane %v7875_v28, 5  ;;  %v584_v39 = vshrl.u32 %v8087_v57, 16 }
  0x80   : > { %6954 = vmatmul.mubr.msk.bf16.gmra.mrb[24].mxu1 %vm657_vm4, %v6177_v36  ;;  %v576_v11 = vor.u32 %v575_v0, %v571_v63  ;;  %7108 = vmatmul.mubr.msk.bf16.gmra.mrb[8].mxu0 %vm657_vm4, %v6461_v2  ;;  %v567_v22 = vrot.slane %v566_v43, 4  ;;  %v581_v47 = vrot.slane %v579_v6, 5  ;;  %v587_v23 = vshll.u32 %v8087_v57, 16 }
  0x81   : > { %v593_v5 = vshll.u32 %v8096_v30, 16  ;;  %v2817_v8 = vsel %vm7937_vm8, %v6445_v12, %v2816_v13  ;;  %v2818_v28 = vrot.slane %v2816_v13, 4  ;;  %v586_v31 = vrot.slane %v584_v39, 4  ;;  %v6432_v13 = vld [vmem:[%s7690_s25 + $0x78] sm:$0xe] }
  0x82   : > { %v577_v59 = vrot.slane %v576_v11, 4  ;;  %v572_v32 = vsel %vm7716_vm5, %v567_v22, %v571_v63  ;;  %v589_v33 = vrot.slane %v587_v23, 5  ;;  %v597_v42 = vshrl.u32 %v8096_v30, 16  ;;  %v7558_v23 = vld [vmem:[%s7690_s25] sm:$0xf] }
  0x83   : > { %v595_v25 = vrot.slane %v593_v5, 5  ;;  %v2820_v50 = vsel %vm7937_vm8, %v2818_v28, %v2819_v14  ;;  %v603_v53 = vshll.u32 %v8102_v20, 16  ;;  %v6446_v56 = vrot.slane %v6430_v52, 9  ;;  %v8137_v5 = vld [vmem:[%s7690_s25 + $0x4] sm:$0xf] }
  0x84   : > { %v582_v38 = vsel %vm7716_vm5, %v577_v59, %v581_v47  ;;  %v6462_v60 = vcombine.low %v2817_v8, %v2820_v50  ;;  %v590_v9 = vor.u32 %v589_v33, %v586_v31  ;;  %v599_v34 = vrot.slane %v597_v42, 4  ;;  %v8141_v59 = vld [vmem:[%s7690_s25 + $0x7c] sm:$0xf]  ;;  %v8144_v8 = vld [vmem:[%s7690_s25 + $0x80] sm:$0x1] }
  0x85   : > { %v6178_v58 = vcombine.low %v572_v32, %v582_v38  ;;  %v605_v36 = vrot.slane %v603_v53, 5  ;;  %v2823_v62 = vrot.slane %v7899_v16, 5  ;;  %v2826_v63 = vrot.slane %v7906_v26, 5  ;;  %v6433_v28 = vld [vmem:[%s7690_s25 + $0x84] sm:$0xe] }
  0x86   : > { %v6447_v0 = vrot.slane %v6431_v48, 9  ;;  %7111 = vmatprep.mubr.msk.bf16.mxu0 %vm657_vm4, %v6462_v60  ;;  %v591_v2 = vrot.slane %v590_v9, 4  ;;  %v600_v43 = vor.u32 %v599_v34, %v595_v25  ;;  %v2830_v6 = vrot.slane %v6367_v19, 5  ;;  %v6373_v42 = vld [vmem:[%s7690_s25 + $0x88] sm:$0xf] }
  0x87   : > { %6957 = vmatprep.mubr.msk.bf16.mxu1 %vm657_vm4, %v6178_v58  ;;  %v2833_v12 = vrot.slane %v6368_v35, 5  ;;  %v2824_v11 = vsel %vm7937_vm8, %v6446_v56, %v2823_v62  ;;  %v2825_v16 = vrot.slane %v2823_v62, 4  ;;  %v6196_v52 = vcombine.low %v7558_v23, %v8137_v5  ;;  %v6374_v48 = vld [vmem:[%s7690_s25 + $0x8c] sm:$0x1]  ;;  %v6376_v53 = vld [vmem:[%s7690_s25 + $0x94] sm:$0xf] }
  0x88   : > { %v596_v26 = vsel %vm7716_vm5, %v591_v2, %v595_v25  ;;  %v601_v14 = vrot.slane %v600_v43, 4  ;;  %v2831_v39 = vsel %vm7937_vm8, %v6447_v0, %v2830_v6  ;;  %v2832_v22 = vrot.slane %v2830_v6, 4  ;;  %v6377_v9 = vld [vmem:[%s7690_s25 + $0x98] sm:$0x1]  ;;  %v6434_v34 = vld [vmem:[%s7690_s25 + $0x90] sm:$0xe] }
  0x89   : > { %v2827_v47 = vsel %vm7937_vm8, %v2825_v16, %v2826_v63  ;;  %v6448_v25 = vrot.slane %v6432_v13, 9  ;;  %v2837_v56 = vrot.slane %v8141_v59, 5  ;;  %v2840_v19 = vrot.slane %v8144_v8, 5  ;;  %v6379_v0 = vld [vmem:[%s7690_s25 + $0xa0] sm:$0xf] }
  0x8a   : > { %v606_v31 = vsel %vm7716_vm5, %v601_v14, %v605_v36  ;;  %v6463_v32 = vcombine.low %v2824_v11, %v2827_v47  ;;  %v2834_v33 = vsel %vm7937_vm8, %v2832_v22, %v2833_v12  ;;  %v6449_v35 = vrot.slane %v6433_v28, 9  ;;  %v6380_v6 = vld [vmem:[%s7690_s25 + $0xa4] sm:$0x1]  ;;  %v6435_v12 = vld [vmem:[%s7690_s25 + $0x9c] sm:$0xe] }
  0x8b   : > { %v6179_v38 = vcombine.low %v596_v26, %v606_v31  ;;  %v6464_v50 = vcombine.low %v2831_v39, %v2834_v33  ;;  %v2844_v58 = vrot.slane %v6373_v42, 5  ;;  %v2847_v60 = vrot.slane %v6374_v48, 5  ;;  %v7560_v11 = vld [vmem:[%s7690_s25 + $0xc] sm:$0xf]  ;;  %v8171_v16 = vld [vmem:[%s7690_s25 + $0x10] sm:$0xf] }
  0x8c   : > { %7112 = vmatmul.mubr.msk.bf16.gmra.mrb[12].mxu0 %vm657_vm4, %v6463_v32  ;;  %v2838_v36 = vsel %vm7937_vm8, %v6448_v25, %v2837_v56  ;;  %v2839_v62 = vrot.slane %v2837_v56, 4  ;;  %v2851_v63 = vrot.slane %v6376_v53, 5  ;;  %v6197_v13 = vcombine.low %v7560_v11, %v8171_v16  ;;  %v7562_v28 = vld [vmem:[%s7690_s25 + $0x18] sm:$0xf]  ;;  %v8180_v31 = vld [vmem:[%s7690_s25 + $0x1c] sm:$0xf] }
  0x8d   : > { %6958 = vmatmul.mubr.msk.bf16.gmra.mrb[28].mxu1 %vm657_vm4, %v6179_v38  ;;  %7115 = vmatprep.mubr.msk.bf16.mxu0 %vm657_vm4, %v6464_v50  ;;  %v2845_v2 = vsel %vm7937_vm8, %v6449_v35, %v2844_v58  ;;  %v2846_v43 = vrot.slane %v2844_v58, 4  ;;  %v6450_v14 = vrot.slane %v6434_v34, 9  ;;  %v2854_v39 = vrot.slane %v6377_v9, 5  ;;  %v6382_v48 = vld [vmem:[%s7690_s25 + $0xac] sm:$0xf] }
  0x8e   : > { %6963 = vmatprep.mubr.msk.bf16.mxu1 %vm657_vm4, %v6196_v52  ;;  %v2841_v26 = vsel %vm7937_vm8, %v2839_v62, %v2840_v19  ;;  %v2853_v23 = vrot.slane %v2851_v63, 4  ;;  %v2858_v52 = vrot.slane %v6379_v0, 5  ;;  %v6198_v32 = vcombine.low %v7562_v28, %v8180_v31  ;;  %v6385_v50 = vld [vmem:[%s7690_s25 + $0xb8] sm:$0xf]  ;;  %v6383_v53 = vld [vmem:[%s7690_s25 + $0xb0] sm:$0x1] }
  0x8f   : > { %v6465_v22 = vcombine.low %v2838_v36, %v2841_v26  ;;  %v2848_v47 = vsel %vm7937_vm8, %v2846_v43, %v2847_v60  ;;  %v6451_v25 = vrot.slane %v6435_v12, 9  ;;  %v2861_v42 = vrot.slane %v6380_v6, 5  ;;  %v6436_v56 = vld [vmem:[%s7690_s25 + $0xa8] sm:$0xe]  ;;  %v6601_v60 = vld [vmem:[%s10013_s1 + $0xe] sm:$0x3] }
  0x90   : > { %v6466_v33 = vcombine.low %v2845_v2, %v2848_v47  ;;  %v2860_v38 = vrot.slane %v2858_v52, 4  ;;  %v2852_v19 = vsel %vm7937_vm8, %v6450_v14, %v2851_v63  ;;  %v2855_v35 = vsel %vm7937_vm8, %v2853_v23, %v2854_v39  ;;  %v6437_v36 = vld [vmem:[%s7690_s25 + $0xb4] sm:$0xe]  ;;  %v6386_v63 = vld [vmem:[%s7690_s25 + $0xbc] sm:$0x1] }
  0x91   : > { %v2865_v58 = vrot.slane %v6382_v48, 5  ;;  %v2859_v9 = vsel %vm7937_vm8, %v6451_v25, %v2858_v52  ;;  %v2872_v62 = vrot.slane %v6385_v50, 5  ;;  %v7564_v0 = vld [vmem:[%s7690_s25 + $0x24] sm:$0xf]  ;;  %v8207_v2 = vld [vmem:[%s7690_s25 + $0x28] sm:$0xf]  ;;  %v6467_v6 = vcombine.low %v2852_v19, %v2855_v35 }
  0x92   : > { %v2862_v34 = vsel %vm7937_vm8, %v2860_v38, %v2861_v42  ;;  %v6199_v43 = vcombine.low %v7564_v0, %v8207_v2  ;;  %v6388_v12 = vld [vmem:[%s7690_s25 + $0xc4] sm:$0xf]  ;;  %v8212_v11 = vand.u32 %v6601_v60, %v7664_v4  ;;  %v2868_v14 = vrot.slane %v6383_v53, 5  ;;  %v7566_v47 = vld [vmem:[%s7690_s25 + $0x30] sm:$0xf] }
  0x93   : > { %v2867_v26 = vrot.slane %v2865_v58, 4  ;;  %v6453_v39 = vrot.slane %v6437_v36, 9  ;;  %v8219_v23 = vld [vmem:[%s7690_s25 + $0x34] sm:$0xf]  ;;  %v2874_v28 = vrot.slane %v2872_v62, 4  ;;  %v2879_v48 = vrot.slane %v6388_v12, 5 }
  0x94   : > { %7116 = vmatmul.mubr.msk.bf16.gmra.mrb[16].mxu0 %vm657_vm4, %v6465_v22  ;;  %v6309_v22 = vld [vmem:[%s10013_s1 + $0x6] sm:$0x3]  ;;  %v6200_v52 = vcombine.low %v7566_v47, %v8219_v23  ;;  %7165 = vmatprep.subr.bf16.mxu0 %v8212_v11  ;;  %v6389_v53 = vld [vmem:[%s7690_s25 + $0xc8] sm:$0x1]  ;;  %v7568_v19 = vld [vmem:[%s7690_s25 + $0x3c] sm:$0xf] }
  0x95   : > { %6964 = vmatmul.mubr.msk.bf16.vlgmr.msra.gmra.mrb[0].mxu1 %vm657_vm4, %v6197_v13  ;;  %7119 = vmatprep.mubr.msk.bf16.mxu0 %vm657_vm4, %v6466_v33  ;;  %v6468_v13 = vcombine.low %v2859_v9, %v2862_v34  ;;  %v8225_v33 = vand.u32 %v6309_v22, %v7664_v4  ;;  %v2869_v42 = vsel %vm7937_vm8, %v2867_v26, %v2868_v14  ;;  %v8243_v35 = vld [vmem:[%s7690_s25 + $0x40] sm:$0xf]  ;;  %v2881_v36 = vrot.slane %v2879_v48, 4  ;;  %v7519_v12 = vld [vmem:[%s7690_s25 + $0x18] sm:$0xff]   ;;  %v7570_v47 = vld [vmem:[%s7690_s25 + $0x8] sm:$0x1] }
  0x96   : > { %6996 = vmatpush3.bf16.msra.mxu1 %v7725_v46  ;;  %6967 = vmatprep.mubr.msk.bf16.mxu1 %vm657_vm4, %v6198_v32  ;;  %v6452_v46 = vrot.slane %v6436_v56, 9  ;;  %v2875_v32 = vrot.slane %v6386_v63, 5  ;;  %v2873_v38 = vsel %vm7937_vm8, %v6453_v39, %v2872_v62  ;;  %v6438_v56 = vld [vmem:[%s7690_s25 + $0xc0] sm:$0xe]  ;;  %v2882_v63 = vrot.slane %v6389_v53, 5 }
  0x97   : > { %7029 = vmatprep.subr.bf16.mxu1 %v8225_v33  ;;  %v6454_v34 = vrot.slane %v6438_v56, 9  ;;  %v6202_v62 = vcombine.low %v7850_v41, %v7853_v49  ;;  %v2260_v41 = vshrl.u32 %v8141_v59, 16  ;;  %v6204_v26 = vcombine.low %v7910_v44, %v7916_v54  ;;  %v1166_v22 = vld [vmem:[%s7690_s25] sm:$0xe]  ;;  %v7571_v44 = vld [vmem:[%s7690_s25 + $0x14] sm:$0x1] }
  0x98   : > { %v2866_v25 = vsel %vm7937_vm8, %v6452_v46, %v2865_v58  ;;  %v2876_v50 = vsel %vm7937_vm8, %v2874_v28, %v2875_v32  ;;  %v6201_v58 = vcombine.low %v7568_v19, %v8243_v35  ;;  %v6203_v46 = vcombine.low %v7879_v10, %v7885_v51  ;;  %v1168_v51 = vld [vmem:[%s7690_s25 + $0x18] sm:$0xe]  ;;  %v1170_v53 = vld [vmem:[%s7690_s25 + $0x30] sm:$0xe] }
  0x99   : > { %v6469_v60 = vcombine.low %v2866_v25, %v2869_v42  ;;  %v6470_v9 = vcombine.low %v2873_v38, %v2876_v50  ;;  %v2880_v0 = vsel %vm7937_vm8, %v6454_v34, %v2879_v48  ;;  %v2262_v39 = vrot.slane %v2260_v41, 4  ;;  %v1169_v25 = vld [vmem:[%s7690_s25 + $0x24] sm:$0xe]  ;;  %v7523_v56 = vld [vmem:[%s7690_s25 + $0x30] sm:$0xff]  }
  0x9a   : > { %v1219_v10 = vrot.slane %v8137_v5, 5  ;;  %v1229_v54 = vrot.slane %v7571_v44, 5  ;;  %v6228_v28 = vrot.slane %v1166_v22, 9  ;;  %v1233_v32 = vrot.slane %v8180_v31, 5  ;;  %v7521_v38 = vld [vmem:[%s7690_s25 + $0x24] sm:$0xff]  }
  0x9b   : > { %v6205_v48 = vcombine.low %v7931_v18, %v7944_v55  ;;  %v1240_v50 = vrot.slane %v8207_v2, 5  ;;  %v6207_v31 = vcombine.low %v7989_v61, %v7997_v29  ;;  %v6666_v18 = vld [vmem:[%s10013_s1 + $0x10] sm:$0x3]  ;;  %v6230_v2 = vrot.slane %v1168_v51, 9  ;;  %v7575_v22 = vld [vmem:[%s7690_s25 + $0x4c] sm:$0xf] }
  0x9c   : > { %7120 = vmatmul.mubr.msk.bf16.gmra.mrb[20].mxu0 %vm657_vm4, %v6467_v6  ;;  %v2256_v6 = vshll.u32 %v8141_v59, 16  ;;  %v1167_v59 = vld [vmem:[%s7690_s25 + $0xc] sm:$0xe]  ;;  %v1221_v55 = vrot.slane %v1219_v10, 4  ;;  %v6231_v34 = vrot.slane %v1169_v25, 9  ;;  %v7525_v25 = vld [vmem:[%s7690_s25 + $0x3c] sm:$0xff]  }
  0x9d   : > { %6968 = vmatmul.mubr.msk.bf16.gmra.mrb[4].mxu1 %vm657_vm4, %v6199_v43  ;;  %7123 = vmatprep.mubr.msk.bf16.mxu0 %vm657_vm4, %v6468_v13  ;;  %v2883_v43 = vsel %vm7937_vm8, %v2881_v36, %v2882_v63  ;;  %v1226_v13 = vrot.slane %v8171_v16, 5  ;;  %v2266_v16 = vshll.u32 %v8144_v8, 16  ;;  %v6229_v5 = vrot.slane %v1167_v59, 9  ;;  %v1171_v63 = vld [vmem:[%s7690_s25 + $0x3c] sm:$0xe] }
  0x9e   : > { %6971 = vmatprep.mubr.msk.bf16.mxu1 %vm657_vm4, %v6200_v52  ;;  %v6471_v49 = vcombine.low %v2880_v0, %v2883_v43  ;;  %v8264_v14 = vrot.slane %v2256_v6, 5  ;;  %v1222_v52 = vrot.slane %v7570_v47, 5  ;;  %v6206_v8 = vcombine.low %v7963_v15, %v7970_v21  ;;  %v7573_v6 = vld [vmem:[%s7690_s25 + $0x2c] sm:$0x1]  ;;  %v7581_v61 = vld [vmem:[%s7690_s25 + $0x68] sm:$0x1] }
  0x9f   : > { %v1228_v19 = vrot.slane %v1226_v13, 4  ;;  %v6208_v15 = vcombine.low %v8016_v40, %v8026_v1  ;;  %v8299_v21 = vsel %vm7937_vm8, %v6228_v28, %v1219_v10  ;;  %v1235_v36 = vrot.slane %v1233_v32, 4 }
  0xa0   : > { %10054 = vst [vmem:[#allocation3_spill] sm:$0xff] %v8264_v14  ;;  %v2263_v42 = vor.u32 %v2262_v39, %v8264_v14  ;;  %v8305_v0 = vsel %vm7937_vm8, %v6229_v5, %v1226_v13  ;;  %v1242_v43 = vrot.slane %v1240_v50, 4  ;;  %v1243_v41 = vrot.slane %v7573_v6, 5  ;;  %v7577_v5 = vld [vmem:[%s7690_s25 + $0x50] sm:$0x1] }
  0xa1   : > { %v1254_v39 = vrot.slane %v8243_v35, 5  ;;  %v1261_v59 = vrot.slane %v7575_v22, 5  ;;  %v8315_v47 = vrot.slane %v2266_v16, 5  ;;  %v8325_v13 = vsel %vm7937_vm8, %v1228_v19, %v1229_v54  ;;  %v7576_v16 = vld [vmem:[%s7690_s25 + $0x44] sm:$0x1] }
  0xa2   : > { %v8329_v35 = vsel %vm7937_vm8, %v6230_v2, %v1233_v32  ;;  %v8331_v10 = vrot.slane %v2263_v42, 4  ;;  %v8349_v44 = vsel %vm7937_vm8, %v1242_v43, %v1243_v41  ;;  %v6233_v54 = vrot.slane %v1171_v63, 9 }
  0xa3   : > { %10055 = vst [vmem:[#allocation4_spill] sm:$0xff] %v8315_v47  ;;  %v1257_v28 = vrot.slane %v7576_v16, 5  ;;  %v1278_v29 = vrot.slane %v7581_v61, 5  ;;  %v7531_v61 = vld [vmem:[%s7690_s25 + $0x60] sm:$0xff]   ;;  %vm5502_vm12 = vcmask 1047559   ;;  %vm6087_vm13 = vcmask 130048  }
  0xa4   : > { %7124 = vmatmul.mubr.msk.bf16.gmra.mrb[24].mxu0 %vm657_vm4, %v6469_v60  ;;  %v7572_v60 = vld [vmem:[%s7690_s25 + $0x20] sm:$0x1]  ;;  %10056 = vst [vmem:[#allocation5_spill] sm:$0xff] %v8331_v10  ;;  %v8383_v6 = vsel %vm7937_vm8, %v6233_v54, %v1254_v39  ;;  %v6556_v54 = vld [vmem:[%s7690_s25 + $0x24] sm:$0xf]  ;;  %vm6089_vm14 = vcmask 261120  }
  0xa5   : > { %6972 = vmatmul.mubr.msk.bf16.gmra.mrb[8].mxu1 %vm657_vm4, %v6201_v58  ;;  %7127 = vmatprep.mubr.msk.bf16.mxu0 %vm657_vm4, %v6470_v9  ;;  %v1247_v58 = vrot.slane %v8219_v23, 5  ;;  %v1236_v9 = vrot.slane %v7572_v60, 5  ;;  %v6232_v23 = vrot.slane %v1170_v53, 9  ;;  %v7527_v53 = vld [vmem:[%s7690_s25 + $0x48] sm:$0xff]   ;;  %v3613_v40 = vshll.u32 %v6556_v54, 16 }
  0xa6   : > { %6975 = vmatprep.mubr.msk.bf16.mxu1 %vm657_vm4, %v6202_v62  ;;  %v1172_v62 = vld [vmem:[%s7690_s25 + $0x48] sm:$0xe]  ;;  %v1177_v10 = vld [vmem:[%s7690_s25 + $0x84] sm:$0xe]  ;;  %vm6091_vm15 = vcmask 392192   ;;  %vm6093_vm0 = vcmask 523264  }
  0xa7   : > { %v8345_v51 = vsel %vm7937_vm8, %v6232_v23, %v1247_v58  ;;  %v6234_v32 = vrot.slane %v1172_v62, 9  ;;  %v7579_v23 = vld [vmem:[%s7690_s25 + $0x64] sm:$0xf]  ;;  %v7582_v62 = vld [vmem:[%s7690_s25 + $0x70] sm:$0xf]  ;;  %vm6095_vm1 = vcmask 654336  }
  0xa8   : > { %v1275_v63 = vrot.slane %v7579_v23, 5  ;;  %vm6097_vm2 = vcmask 785408   ;;  %vm6099_vm3 = vcmask 916480  }
  0xa9   : > { %v8387_v41 = vsel %vm7937_vm8, %v6234_v32, %v1261_v59 }
  0xac   : > { %7128 = vmatmul.mubr.msk.bf16.gmra.mrb[28].mxu0 %vm657_vm4, %v6471_v49  ;;  %v8309_v49 = vand.u32 %v6666_v18, %v7664_v4  ;;  %v8321_v4 = vsel %vm7937_vm8, %v1221_v55, %v1222_v52  ;;  %v8341_v52 = vsel %vm7937_vm8, %v6231_v34, %v1240_v50  ;;  %v1264_v50 = vrot.slane %v7577_v5, 5  ;;  %v6553_v55 = vld [vmem:[%s7690_s25 + $0x18] sm:$0xf]  ;;  %v1173_v34 = vld [vmem:[%s7690_s25 + $0x54] sm:$0xe] }
  0xad   : > { %6976 = vmatmul.mubr.msk.bf16.gmra.mrb[12].mxu1 %vm657_vm4, %v6203_v46  ;;  %7133 = vmatprep.mubr.msk.bf16.mxu0 %vm657_vm4, %v7519_v12  ;;  %v1249_v46 = vrot.slane %v1247_v58, 4  ;;  %v7574_v12 = vld [vmem:[%s7690_s25 + $0x38] sm:$0x1]  ;;  %v3589_v22 = vshll.u32 %v6553_v55, 16  ;;  %v6555_v5 = vld [vmem:[%s7690_s25 + $0x20] sm:$0x1] }
  0xae   : > { %6979 = vmatprep.mubr.msk.bf16.mxu1 %vm657_vm4, %v6204_v26  ;;  %v1250_v26 = vrot.slane %v7574_v12, 5  ;;  %v7578_v58 = vld [vmem:[%s7690_s25 + $0x58] sm:$0xf] }
  0xaf   : > { %v1268_v18 = vrot.slane %v7578_v58, 5 }
  0xb0   : > { %v8356_v42 = vsel %vm7937_vm8, %v1249_v46, %v1250_v26  ;;  %v6554_v46 = vld [vmem:[%s7690_s25 + $0x1c] sm:$0xf] }
  0xb1   : > { %v1270_v16 = vrot.slane %v1268_v18, 4 }
  0xb4   : > { %7134 = vmatmul.mubr.msk.bf16.vlgmr.msra.gmra.mrb[0].mxu0 %vm657_vm4, %v7521_v38  ;;  %v1263_v38 = vrot.slane %v1261_v59, 4  ;;  %v6235_v59 = vrot.slane %v1173_v34, 9  ;;  %v3610_v34 = vshrl.u32 %v6556_v54, 16  ;;  %v1175_v54 = vld [vmem:[%s7690_s25 + $0x6c] sm:$0xe] }
  0xb5   : > { %6980 = vmatmul.mubr.msk.bf16.gmra.mrb[16].mxu1 %vm657_vm4, %v6205_v48  ;;  %7166 = vmatpush3.bf16.msra.mxu0 %v8212_v11  ;;  %v8337_v11 = vsel %vm7937_vm8, %v1235_v36, %v1236_v9  ;;  %v1256_v48 = vrot.slane %v1254_v39, 4  ;;  %v1174_v36 = vld [vmem:[%s7690_s25 + $0x60] sm:$0xe]  ;;  %v3586_v39 = vshrl.u32 %v6553_v55, 16  ;;  %v6558_v9 = vld [vmem:[%s7690_s25 + $0x2c] sm:$0x1] }
  0xb6   : > { %6983 = vmatprep.mubr.msk.bf16.mxu1 %vm657_vm4, %v6206_v8  ;;  %7137 = vmatprep.mubr.msk.bf16.mxu0 %vm657_vm4, %v7523_v56  ;;  %v6209_v8 = vcombine.low %v8035_v3, %v8046_v27  ;;  %v6210_v56 = vcombine.low %v8067_v17, %v8072_v24  ;;  %v8397_v26 = vsel %vm7937_vm8, %v1263_v38, %v1264_v50  ;;  %v1277_v38 = vrot.slane %v1275_v63, 4 }
  0xb7   : > { %7199 = vmatprep.subr.bf16.mxu0 %v8309_v49  ;;  %v8393_v12 = vsel %vm7937_vm8, %v1256_v48, %v1257_v28  ;;  %v7580_v28 = vld [vmem:[%s7690_s25 + $0x5c] sm:$0x1]  ;;  %v6557_v48 = vld [vmem:[%s7690_s25 + $0x28] sm:$0xf]  ;;  %v3599_v50 = vshrl.u32 %v6554_v46, 16  ;;  %v3588_v1 = vrot.slane %v3586_v39, 4 }
  0xb8   : > { %v1271_v32 = vrot.slane %v7580_v28, 5  ;;  %v3623_v23 = vshrl.u32 %v6557_v48, 16  ;;  %v6559_v28 = vld [vmem:[%s7690_s25 + $0x30] sm:$0xf]  ;;  %v3605_v39 = vshll.u32 %v6555_v5, 16  ;;  %v3612_v60 = vrot.slane %v3610_v34, 4 }
  0xb9   : > { %v3601_v43 = vrot.slane %v3599_v50, 4  ;;  %v3637_v2 = vshll.u32 %v6559_v28, 16  ;;  %v3629_v34 = vshll.u32 %v6558_v9, 16  ;;  %v8471_v9 = vld [vmem:[%s7690_s25 + $0x38] sm:$0x1] }
  0xba   : > { %v8426_v58 = vsel %vm7937_vm8, %v1270_v16, %v1271_v32  ;;  %v3615_v16 = vrot.slane %v3613_v40, 5  ;;  %v3634_v32 = vshrl.u32 %v6559_v28, 16  ;;  %v6562_v40 = vld [vmem:[%s7690_s25 + $0x3c] sm:$0xf]  ;;  %10057 = vst [vmem:[#allocation6_spill] sm:$0xff] %v8471_v9  ;;  %v3653_v14 = vshll.u32 %v8471_v9, 16 }
  0xbb   : > { %v7540_v9 = vld [vmem:[%s7690_s25 + $0xc0] sm:$0xff]  }
  0xbc   : > { %7138 = vmatmul.mubr.msk.bf16.gmra.mrb[4].mxu0 %vm657_vm4, %v7525_v25  ;;  %v6236_v25 = vrot.slane %v1174_v36, 9  ;;  %v3619_v36 = vshll.u32 %v6557_v48, 16  ;;  %v3636_v28 = vrot.slane %v3634_v32, 4  ;;  %v3661_v32 = vshll.u32 %v6562_v40, 16 }
  0xbd   : > { %6984 = vmatmul.mubr.msk.bf16.gmra.mrb[20].mxu1 %vm657_vm4, %v6207_v31  ;;  %7141 = vmatprep.mubr.msk.bf16.mxu0 %vm657_vm4, %v7527_v53  ;;  %v3595_v31 = vshll.u32 %v6554_v46, 16  ;;  %v7529_v53 = vld [vmem:[%s7690_s25 + $0x54] sm:$0xff]   ;;  %v8422_v46 = vsel %vm7937_vm8, %v6235_v59, %v1268_v18  ;;  %v1282_v18 = vrot.slane %v7582_v62, 5  ;;  %v7585_v62 = vld [vmem:[%s7690_s25 + $0x80] sm:$0x1] }
  0xbe   : > { %6987 = vmatprep.mubr.msk.bf16.mxu1 %vm657_vm4, %v6208_v15  ;;  %v3591_v15 = vrot.slane %v3589_v22, 5  ;;  %v8430_v55 = vsel %vm7937_vm8, %v6236_v25, %v1275_v63  ;;  %v8435_v22 = vsel %vm7937_vm8, %v1277_v38, %v1278_v29  ;;  %v6560_v59 = vld [vmem:[%s7690_s25 + $0x34] sm:$0xf]  ;;  %v6237_v25 = vrot.slane %v1175_v54, 9  ;;  %v7533_v54 = vld [vmem:[%s7690_s25 + $0x6c] sm:$0xff]  }
  0xbf   : > { %v8437_v48 = vrot.slane %v3595_v31, 5  ;;  %v8443_v5 = vrot.slane %v3619_v36, 5  ;;  %v3625_v38 = vrot.slane %v3623_v23, 4  ;;  %v3643_v31 = vshll.u32 %v6560_v59, 16  ;;  %v7584_v36 = vld [vmem:[%s7690_s25 + $0x7c] sm:$0xf] }
  0xc0   : > { %v3592_v63 = vor.u32 %v3591_v15, %v3588_v1  ;;  %v3647_v50 = vshrl.u32 %v6560_v59, 16  ;;  %v1284_v27 = vrot.slane %v1282_v18, 4  ;;  %v3616_v1 = vor.u32 %v3615_v16, %v3612_v60  ;;  %v1176_v15 = vld [vmem:[%s7690_s25 + $0x78] sm:$0xe]  ;;  %v8476_v16 = vld [vmem:[%s7690_s25 + $0x40] sm:$0xf] }
  0xc1   : > { %v3602_v3 = vor.u32 %v3601_v43, %v8437_v48  ;;  %v1289_v23 = vrot.slane %v7584_v36, 5  ;;  %v7534_v59 = vld [vmem:[%s7690_s25 + $0x78] sm:$0xff]   ;;  %v8467_v43 = vsel %vm7937_vm8, %v6237_v25, %v1282_v18  ;;  %v8473_v29 = vrot.slane %v3643_v31, 5  ;;  %10058 = vst [vmem:[#allocation7_spill] sm:$0xff] %v8476_v16 }
  0xc2   : > { %v3593_v17 = vrot.slane %v3592_v63, 4  ;;  %v3649_v60 = vrot.slane %v3647_v50, 4  ;;  %v3631_v63 = vrot.slane %v3629_v34, 5  ;;  %v6238_v18 = vrot.slane %v1176_v15, 9 }
  0xc3   : > { %v3603_v36 = vrot.slane %v3602_v3, 4  ;;  %v3617_v25 = vrot.slane %v3616_v1, 4  ;;  %v1292_v19 = vrot.slane %v7585_v62, 5  ;;  %v3667_v3 = vshll.u32 %v8476_v16, 16 }
  0xc4   : > { %7142 = vmatmul.mubr.msk.bf16.gmra.mrb[8].mxu0 %vm657_vm4, %v7529_v53  ;;  %v3650_v62 = vor.u32 %v3649_v60, %v8473_v29  ;;  %v3663_v15 = vrot.slane %v3661_v32, 5  ;;  %v7535_v60 = vld [vmem:[%s7690_s25 + $0x84] sm:$0xff]  }
  0xc5   : > { %6988 = vmatmul.mubr.msk.bf16.gmra.mrb[24].mxu1 %vm657_vm4, %v6209_v8  ;;  %7145 = vmatprep.mubr.msk.bf16.mxu0 %vm657_vm4, %v7531_v61  ;;  %v7583_v8 = vld [vmem:[%s7690_s25 + $0x74] sm:$0x1]  ;;  %v3639_v61 = vrot.slane %v3637_v2, 5  ;;  %v3658_v2 = vshrl.u32 %v6562_v40, 16  ;;  %v3671_v40 = vshrl.u32 %v8476_v16, 16  ;;  %v8524_v32 = vrot.slane %v3667_v3, 5 }
  0xc6   : > { %6991 = vmatprep.mubr.msk.bf16.mxu1 %vm657_vm4, %v6210_v56  ;;  %v1285_v53 = vrot.slane %v7583_v8, 5  ;;  %v3607_v56 = vrot.slane %v3605_v39, 5  ;;  %v3626_v8 = vor.u32 %v3625_v38, %v8443_v5  ;;  %v1291_v38 = vrot.slane %v1289_v23, 4 }
  0xc7   : > { %v3640_v31 = vor.u32 %v3639_v61, %v3636_v28  ;;  %v3660_v1 = vrot.slane %v3658_v2, 4  ;;  %v10060_v28 = vcombine.low %v8299_v21, %v8321_v4  ;;  %v3622_v21 = vsel %vm7716_vm5, %v3617_v25, %v8443_v5  ;;  %v7536_v5 = vld [vmem:[%s7690_s25 + $0x90] sm:$0xff]   ;;  %v7587_v25 = vld [vmem:[%s7690_s25 + $0x8c] sm:$0x1] }
  0xc8   : > { %v8480_v39 = vsel %vm7937_vm8, %v1284_v27, %v1285_v53  ;;  %v3627_v50 = vrot.slane %v3626_v8, 4  ;;  %v10059_v27 = vcombine.low %v8087_v57, %v8096_v30  ;;  %v7586_v53 = vld [vmem:[%s7690_s25 + $0x88] sm:$0xf]  ;;  %v3598_v57 = vsel %vm7716_vm5, %v3593_v17, %v8437_v48 }
  0xc9   : > { %v1296_v34 = vrot.slane %v7586_v53, 5  ;;  %v3608_v61 = vsel %vm7716_vm5, %v3603_v36, %v3607_v56  ;;  %v8515_v4 = vsel %vm7937_vm8, %v1291_v38, %v1292_v19  ;;  %v3641_v48 = vrot.slane %v3640_v31, 4  ;;  %v8518_v56 = vld [vmem:[%s7690_s25 + $0x44] sm:$0x1]  ;;  %v6565_v8 = vld [vmem:[%s7690_s25 + $0x48] sm:$0xf] }
  0xca   : > { %v6239_v17 = vrot.slane %v1177_v10, 9  ;;  %10061 = vst [vmem:[#allocation8_spill] sm:$0xff] %v8518_v56  ;;  %v3655_v2 = vrot.slane %v3653_v14, 5  ;;  %v3673_v36 = vrot.slane %v3671_v40, 4  ;;  %v1299_v38 = vrot.slane %v7587_v25, 5 }
  0xcb   : > { %v1298_v19 = vrot.slane %v1296_v34, 4  ;;  %v3664_v10 = vor.u32 %v3663_v15, %v3660_v1  ;;  %v8529_v31 = vld [vmem:[%s7690_s25 + $0x4c] sm:$0xf]  ;;  %v3677_v53 = vshll.u32 %v8518_v56, 16  ;;  %v3682_v14 = vshrl.u32 %v6565_v8, 16 }
  0xcc   : > { %7146 = vmatmul.mubr.msk.bf16.gmra.mrb[12].mxu0 %vm657_vm4, %v7533_v54  ;;  %v8544_v1 = vsel %vm7937_vm8, %v6239_v17, %v1296_v34  ;;  %v6568_v15 = vld [vmem:[%s7690_s25 + $0x54] sm:$0xf] }
  0xcd   : > { %6992 = vmatmul.mubr.msk.bf16.gmra.mrb[28].mxu1 %vm657_vm4, %v10059_v27  ;;  %7149 = vmatprep.mubr.msk.bf16.mxu0 %vm657_vm4, %v7534_v59  ;;  %v8508_v59 = vsel %vm7937_vm8, %v6238_v18, %v1289_v23  ;;  %v3632_v23 = vsel %vm7716_vm5, %v3627_v50, %v3631_v63  ;;  %v3651_v18 = vrot.slane %v3650_v62, 4  ;;  %v8531_v27 = vcombine.low %v3598_v57, %v3608_v61  ;;  %v1178_v63 = vld [vmem:[%s7690_s25 + $0x90] sm:$0xe]  ;;  %v7588_v57 = vld [vmem:[%s7690_s25 + $0x94] sm:$0xf] }
  0xce   : > { %6997 = vmatprep.mubr.msk.bf16.mxu1 %vm657_vm4, %v10060_v28  ;;  %v3685_v50 = vshll.u32 %v6565_v8, 16  ;;  %v8535_v3 = vcombine.low %v3622_v21, %v3632_v23  ;;  %v3646_v62 = vsel %vm7716_vm5, %v3641_v48, %v8473_v29  ;;  %v3674_v28 = vor.u32 %v3673_v36, %v8524_v32  ;;  %v8553_v23 = vld [vmem:[%s7690_s25 + $0x58] sm:$0xf] }
  0xcf   : > { %v1303_v61 = vrot.slane %v7588_v57, 5  ;;  %v3691_v21 = vshll.u32 %v8529_v31, 16  ;;  %v3695_v8 = vshrl.u32 %v8529_v31, 16  ;;  %v10062_v29 = vcombine.low %v8305_v0, %v8325_v13  ;;  %v7589_v36 = vld [vmem:[%s7690_s25 + $0x98] sm:$0x1] }
  0xd0   : > { %v3656_v34 = vsel %vm7716_vm5, %v3651_v18, %v3655_v2  ;;  %v8564_v48 = vsel %vm7937_vm8, %v1298_v19, %v1299_v38  ;;  %v8566_v17 = vrot.slane %v3664_v10, 4  ;;  %v10063_v0 = vcombine.low %v8329_v35, %v8337_v11  ;;  %v6571_v10 = vld [vmem:[%s7690_s25 + $0x60] sm:$0xf] }
  0xd1   : > { %v8573_v13 = vrot.slane %v3677_v53, 5  ;;  %v1306_v2 = vrot.slane %v7589_v36, 5  ;;  %v3687_v18 = vrot.slane %v3685_v50, 5  ;;  %v3706_v19 = vshrl.u32 %v6568_v15, 16  ;;  %v7537_v35 = vld [vmem:[%s7690_s25 + $0x9c] sm:$0xff]   ;;  %v7538_v50 = vld [vmem:[%s7690_s25 + $0xa8] sm:$0xff]  }
  0xd2   : > { %v3709_v25 = vshll.u32 %v6568_v15, 16  ;;  %v3715_v38 = vshll.u32 %v8553_v23, 16  ;;  %v8581_v11 = vrot.slane %v3674_v28, 4  ;;  %v1305_v53 = vrot.slane %v1303_v61, 4  ;;  %v8599_v28 = vld [vmem:[%s7690_s25 + $0x50] sm:$0x1] }
  0xd3   : > { %v8586_v57 = vcombine.low %v3646_v62, %v3656_v34  ;;  %v7590_v36 = vld [vmem:[%s7690_s25 + $0xa0] sm:$0xf]  ;;  %v8604_v34 = vld [vmem:[%s7690_s25 + $0x64] sm:$0xf]  ;;  %v3730_v15 = vshrl.u32 %v6571_v10, 16  ;;  %v3733_v40 = vshll.u32 %v6571_v10, 16 }
  0xd4   : > { %7150 = vmatmul.mubr.msk.bf16.gmra.mrb[16].mxu0 %vm657_vm4, %v7535_v60  ;;  %v6240_v60 = vrot.slane %v1178_v63, 9  ;;  %v8583_v63 = vrot.slane %v3691_v21, 5  ;;  %v1179_v21 = vld [vmem:[%s7690_s25 + $0x9c] sm:$0xe]  ;;  %v1310_v62 = vrot.slane %v7590_v36, 5  ;;  %10064 = vst [vmem:[#allocation9_spill] sm:$0xff] %v8604_v34 }
  0xd5   : > { %6998 = vmatmul.mubr.msk.bf16.vlgmr.msra.gmra.mrb[0].mxu1 %vm657_vm4, %v10062_v29  ;;  %7153 = vmatprep.mubr.msk.bf16.mxu0 %vm657_vm4, %v7536_v5  ;;  %v3684_v5 = vrot.slane %v3682_v14, 4  ;;  %v3697_v14 = vrot.slane %v3695_v8, 4  ;;  %v3708_v54 = vrot.slane %v3706_v19, 4  ;;  %v3711_v56 = vrot.slane %v3709_v25, 5  ;;  %v8620_v19 = vld [vmem:[%s7690_s25 + $0x5c] sm:$0x1] }
  0xd6   : > { %7030 = vmatpush3.bf16.msra.mxu1 %v8225_v33  ;;  %7001 = vmatprep.mubr.msk.bf16.mxu1 %vm657_vm4, %v10063_v0  ;;  %v3719_v33 = vshrl.u32 %v8553_v23, 16  ;;  %v8596_v0 = vsel %vm7937_vm8, %v6240_v60, %v1303_v61  ;;  %v8606_v16 = vrot.slane %v3715_v38, 5  ;;  %v3680_v61 = vsel %vm7716_vm5, %v8581_v11, %v8573_v13  ;;  %v1180_v13 = vld [vmem:[%s7690_s25 + $0xa8] sm:$0xe] }
  0xd7   : > { %7233 = vmatprep.subr.bf16.mxu1 %v7673_v7  ;;  %v3688_v8 = vor.u32 %v3687_v18, %v3684_v5  ;;  %v8615_v60 = vsel %vm7937_vm8, %v1305_v53, %v1306_v2  ;;  %v3698_v5 = vor.u32 %v3697_v14, %v8583_v63  ;;  %v3701_v18 = vshll.u32 %v8599_v28, 16  ;;  %v8643_v7 = vld [vmem:[%s7690_s25 + $0x68] sm:$0x1] }
  0xd8   : > { %v3721_v29 = vrot.slane %v3719_v33, 4  ;;  %v10065_v25 = vcombine.low %v8341_v52, %v8349_v44  ;;  %v6241_v38 = vrot.slane %v1179_v21, 9  ;;  %v1317_v2 = vrot.slane %v8072_v24, 5  ;;  %v7591_v44 = vld [vmem:[%s7690_s25 + $0xa4] sm:$0x1]  ;;  %10067 = vst [vmem:[#allocation10_spill] sm:$0xff] %v8643_v7 }
  0xd9   : > { %v3739_v33 = vshll.u32 %v8604_v34, 16  ;;  %v3743_v10 = vshrl.u32 %v8604_v34, 16  ;;  %v3689_v52 = vrot.slane %v3688_v8, 4  ;;  %v1313_v11 = vrot.slane %v7591_v44, 5 }
  0xda   : > { %v3732_v53 = vrot.slane %v3730_v15, 4  ;;  %v3735_v14 = vrot.slane %v3733_v40, 5  ;;  %v1312_v21 = vrot.slane %v1310_v62, 4  ;;  %v3712_v24 = vor.u32 %v3711_v56, %v3708_v54  ;;  %v7592_v40 = vld [vmem:[%s7690_s25 + $0xb0] sm:$0x1] }
  0xdb   : > { %v3722_v36 = vor.u32 %v3721_v29, %v8606_v16  ;;  %v3703_v8 = vrot.slane %v3701_v18, 5  ;;  %v1319_v15 = vrot.slane %v1317_v2, 4  ;;  %v1320_v44 = vrot.slane %v7592_v40, 5  ;;  %v1181_v56 = vld [vmem:[%s7690_s25 + $0xb4] sm:$0xe] }
  0xdc   : > { %7154 = vmatmul.mubr.msk.bf16.gmra.mrb[20].mxu0 %vm657_vm4, %v7537_v35  ;;  %v10066_v35 = vcombine.low %v8345_v51, %v8356_v42  ;;  %v3699_v42 = vrot.slane %v3698_v5, 4  ;;  %v8646_v47 = vrot.slane %v3739_v33, 5  ;;  %v3745_v54 = vrot.slane %v3743_v10, 4 }
  0xdd   : > { %7002 = vmatmul.mubr.msk.bf16.gmra.mrb[4].mxu1 %vm657_vm4, %v10065_v25  ;;  %7157 = vmatprep.mubr.msk.bf16.mxu0 %vm657_vm4, %v7538_v50  ;;  %v7539_v50 = vld [vmem:[%s7690_s25 + $0xb4] sm:$0xff]   ;;  %v3725_v25 = vshll.u32 %v8620_v19, 16  ;;  %v3694_v29 = vsel %vm7716_vm5, %v3689_v52, %v8583_v63  ;;  %v8654_v34 = vsel %vm7937_vm8, %v6241_v38, %v1310_v62  ;;  %v3736_v5 = vor.u32 %v3735_v14, %v3732_v53 }
  0xde   : > { %7005 = vmatprep.mubr.msk.bf16.mxu1 %vm657_vm4, %v10066_v35  ;;  %v6242_v35 = vrot.slane %v1180_v13, 9  ;;  %v1324_v18 = vrot.slane %v8096_v30, 5  ;;  %v6574_v13 = vld [vmem:[%s7690_s25 + $0x6c] sm:$0xf]  ;;  %v8660_v40 = vsel %vm7937_vm8, %v1312_v21, %v1313_v11  ;;  %v8662_v33 = vrot.slane %v3712_v24, 4 }
  0xdf   : > { %10068 = vst [vmem:[#allocation11_spill] sm:$0xff] %v8660_v40  ;;  %v8664_v10 = vrot.slane %v3722_v36, 4  ;;  %v8666_v51 = vrot.slane %v3725_v25, 5  ;;  %v3704_v63 = vsel %vm7716_vm5, %v3699_v42, %v3703_v8  ;;  %v3749_v62 = vshll.u32 %v8643_v7, 16  ;;  %v7541_v25 = vld [vmem:[%s7690_s25 + $0xcc] sm:$0xff]  }
  0xe0   : > { %v8673_v30 = vsel %vm7937_vm8, %v6242_v35, %v1317_v2  ;;  %v6243_v38 = vrot.slane %v1181_v56, 9  ;;  %v10070_v52 = vcombine.low %v8383_v6, %v8393_v12  ;;  %v8683_v11 = vsel %vm7937_vm8, %v1319_v15, %v1320_v44  ;;  %v8687_v2 = vld [vmem:[%s7690_s25 + $0x70] sm:$0xf]  ;;  %v8730_v44 = vld [vmem:[%s7690_s25 + $0x7c] sm:$0xf] }
  0xe1   : > { %10069 = vst [vmem:[#allocation12_spill] sm:$0xff] %v8673_v30  ;;  %10071 = vst [vmem:[#allocation13_spill] sm:$0xff] %v8683_v11  ;;  %v3746_v53 = vor.u32 %v3745_v54, %v8646_v47  ;;  %v3754_v14 = vshrl.u32 %v6574_v13, 16  ;;  %v10073_v21 = vcombine.low %v8387_v41, %v8397_v26  ;;  %v10074_v6 = vsel %vm7716_vm5, %v8566_v17, %v8524_v32  ;;  %v8717_v17 = vld [vmem:[%s7690_s25 + $0x74] sm:$0x1] }
  0xe2   : > { %10072 = vst [vmem:[#allocation14_spill] sm:$0xff] %v8687_v2  ;;  %v8698_v12 = vcombine.low %v10074_v6, %v3680_v61  ;;  %v1326_v24 = vrot.slane %v1324_v18, 4  ;;  %v1327_v36 = vrot.slane %v8102_v20, 5  ;;  %v8704_v42 = vcombine.low %v3694_v29, %v3704_v63  ;;  %10075 = vst [vmem:[#allocation15_spill] sm:$0xff] %v8717_v17  ;;  %v6577_v20 = vld [vmem:[%s7690_s25 + $0x78] sm:$0xf] }
  0xe3   : > { %v8722_v8 = vrot.slane %v3749_v62, 5  ;;  %v8726_v35 = vsel %vm7937_vm8, %v6243_v38, %v1324_v18  ;;  %v3763_v15 = vshll.u32 %v8687_v2, 16  ;;  %10076 = vst [vmem:[#allocation16_spill] sm:$0xff] %v8730_v44  ;;  %v6580_v54 = vld [vmem:[%s7690_s25 + $0x84] sm:$0xf]  ;;  %v8733_v56 = vrot.slane %v3746_v53, 4 }
  0xe4   : > { %7158 = vmatmul.mubr.msk.bf16.gmra.mrb[24].mxu0 %vm657_vm4, %v7539_v50  ;;  %v3757_v50 = vshll.u32 %v6574_v13, 16  ;;  %v8735_v29 = vrot.slane %v3754_v14, 4  ;;  %v3767_v13 = vshrl.u32 %v8687_v2, 16  ;;  %v8741_v63 = vld [vmem:[%s7690_s25 + $0x88] sm:$0xf]  ;;  %v8749_v62 = vsel %vm7937_vm8, %v1326_v24, %v1327_v36 }
  0xe5   : > { %7006 = vmatmul.mubr.msk.bf16.gmra.mrb[8].mxu1 %vm657_vm4, %v10070_v52  ;;  %7161 = vmatprep.mubr.msk.bf16.mxu0 %vm657_vm4, %v7540_v9  ;;  %v8700_v9 = vrot.slane %v3736_v5, 4  ;;  %10077 = vst [vmem:[#allocation17_spill] sm:$0xff] %v8741_v63  ;;  %v3778_v38 = vshrl.u32 %v6577_v20, 16  ;;  %v3781_v52 = vshll.u32 %v6577_v20, 16  ;;  %v6583_v53 = vld [vmem:[%s7690_s25 + $0x90] sm:$0xf]  ;;  %v10079_v18 = vcombine.low %v8422_v46, %v8426_v58 }
  0xe6   : > { %7009 = vmatprep.mubr.msk.bf16.mxu1 %vm657_vm4, %v10073_v21  ;;  %v8737_v5 = vrot.slane %v3757_v50, 5  ;;  %v8753_v14 = vld [vmem:[%s7690_s25 + $0x94] sm:$0xf]  ;;  %v3787_v50 = vshll.u32 %v8730_v44, 16  ;;  %v3791_v21 = vshrl.u32 %v8730_v44, 16  ;;  %v3802_v6 = vshrl.u32 %v6580_v54, 16 }
  0xe7   : > { %10078 = vst [vmem:[#allocation18_spill] sm:$0xff] %v8753_v14  ;;  %v3805_v61 = vshll.u32 %v6580_v54, 16  ;;  %v8758_v41 = vrot.slane %v3763_v15, 5  ;;  %v3773_v24 = vshll.u32 %v8717_v17, 16  ;;  %v3811_v36 = vshll.u32 %v8741_v63, 16 }
  0xe8   : > { %v3815_v20 = vshrl.u32 %v8741_v63, 16  ;;  %v3826_v54 = vshrl.u32 %v6583_v53, 16  ;;  %v3835_v15 = vshll.u32 %v8753_v14, 16  ;;  %v3839_v26 = vshrl.u32 %v8753_v14, 16  ;;  %v6586_v32 = vld [vmem:[%s7690_s25 + $0x9c] sm:$0xf] }
  0xe9   : > { %v10080_v44 = vcombine.low %v8430_v55, %v8435_v22  ;;  %v3769_v46 = vrot.slane %v3767_v13, 4  ;;  %v8783_v63 = vrot.slane %v3787_v50, 5  ;;  %v3793_v14 = vrot.slane %v3791_v21, 4  ;;  %v8786_v55 = vld [vmem:[%s7690_s25 + $0x8c] sm:$0x1] }
  0xea   : > { %v3804_v17 = vrot.slane %v3802_v6, 4  ;;  %v3807_v2 = vrot.slane %v3805_v61, 5  ;;  %v8788_v22 = vrot.slane %v3811_v36, 5  ;;  %v3850_v7 = vshrl.u32 %v6586_v32, 16  ;;  %v8791_v58 = vld [vmem:[%s7690_s25 + $0x98] sm:$0x1] }
  0xeb   : > { %v3853_v11 = vshll.u32 %v6586_v32, 16  ;;  %v3828_v13 = vrot.slane %v3826_v54, 4  ;;  %v3841_v50 = vrot.slane %v3839_v26, 4  ;;  %v3760_v21 = vor.u32 %v8737_v5, %v8735_v29 }
  0xec   : > { %7162 = vmatmul.mubr.msk.bf16.gmra.mrb[28].mxu0 %vm657_vm4, %v7541_v25  ;;  %v3829_v25 = vshll.u32 %v6583_v53, 16  ;;  %v8781_v53 = vld [vmem:[%s7690_s25 + $0x80] sm:$0x1]  ;;  %v3770_v61 = vor.u32 %v3769_v46, %v8758_v41  ;;  %v8798_v6 = vrot.slane %v3773_v24, 5  ;;  %v3794_v32 = vor.u32 %v3793_v14, %v8783_v63 }
  0xed   : > { %7010 = vmatmul.mubr.msk.bf16.gmra.mrb[12].mxu1 %vm657_vm4, %v10079_v18  ;;  %7167 = vmatprep.mubr.msk.bf16.mxu0 %vm657_vm4, %v8531_v27  ;;  %v3780_v27 = vrot.slane %v3778_v38, 4  ;;  %v3783_v18 = vrot.slane %v3781_v52, 5  ;;  %v8793_v52 = vrot.slane %v3835_v15, 5  ;;  %v3797_v36 = vshll.u32 %v8781_v53, 16 }
  0xee   : > { %7013 = vmatprep.mubr.msk.bf16.mxu1 %vm657_vm4, %v10080_v44  ;;  %v3817_v44 = vrot.slane %v3815_v20, 4  ;;  %v3831_v38 = vrot.slane %v3829_v25, 5  ;;  %v8802_v20 = vld [vmem:[%s7690_s25 + $0xa0] sm:$0xf]  ;;  %v3808_v40 = vor.u32 %v3807_v2, %v3804_v17  ;;  %v3821_v54 = vshll.u32 %v8786_v55, 16 }
  0xef   : > { %10081 = vst [vmem:[#allocation19_spill] sm:$0xff] %v8802_v20  ;;  %v3784_v30 = vor.u32 %v3783_v18, %v3780_v27  ;;  %v6589_v25 = vld [vmem:[%s7690_s25 + $0xa8] sm:$0xf]  ;;  %v3845_v29 = vshll.u32 %v8791_v58, 16  ;;  %v3852_v5 = vrot.slane %v3850_v7, 4  ;;  %v3855_v24 = vrot.slane %v3853_v11, 5 }
  0xf0   : > { %v3818_v26 = vor.u32 %v3817_v44, %v8788_v22  ;;  %v10082_v15 = vcombine.low %v8467_v43, %v8480_v39  ;;  %v3832_v2 = vor.u32 %v3831_v38, %v3828_v13  ;;  %v3842_v17 = vor.u32 %v3841_v50, %v8793_v52 }
  0xf1   : > { %v3859_v14 = vshll.u32 %v8802_v20, 16  ;;  %v10083_v46 = vcombine.low %v8508_v59, %v8515_v4  ;;  %v3761_v7 = vrot.slane %v3760_v21, 4  ;;  %v3771_v43 = vrot.slane %v3770_v61, 4  ;;  %v8831_v21 = vld [vmem:[%s7690_s25 + $0xac] sm:$0xf] }
  0xf2   : > { %v3877_v39 = vshll.u32 %v6589_v25, 16  ;;  %v3785_v11 = vrot.slane %v3784_v30, 4  ;;  %v3795_v27 = vrot.slane %v3794_v32, 4  ;;  %v3799_v18 = vrot.slane %v3797_v36, 5  ;;  %v8840_v61 = vld [vmem:[%s7690_s25 + $0xb0] sm:$0x1] }
  0xf3   : > { %v3809_v44 = vrot.slane %v3808_v40, 4  ;;  %v3819_v13 = vrot.slane %v3818_v26, 4  ;;  %v3823_v38 = vrot.slane %v3821_v54, 5  ;;  %v3847_v50 = vrot.slane %v3845_v29, 5 }
  0xf4   : > { %7168 = vmatmul.mubr.msk.bf16.vlgmr.msra.gmra.mrb[0].mxu0 %vm657_vm4, %v8535_v3  ;;  %v3863_v3 = vshrl.u32 %v8802_v20, 16  ;;  %v3856_v59 = vor.u32 %v3855_v24, %v3852_v5  ;;  %v3833_v4 = vrot.slane %v3832_v2, 4  ;;  %v8828_v20 = vrot.slane %v3859_v14, 5 }
  0xf5   : > { %7014 = vmatmul.mubr.msk.bf16.gmra.mrb[16].mxu1 %vm657_vm4, %v10082_v15  ;;  %7200 = vmatpush3.bf16.msra.mxu0 %v8309_v49  ;;  %v3874_v49 = vshrl.u32 %v6589_v25, 16  ;;  %v8826_v15 = vld [vmem:[%s7690_s25 + $0xa4] sm:$0x1]  ;;  %v3766_v30 = vsel %vm7716_vm5, %v3761_v7, %v8758_v41  ;;  %v3776_v40 = vsel %vm7716_vm5, %v3771_v43, %v8798_v6  ;;  %v3879_v32 = vrot.slane %v3877_v39, 5 }
  0xf6   : > { %7017 = vmatprep.mubr.msk.bf16.mxu1 %vm657_vm4, %v10083_v46  ;;  %7171 = vmatprep.mubr.msk.bf16.mxu0 %vm657_vm4, %v8586_v57  ;;  %v3843_v46 = vrot.slane %v3842_v17, 4  ;;  %v3865_v57 = vrot.slane %v3863_v3, 4  ;;  %v3790_v54 = vsel %vm7716_vm5, %v3785_v11, %v8783_v63  ;;  %v3800_v25 = vsel %vm7716_vm5, %v3795_v27, %v3799_v18  ;;  %v6592_v3 = vld [vmem:[%s7690_s25 + $0xb4] sm:$0xf] }
  0xf7   : > { %v3876_v36 = vrot.slane %v3874_v49, 4  ;;  %v3814_v26 = vsel %vm7716_vm5, %v3809_v44, %v8788_v22  ;;  %v3869_v41 = vshll.u32 %v8826_v15, 16  ;;  %v3824_v6 = vsel %vm7716_vm5, %v3819_v13, %v3823_v38  ;;  %v6639_v11 = vld [vmem:[%s7690_s25 + $0x54] sm:$0xe]  ;;  %v6640_v38 = vld [vmem:[%s7690_s25 + $0x60] sm:$0xe] }
  0xf8   : > { %v8855_v29 = vrot.slane %v3856_v59, 4  ;;  %v3883_v63 = vshll.u32 %v8831_v21, 16  ;;  %v3887_v5 = vshrl.u32 %v8831_v21, 16  ;;  %v10084_v24 = vcombine.low %v8544_v1, %v8564_v48 }
  0xf9   : > { %v3848_v22 = vsel %vm7716_vm5, %v3843_v46, %v3847_v50  ;;  %v3866_v2 = vor.u32 %v3865_v57, %v8828_v20  ;;  %v3893_v17 = vshll.u32 %v8840_v61, 16  ;;  %v10085_v1 = vcombine.low %v8596_v0, %v8615_v60 }
  0xfa   : > { %v10086_v48 = vsel %vm7716_vm5, %v8664_v10, %v8666_v51  ;;  %v10088_v14 = vsel %vm7716_vm5, %v8733_v56, %v8722_v8  ;;  %v10089_v0 = vsel %vm7716_vm5, %v8700_v9, %v8646_v47  ;;  %v6260_v51 = vcombine.low %v8726_v35, %v8749_v62  ;;  %v8909_v56 = vld [vmem:[%s7690_s25 + $0xb8] sm:$0xf] }
  0xfb   : > { %v6608_v60 = vcombine.low %v10089_v0, %v10088_v14  ;;  %v3880_v10 = vor.u32 %v3879_v32, %v3876_v36  ;;  %v8902_v7 = vcombine.low %v3790_v54, %v3800_v25  ;;  %v8904_v43 = vcombine.low %v3814_v26, %v3824_v6  ;;  %v6641_v32 = vld [vmem:[%s7690_s25 + $0x6c] sm:$0xe] }
  0xfc   : > { %7172 = vmatmul.mubr.msk.bf16.gmra.mrb[4].mxu0 %vm657_vm4, %v8698_v12  ;;  %v3838_v12 = vsel %vm7716_vm5, %v3833_v4, %v8793_v52  ;;  %v8906_v8 = vrot.slane %v3869_v41, 5  ;;  %v3862_v47 = vsel %vm7716_vm5, %v8855_v29, %v8828_v20  ;;  %v8917_v9 = vrot.slane %v3883_v63, 5  ;;  %v10092_v63 = vld [vmem:[#allocation9_spill] sm:$0xff]  ;;  %v6598_v29 = vld [vmem:[%s7690_s25 + $0xcc] sm:$0xf] }
  0xfd   : > { %7018 = vmatmul.mubr.msk.bf16.gmra.mrb[20].mxu1 %vm657_vm4, %v10084_v24  ;;  %7175 = vmatprep.mubr.msk.bf16.mxu0 %vm657_vm4, %v8704_v42  ;;  %v10087_v42 = vsel %vm7716_vm5, %v8662_v33, %v8606_v16  ;;  %v6638_v16 = vld [vmem:[%s7690_s25 + $0x48] sm:$0xe]  ;;  %v8900_v33 = vcombine.low %v3766_v30, %v3776_v40  ;;  %v8911_v49 = vcombine.low %v3838_v12, %v3848_v22  ;;  %v3889_v39 = vrot.slane %v3887_v5, 4  ;;  %v10093_v24 = vld [vmem:[#allocation12_spill] sm:$0xff]  ;;  %v10094_v12 = vld [vmem:[#allocation13_spill] sm:$0xff] }
  0xfe   : > { %7021 = vmatprep.mubr.msk.bf16.mxu1 %vm657_vm4, %v10085_v1  ;;  %v6607_v52 = vcombine.low %v10087_v42, %v10086_v48  ;;  %v8920_v27 = vrot.slane %v3866_v2, 4  ;;  %v8922_v18 = vrot.slane %v3893_v17, 5  ;;  %v3898_v44 = vshrl.u32 %v6592_v3, 16  ;;  %v10096_v2 = vld [vmem:[#allocation10_spill] sm:$0xff] }
  0xff   : > { %v6654_v13 = vrot.slane %v6638_v16, 9  ;;  %v8925_v50 = vrot.slane %v3880_v10, 4  ;;  %v3901_v59 = vshll.u32 %v6592_v3, 16  ;;  %v3907_v4 = vshll.u32 %v8909_v56, 16  ;;  %v10097_v48 = vld [vmem:[#allocation14_spill] sm:$0xff] }
 0x100   : > { %v4357_v46 = vrot.slane %v8529_v31, 5  ;;  %v4360_v57 = vrot.slane %v8599_v28, 5  ;;  %v6655_v30 = vrot.slane %v6639_v11, 9  ;;  %v4364_v40 = vrot.slane %v8553_v23, 5  ;;  %v10090_v31 = vld [vmem:[#allocation11_spill] sm:$0xff] }
 0x101   : > { %v4367_v36 = vrot.slane %v8620_v19, 5  ;;  %v3890_v54 = vor.u32 %v3889_v39, %v8917_v9  ;;  %v6656_v41 = vrot.slane %v6640_v38, 9  ;;  %v10091_v28 = vcombine.low %v8654_v34, %v10090_v31  ;;  %v8972_v3 = vld [vmem:[%s7690_s25 + $0xbc] sm:$0x1] }
 0x102   : > { %v8937_v25 = vsel %vm7937_vm8, %v6654_v13, %v4357_v46  ;;  %v4359_v26 = vrot.slane %v4357_v46, 4  ;;  %v3911_v23 = vshrl.u32 %v8909_v56, 16  ;;  %v8947_v19 = vsel %vm7937_vm8, %v6655_v30, %v4364_v40  ;;  %v10098_v13 = vld [vmem:[#allocation15_spill] sm:$0xff] }
 0x103   : > { %v4366_v6 = vrot.slane %v4364_v40, 4  ;;  %v4371_v5 = vrot.slane %v10092_v63, 5  ;;  %v10095_v22 = vcombine.low %v10093_v24, %v10094_v12  ;;  %v4374_v17 = vrot.slane %v10096_v2, 5  ;;  %v8990_v40 = vld [vmem:[%s7690_s25 + $0xc4] sm:$0xf]  ;;  %v10099_v12 = vld [vmem:[#allocation16_spill] sm:$0xff] }
 0x104   : > { %7176 = vmatmul.mubr.msk.bf16.gmra.mrb[8].mxu0 %vm657_vm4, %v6607_v52  ;;  %v8956_v34 = vsel %vm7937_vm8, %v4359_v26, %v4360_v57  ;;  %v6657_v1 = vrot.slane %v6641_v32, 9  ;;  %v4378_v42 = vrot.slane %v10097_v48, 5  ;;  %v6595_v52 = vld [vmem:[%s7690_s25 + $0xc0] sm:$0xf]  ;;  %v4381_v38 = vrot.slane %v10098_v13, 5  ;;  %v7542_v26 = vld [vmem:[%s7690_s25 + $0xc] sm:$0xff]  }
 0x105   : > { %7022 = vmatmul.mubr.msk.bf16.gmra.mrb[24].mxu1 %vm657_vm4, %v10091_v28  ;;  %7179 = vmatprep.mubr.msk.bf16.mxu0 %vm657_vm4, %v6608_v60  ;;  %v6671_v14 = vcombine.low %v8937_v25, %v8956_v34  ;;  %v8965_v0 = vsel %vm7937_vm8, %v4366_v6, %v4367_v36  ;;  %v8969_v60 = vsel %vm7937_vm8, %v6656_v41, %v4371_v5  ;;  %v4373_v10 = vrot.slane %v4371_v5, 4  ;;  %v6642_v32 = vld [vmem:[%s7690_s25 + $0x78] sm:$0xe]  ;;  %v6643_v2 = vld [vmem:[%s7690_s25 + $0x84] sm:$0xe] }
 0x106   : > { %7025 = vmatprep.mubr.msk.bf16.mxu1 %vm657_vm4, %v10095_v22  ;;  %v6672_v16 = vcombine.low %v8947_v19, %v8965_v0  ;;  %v8978_v39 = vsel %vm7937_vm8, %v6657_v1, %v4378_v42  ;;  %v4380_v11 = vrot.slane %v4378_v42, 4  ;;  %v3872_v46 = vsel %vm7716_vm5, %v8920_v27, %v8906_v8  ;;  %v6369_v27 = vld [vmem:[%s7690_s25 + $0x78] sm:$0xf]  ;;  %v7603_v0 = vld [vmem:[%s7690_s25 + $0xa0] sm:$0xf] }
 0x107   : > { %v8985_v57 = vrot.slane %v3898_v44, 4  ;;  %v8987_v30 = vrot.slane %v3901_v59, 5  ;;  %v8994_v36 = vsel %vm7937_vm8, %v4373_v10, %v4374_v17  ;;  %v8998_v41 = vrot.slane %v3907_v4, 5  ;;  %v10101_v48 = vld [vmem:[#allocation5_spill] sm:$0xff] }
 0x108   : > { %v3922_v31 = vshrl.u32 %v6595_v52, 16  ;;  %v6673_v28 = vcombine.low %v8969_v60, %v8994_v36  ;;  %v9004_v8 = vsel %vm7937_vm8, %v4380_v11, %v4381_v38  ;;  %v9007_v44 = vrot.slane %v3890_v54, 4  ;;  %v10102_v38 = vld [vmem:[#allocation17_spill] sm:$0xff] }
 0x109   : > { %v3917_v59 = vshll.u32 %v8972_v3, 16  ;;  %v3925_v6 = vshll.u32 %v6595_v52, 16  ;;  %v6674_v63 = vcombine.low %v8978_v39, %v9004_v8  ;;  %v9014_v4 = vrot.slane %v3911_v23, 4  ;;  %v7606_v8 = vld [vmem:[%s7690_s25 + $0xac] sm:$0xf] }
 0x10a   : > { %v3931_v5 = vshll.u32 %v8990_v40, 16  ;;  %v6658_v24 = vrot.slane %v6642_v32, 9  ;;  %v4385_v22 = vrot.slane %v10099_v12, 5  ;;  %v3935_v54 = vshrl.u32 %v8990_v40, 16 }
 0x10b   : > { %v2247_v23 = vshrl.u32 %v6369_v27, 16  ;;  %v2250_v17 = vshll.u32 %v6369_v27, 16  ;;  %v3924_v1 = vrot.slane %v3922_v31, 4  ;;  %v6659_v10 = vrot.slane %v6643_v2, 9  ;;  %v7543_v31 = vld [vmem:[%s7690_s25 + $0x18] sm:$0xff]  }
 0x10c   : > { %7180 = vmatmul.mubr.msk.bf16.gmra.mrb[12].mxu0 %vm657_vm4, %v8900_v33  ;;  %v4388_v33 = vrot.slane %v8781_v53, 5  ;;  %v9030_v35 = vsel %vm7937_vm8, %v6658_v24, %v4385_v22  ;;  %v4387_v62 = vrot.slane %v4385_v22, 4  ;;  %v3927_v53 = vrot.slane %v3925_v6, 5  ;;  %v7544_v24 = vld [vmem:[%s7690_s25 + $0x24] sm:$0xff]  }
 0x10d   : > { %7026 = vmatmul.mubr.msk.bf16.gmra.mrb[28].mxu1 %vm657_vm4, %v6260_v51  ;;  %7183 = vmatprep.mubr.msk.bf16.mxu0 %vm657_vm4, %v8902_v7  ;;  %v10100_v51 = vld [vmem:[#allocation4_spill] sm:$0xff]  ;;  %v2249_v42 = vrot.slane %v2247_v23, 4  ;;  %v2252_v52 = vrot.slane %v2250_v17, 5  ;;  %v6613_v11 = vcombine.low %v3862_v47, %v3872_v46  ;;  %v4392_v32 = vrot.slane %v10102_v38, 5  ;;  %v10105_v38 = vld [vmem:[#allocation18_spill] sm:$0xff] }
 0x10e   : > { %7031 = vmatprep.mubr.msk.bf16.mxu1 %vm657_vm4, %v7542_v26  ;;  %v2269_v7 = vsel %vm7716_vm5, %v10101_v48, %v10100_v51  ;;  %v9043_v13 = vsel %vm7937_vm8, %v4387_v62, %v4388_v33  ;;  %v4395_v26 = vrot.slane %v8786_v55, 5  ;;  %v3886_v27 = vsel %vm7716_vm5, %v8925_v50, %v8917_v9  ;;  %v9056_v47 = vld [vmem:[%s7690_s25 + $0xd0] sm:$0xf]  ;;  %v10104_v51 = vld [vmem:[#allocation2_spill] sm:$0xff] }
 0x10f   : > { %v3904_v20 = vor.u32 %v8987_v30, %v8985_v57  ;;  %v6675_v46 = vcombine.low %v9030_v35, %v9043_v13  ;;  %v2253_v6 = vor.u32 %v2252_v52, %v2249_v42  ;;  %v9061_v12 = vrot.slane %v3931_v5, 5  ;;  %v6644_v9 = vld [vmem:[%s7690_s25 + $0x90] sm:$0xe]  ;;  %v9075_v30 = vld [vmem:[%s7690_s25 + $0xc8] sm:$0x1] }
 0x110   : > { %v3937_v55 = vrot.slane %v3935_v54, 4  ;;  %v9065_v22 = vsel %vm7937_vm8, %v6659_v10, %v4392_v32  ;;  %v4394_v2 = vrot.slane %v4392_v32, 4  ;;  %v3896_v50 = vsel %vm7716_vm5, %v9007_v44, %v8922_v18  ;;  %v10103_v44 = vld [vmem:[#allocation3_spill] sm:$0xff] }
 0x111   : > { %v3914_v57 = vor.u32 %v9014_v4, %v8998_v41  ;;  %v3928_v33 = vor.u32 %v3927_v53, %v3924_v1  ;;  %v2254_v5 = vrot.slane %v2253_v6, 4  ;;  %v3946_v54 = vshrl.u32 %v6598_v29, 16 }
 0x112   : > { %v3949_v23 = vshll.u32 %v6598_v29, 16  ;;  %v3955_v17 = vshll.u32 %v9056_v47, 16  ;;  %v9082_v62 = vsel %vm7937_vm8, %v4394_v2, %v4395_v26  ;;  %v3959_v18 = vshrl.u32 %v9056_v47, 16 }
 0x113   : > { %v2259_v4 = vsel %vm7716_vm5, %v2254_v5, %v10103_v44  ;;  %v6660_v1 = vrot.slane %v6644_v9, 9  ;;  %v3919_v48 = vrot.slane %v3917_v59, 5  ;;  %v3941_v53 = vshll.u32 %v9075_v30, 16  ;;  %v6645_v9 = vld [vmem:[%s7690_s25 + $0x9c] sm:$0xe]  ;;  %v10106_v44 = vld [vmem:[#allocation19_spill] sm:$0xff] }
 0x114   : > { %7184 = vmatmul.mubr.msk.bf16.gmra.mrb[16].mxu0 %vm657_vm4, %v8904_v43  ;;  %v6676_v43 = vcombine.low %v9065_v22, %v9082_v62  ;;  %v9097_v42 = vcombine.low %v2259_v4, %v2269_v7  ;;  %v6614_v52 = vcombine.low %v3886_v27, %v3896_v50  ;;  %v3905_v10 = vrot.slane %v3904_v20, 4  ;;  %v9104_v59 = vld [vmem:[%s7690_s25 + $0xd4] sm:$0x1]  ;;  %v7546_v20 = vld [vmem:[%s7690_s25 + $0x3c] sm:$0xff]  }
 0x115   : > { %7032 = vmatmul.mubr.msk.bf16.vlgmr.msra.gmra.mrb[0].mxu1 %vm657_vm4, %v7543_v31  ;;  %7187 = vmatprep.mubr.msk.bf16.mxu0 %vm657_vm4, %v8911_v49  ;;  %v3938_v49 = vor.u32 %v3937_v55, %v9061_v12  ;;  %v4399_v32 = vrot.slane %v10105_v38, 5  ;;  %v4402_v26 = vrot.slane %v8791_v58, 5  ;;  %v3915_v31 = vrot.slane %v3914_v57, 4  ;;  %v6646_v38 = vld [vmem:[%s7690_s25 + $0xa8] sm:$0xe] }
 0x116   : > { %7234 = vmatpush3.bf16.msra.mxu1 %v10104_v51  ;;  %7035 = vmatprep.mubr.msk.bf16.mxu1 %vm657_vm4, %v7544_v24  ;;  %v3929_v29 = vrot.slane %v3928_v33, 4  ;;  %v3948_v6 = vrot.slane %v3946_v54, 4  ;;  %v3951_v2 = vrot.slane %v3949_v23, 5  ;;  %v7545_v24 = vld [vmem:[%s7690_s25 + $0x30] sm:$0xff]   ;;  %v9106_v55 = vrot.slane %v3955_v17, 5 }
 0x117   : > { %v3961_v5 = vrot.slane %v3959_v18, 4  ;;  %v9110_v7 = vsel %vm7937_vm8, %v6660_v1, %v4399_v32  ;;  %v4401_v27 = vrot.slane %v4399_v32, 4  ;;  %v3939_v50 = vrot.slane %v3938_v49, 4  ;;  %v6634_v51 = vld [vmem:[%s7690_s25 + $0x18] sm:$0xe] }
 0x118   : > { %v3943_v58 = vrot.slane %v3941_v53, 5  ;;  %v3910_v57 = vsel %vm7716_vm5, %v3905_v10, %v8998_v41  ;;  %v6661_v54 = vrot.slane %v6645_v9, 9  ;;  %v3920_v23 = vsel %vm7716_vm5, %v3915_v31, %v3919_v48  ;;  %v7593_v53 = vld [vmem:[%s7690_s25 + $0x1c] sm:$0xf] }
 0x119   : > { %v9118_v33 = vsel %vm7937_vm8, %v4401_v27, %v4402_v26  ;;  %v3965_v17 = vshll.u32 %v9104_v59, 16  ;;  %v4406_v4 = vrot.slane %v10106_v44, 5  ;;  %v3934_v41 = vsel %vm7716_vm5, %v3929_v29, %v9061_v12  ;;  %v7547_v29 = vld [vmem:[%s7690_s25 + $0x48] sm:$0xff]  }
 0x11a   : > { %v6677_v18 = vcombine.low %v9110_v7, %v9118_v33  ;;  %v3962_v1 = vor.u32 %v3961_v5, %v9106_v55  ;;  %v4409_v48 = vrot.slane %v8826_v15, 5  ;;  %v3944_v49 = vsel %vm7716_vm5, %v3939_v50, %v3943_v58  ;;  %v7548_v5 = vld [vmem:[%s7690_s25 + $0x54] sm:$0xff]  }
 0x11b   : > { %v9141_v10 = vsel %vm7937_vm8, %v6661_v54, %v4406_v4  ;;  %v4408_v12 = vrot.slane %v4406_v4, 4  ;;  %v6615_v32 = vcombine.low %v3910_v57, %v3920_v23  ;;  %v3967_v26 = vrot.slane %v3965_v17, 5  ;;  %v6635_v23 = vld [vmem:[%s7690_s25 + $0x24] sm:$0xe]  ;;  %v7595_v4 = vld [vmem:[%s7690_s25 + $0x28] sm:$0xf] }
 0x11c   : > { %7188 = vmatmul.mubr.msk.bf16.gmra.mrb[20].mxu0 %vm657_vm4, %v6613_v11  ;;  %v3952_v11 = vor.u32 %v3951_v2, %v3948_v6  ;;  %v6650_v31 = vrot.slane %v6634_v51, 9  ;;  %v6616_v6 = vcombine.low %v3934_v41, %v3944_v49  ;;  %v3963_v9 = vrot.slane %v3962_v1, 4  ;;  %v7596_v49 = vld [vmem:[%s7690_s25 + $0x34] sm:$0xf] }
 0x11d   : > { %7036 = vmatmul.mubr.msk.bf16.gmra.mrb[4].mxu1 %vm657_vm4, %v7545_v24  ;;  %7191 = vmatprep.mubr.msk.bf16.mxu0 %vm657_vm4, %v6614_v52  ;;  %v4329_v52 = vrot.slane %v7593_v53, 5  ;;  %v9146_v15 = vsel %vm7937_vm8, %v4408_v12, %v4409_v48  ;;  %v6662_v58 = vrot.slane %v6646_v38, 9  ;;  %v4413_v57 = vrot.slane %v8831_v21, 5  ;;  %v6636_v48 = vld [vmem:[%s7690_s25 + $0x30] sm:$0xe] }
 0x11e   : > { %7039 = vmatprep.mubr.msk.bf16.mxu1 %vm657_vm4, %v7546_v20  ;;  %v3953_v2 = vrot.slane %v3952_v11, 4  ;;  %v6678_v24 = vcombine.low %v9141_v10, %v9146_v15  ;;  %v7594_v20 = vld [vmem:[%s7690_s25 + $0x20] sm:$0x1]  ;;  %v4416_v54 = vrot.slane %v8840_v61, 5  ;;  %v3968_v61 = vsel %vm7716_vm5, %v3963_v9, %v3967_v26  ;;  %v6647_v11 = vld [vmem:[%s7690_s25 + $0xb4] sm:$0xe] }
 0x11f   : > { %v4331_v27 = vrot.slane %v4329_v52, 4  ;;  %v4332_v50 = vrot.slane %v7594_v20, 5  ;;  %v9159_v17 = vsel %vm7937_vm8, %v6662_v58, %v4413_v57  ;;  %v4415_v44 = vrot.slane %v4413_v57, 4  ;;  %v7597_v26 = vld [vmem:[%s7690_s25 + $0x2c] sm:$0x1]  ;;  %v10107_v58 = vld [vmem:[#allocation6_spill] sm:$0xff] }
 0x120   : > { %v3958_v21 = vsel %vm7716_vm5, %v3953_v2, %v9106_v55  ;;  %v4336_v41 = vrot.slane %v7595_v4, 5  ;;  %v4330_v1 = vsel %vm7937_vm8, %v6650_v31, %v4329_v52  ;;  %v4343_v53 = vrot.slane %v7596_v49, 5  ;;  %v7550_v20 = vld [vmem:[%s7690_s25 + $0x6c] sm:$0xff]   ;;  %v7611_v10 = vld [vmem:[%s7690_s25 + $0xc8] sm:$0x1] }
 0x121   : > { %v4333_v51 = vsel %vm7937_vm8, %v4331_v27, %v4332_v50  ;;  %v9179_v55 = vsel %vm7937_vm8, %v4415_v44, %v4416_v54  ;;  %v6651_v12 = vrot.slane %v6635_v23, 9  ;;  %v6663_v52 = vrot.slane %v6647_v11, 9  ;;  %v6648_v44 = vld [vmem:[%s7690_s25 + $0xc0] sm:$0xe]  ;;  %v6637_v11 = vld [vmem:[%s7690_s25 + $0x3c] sm:$0xe] }
 0x122   : > { %v6679_v38 = vcombine.low %v9159_v17, %v9179_v55  ;;  %v4420_v31 = vrot.slane %v8909_v56, 5  ;;  %v6667_v2 = vcombine.low %v4330_v1, %v4333_v51  ;;  %v4338_v9 = vrot.slane %v4336_v41, 4  ;;  %v10108_v56 = vld [vmem:[#allocation7_spill] sm:$0xff] }
 0x123   : > { %v4423_v27 = vrot.slane %v8972_v3, 5  ;;  %v4345_v50 = vrot.slane %v4343_v53, 4  ;;  %v4346_v57 = vrot.slane %v10107_v58, 5  ;;  %v4337_v3 = vsel %vm7937_vm8, %v6651_v12, %v4336_v41 }
 0x124   : > { %7192 = vmatmul.mubr.msk.bf16.gmra.mrb[24].mxu0 %vm657_vm4, %v6615_v32  ;;  %v6617_v32 = vcombine.low %v3958_v21, %v3968_v61  ;;  %v9191_v54 = vsel %vm7937_vm8, %v6663_v52, %v4420_v31  ;;  %v4422_v23 = vrot.slane %v4420_v31, 4  ;;  %v4350_v21 = vrot.slane %v10108_v56, 5  ;;  %v10109_v31 = vld [vmem:[#allocation8_spill] sm:$0xff] }
 0x125   : > { %7040 = vmatmul.mubr.msk.bf16.gmra.mrb[8].mxu1 %vm657_vm4, %v7547_v29  ;;  %7195 = vmatprep.mubr.msk.bf16.mxu0 %vm657_vm4, %v6616_v6  ;;  %v4339_v29 = vrot.slane %v7597_v26, 5  ;;  %v7549_v6 = vld [vmem:[%s7690_s25 + $0x60] sm:$0xff]   ;;  %v6664_v49 = vrot.slane %v6648_v44, 9  ;;  %v4427_v41 = vrot.slane %v8990_v40, 5  ;;  %v4430_v12 = vrot.slane %v9075_v30, 5 }
 0x126   : > { %7043 = vmatprep.mubr.msk.bf16.mxu1 %vm657_vm4, %v7548_v5  ;;  %v6652_v5 = vrot.slane %v6636_v48, 9  ;;  %v9198_v61 = vsel %vm7937_vm8, %v4422_v23, %v4423_v27  ;;  %v4347_v48 = vsel %vm7937_vm8, %v4345_v50, %v4346_v57  ;;  %v4352_v52 = vrot.slane %v4350_v21, 4  ;;  %v7598_v56 = vld [vmem:[%s7690_s25 + $0x70] sm:$0xf] }
 0x127   : > { %v4340_v4 = vsel %vm7937_vm8, %v4338_v9, %v4339_v29  ;;  %v6680_v1 = vcombine.low %v9191_v54, %v9198_v61  ;;  %v6653_v29 = vrot.slane %v6637_v11, 9  ;;  %v7551_v9 = vld [vmem:[%s7690_s25 + $0x78] sm:$0xff]   ;;  %v4434_v11 = vrot.slane %v9056_v47, 5 }
 0x128   : > { %v4344_v51 = vsel %vm7937_vm8, %v6652_v5, %v4343_v53  ;;  %v6668_v26 = vcombine.low %v4337_v3, %v4340_v4  ;;  %v9222_v53 = vsel %vm7937_vm8, %v6664_v49, %v4427_v41  ;;  %v4429_v5 = vrot.slane %v4427_v41, 4 }
 0x129   : > { %v6669_v27 = vcombine.low %v4344_v51, %v4347_v48  ;;  %v4351_v57 = vsel %vm7937_vm8, %v6653_v29, %v4350_v21  ;;  %v2232_v3 = vshll.u32 %v7598_v56, 16  ;;  %v2236_v4 = vshrl.u32 %v7598_v56, 16 }
 0x12a   : > { %v9227_v40 = vsel %vm7937_vm8, %v4429_v5, %v4430_v12  ;;  %v4437_v21 = vrot.slane %v9104_v59, 5  ;;  %v7553_v12 = vld [vmem:[%s7690_s25 + $0x90] sm:$0xff]   ;;  %v7554_v59 = vld [vmem:[%s7690_s25 + $0x9c] sm:$0xff]   ;;  %v2410_v15 = vshll.u32 %v7611_v10, 16 }
 0x12b   : > { %v6681_v44 = vcombine.low %v9222_v53, %v9227_v40  ;;  %v2238_v29 = vrot.slane %v2236_v4, 4  ;;  %v7556_v4 = vld [vmem:[%s7690_s25 + $0xb4] sm:$0xff]  }
 0x12c   : > { %7196 = vmatmul.mubr.msk.bf16.gmra.mrb[28].mxu0 %vm657_vm4, %v6617_v32  ;;  %v6366_v32 = vld [vmem:[%s7690_s25 + $0x6c] sm:$0xf] }
 0x12d   : > { %7044 = vmatmul.mubr.msk.bf16.gmra.mrb[12].mxu1 %vm657_vm4, %v7549_v6  ;;  %7201 = vmatprep.mubr.msk.bf16.mxu0 %vm657_vm4, %v6667_v2  ;;  %v4353_v6 = vrot.slane %v10109_v31, 5  ;;  %v6649_v2 = vld [vmem:[%s7690_s25 + $0xcc] sm:$0xe]  ;;  %v2223_v50 = vshrl.u32 %v6366_v32, 16  ;;  %v2226_v58 = vshll.u32 %v6366_v32, 16  ;;  %v4436_v32 = vrot.slane %v4434_v11, 4 }
 0x12e   : > { %7047 = vmatprep.mubr.msk.bf16.mxu1 %vm657_vm4, %v7550_v20  ;;  %v7552_v20 = vld [vmem:[%s7690_s25 + $0x84] sm:$0xff]   ;;  %v6665_v30 = vrot.slane %v6649_v2, 9  ;;  %v7599_v2 = vld [vmem:[%s7690_s25 + $0x74] sm:$0x1] }
 0x12f   : > { %v4354_v23 = vsel %vm7937_vm8, %v4352_v52, %v4353_v6  ;;  %v2225_v51 = vrot.slane %v2223_v50, 4  ;;  %v2228_v48 = vrot.slane %v2226_v58, 5  ;;  %v9249_v47 = vsel %vm7937_vm8, %v4436_v32, %v4437_v21  ;;  %v6372_v52 = vld [vmem:[%s7690_s25 + $0x84] sm:$0xf] }
 0x130   : > { %v9244_v49 = vsel %vm7937_vm8, %v6665_v30, %v4434_v11  ;;  %v6670_v41 = vcombine.low %v4351_v57, %v4354_v23  ;;  %v2274_v5 = vshll.u32 %v6372_v52, 16  ;;  %v6375_v57 = vld [vmem:[%s7690_s25 + $0x90] sm:$0xf]  ;;  %v7555_v23 = vld [vmem:[%s7690_s25 + $0xa8] sm:$0xff]  }
 0x131   : > { %v6682_v31 = vcombine.low %v9244_v49, %v9249_v47  ;;  %v2229_v6 = vor.u32 %v2228_v48, %v2225_v51  ;;  %v2295_v51 = vshrl.u32 %v6375_v57, 16  ;;  %v2298_v48 = vshll.u32 %v6375_v57, 16 }
 0x133   : > { %v2230_v30 = vrot.slane %v2229_v6, 4  ;;  %v7602_v6 = vld [vmem:[%s7690_s25 + $0x8c] sm:$0x1]  ;;  %v2300_v60 = vrot.slane %v2298_v48, 5  ;;  %v7605_v48 = vld [vmem:[%s7690_s25 + $0xa4] sm:$0x1] }
 0x134   : > { %7202 = vmatmul.mubr.msk.bf16.vlgmr.msra.gmra.mrb[0].mxu0 %vm657_vm4, %v6668_v26  ;;  %v2234_v26 = vrot.slane %v2232_v3, 5  ;;  %v6378_v3 = vld [vmem:[%s7690_s25 + $0x9c] sm:$0xf]  ;;  %v2290_v19 = vshll.u32 %v7602_v6, 16 }
 0x135   : > { %7048 = vmatmul.mubr.msk.bf16.gmra.mrb[16].mxu1 %vm657_vm4, %v7551_v9  ;;  %7205 = vmatprep.mubr.msk.bf16.mxu0 %vm657_vm4, %v6669_v27  ;;  %v2242_v9 = vshll.u32 %v7599_v2, 16  ;;  %v2271_v27 = vshrl.u32 %v6372_v52, 16  ;;  %v2322_v52 = vshll.u32 %v6378_v3, 16 }
 0x136   : > { %7051 = vmatprep.mubr.msk.bf16.mxu1 %vm657_vm4, %v7552_v20  ;;  %v2239_v45 = vor.u32 %v2238_v29, %v2234_v26  ;;  %v7600_v20 = vld [vmem:[%s7690_s25 + $0x88] sm:$0xf]  ;;  %v2235_v32 = vsel %vm7716_vm5, %v2230_v30, %v2234_v26  ;;  %v2292_v30 = vrot.slane %v2290_v19, 5 }
 0x137   : > { %v2280_v50 = vshll.u32 %v7600_v20, 16  ;;  %v2284_v58 = vshrl.u32 %v7600_v20, 16  ;;  %v2244_v25 = vrot.slane %v2242_v9, 5  ;;  %v2273_v34 = vrot.slane %v2271_v27, 4 }
 0x138   : > { %v2240_v56 = vrot.slane %v2239_v45, 4  ;;  %v2332_v45 = vshrl.u32 %v7603_v0, 16  ;;  %v2297_v27 = vrot.slane %v2295_v51, 4  ;;  %v2324_v20 = vrot.slane %v2322_v52, 5 }
 0x139   : > { %v9268_v11 = vrot.slane %v2280_v50, 5  ;;  %v2286_v21 = vrot.slane %v2284_v58, 4  ;;  %v7557_v50 = vld [vmem:[%s7690_s25 + $0xc0] sm:$0xff]  }
 0x13a   : > { %v2245_v26 = vsel %vm7716_vm5, %v2240_v56, %v2244_v25  ;;  %v6381_v56 = vld [vmem:[%s7690_s25 + $0xa8] sm:$0xf] }
 0x13b   : > { %v2287_v9 = vor.u32 %v2286_v21, %v9268_v11  ;;  %v6399_v58 = vcombine.low %v2235_v32, %v2245_v26  ;;  %v2338_v32 = vshll.u32 %v7605_v48, 16  ;;  %v2346_v39 = vshll.u32 %v6381_v56, 16 }
 0x13c   : > { %7206 = vmatmul.mubr.msk.bf16.gmra.mrb[4].mxu0 %vm657_vm4, %v6670_v41  ;;  %v7601_v41 = vld [vmem:[%s7690_s25 + $0x94] sm:$0xf] }
 0x13d   : > { %7052 = vmatmul.mubr.msk.bf16.gmra.mrb[20].mxu1 %vm657_vm4, %v7553_v12  ;;  %7209 = vmatprep.mubr.msk.bf16.mxu0 %vm657_vm4, %v6671_v14  ;;  %v2276_v14 = vrot.slane %v2274_v5, 5  ;;  %v2304_v12 = vshll.u32 %v7601_v41, 16  ;;  %v2308_v29 = vshrl.u32 %v7601_v41, 16  ;;  %v2343_v41 = vshrl.u32 %v6381_v56, 16  ;;  %v6387_v56 = vld [vmem:[%s7690_s25 + $0xc0] sm:$0xf] }
 0x13e   : > { %7055 = vmatprep.mubr.msk.bf16.mxu1 %vm657_vm4, %v7554_v59  ;;  %v2319_v59 = vshrl.u32 %v6378_v3, 16  ;;  %v7604_v3 = vld [vmem:[%s7690_s25 + $0x98] sm:$0x1] }
 0x13f   : > { %v2277_v2 = vor.u32 %v2276_v14, %v2273_v34  ;;  %v9288_v36 = vrot.slane %v2304_v12, 5  ;;  %v2288_v34 = vrot.slane %v2287_v9, 4  ;;  %v2301_v14 = vor.u32 %v2300_v60, %v2297_v27  ;;  %v6384_v12 = vld [vmem:[%s7690_s25 + $0xb4] sm:$0xf] }
 0x140   : > { %v2321_v5 = vrot.slane %v2319_v59, 4  ;;  %v2356_v59 = vshrl.u32 %v7606_v8, 16  ;;  %v2367_v35 = vshrl.u32 %v6384_v12, 16  ;;  %v2370_v13 = vshll.u32 %v6384_v12, 16 }
 0x141   : > { %v2278_v25 = vrot.slane %v2277_v2, 4  ;;  %v2293_v26 = vsel %vm7716_vm5, %v2288_v34, %v2292_v30  ;;  %v2302_v6 = vrot.slane %v2301_v14, 4  ;;  %v2340_v9 = vrot.slane %v2338_v32, 5 }
 0x142   : > { %v2325_v51 = vor.u32 %v2324_v20, %v2321_v5  ;;  %v2345_v27 = vrot.slane %v2343_v41, 4  ;;  %v2358_v20 = vrot.slane %v2356_v59, 4  ;;  %v7610_v41 = vld [vmem:[%s7690_s25 + $0xbc] sm:$0x1] }
 0x143   : > { %v2283_v52 = vsel %vm7716_vm5, %v2278_v25, %v9268_v11  ;;  %v2307_v25 = vsel %vm7716_vm5, %v2302_v6, %v9288_v36  ;;  %v2386_v7 = vshll.u32 %v7610_v41, 16 }
 0x144   : > { %7210 = vmatmul.mubr.msk.bf16.gmra.mrb[8].mxu0 %vm657_vm4, %v6672_v16  ;;  %v2328_v16 = vshll.u32 %v7603_v0, 16  ;;  %v2326_v2 = vrot.slane %v2325_v51, 4  ;;  %v6401_v11 = vcombine.low %v2283_v52, %v2293_v26 }
 0x145   : > { %7056 = vmatmul.mubr.msk.bf16.gmra.mrb[24].mxu1 %vm657_vm4, %v7555_v23  ;;  %7213 = vmatprep.mubr.msk.bf16.mxu0 %vm657_vm4, %v6673_v28  ;;  %v2310_v28 = vrot.slane %v2308_v29, 4  ;;  %v2334_v23 = vrot.slane %v2332_v45, 4 }
 0x146   : > { %7059 = vmatprep.mubr.msk.bf16.mxu1 %vm657_vm4, %v7556_v4  ;;  %v9291_v57 = vrot.slane %v2328_v16, 5  ;;  %v2314_v4 = vshll.u32 %v7604_v3, 16 }
 0x147   : > { %v2311_v21 = vor.u32 %v2310_v28, %v9288_v36  ;;  %v2348_v28 = vrot.slane %v2346_v39, 5  ;;  %v7608_v36 = vld [vmem:[%s7690_s25 + $0xb0] sm:$0x1] }
 0x148   : > { %v2335_v29 = vor.u32 %v2334_v23, %v9291_v57  ;;  %v2316_v19 = vrot.slane %v2314_v4, 5  ;;  %v2331_v14 = vsel %vm7716_vm5, %v2326_v2, %v9291_v57  ;;  %v2362_v3 = vshll.u32 %v7608_v36, 16 }
 0x149   : > { %v2312_v45 = vrot.slane %v2311_v21, 4  ;;  %v2349_v62 = vor.u32 %v2348_v28, %v2345_v27  ;;  %v2391_v4 = vshrl.u32 %v6387_v56, 16  ;;  %v2394_v57 = vshll.u32 %v6387_v56, 16  ;;  %v7609_v21 = vld [vmem:[%s7690_s25 + $0xc4] sm:$0xf] }
 0x14a   : > { %v2336_v60 = vrot.slane %v2335_v29, 4  ;;  %v2400_v51 = vshll.u32 %v7609_v21, 16  ;;  %v2404_v48 = vshrl.u32 %v7609_v21, 16  ;;  %v2364_v39 = vrot.slane %v2362_v3, 5 }
 0x14b   : > { %v2317_v34 = vsel %vm7716_vm5, %v2312_v45, %v2316_v19  ;;  %v2350_v12 = vrot.slane %v2349_v62, 4  ;;  %v2388_v19 = vrot.slane %v2386_v7, 5  ;;  %v2412_v2 = vrot.slane %v2410_v15, 5 }
 0x14c   : > { %7214 = vmatmul.mubr.msk.bf16.gmra.mrb[12].mxu0 %vm657_vm4, %v6674_v63  ;;  %v2352_v63 = vshll.u32 %v7606_v8, 16  ;;  %v2341_v22 = vsel %vm7716_vm5, %v2336_v60, %v2340_v9  ;;  %v6402_v33 = vcombine.low %v2307_v25, %v2317_v34  ;;  %v2393_v8 = vrot.slane %v2391_v4, 4  ;;  %v9400_v25 = vld [vmem:[%s10014_s2] ss:$0 sm:$0xff] }
 0x14d   : > { %7060 = vmatmul.mubr.msk.bf16.gmra.mrb[28].mxu1 %vm657_vm4, %v7557_v50  ;;  %7217 = vmatprep.mubr.msk.bf16.mxu0 %vm657_vm4, %v6675_v46  ;;  %v7607_v46 = vld [vmem:[%s7690_s25 + $0xb8] sm:$0xf]  ;;  %v2369_v50 = vrot.slane %v2367_v35, 4  ;;  %v2402_v59 = vrot.slane %v2400_v51, 5  ;;  %v2406_v52 = vrot.slane %v2404_v48, 4  ;;  %v4839_v56 = vlaneseq }
 0x14e   : > { %7081 = vmatprep.mubr.msk.bf16.mxu1 %vm657_vm4, %v6399_v58  ;;  %v2376_v0 = vshll.u32 %v7607_v46, 16  ;;  %v2380_v16 = vshrl.u32 %v7607_v46, 16  ;;  %v2354_v5 = vrot.slane %v2352_v63, 5  ;;  %v2372_v58 = vrot.slane %v2370_v13, 5 }
 0x14f   : > { %v2396_v63 = vrot.slane %v2394_v57, 5  ;;  %v4840_v36 = vshrl.u32 %v4839_v56, 7  ;;  %v7622_v51 = vmov 1934713408  }
 0x150   : > { %v2378_v30 = vrot.slane %v2376_v0, 5  ;;  %v2382_v23 = vrot.slane %v2380_v16, 4  ;;  %v2355_v35 = vsel %vm7716_vm5, %v2350_v12, %v2354_v5  ;;  %v2407_v0 = vor.u32 %v2406_v52, %v2402_v59 }
 0x151   : > { %v2397_v46 = vor.u32 %v2396_v63, %v2393_v8  ;;  %v5755_v48 = vunpack.c.l.s4 %v7622_v51 }
 0x152   : > { %v2383_v32 = vor.u32 %v2382_v23, %v2378_v30  ;;  %v2408_v45 = vrot.slane %v2407_v0, 4 }
 0x153   : > { %v2398_v16 = vrot.slane %v2397_v46, 4 }
 0x154   : > { %7218 = vmatmul.mubr.msk.bf16.gmra.mrb[16].mxu0 %vm657_vm4, %v6676_v43  ;;  %v2359_v43 = vor.u32 %v2358_v20, %v2354_v5  ;;  %v2384_v6 = vrot.slane %v2383_v32, 4  ;;  %v2413_v27 = vsel %vm7716_vm5, %v2408_v45, %v2412_v2 }
 0x155   : > { %7082 = vmatmul.mubr.msk.bf16.vlgmr.msra.gmra.mrb[16].mxu1 %vm657_vm4, %v9097_v42  ;;  %7221 = vmatprep.mubr.msk.bf16.mxu0 %vm657_vm4, %v6677_v18  ;;  %v2373_v42 = vor.u32 %v2372_v58, %v2369_v50  ;;  %v6403_v18 = vcombine.low %v2331_v14, %v2341_v22  ;;  %v2403_v9 = vsel %vm7716_vm5, %v2398_v16, %v2402_v59 }
 0x156   : > { %7085 = vmatprep.mubr.msk.bf16.mxu1 %vm657_vm4, %v6401_v11  ;;  %v2360_v29 = vrot.slane %v2359_v43, 4  ;;  %v2389_v17 = vsel %vm7716_vm5, %v2384_v6, %v2388_v19  ;;  %v6406_v60 = vcombine.low %v2403_v9, %v2413_v27 }
 0x157   : > { %v2374_v26 = vrot.slane %v2373_v42, 4 }
 0x158   : > { %v2365_v13 = vsel %vm7716_vm5, %v2360_v29, %v2364_v39  ;;  %v5756_v39 = vunpack.c.0.s8 %v5755_v48 }
 0x159   : > { %v6404_v55 = vcombine.low %v2355_v35, %v2365_v13 }
 0x15c   : > { %7222 = vmatmul.mubr.msk.bf16.gmra.mrb[20].mxu0 %vm657_vm4, %v6678_v24  ;;  %v2379_v24 = vsel %vm7716_vm5, %v2374_v26, %v2378_v30  ;;  %v7621_v30 = vmov 1983009808  }
 0x15d   : > { %7086 = vmatmul.mubr.msk.bf16.gmra.mrb[20].mxu1 %vm657_vm4, %v6402_v33  ;;  %7225 = vmatprep.mubr.msk.bf16.mxu0 %vm657_vm4, %v6679_v38  ;;  %v6405_v38 = vcombine.low %v2379_v24, %v2389_v17  ;;  %v4837_v23 = vunpack.c.l.s4 %v7621_v30  ;;  %v9410_v24 = vsub.s32 %v5756_v39, %v4840_v36 }
 0x15e   : > { %7089 = vmatprep.mubr.msk.bf16.mxu1 %vm657_vm4, %v6403_v18 }
 0x15f   : > { %v4838_v43 = vunpack.c.0.s8 %v4837_v23 }
 0x161   : > { %v9405_v18 = vsub.s32 %v4838_v43, %v4840_v36 }
 0x164   : > { %7226 = vmatmul.mubr.msk.bf16.gmra.mrb[24].mxu0 %vm657_vm4, %v6680_v1 }
 0x165   : > { %7090 = vmatmul.mubr.msk.bf16.gmra.mrb[24].mxu1 %vm657_vm4, %v6404_v55  ;;  %7229 = vmatprep.mubr.msk.bf16.mxu0 %vm657_vm4, %v6681_v44 }
 0x166   : > { %7093 = vmatprep.mubr.msk.bf16.mxu1 %vm657_vm4, %v6405_v38 }
 0x16c   : > { %7230 = vmatmul.mubr.msk.bf16.gmra.mrb[28].mxu0 %vm657_vm4, %v6682_v31 }
 0x16d   : > { %7094 = vmatmul.mubr.msk.bf16.gmra.mrb[28].mxu1 %vm657_vm4, %v6406_v60 }
 0x1e8   : > { %v7033_v54 = vpop.f32.mrb[0].mxu1 }
 0x1e9   : > { %v1823_v61 = vpop.f32.mrb[1].mxu1 }
 0x1ea   : > { %v7034_v1 = vpop.f32.mrb[2].mxu1 }
 0x1eb   : > { %v1826_v53 = vpop.f32.mrb[3].mxu1 }
 0x1f0   : > { %v7037_v40 = vpop.f32.mrb[4].mxu1 }
 0x1f1   : > { %v1839_v44 = vpop.f32.mrb[5].mxu1 }
 0x1f2   : > { %v7038_v28 = vpop.f32.mrb[6].mxu1 }
 0x1f3   : > { %v9379_v5 = vpop.f32.mrb[7].mxu1 }
 0x1f8   : > { %v9381_v20 = vpop.f32.mrb[8].mxu1 }
 0x1f9   : > { %v9383_v37 = vpop.f32.mrb[9].mxu1 }
 0x1fa   : > { %v9385_v11 = vpop.f32.mrb[10].mxu1 }
 0x1fb   : > { %v9387_v49 = vpop.f32.mrb[11].mxu1 }
 0x200   : > { %v9389_v47 = vpop.f32.mrb[12].mxu1 }
 0x201   : > { %v9391_v31 = vpop.f32.mrb[13].mxu1 }
 0x202   : > { %v9393_v50 = vpop.f32.mrb[14].mxu1 }
 0x203   : > { %v9395_v58 = vpop.f32.mrb[15].mxu1 }
 0x207   : > { %v7203_v34 = vpop.f32.mrb[0].mxu0 }
 0x208   : > { %v7235_v14 = vadd.f32 %v7203_v34, %v7033_v54  ;;  %v4574_v22 = vpop.f32.mrb[1].mxu0 }
 0x209   : > { %v7236_v62 = vadd.f32 %v4574_v22, %v1823_v61  ;;  %v7204_v3 = vpop.f32.mrb[2].mxu0 }
 0x20a   : > { %v4741_v4 = vadd.f32 %v7235_v14, %v9400_v25  ;;  %v7237_v57 = vadd.f32 %v7204_v3, %v7034_v1  ;;  %v4577_v21 = vpop.f32.mrb[3].mxu0 }
 0x20b   : > { %v4739_v42 = vadd.f32 %v7236_v62, %v9400_v25  ;;  %v7238_v32 = vadd.f32 %v4577_v21, %v1826_v53 }
 0x20c   : > { %v4773_v41 = vmax.f32 %v4741_v4, 0.0  ;;  %v4742_v7 = vadd.f32 %v7237_v57, %v9400_v25 }
 0x20d   : > { %v4771_v33 = vmax.f32 %v4739_v42, 0.0  ;;  %v4740_v12 = vadd.f32 %v7238_v32, %v9400_v25 }
 0x20e   : > { %v4774_v29 = vmax.f32 %v4742_v7, 0.0 }
 0x20f   : > { %v4803_v8 = vmax.f32 %v4771_v33, %v4773_v41  ;;  %v4772_v63 = vmax.f32 %v4740_v12, 0.0  ;;  %v7207_v59 = vpop.f32.mrb[4].mxu0 }
 0x210   : > { %v7239_v52 = vadd.f32 %v7207_v59, %v7037_v40  ;;  %v4590_v26 = vpop.f32.mrb[5].mxu0 }
 0x211   : > { %v4835_v6 = vcombine.high %v4803_v8, %v4803_v8  ;;  %v4842_v19 = vrot.slane %v4803_v8, %v9405_v18  ;;  %v4804_v35 = vmax.f32 %v4772_v63, %v4774_v29  ;;  %v7240_v13 = vadd.f32 %v4590_v26, %v1839_v44  ;;  %v7208_v46 = vpop.f32.mrb[6].mxu0 }
 0x212   : > { %v4745_v0 = vadd.f32 %v7239_v52, %v9400_v25  ;;  %v7241_v10 = vadd.f32 %v7208_v46, %v7038_v28  ;;  %v4593_v15 = vpop.f32.mrb[7].mxu0 }
 0x213   : > { %v4849_v17 = vrot.slane %v4835_v6, %v9405_v18  ;;  %v4850_v55 = vcombine.high %v4842_v19, %v4842_v19  ;;  %v6700_v38 = vrot.slane %v4842_v19, 9  ;;  %v4852_v16 = vcombine.high %v4804_v35, %v4804_v35 }
 0x214   : > { %v4859_v45 = vrot.slane %v4804_v35, %v9405_v18  ;;  %v4777_v2 = vmax.f32 %v4745_v0, 0.0  ;;  %v4743_v9 = vadd.f32 %v7240_v13, %v9400_v25  ;;  %v4746_v27 = vadd.f32 %v7241_v10, %v9400_v25 }
 0x215   : > { %v4851_v60 = vcombine.high %v4849_v17, %v4849_v17  ;;  %v6701_v54 = vrot.slane %v4850_v55, 9  ;;  %v6702_v61 = vrot.slane %v4849_v17, 9  ;;  %v5363_v1 = vmax.f32 %v4842_v19, %v6700_v38 }
 0x216   : > { %v4866_v53 = vrot.slane %v4852_v16, %v9405_v18  ;;  %v4867_v40 = vcombine.high %v4859_v45, %v4859_v45  ;;  %v6704_v44 = vrot.slane %v4859_v45, 9  ;;  %v4775_v28 = vmax.f32 %v4743_v9, 0.0 }
 0x217   : > { %v6703_v30 = vrot.slane %v4851_v60, 9  ;;  %v5364_v23 = vmax.f32 %v4850_v55, %v6701_v54  ;;  %v9417_v56 = vmax.f32 %v4849_v17, %v6702_v61  ;;  %v4778_v34 = vmax.f32 %v4746_v27, 0.0  ;;  %v7211_v14 = vpop.f32.mrb[8].mxu0 }
 0x218   : > { %v4868_v22 = vcombine.high %v4866_v53, %v4866_v53  ;;  %v6705_v62 = vrot.slane %v4867_v40, 9  ;;  %v6706_v43 = vrot.slane %v4866_v53, 9  ;;  %v5367_v36 = vmax.f32 %v4859_v45, %v6704_v44  ;;  %v4606_v3 = vpop.f32.mrb[9].mxu0 }
 0x219   : > { %v5366_v4 = vmax.f32 %v4851_v60, %v6703_v30  ;;  %v9419_v57 = vrot.slane %v5364_v23, 7  ;;  %v4805_v21 = vmax.f32 %v4775_v28, %v4777_v2  ;;  %v7242_v51 = vadd.f32 %v4593_v15, %v9379_v5  ;;  %v7212_v48 = vpop.f32.mrb[10].mxu0 }
 0x21a   : > { %v6707_v42 = vrot.slane %v4868_v22, 9  ;;  %v5368_v32 = vmax.f32 %v4867_v40, %v6705_v62  ;;  %v5369_v41 = vmax.f32 %v4866_v53, %v6706_v43  ;;  %v7243_v7 = vadd.f32 %v7211_v14, %v9381_v20  ;;  %v4609_v33 = vpop.f32.mrb[11].mxu0 }
 0x21b   : > { %v9425_v12 = vsel %vm5496_vm9, %v9419_v57, %v5363_v1  ;;  %v9427_v29 = vrot.slane %v5366_v4, 7  ;;  %v4869_v39 = vcombine.high %v4805_v21, %v4805_v21  ;;  %v4876_v8 = vrot.slane %v4805_v21, %v9405_v18 }
 0x21c   : > { %v5370_v63 = vmax.f32 %v4868_v22, %v6707_v42  ;;  %v9430_v59 = vrot.slane %v5368_v32, 7  ;;  %v4744_v5 = vadd.f32 %v7242_v51, %v9400_v25  ;;  %v4749_v52 = vadd.f32 %v7243_v7, %v9400_v25 }
 0x21d   : > { %v4883_v26 = vrot.slane %v4869_v39, %v9405_v18  ;;  %v4884_v20 = vcombine.high %v4876_v8, %v4876_v8  ;;  %v6708_v6 = vrot.slane %v4876_v8, 9  ;;  %v7244_v19 = vadd.f32 %v4606_v3, %v9383_v37 }
 0x21e   : > { %10110 = vst [vmem:[#allocation11_spill] sm:$0xff] %v9430_v59  ;;  %v9438_v35 = vsel %vm5496_vm9, %v9430_v59, %v5367_v36  ;;  %v9440_v13 = vrot.slane %v5370_v63, 7  ;;  %v4776_v46 = vmax.f32 %v4744_v5, 0.0  ;;  %v4781_v0 = vmax.f32 %v4749_v52, 0.0 }
 0x21f   : > { %10111 = vst [vmem:[#allocation9_spill] sm:$0xff] %v9438_v35  ;;  %v4885_v10 = vcombine.high %v4883_v26, %v4883_v26  ;;  %v6709_v15 = vrot.slane %v4884_v20, 9  ;;  %v6710_v17 = vrot.slane %v4883_v26, 9  ;;  %v5371_v55 = vmax.f32 %v4876_v8, %v6708_v6  ;;  %v7215_v38 = vpop.f32.mrb[12].mxu0 }
 0x220   : > { %10112 = vst [vmem:[#allocation12_spill] sm:$0xff] %v9440_v13  ;;  %v9444_v16 = vsel %vm5496_vm9, %v9440_v13, %v5369_v41  ;;  %v4806_v45 = vmax.f32 %v4776_v46, %v4778_v34  ;;  %v4747_v37 = vadd.f32 %v7244_v19, %v9400_v25  ;;  %v7245_v2 = vadd.f32 %v7212_v48, %v9385_v11  ;;  %v4622_v9 = vpop.f32.mrb[13].mxu0 }
 0x221   : > { %10113 = vst [vmem:[#allocation13_spill] sm:$0xff] %v9444_v16  ;;  %v6711_v27 = vrot.slane %v4885_v10, 9  ;;  %v5372_v60 = vmax.f32 %v4884_v20, %v6709_v15  ;;  %v9448_v54 = vmax.f32 %v4883_v26, %v6710_v17  ;;  %v7246_v61 = vadd.f32 %v4609_v33, %v9387_v49  ;;  %v9451_v1 = vpop.f32.mrb[14].mxu0 }
 0x222   : > { %v4886_v53 = vcombine.high %v4806_v45, %v4806_v45  ;;  %v4893_v40 = vrot.slane %v4806_v45, %v9405_v18  ;;  %v4779_v44 = vmax.f32 %v4747_v37, 0.0  ;;  %v4750_v28 = vadd.f32 %v7245_v2, %v9400_v25  ;;  %v9455_v30 = vpop.f32.mrb[15].mxu0 }
 0x223   : > { %v5374_v23 = vmax.f32 %v4885_v10, %v6711_v27  ;;  %v9457_v34 = vrot.slane %v5372_v60, 7  ;;  %v4748_v11 = vadd.f32 %v7246_v61, %v9400_v25  ;;  %v7247_v14 = vadd.f32 %v7215_v38, %v9389_v47 }
 0x224   : > { %v4900_v22 = vrot.slane %v4886_v53, %v9405_v18  ;;  %v4901_v49 = vcombine.high %v4893_v40, %v4893_v40  ;;  %v6712_v62 = vrot.slane %v4893_v40, 9  ;;  %v4807_v43 = vmax.f32 %v4779_v44, %v4781_v0 }
 0x225   : > { %v9464_v36 = vsel %vm5496_vm9, %v9457_v34, %v5371_v55  ;;  %v9466_v3 = vrot.slane %v5374_v23, 7  ;;  %v4782_v4 = vmax.f32 %v4750_v28, 0.0  ;;  %v4780_v21 = vmax.f32 %v4748_v11, 0.0 }
 0x226   : > { %v4902_v51 = vcombine.high %v4900_v22, %v4900_v22  ;;  %v6713_v48 = vrot.slane %v4901_v49, 9  ;;  %v6714_v42 = vrot.slane %v4900_v22, 9  ;;  %v5375_v32 = vmax.f32 %v4893_v40, %v6712_v62 }
 0x227   : > { %v4903_v41 = vcombine.high %v4807_v43, %v4807_v43  ;;  %v4910_v47 = vrot.slane %v4807_v43, %v9405_v18  ;;  %v4808_v7 = vmax.f32 %v4780_v21, %v4782_v4  ;;  %v4753_v33 = vadd.f32 %v7247_v14, %v9400_v25  ;;  %v7219_v39 = vpop.f32.mrb[16].mxu0 }
 0x228   : > { %v6715_v8 = vrot.slane %v4902_v51, 9  ;;  %v5376_v63 = vmax.f32 %v4901_v49, %v6713_v48  ;;  %v5377_v5 = vmax.f32 %v4900_v22, %v6714_v42  ;;  %v7248_v52 = vadd.f32 %v4622_v9, %v9391_v31  ;;  %v7083_v26 = vpop.f32.mrb[16].mxu1  ;;  %v4638_v20 = vpop.f32.mrb[17].mxu0 }
 0x229   : > { %v4917_v6 = vrot.slane %v4903_v41, %v9405_v18  ;;  %v4918_v19 = vcombine.high %v4910_v47, %v4910_v47  ;;  %v6716_v46 = vrot.slane %v4910_v47, 9  ;;  %v4920_v0 = vcombine.high %v4808_v7, %v4808_v7  ;;  %v2613_v10 = vpop.f32.mrb[17].mxu1  ;;  %v7220_v15 = vpop.f32.mrb[18].mxu0 }
 0x22a   : > { %v5378_v17 = vmax.f32 %v4902_v51, %v6715_v8  ;;  %v9472_v55 = vrot.slane %v5376_v63, 7  ;;  %v4927_v38 = vrot.slane %v4808_v7, %v9405_v18  ;;  %v4785_v45 = vmax.f32 %v4753_v33, 0.0  ;;  %v7084_v37 = vpop.f32.mrb[18].mxu1  ;;  %v4641_v2 = vpop.f32.mrb[19].mxu0 }
 0x22b   : > { %v4919_v27 = vcombine.high %v4917_v6, %v4917_v6  ;;  %v6717_v60 = vrot.slane %v4918_v19, 9  ;;  %v6718_v31 = vrot.slane %v4917_v6, 9  ;;  %v5379_v9 = vmax.f32 %v4910_v47, %v6716_v46  ;;  %v2616_v61 = vpop.f32.mrb[19].mxu1 }
 0x22c   : > { %10114 = vst [vmem:[#allocation10_spill] sm:$0xff] %v9472_v55  ;;  %v9477_v53 = vsel %vm5496_vm9, %v9472_v55, %v5375_v32  ;;  %v9479_v40 = vrot.slane %v5378_v17, 7  ;;  %v4934_v44 = vrot.slane %v4920_v0, %v9405_v18  ;;  %v4935_v28 = vcombine.high %v4927_v38, %v4927_v38 }
 0x22d   : > { %10115 = vst [vmem:[#allocation14_spill] sm:$0xff] %v9477_v53  ;;  %v6719_v23 = vrot.slane %v4919_v27, 9  ;;  %v5380_v11 = vmax.f32 %v4918_v19, %v6717_v60  ;;  %v9482_v14 = vmax.f32 %v4917_v6, %v6718_v31  ;;  %v6720_v22 = vrot.slane %v4927_v38, 9 }
 0x22e   : > { %10116 = vst [vmem:[#allocation15_spill] sm:$0xff] %v9479_v40  ;;  %v9486_v49 = vsel %vm5496_vm9, %v9479_v40, %v5377_v5  ;;  %v4936_v62 = vcombine.high %v4934_v44, %v4934_v44  ;;  %v6721_v43 = vrot.slane %v4935_v28, 9  ;;  %v6722_v4 = vrot.slane %v4934_v44, 9 }
 0x22f   : > { %10117 = vst [vmem:[#allocation16_spill] sm:$0xff] %v9486_v49  ;;  %v5382_v21 = vmax.f32 %v4919_v27, %v6719_v23  ;;  %v9488_v51 = vrot.slane %v5380_v11, 7  ;;  %v5383_v48 = vmax.f32 %v4927_v38, %v6720_v22  ;;  %v4751_v42 = vadd.f32 %v7248_v52, %v9400_v25  ;;  %v7223_v32 = vpop.f32.mrb[20].mxu0 }
 0x230   : > { %v6723_v41 = vrot.slane %v4936_v62, 9  ;;  %v5384_v47 = vmax.f32 %v4935_v28, %v6721_v43  ;;  %v5385_v7 = vmax.f32 %v4934_v44, %v6722_v4  ;;  %v7249_v33 = vadd.f32 %v9451_v1, %v9393_v50  ;;  %v7087_v8 = vpop.f32.mrb[20].mxu1  ;;  %v9493_v63 = vpop.f32.mrb[21].mxu0 }
 0x231   : > { %v9497_v5 = vsel %vm5496_vm9, %v9488_v51, %v5379_v9  ;;  %v9499_v6 = vrot.slane %v5382_v21, 7  ;;  %v4783_v19 = vmax.f32 %v4751_v42, 0.0  ;;  %v7250_v52 = vadd.f32 %v9455_v30, %v9395_v58  ;;  %v9503_v46 = vpop.f32.mrb[21].mxu1  ;;  %v9505_v0 = vpop.f32.mrb[22].mxu0 }
 0x232   : > { %v5386_v17 = vmax.f32 %v4936_v62, %v6723_v41  ;;  %v9507_v38 = vrot.slane %v5384_v47, 7  ;;  %v4754_v50 = vadd.f32 %v7249_v33, %v9400_v25  ;;  %v7251_v1 = vadd.f32 %v7219_v39, %v7083_v26  ;;  %v9510_v27 = vpop.f32.mrb[22].mxu1  ;;  %v9512_v60 = vpop.f32.mrb[23].mxu0 }
 0x233   : > { %v4809_v31 = vmax.f32 %v4783_v19, %v4785_v45  ;;  %v4752_v9 = vadd.f32 %v7250_v52, %v9400_v25  ;;  %v7252_v44 = vadd.f32 %v4638_v20, %v2613_v10  ;;  %v7253_v28 = vadd.f32 %v7220_v15, %v7084_v37  ;;  %v9515_v58 = vpop.f32.mrb[23].mxu1 }
 0x234   : > { %10118 = vst [vmem:[#allocation4_spill] sm:$0xff] %v9507_v38  ;;  %v9519_v30 = vsel %vm5496_vm9, %v9507_v38, %v5383_v48  ;;  %v9521_v23 = vrot.slane %v5386_v17, 7  ;;  %v4786_v11 = vmax.f32 %v4754_v50, 0.0  ;;  %v4757_v39 = vadd.f32 %v7251_v1, %v9400_v25 }
 0x235   : > { %10119 = vst [vmem:[#allocation5_spill] sm:$0xff] %v9519_v30  ;;  %v4937_v26 = vcombine.high %v4809_v31, %v4809_v31  ;;  %v4944_v22 = vrot.slane %v4809_v31, %v9405_v18  ;;  %v4784_v62 = vmax.f32 %v4752_v9, 0.0  ;;  %v4755_v45 = vadd.f32 %v7252_v44, %v9400_v25 }
 0x236   : > { %10120 = vst [vmem:[#allocation17_spill] sm:$0xff] %v9521_v23  ;;  %v9528_v20 = vsel %vm5496_vm9, %v9521_v23, %v5385_v7  ;;  %v4789_v10 = vmax.f32 %v4757_v39, 0.0  ;;  %v4758_v15 = vadd.f32 %v7253_v28, %v9400_v25  ;;  %v7254_v37 = vadd.f32 %v4641_v2, %v2616_v61 }
 0x237   : > { %10121 = vst [vmem:[#allocation3_spill] sm:$0xff] %v9528_v20  ;;  %v4951_v43 = vrot.slane %v4937_v26, %v9405_v18  ;;  %v4952_v4 = vcombine.high %v4944_v22, %v4944_v22  ;;  %v6724_v21 = vrot.slane %v4944_v22, 9  ;;  %v4810_v48 = vmax.f32 %v4784_v62, %v4786_v11  ;;  %v9532_v42 = vpop.f32.mrb[24].mxu0 }
 0x238   : > { %v4787_v41 = vmax.f32 %v4755_v45, 0.0  ;;  %v4790_v47 = vmax.f32 %v4758_v15, 0.0  ;;  %v4756_v33 = vadd.f32 %v7254_v37, %v9400_v25  ;;  %v7255_v19 = vadd.f32 %v7223_v32, %v7087_v8  ;;  %v9535_v52 = vpop.f32.mrb[24].mxu1  ;;  %v9537_v7 = vpop.f32.mrb[25].mxu0 }
 0x239   : > { %v4953_v17 = vcombine.high %v4951_v43, %v4951_v43  ;;  %v6725_v50 = vrot.slane %v4952_v4, 9  ;;  %v6726_v1 = vrot.slane %v4951_v43, 9  ;;  %v5387_v2 = vmax.f32 %v4944_v22, %v6724_v21  ;;  %v9539_v61 = vpop.f32.mrb[25].mxu1  ;;  %v9541_v31 = vpop.f32.mrb[26].mxu0 }
 0x23a   : > { %v4954_v9 = vcombine.high %v4810_v48, %v4810_v48  ;;  %v4961_v44 = vrot.slane %v4810_v48, %v9405_v18  ;;  %v4811_v28 = vmax.f32 %v4787_v41, %v4789_v10  ;;  %v4788_v11 = vmax.f32 %v4756_v33, 0.0  ;;  %v9544_v39 = vpop.f32.mrb[26].mxu1  ;;  %v9546_v32 = vpop.f32.mrb[27].mxu0 }
 0x23b   : > { %v6727_v8 = vrot.slane %v4953_v17, 9  ;;  %v5388_v26 = vmax.f32 %v4952_v4, %v6725_v50  ;;  %v9548_v62 = vmax.f32 %v4951_v43, %v6726_v1  ;;  %v9551_v45 = vadd.f32 %v7255_v19, %v9400_v25  ;;  %v9553_v22 = vpop.f32.mrb[27].mxu1 }
 0x23c   : > { %v4968_v15 = vrot.slane %v4954_v9, %v9405_v18  ;;  %v4969_v37 = vcombine.high %v4961_v44, %v4961_v44  ;;  %v6728_v21 = vrot.slane %v4961_v44, 9  ;;  %v4971_v48 = vcombine.high %v4811_v28, %v4811_v28 }
 0x23d   : > { %10122 = vst [vmem:[#allocation2_spill] sm:$0xff] %v9548_v62  ;;  %v5390_v10 = vmax.f32 %v4953_v17, %v6727_v8  ;;  %v9556_v41 = vrot.slane %v5388_v26, 7  ;;  %v4978_v33 = vrot.slane %v4811_v28, %v9405_v18  ;;  %v4812_v23 = vmax.f32 %v4788_v11, %v4790_v47 }
 0x23e   : > { %v4970_v20 = vcombine.high %v4968_v15, %v4968_v15  ;;  %v6729_v4 = vrot.slane %v4969_v37, 9  ;;  %v6730_v43 = vrot.slane %v4968_v15, 9  ;;  %v5391_v50 = vmax.f32 %v4961_v44, %v6728_v21 }
 0x23f   : > { %v9561_v19 = vsel %vm5496_vm9, %v9556_v41, %v5387_v2  ;;  %v9563_v1 = vrot.slane %v5390_v10, 7  ;;  %v4985_v9 = vrot.slane %v4971_v48, %v9405_v18  ;;  %v4986_v40 = vcombine.high %v4978_v33, %v4978_v33  ;;  %v9566_v49 = vpop.f32.mrb[28].mxu0 }
 0x240   : > { %v6731_v17 = vrot.slane %v4970_v20, 9  ;;  %v5392_v8 = vmax.f32 %v4969_v37, %v6729_v4  ;;  %v5393_v26 = vmax.f32 %v4968_v15, %v6730_v43  ;;  %v6732_v28 = vrot.slane %v4978_v33, 9  ;;  %v7095_v47 = vpop.f32.mrb[28].mxu1  ;;  %v9568_v11 = vpop.f32.mrb[29].mxu0 }
 0x241   : > { %10123 = vst [vmem:[#allocation18_spill] sm:$0xff] %v9563_v1  ;;  %v4987_v13 = vcombine.high %v4985_v9, %v4985_v9  ;;  %v6733_v44 = vrot.slane %v4986_v40, 9  ;;  %v6734_v21 = vrot.slane %v4985_v9, 9  ;;  %v4988_v16 = vcombine.high %v4812_v23, %v4812_v23  ;;  %v2661_v2 = vpop.f32.mrb[29].mxu1  ;;  %v7232_v38 = vpop.f32.mrb[30].mxu0 }
 0x242   : > { %v5394_v10 = vmax.f32 %v4970_v20, %v6731_v17  ;;  %v9570_v30 = vrot.slane %v5392_v8, 7  ;;  %v5395_v48 = vmax.f32 %v4978_v33, %v6732_v28  ;;  %v4995_v55 = vrot.slane %v4812_v23, %v9405_v18  ;;  %v7096_v53 = vpop.f32.mrb[30].mxu1  ;;  %v4689_v59 = vpop.f32.mrb[31].mxu0 }
 0x243   : > { %v6735_v37 = vrot.slane %v4987_v13, 9  ;;  %v5396_v15 = vmax.f32 %v4986_v40, %v6733_v44  ;;  %v9573_v4 = vmax.f32 %v4985_v9, %v6734_v21  ;;  %v5002_v43 = vrot.slane %v4988_v16, %v9405_v18  ;;  %v2664_v35 = vpop.f32.mrb[31].mxu1 }
 0x244   : > { %v9578_v1 = vsel %vm5496_vm9, %v9570_v30, %v5391_v50  ;;  %v9580_v62 = vrot.slane %v5394_v10, 7  ;;  %v5003_v20 = vcombine.high %v4995_v55, %v4995_v55  ;;  %v6736_v17 = vrot.slane %v4995_v55, 9 }
 0x245   : > { %v5398_v33 = vmax.f32 %v4987_v13, %v6735_v37  ;;  %v9582_v8 = vrot.slane %v5396_v15, 7  ;;  %v5004_v23 = vcombine.high %v5002_v43, %v5002_v43  ;;  %v6738_v28 = vrot.slane %v5002_v43, 9 }
 0x246   : > { %10124 = vst [vmem:[#allocation19_spill] sm:$0xff] %v9580_v62  ;;  %v9586_v40 = vsel %vm5496_vm9, %v9580_v62, %v5393_v26  ;;  %v6737_v9 = vrot.slane %v5003_v20, 9  ;;  %v5399_v16 = vmax.f32 %v4995_v55, %v6736_v17  ;;  %v4793_v44 = vmax.f32 %v9551_v45, 0.0 }
 0x247   : > { %v9591_v50 = vsel %vm5496_vm9, %v9582_v8, %v5395_v48  ;;  %v9593_v21 = vrot.slane %v5398_v33, 7  ;;  %v6739_v10 = vrot.slane %v5004_v23, 9  ;;  %v5401_v13 = vmax.f32 %v5002_v43, %v6738_v28 }
 0x248   : > { %v5400_v37 = vmax.f32 %v5003_v20, %v6737_v9  ;;  %v7256_v15 = vadd.f32 %v9493_v63, %v9503_v46  ;;  %v7257_v26 = vadd.f32 %v9505_v0, %v9510_v27  ;;  %v7258_v55 = vadd.f32 %v9512_v60, %v9515_v58 }
 0x249   : > { %v5402_v17 = vmax.f32 %v5004_v23, %v6739_v10  ;;  %v7259_v45 = vadd.f32 %v9532_v42, %v9535_v52  ;;  %v7260_v48 = vadd.f32 %v9537_v7, %v9539_v61  ;;  %v7261_v43 = vadd.f32 %v9541_v31, %v9544_v39 }
 0x24a   : > { %v9607_v20 = vrot.slane %v5400_v37, 7  ;;  %v4759_v63 = vadd.f32 %v7256_v15, %v9400_v25  ;;  %v4762_v46 = vadd.f32 %v7257_v26, %v9400_v25  ;;  %v4760_v0 = vadd.f32 %v7258_v55, %v9400_v25 }
 0x24b   : > { %v9612_v27 = vrot.slane %v5402_v17, 7  ;;  %v4765_v60 = vadd.f32 %v7259_v45, %v9400_v25  ;;  %v4763_v58 = vadd.f32 %v7260_v48, %v9400_v25  ;;  %v9617_v42 = vadd.f32 %v7261_v43, %v9400_v25 }
 0x24c   : > { %v9621_v52 = vsel %vm5496_vm9, %v9607_v20, %v5399_v16  ;;  %v4791_v7 = vmax.f32 %v4759_v63, 0.0  ;;  %v4794_v61 = vmax.f32 %v4762_v46, 0.0  ;;  %v4792_v31 = vmax.f32 %v4760_v0, 0.0 }
 0x24d   : > { %10125 = vst [vmem:[#allocation6_spill] sm:$0xff] %v9612_v27  ;;  %v9625_v39 = vsel %vm5496_vm9, %v9612_v27, %v5401_v13  ;;  %v4797_v33 = vmax.f32 %v4765_v60, 0.0  ;;  %v4795_v23 = vmax.f32 %v4763_v58, 0.0  ;;  %v7262_v37 = vadd.f32 %v9546_v32, %v9553_v22 }
 0x24e   : > { %10126 = vst [vmem:[#allocation7_spill] sm:$0xff] %v9625_v39  ;;  %v4813_v9 = vmax.f32 %v4791_v7, %v4793_v44  ;;  %v4814_v10 = vmax.f32 %v4792_v31, %v4794_v61  ;;  %v7263_v15 = vadd.f32 %v9566_v49, %v7095_v47  ;;  %v7264_v26 = vadd.f32 %v9568_v11, %v2661_v2 }
 0x24f   : > { %v4815_v16 = vmax.f32 %v4795_v23, %v4797_v33  ;;  %v7265_v55 = vadd.f32 %v7232_v38, %v7096_v53  ;;  %v7266_v17 = vadd.f32 %v4689_v59, %v2664_v35  ;;  %v4764_v46 = vadd.f32 %v7262_v37, %v9400_v25 }
 0x250   : > { %v5005_v45 = vcombine.high %v4813_v9, %v4813_v9  ;;  %v5012_v13 = vrot.slane %v4813_v9, %v9405_v18  ;;  %v5022_v48 = vcombine.high %v4814_v10, %v4814_v10  ;;  %v5029_v43 = vrot.slane %v4814_v10, %v9405_v18 }
 0x251   : > { %v5039_v63 = vcombine.high %v4815_v16, %v4815_v16  ;;  %v5046_v44 = vrot.slane %v4815_v16, %v9405_v18  ;;  %v4769_v32 = vadd.f32 %v7263_v15, %v9400_v25 }
 0x252   : > { %v5019_v49 = vrot.slane %v5005_v45, %v9405_v18  ;;  %v5020_v22 = vcombine.high %v5012_v13, %v5012_v13  ;;  %v6740_v47 = vrot.slane %v5012_v13, 9  ;;  %v5036_v53 = vrot.slane %v5022_v48, %v9405_v18 }
 0x253   : > { %v5037_v59 = vcombine.high %v5029_v43, %v5029_v43  ;;  %v6744_v35 = vrot.slane %v5029_v43, 9  ;;  %v5053_v38 = vrot.slane %v5039_v63, %v9405_v18  ;;  %v5054_v11 = vcombine.high %v5046_v44, %v5046_v44 }
 0x254   : > { %v5021_v2 = vcombine.high %v5019_v49, %v5019_v49  ;;  %v6741_v0 = vrot.slane %v5020_v22, 9  ;;  %v6742_v60 = vrot.slane %v5019_v49, 9  ;;  %v5403_v58 = vmax.f32 %v5012_v13, %v6740_v47 }
 0x255   : > { %v5038_v7 = vcombine.high %v5036_v53, %v5036_v53  ;;  %v6745_v61 = vrot.slane %v5037_v59, 9  ;;  %v6746_v31 = vrot.slane %v5036_v53, 9  ;;  %v5407_v33 = vmax.f32 %v5029_v43, %v6744_v35 }
 0x256   : > { %v6743_v23 = vrot.slane %v5021_v2, 9  ;;  %v5404_v9 = vmax.f32 %v5020_v22, %v6741_v0  ;;  %v9640_v10 = vmax.f32 %v5019_v49, %v6742_v60  ;;  %v5055_v37 = vcombine.high %v5053_v38, %v5053_v38 }
 0x257   : > { %v6747_v15 = vrot.slane %v5038_v7, 9  ;;  %v5408_v16 = vmax.f32 %v5037_v59, %v6745_v61  ;;  %v5409_v45 = vmax.f32 %v5036_v53, %v6746_v31  ;;  %v6748_v48 = vrot.slane %v5046_v44, 9 }
 0x258   : > { %v5406_v63 = vmax.f32 %v5021_v2, %v6743_v23  ;;  %v9642_v28 = vrot.slane %v5404_v9, 7  ;;  %v6749_v27 = vrot.slane %v5054_v11, 9  ;;  %v6750_v13 = vrot.slane %v5053_v38, 9 }
 0x259   : > { %v5410_v47 = vmax.f32 %v5038_v7, %v6747_v15  ;;  %v9644_v39 = vrot.slane %v5408_v16, 7  ;;  %v6751_v62 = vrot.slane %v5055_v37, 9  ;;  %v5411_v43 = vmax.f32 %v5046_v44, %v6748_v48 }
 0x25a   : > { %v9648_v22 = vsel %vm5496_vm9, %v9642_v28, %v5403_v58  ;;  %v9650_v49 = vrot.slane %v5406_v63, 7  ;;  %v5412_v35 = vmax.f32 %v5054_v11, %v6749_v27  ;;  %v9652_v59 = vmax.f32 %v5053_v38, %v6750_v13 }
 0x25b   : > { %v9656_v53 = vsel %vm5496_vm9, %v9644_v39, %v5407_v33  ;;  %v9658_v2 = vrot.slane %v5410_v47, 7  ;;  %v5414_v0 = vmax.f32 %v5055_v37, %v6751_v62  ;;  %v4796_v60 = vmax.f32 %v4764_v46, 0.0 }
 0x25c   : > { %v9660_v7 = vrot.slane %v5412_v35, 7  ;;  %v4801_v44 = vmax.f32 %v4769_v32, 0.0  ;;  %v4767_v61 = vadd.f32 %v7264_v26, %v9400_v25  ;;  %v4770_v58 = vadd.f32 %v7265_v55, %v9400_v25 }
 0x25d   : > { %v9666_v27 = vsel %vm5496_vm9, %v9658_v2, %v5409_v45  ;;  %v9668_v38 = vrot.slane %v5414_v0, 7  ;;  %v10127_v11 = vmax.f32 %v9617_v42, 0.0  ;;  %v4768_v33 = vadd.f32 %v7266_v17, %v9400_v25 }
 0x25e   : > { %v9675_v62 = vsel %vm5496_vm9, %v9660_v7, %v5411_v43  ;;  %v4799_v46 = vmax.f32 %v4767_v61, 0.0  ;;  %v4802_v32 = vmax.f32 %v4770_v58, 0.0  ;;  %v5499_v26 = vsel %vm5498_vm10, %v9419_v57, %v9425_v12 }
 0x25f   : > { %v4816_v31 = vmax.f32 %v4796_v60, %v10127_v11  ;;  %v4800_v9 = vmax.f32 %v4768_v33, 0.0  ;;  %v5501_v42 = vsel %vm5500_vm11, %v9419_v57, %v5499_v26  ;;  %v5529_v17 = vsel %vm5498_vm10, %v9457_v34, %v9464_v36 }
 0x260   : > { %v4817_v37 = vmax.f32 %v4799_v46, %v4801_v44  ;;  %v9685_v25 = vsel %vm5502_vm12, %v9419_v57, %v5501_v42  ;;  %v5557_v12 = vsel %vm5498_vm10, %v9488_v51, %v9497_v5  ;;  %v5530_v57 = vsel %vm5500_vm11, %v9457_v34, %v5529_v17 }
 0x261   : > { %v5056_v55 = vcombine.high %v4816_v31, %v4816_v31  ;;  %v5063_v23 = vrot.slane %v4816_v31, %v9405_v18  ;;  %v4818_v48 = vmax.f32 %v4800_v9, %v4802_v32  ;;  %v5558_v47 = vsel %vm5500_vm11, %v9488_v51, %v5557_v12 }
 0x262   : > { %v5073_v63 = vcombine.high %v4817_v37, %v4817_v37  ;;  %v5080_v13 = vrot.slane %v4817_v37, %v9405_v18 }
 0x263   : > { %v5070_v15 = vrot.slane %v5056_v55, %v9405_v18  ;;  %v5071_v16 = vcombine.high %v5063_v23, %v5063_v23  ;;  %v6752_v45 = vrot.slane %v5063_v23, 9  ;;  %v5090_v61 = vcombine.high %v4818_v48, %v4818_v48 }
 0x264   : > { %v5087_v5 = vrot.slane %v5073_v63, %v9405_v18  ;;  %v5088_v60 = vcombine.high %v5080_v13, %v5080_v13  ;;  %v6756_v44 = vrot.slane %v5080_v13, 9  ;;  %v5097_v33 = vrot.slane %v4818_v48, %v9405_v18 }
 0x265   : > { %v5072_v43 = vcombine.high %v5070_v15, %v5070_v15  ;;  %v6753_v36 = vrot.slane %v5071_v16, 9  ;;  %v6754_v35 = vrot.slane %v5070_v15, 9  ;;  %v5415_v0 = vmax.f32 %v5063_v23, %v6752_v45 }
 0x266   : > { %v5089_v46 = vcombine.high %v5087_v5, %v5087_v5  ;;  %v6757_v32 = vrot.slane %v5088_v60, 9  ;;  %v6758_v26 = vrot.slane %v5087_v5, 9  ;;  %v5419_v55 = vmax.f32 %v5080_v13, %v6756_v44 }
 0x267   : > { %v6755_v58 = vrot.slane %v5072_v43, 9  ;;  %v5416_v11 = vmax.f32 %v5071_v16, %v6753_v36  ;;  %v5417_v31 = vmax.f32 %v5070_v15, %v6754_v35  ;;  %v5104_v37 = vrot.slane %v5090_v61, %v9405_v18 }
 0x268   : > { %v5105_v23 = vcombine.high %v5097_v33, %v5097_v33  ;;  %v6759_v17 = vrot.slane %v5089_v46, 9  ;;  %v5420_v12 = vmax.f32 %v5088_v60, %v6757_v32  ;;  %v9704_v45 = vmax.f32 %v5087_v5, %v6758_v26 }
 0x269   : > { %v5418_v9 = vmax.f32 %v5072_v43, %v6755_v58  ;;  %v9701_v42 = vrot.slane %v5416_v11, 7  ;;  %v6760_v63 = vrot.slane %v5097_v33, 9  ;;  %v5106_v48 = vcombine.high %v5104_v37, %v5104_v37 }
 0x26a   : > { %v6761_v36 = vrot.slane %v5105_v23, 9  ;;  %v5422_v13 = vmax.f32 %v5089_v46, %v6759_v17  ;;  %v5695_v43 = vrot.slane %v5420_v12, 7  ;;  %v6762_v35 = vrot.slane %v5104_v37, 9 }
 0x26b   : > { %v9708_v15 = vsel %vm5496_vm9, %v9701_v42, %v5415_v0  ;;  %v9710_v16 = vrot.slane %v5418_v9, 7  ;;  %v5423_v44 = vmax.f32 %v5097_v33, %v6760_v63  ;;  %v6763_v60 = vrot.slane %v5106_v48, 9 }
 0x26c   : > { %v5424_v5 = vmax.f32 %v5105_v23, %v6761_v36  ;;  %v5531_v58 = vsel %vm5502_vm12, %v9457_v34, %v5530_v57  ;;  %v5696_v0 = vsel %vm5496_vm9, %v5695_v43, %v5419_v55  ;;  %v9719_v11 = vrot.slane %v5422_v13, 7 }
 0x26d   : > { %v9714_v61 = vsel %vm5496_vm9, %v9710_v16, %v5417_v31  ;;  %v5425_v32 = vmax.f32 %v5104_v37, %v6762_v35  ;;  %v5559_v46 = vsel %vm5502_vm12, %v9488_v51, %v5558_v47  ;;  %v5426_v26 = vmax.f32 %v5106_v48, %v6763_v60 }
 0x26e   : > { %v9723_v9 = vrot.slane %v5424_v5, 7  ;;  %v5585_v31 = vsel %vm5498_vm10, %v9556_v41, %v9561_v19  ;;  %v5613_v33 = vsel %vm5498_vm10, %v9582_v8, %v9591_v50  ;;  %v5641_v51 = vsel %vm5498_vm10, %v9642_v28, %v9648_v22 }
 0x26f   : > { %v5586_v34 = vsel %vm5500_vm11, %v9556_v41, %v5585_v31  ;;  %v5614_v57 = vsel %vm5500_vm11, %v9582_v8, %v5613_v33  ;;  %v5669_v47 = vsel %vm5498_vm10, %v9660_v7, %v9675_v62  ;;  %v9745_v55 = vrot.slane %v5426_v26, 7 }
 0x270   : > { %v9743_v19 = vsel %vm5496_vm9, %v9723_v9, %v5423_v44  ;;  %v5587_v50 = vsel %vm5502_vm12, %v9556_v41, %v5586_v34  ;;  %v5615_v37 = vsel %vm5502_vm12, %v9582_v8, %v5614_v57  ;;  %v5642_v23 = vsel %vm5500_vm11, %v9642_v28, %v5641_v51  ;;  %v10128_v51 = vld [vmem:[#allocation2_spill] sm:$0xff] }
 0x271   : > { %v5670_v22 = vsel %vm5500_vm11, %v9660_v7, %v5669_v47  ;;  %v5697_v62 = vsel %vm5498_vm10, %v5695_v43, %v5696_v0  ;;  %v5753_v17 = vcombine.low %v9685_v25, %v5531_v58  ;;  %v9759_v12 = vsel %vm5496_vm9, %v9745_v55, %v5425_v32  ;;  %v10129_v47 = vld [vmem:[#allocation18_spill] sm:$0xff] }
 0x272   : > { %v5643_v41 = vsel %vm5502_vm12, %v9642_v28, %v5642_v23  ;;  %v5671_v8 = vsel %vm5502_vm12, %v9660_v7, %v5670_v22  ;;  %v5698_v63 = vsel %vm5500_vm11, %v5695_v43, %v5697_v62  ;;  %v5762_v13 = vcombine.low %v5559_v46, %v5587_v50 }
 0x273   : > { %v5699_v48 = vsel %vm5502_vm12, %v5695_v43, %v5698_v63  ;;  %v9768_v36 = vrot.slane %v5753_v17, %v9410_v24  ;;  %v5771_v35 = vcombine.low %v5615_v37, %v5643_v41  ;;  %v5507_v44 = vsel %vm5496_vm9, %v9427_v29, %v9417_v56 }
 0x274   : > { %v5780_v25 = vcombine.low %v5671_v8, %v5699_v48  ;;  %v5535_v28 = vsel %vm5496_vm9, %v9466_v3, %v9448_v54  ;;  %v5563_v7 = vsel %vm5496_vm9, %v9499_v6, %v9482_v14  ;;  %v9780_v43 = vrot.slane %v5762_v13, %v9410_v24 }
 0x275   : > { %v9783_v60 = vrot.slane %v5771_v35, %v9410_v24  ;;  %v5508_v5 = vsel %vm5498_vm10, %v9427_v29, %v5507_v44  ;;  %v5536_v56 = vsel %vm5498_vm10, %v9466_v3, %v5535_v28  ;;  %v5564_v0 = vsel %vm5498_vm10, %v9499_v6, %v5563_v7 }
 0x276   : > { %v9790_v58 = vrot.slane %v5780_v25, %v9410_v24  ;;  %v5509_v54 = vsel %vm5500_vm11, %v9427_v29, %v5508_v5  ;;  %v5537_v14 = vsel %vm5500_vm11, %v9466_v3, %v5536_v56  ;;  %v5901_v32 = vcombine.low %v9768_v36, %v9780_v43 }
 0x277   : > { %v6764_v46 = vcombine.high %v9768_v36, %v9780_v43  ;;  %v5510_v26 = vsel %vm5502_vm12, %v9427_v29, %v5509_v54  ;;  %v5538_v31 = vsel %vm5502_vm12, %v9466_v3, %v5537_v14  ;;  %v5565_v57 = vsel %vm5500_vm11, %v9499_v6, %v5564_v0  ;;  %v10130_v14 = vld [vmem:[#allocation9_spill] sm:$0xff]  ;;  %v10131_v0 = vld [vmem:[#allocation11_spill] sm:$0xff] }
 0x278   : > { %v6765_v33 = vcombine.high %v9783_v60, %v9790_v58  ;;  %v5902_v34 = vcombine.low %v9783_v60, %v9790_v58  ;;  %v5591_v50 = vsel %vm5496_vm9, %v10129_v47, %v10128_v51  ;;  %v5566_v29 = vsel %vm5502_vm12, %v9499_v6, %v5565_v57 }
 0x279   : > { %v5931_v37 = vrot.slane %v6764_v46, %v9405_v18  ;;  %v5592_v3 = vsel %vm5498_vm10, %v10129_v47, %v5591_v50  ;;  %v5619_v23 = vsel %vm5496_vm9, %v9593_v21, %v9573_v4  ;;  %v5647_v41 = vsel %vm5496_vm9, %v9650_v49, %v9640_v10  ;;  %v10132_v46 = vld [vmem:[#allocation14_spill] sm:$0xff] }
 0x27a   : > { %v5938_v22 = vrot.slane %v6765_v33, %v9405_v18  ;;  %v5593_v62 = vsel %vm5500_vm11, %v10129_v47, %v5592_v3  ;;  %v5620_v17 = vsel %vm5498_vm10, %v9593_v21, %v5619_v23  ;;  %v5648_v4 = vsel %vm5498_vm10, %v9650_v49, %v5647_v41  ;;  %v10135_v3 = vld [vmem:[#allocation4_spill] sm:$0xff] }
 0x27b   : > { %v5594_v6 = vsel %vm5502_vm12, %v10129_v47, %v5593_v62  ;;  %v5621_v8 = vsel %vm5500_vm11, %v9593_v21, %v5620_v17  ;;  %v5675_v63 = vsel %vm5496_vm9, %v9668_v38, %v9652_v59  ;;  %v5649_v10 = vsel %vm5500_vm11, %v9650_v49, %v5648_v4 }
 0x27c   : > { %v5939_v48 = vcombine.low %v5931_v37, %v5938_v22  ;;  %v5622_v13 = vsel %vm5502_vm12, %v9593_v21, %v5621_v8  ;;  %v5676_v35 = vsel %vm5498_vm10, %v9668_v38, %v5675_v63  ;;  %v5650_v25 = vsel %vm5502_vm12, %v9650_v49, %v5649_v10 }
 0x27d   : > { %v5677_v44 = vsel %vm5500_vm11, %v9668_v38, %v5676_v35  ;;  %v5703_v59 = vsel %vm5496_vm9, %v9719_v11, %v9704_v45  ;;  %v5789_v28 = vcombine.low %v5510_v26, %v5538_v31  ;;  %v5798_v5 = vcombine.low %v5566_v29, %v5594_v6  ;;  %v10133_v26 = vld [vmem:[#allocation10_spill] sm:$0xff]  ;;  %v10134_v29 = vld [vmem:[#allocation5_spill] sm:$0xff] }
 0x27e   : > { %5940 = vrot.lane.b32.xlu0 %v5939_v48, %s7623_s11  ;;  %v5678_v21 = vsel %vm5502_vm12, %v9668_v38, %v5677_v44  ;;  %v5704_v7 = vsel %vm5498_vm10, %v9719_v11, %v5703_v59  ;;  %v5807_v56 = vcombine.low %v5622_v13, %v5650_v25  ;;  %v5515_v45 = vsel %vm5498_vm10, %v10131_v0, %v10130_v14 }
 0x27f   : > { %v5705_v49 = vsel %vm5500_vm11, %v9719_v11, %v5704_v7  ;;  %v5796_v54 = vrot.slane %v5789_v28, %v9410_v24  ;;  %v5543_v31 = vsel %vm5498_vm10, %v10133_v26, %v10132_v46  ;;  %v5805_v33 = vrot.slane %v5798_v5, %v9410_v24 }
 0x280   : > { %v5706_v38 = vsel %vm5502_vm12, %v9719_v11, %v5705_v49  ;;  %v5814_v57 = vrot.slane %v5807_v56, %v9410_v24  ;;  %v5516_v51 = vsel %vm5500_vm11, %v10131_v0, %v5515_v45  ;;  %v5544_v37 = vsel %vm5500_vm11, %v10133_v26, %v5543_v31  ;;  %v10137_v31 = vld [vmem:[#allocation12_spill] sm:$0xff] }
 0x281   : > { %v5816_v47 = vcombine.low %v5678_v21, %v5706_v38  ;;  %v5517_v50 = vsel %vm5502_vm12, %v10131_v0, %v5516_v51  ;;  %v5571_v23 = vsel %vm5498_vm10, %v10135_v3, %v10134_v29  ;;  %v6766_v22 = vcombine.high %v5796_v54, %v5805_v33  ;;  %v10138_v38 = vld [vmem:[#allocation16_spill] sm:$0xff] }
 0x282   : > { %v5947_v11 = vcombine.low %v5796_v54, %v5805_v33  ;;  %v5545_v62 = vsel %vm5502_vm12, %v10133_v26, %v5544_v37  ;;  %v5572_v17 = vsel %vm5500_vm11, %v10135_v3, %v5571_v23  ;;  %v5599_v8 = vsel %vm5498_vm10, %v9570_v30, %v9578_v1  ;;  %v10136_v26 = vld [vmem:[#allocation13_spill] sm:$0xff]  ;;  %v10139_v33 = vld [vmem:[#allocation15_spill] sm:$0xff] }
 0x283   : > { %v5823_v41 = vrot.slane %v5816_v47, %v9410_v24  ;;  %v5573_v6 = vsel %vm5502_vm12, %v10135_v3, %v5572_v17  ;;  %v5627_v4 = vsel %vm5498_vm10, %v9607_v20, %v9621_v52  ;;  %v5979_v63 = vrot.slane %v6766_v22, %v9405_v18  ;;  %v10140_v22 = vld [vmem:[#allocation3_spill] sm:$0xff] }
 0x284   : > { %v5955_v48 = vrot.slane %v5947_v11, %v9405_v18  ;;  %v5600_v13 = vsel %vm5500_vm11, %v9570_v30, %v5599_v8  ;;  %v5628_v10 = vsel %vm5500_vm11, %v9607_v20, %v5627_v4  ;;  %v5655_v52 = vsel %vm5498_vm10, %v9644_v39, %v9656_v53  ;;  %v10141_v11 = vld [vmem:[#allocation17_spill] sm:$0xff]  ;;  %v10142_v17 = vld [vmem:[#allocation19_spill] sm:$0xff] }
 0x285   : > { %v6767_v35 = vcombine.high %v5814_v57, %v5823_v41  ;;  %v5948_v25 = vcombine.low %v5814_v57, %v5823_v41  ;;  %v5601_v44 = vsel %vm5502_vm12, %v9570_v30, %v5600_v13  ;;  %v5629_v1 = vsel %vm5502_vm12, %v9607_v20, %v5628_v10 }
 0x286   : > { %v5683_v59 = vsel %vm5498_vm10, %v9701_v42, %v9708_v15  ;;  %v5711_v28 = vsel %vm5498_vm10, %v9723_v9, %v9743_v19  ;;  %v5825_v21 = vcombine.low %v5517_v50, %v5545_v62  ;;  %v5656_v20 = vsel %vm5500_vm11, %v9644_v39, %v5655_v52 }
 0x287   : > { %v5986_v7 = vrot.slane %v6767_v35, %v9405_v18  ;;  %v5962_v30 = vrot.slane %v5948_v25, %v9405_v18  ;;  %v5684_v5 = vsel %vm5500_vm11, %v9701_v42, %v5683_v59  ;;  %v5657_v53 = vsel %vm5502_vm12, %v9644_v39, %v5656_v20 }
 0x288   : > { %v5685_v15 = vsel %vm5502_vm12, %v9701_v42, %v5684_v5  ;;  %v5712_v19 = vsel %vm5500_vm11, %v9723_v9, %v5711_v28  ;;  %v5832_v56 = vrot.slane %v5825_v21, %v9410_v24  ;;  %v5834_v0 = vcombine.low %v5573_v6, %v5601_v44  ;;  %v10143_v44 = vld [vmem:[#allocation7_spill] sm:$0xff] }
 0x289   : > { %v5987_v49 = vcombine.low %v5979_v63, %v5986_v7  ;;  %v5963_v54 = vcombine.low %v5955_v48, %v5962_v30  ;;  %v5713_v14 = vsel %vm5502_vm12, %v9723_v9, %v5712_v19  ;;  %v5843_v45 = vcombine.low %v5629_v1, %v5657_v53  ;;  %v10144_v1 = vld [vmem:[#allocation6_spill] sm:$0xff] }
 0x28a   : > { %v5852_v46 = vcombine.low %v5685_v15, %v5713_v14  ;;  %v5522_v39 = vsel %vm5498_vm10, %v10137_v31, %v10136_v26  ;;  %v5550_v42 = vsel %vm5498_vm10, %v10139_v33, %v10138_v38  ;;  %v5841_v57 = vrot.slane %v5834_v0, %v9410_v24 }
 0x28b   : > { %5988 = vrot.lane.b32.xlu1 %v5987_v49, %s7624_s14  ;;  %5964 = vrot.lane.b32.xlu0 %v5963_v54, %s7625_s15  ;;  %v5523_v9 = vsel %vm5500_vm11, %v10137_v31, %v5522_v39  ;;  %v5551_v51 = vsel %vm5500_vm11, %v10139_v33, %v5550_v42  ;;  %v5850_v47 = vrot.slane %v5843_v45, %v9410_v24 }
 0x28c   : > { %v5859_v50 = vrot.slane %v5852_v46, %v9410_v24  ;;  %v5524_v37 = vsel %vm5502_vm12, %v10137_v31, %v5523_v9  ;;  %v5552_v29 = vsel %vm5502_vm12, %v10139_v33, %v5551_v51  ;;  %v5995_v3 = vcombine.low %v5832_v56, %v5841_v57 }
 0x28d   : > { %v6768_v23 = vcombine.high %v5832_v56, %v5841_v57  ;;  %v5578_v62 = vsel %vm5498_vm10, %v10141_v11, %v10140_v22  ;;  %v5606_v41 = vsel %vm5498_vm10, %v10142_v17, %v9586_v40  ;;  %v5634_v52 = vsel %vm5498_vm10, %v10144_v1, %v10143_v44 }
 0x28e   : > { %v5996_v6 = vcombine.low %v5850_v47, %v5859_v50  ;;  %v6769_v8 = vcombine.high %v5850_v47, %v5859_v50  ;;  %v5579_v4 = vsel %vm5500_vm11, %v10141_v11, %v5578_v62  ;;  %v5607_v63 = vsel %vm5500_vm11, %v10142_v17, %v5606_v41 }
 0x28f   : > { %v6003_v48 = vrot.slane %v5995_v3, %v9405_v18  ;;  %v6027_v13 = vrot.slane %v6768_v23, %v9405_v18  ;;  %v5580_v10 = vsel %vm5502_vm12, %v10141_v11, %v5579_v4  ;;  %v5608_v35 = vsel %vm5502_vm12, %v10142_v17, %v5607_v63 }
 0x290   : > { %v6010_v40 = vrot.slane %v5996_v6, %v9405_v18  ;;  %v6034_v25 = vrot.slane %v6769_v8, %v9405_v18  ;;  %v5662_v59 = vsel %vm5498_vm10, %v9658_v2, %v9666_v27  ;;  %v5635_v28 = vsel %vm5500_vm11, %v10144_v1, %v5634_v52 }
 0x291   : > { %v5663_v21 = vsel %vm5500_vm11, %v9658_v2, %v5662_v59  ;;  %v5690_v7 = vsel %vm5498_vm10, %v9710_v16, %v9714_v61  ;;  %v5718_v30 = vsel %vm5498_vm10, %v9745_v55, %v9759_v12  ;;  %v5636_v53 = vsel %vm5502_vm12, %v10144_v1, %v5635_v28 }
 0x292   : > { %v6011_v20 = vcombine.low %v6003_v48, %v6010_v40  ;;  %v6035_v5 = vcombine.low %v6027_v13, %v6034_v25  ;;  %v5664_v27 = vsel %vm5502_vm12, %v9658_v2, %v5663_v21  ;;  %v5691_v15 = vsel %vm5500_vm11, %v9710_v16, %v5690_v7 }
 0x293   : > { %v5719_v19 = vsel %vm5500_vm11, %v9745_v55, %v5718_v30  ;;  %v5861_v56 = vcombine.low %v5524_v37, %v5552_v29  ;;  %v5870_v61 = vcombine.low %v5580_v10, %v5608_v35  ;;  %v5692_v12 = vsel %vm5502_vm12, %v9710_v16, %v5691_v15 }
 0x294   : > { %6012 = vrot.lane.b32.xlu1 %v6011_v20, %s7626_s16  ;;  %6036 = vrot.lane.b32.xlu0 %v6035_v5, %s7627_s17  ;;  %v5720_v49 = vsel %vm5502_vm12, %v9745_v55, %v5719_v19  ;;  %v5879_v54 = vcombine.low %v5636_v53, %v5664_v27  ;;  %v5909_v45 = vrot.slane %v5901_v32, %v9405_v18 }
 0x295   : > { %v5868_v2 = vrot.slane %v5861_v56, %v9410_v24  ;;  %v5877_v14 = vrot.slane %v5870_v61, %v9410_v24  ;;  %v5888_v0 = vcombine.low %v5692_v12, %v5720_v49  ;;  %v5916_v46 = vrot.slane %v5902_v34, %v9405_v18 }
 0x296   : > { %v5886_v16 = vrot.slane %v5879_v54, %v9410_v24 }
 0x297   : > { %v5895_v55 = vrot.slane %v5888_v0, %v9410_v24  ;;  %v6043_v26 = vcombine.low %v5868_v2, %v5877_v14  ;;  %v6770_v31 = vcombine.high %v5868_v2, %v5877_v14  ;;  %v5917_v39 = vcombine.low %v5909_v45, %v5916_v46 }
 0x299   : > { %v6044_v38 = vcombine.low %v5886_v16, %v5895_v55  ;;  %v6771_v33 = vcombine.high %v5886_v16, %v5895_v55  ;;  %v6051_v42 = vrot.slane %v6043_v26, %v9405_v18  ;;  %v6075_v36 = vrot.slane %v6770_v31, %v9405_v18 }
 0x29b   : > { %v6058_v57 = vrot.slane %v6044_v38, %v9405_v18  ;;  %v6082_v43 = vrot.slane %v6771_v33, %v9405_v18 }
 0x29d   : > { %v6059_v32 = vcombine.low %v6051_v42, %v6058_v57  ;;  %v6083_v60 = vcombine.low %v6075_v36, %v6082_v43 }
 0x29f   : > { %6060 = vrot.lane.b32.xlu1 %v6059_v32, %s7628_s18  ;;  %6084 = vrot.lane.b32.xlu0 %v6083_v60, %s7629_s19 }
 0x2f0   : > { %v5941_v24 = vpop.permute.xlu0 %5940 }
 0x2f1   : > { %v6088_v9 = vsel %vm6087_vm13, %v5917_v39, %v5941_v24 }
 0x2fd   : > { %v5989_v58 = vpop.permute.xlu1 %5988  ;;  %v5965_v34 = vpop.permute.xlu0 %5964 }
 0x2fe   : > { %v6090_v51 = vsel %vm6089_vm14, %v6088_v9, %v5965_v34 }
 0x2ff   : > { %v6092_v47 = vsel %vm6091_vm15, %v6090_v51, %v5989_v58 }
 0x306   : > { %v6013_v50 = vpop.permute.xlu1 %6012  ;;  %v6037_v37 = vpop.permute.xlu0 %6036 }
 0x307   : > { %v6094_v18 = vsel %vm6093_vm0, %v6092_v47, %v6013_v50 }
 0x308   : > { %v6096_v29 = vsel %vm6095_vm1, %v6094_v18, %v6037_v37 }
 0x311   : > { %v6061_v3 = vpop.permute.xlu1 %6060  ;;  %v6085_v23 = vpop.permute.xlu0 %6084 }
 0x312   : > { %v6098_v22 = vsel %vm6097_vm2, %v6096_v29, %v6061_v3 }
 0x313   : > { %v6100_v11 = vsel %vm6099_vm3, %v6098_v22, %v6085_v23 }
 0x314   : > { %v6101_v62 = vpack.c.bf16 %v6100_v11, %v6100_v11 }
 0x316   : > { %6102 = vst [vmem:[%s168_s23] sm:$0xf] %v6101_v62 }
 0x317 PF: > { %s13_s12 = sadd.s32 1, %s7618_s12  }
 0x318   : > { %p10_p4 = scmp.ge.s32.totalorder %s13_s12, 4  }
 0x31a   :  { %12 = sbr.rel (!%p10_p4) target bundleno = 1 (0x1), region = 72 }

</bundles_post_ra>
